<compile_context>
chip_gen: v6e
topology: v6e:2x2x1
jax: 0.10.0
libtpu: 0.0.40
codegen_flags: <defaults>
</compile_context>

<pallas_src>
import math

import numpy as np

import jax
import jax.numpy as jnp
from jax.experimental import pallas as pl
from jax.experimental.pallas import tpu as pltpu


# ---------------- scaled-down EyebrowDecomposer00Args ----------------
IMAGE_SIZE = 16
IMAGE_CHANNELS = 4
START_CHANNELS = 8
BOTTLENECK_IMAGE_SIZE = 4
NUM_BOTTLENECK_BLOCKS = 2
MAX_CHANNELS = 32
BATCH = 2

HW = IMAGE_SIZE * IMAGE_SIZE            # spatial pixels = the lane axis everywhere
CIN0 = 8                                 # image channels padded 4 -> 8 (sublane aligned)
OUT_CHANNELS = 4 * IMAGE_CHANNELS + 2    # 6 outputs packed into one (18, HW) slab
NUM_LEVELS = int(math.log2(IMAGE_SIZE // BOTTLENECK_IMAGE_SIZE)) + 1


def _channels_at(size):
    # PoserEncoderDecoder00.get_num_output_channels_from_image_size
    return min(START_CHANNELS * (IMAGE_SIZE // size), MAX_CHANNELS)


# ---------------- static plan: tap offsets + packed-constant layouts ----------------

class _Alloc:
    """8-row-aligned row allocator for the packed constant arrays."""

    def __init__(self):
        self.n = 0

    def take(self, rows):
        off = self.n
        self.n += ((rows + 7) // 8) * 8
        return off


def _conv_offsets(k, p):
    return [(ky - p, kx - p) for ky in range(k) for kx in range(k)]


def _mask_np(h, w, offsets):
    """(T, h*w) 0/1 validity mask per tap (implements the conv zero padding)."""
    yy, xx = np.meshgrid(np.arange(h), np.arange(w), indexing="ij")
    rows = []
    for dy, dx in offsets:
        ok = ((yy + dy >= 0) & (yy + dy < h) & (xx + dx >= 0) & (xx + dx < w))
        rows.append(ok.reshape(-1).astype(np.float32))
    return np.stack(rows, axis=0)


def _decim_np(h, w):
    """(h*w, (h//2)*(w//2)) matrix selecting even rows / even cols (stride 2)."""
    ho, wo = h // 2, w // 2
    m = np.zeros((h * w, ho * wo), np.float32)
    ys, xs = np.meshgrid(np.arange(ho), np.arange(wo), indexing="ij")
    m[(2 * ys * w + 2 * xs).reshape(-1), (ys * wo + xs).reshape(-1)] = 1.0
    return m


def _scatter_np(h, w, qy, qx):
    """(h*w, 4*h*w) matrix writing a parity sub-grid into the 2x upsampled grid."""
    m = np.zeros((h * w, 4 * h * w), np.float32)
    ys, xs = np.meshgrid(np.arange(h), np.arange(w), indexing="ij")
    src = (ys * w + xs).reshape(-1)
    dst = ((2 * ys + qy) * (2 * w) + (2 * xs + qx)).reshape(-1)
    m[src, dst] = 1.0
    return m


def _build_static():
    w_alloc, n_alloc, m_alloc, s_alloc = _Alloc(), _Alloc(), _Alloc(), _Alloc()
    mask_blocks, sel_blocks, mask_cache = [], [], {}

    def add_mask(h, w, offsets):
        key = (h, w, tuple(offsets))
        if key not in mask_cache:
            blk = _mask_np(h, w, offsets)
            off = m_alloc.take(blk.shape[0])
            mask_blocks.append((off, blk))
            mask_cache[key] = off
        return mask_cache[key]

    def add_sel(mat):
        off = s_alloc.take(mat.shape[0])
        sel_blocks.append((off, mat))
        return off

    def conv_spec(cin, w_rows, h, w, offsets):
        assert cin % 8 == 0, "channel-on-sublane layout needs Cin % 8 == 0"
        return dict(cin=cin, w_rows=w_rows, geom=(h, w), hw=h * w,
                    offsets=offsets, w_cols=len(offsets) * cin,
                    w_off=w_alloc.take(w_rows),
                    mask_off=add_mask(h, w, offsets))

    plan = []

    # downsample path
    c, size = START_CHANNELS, IMAGE_SIZE
    s = conv_spec(CIN0, c, size, size, _conv_offsets(7, 3))
    s.update(cout=c, n_off=n_alloc.take(c))
    plan.append(("conv_in_relu", s))
    while size > BOTTLENECK_IMAGE_SIZE:
        nsize, cnext = size // 2, _channels_at(size // 2)
        s = conv_spec(c, cnext, size, size, _conv_offsets(4, 1))
        s.update(cout=cnext, n_off=n_alloc.take(cnext),
                 dec_off=add_sel(_decim_np(size, size)), hw_out=nsize * nsize)
        plan.append(("down", s))
        size, c = nsize, cnext

    # bottleneck
    s = conv_spec(c, c, size, size, _conv_offsets(3, 1))
    s.update(cout=c, n_off=n_alloc.take(c))
    plan.append(("conv_in_relu", s))
    for _ in range(NUM_BOTTLENECK_BLOCKS - 1):
        sa = conv_spec(c, c, size, size, _conv_offsets(3, 1))
        sa.update(cout=c, n_off=n_alloc.take(c))
        sb = conv_spec(c, c, size, size, _conv_offsets(3, 1))
        sb.update(cout=c, n_off=n_alloc.take(c))
        plan.append(("resnet", dict(a=sa, b=sb)))

    # upsample path (ConvTranspose2d as 4 output-parity stride-1 convs + scatter)
    while size < IMAGE_SIZE:
        nsize, cnext = size * 2, _channels_at(size * 2)
        s = conv_spec(c, 4 * cnext, size, size, _conv_offsets(3, 1))
        s.update(cout=cnext, n_off=n_alloc.take(cnext), hw_out=nsize * nsize,
                 scat_off=[add_sel(_scatter_np(size, size, qy, qx))
                           for qy in range(2) for qx in range(2)])
        plan.append(("up", s))
        size, c = nsize, cnext

    # heads: bg_alpha(1) | bg_color(4) | eb_alpha(1) | eb_color(4) fused on Cout
    hcout = 2 * (1 + IMAGE_CHANNELS)
    s = conv_spec(c, hcout, size, size, _conv_offsets(3, 1))
    s.update(cout=hcout, bias_off=n_alloc.take(hcout))
    plan.append(("head", s))

    def pack(blocks, rows, cols):
        out = np.zeros((rows, cols), np.float32)
        for off, blk in blocks:
            out[off:off + blk.shape[0], :blk.shape[1]] = blk
        return out

    mask_pack = pack(mask_blocks, m_alloc.n, HW)
    sel_pack = pack(sel_blocks, s_alloc.n, HW)

    specs = []
    for kind, sp in plan:
        specs += [sp["a"], sp["b"]] if kind == "resnet" else [sp]
    w_cols_max = max(sp["w_cols"] for sp in specs)
    return plan, mask_pack, sel_pack, (w_alloc.n, w_cols_max), n_alloc.n, w_cols_max


PLAN, MASK_PACK, SEL_PACK, W_PACK_SHAPE, NORM_PACK_ROWS, P_ROWS = _build_static()


# ---------------- lane-shift helper (XLU roll, with a one-time direction probe) ------

_ROLL_CONV = "jnp"   # safe default: jnp.roll (static slice+concat, certain semantics)


def _detect_roll_convention():
    """One tiny eager pallas_call to pin down pltpu.roll's rotation direction."""
    global _ROLL_CONV
    try:
        def probe(x_ref, o_ref):
            o_ref[...] = pltpu.roll(x_ref[...], 1, axis=1)

        x = jax.lax.broadcasted_iota(jnp.float32, (8, 256), 1)
        r = pl.pallas_call(
            probe, out_shape=jax.ShapeDtypeStruct((8, 256), jnp.float32))(x)
        v = int(jax.device_get(r)[0, 0])
        if v == 255:
            _ROLL_CONV = "rollup"      # pltpu.roll == jnp.roll
        elif v == 1:
            _ROLL_CONV = "rolldown"    # opposite direction
    except Exception:
        _ROLL_CONV = "jnp"


def _shift_lanes(x, d, n):
    """y[:, j] = x[:, (j + d) % n] for a static Python shift d."""
    d %= n
    if d == 0:
        return x
    if n % 128 == 0 and _ROLL_CONV in ("rollup", "rolldown"):
        amount = (n - d) if _ROLL_CONV == "rollup" else d
        return pltpu.roll(x, amount, axis=1)
    return jnp.roll(x, -d, axis=1)   # static roll -> slice + concat, always safe


def _sigmoid(x):
    # EUP-friendly, overflow-free sigmoid.
    return 0.5 * (jnp.tanh(0.5 * x) + 1.0)


# ---------------- the fused kernel (one grid step == one sample) ----------------

def _fused_kernel(img_ref, w_ref, norm_ref, mask_ref, sel_ref, out_ref, p_ref):
    f32 = jnp.float32

    def conv(x, s):
        """Masked stride-1 conv on a (Cin, HW) feature -> (w_rows, HW).

        Each tap = lane-roll of the flattened feature * precomputed 0/1 mask;
        taps stacked along sublanes in the patches scratch; one MXU matmul.
        """
        cin, hw = s["cin"], s["hw"]
        w_img = s["geom"][1]
        for t, (dy, dx) in enumerate(s["offsets"]):
            slab = _shift_lanes(x, dy * w_img + dx, hw)
            if (dy, dx) != (0, 0):
                moff = s["mask_off"] + t
                slab = slab * mask_ref[moff:moff + 1, 0:hw]
            p_ref[t * cin:(t + 1) * cin, 0:hw] = slab
        tk = len(s["offsets"]) * cin
        wmat = w_ref[s["w_off"]:s["w_off"] + s["w_rows"], 0:tk]
        return jnp.dot(wmat, p_ref[0:tk, 0:hw], preferred_element_type=f32)

    def inorm(x, n_off, c, relu, residual=None, eps=1e-5):
        g = norm_ref[n_off:n_off + c, 0:1]
        b = norm_ref[n_off:n_off + c, 1:2]
        inv_n = 1.0 / float(x.shape[1])
        mean = jnp.sum(x, axis=1, keepdims=True) * inv_n
        var = jnp.maximum(jnp.sum(x * x, axis=1, keepdims=True) * inv_n
                          - mean * mean, 0.0)
        y = (x - mean) * jax.lax.rsqrt(var + eps) * g + b
        if relu:
            y = jnp.maximum(y, 0.0)
        if residual is not None:
            y = y + residual
        return y

    x = img_ref[...]                         # (8, 256): 4 real + 4 zero image channels
    img4 = x[0:IMAGE_CHANNELS, :]            # (4, 256) for the color-change composition
    heads = None

    for kind, s in PLAN:
        if kind == "conv_in_relu":
            x = inorm(conv(x, s), s["n_off"], s["cout"], relu=True)
        elif kind == "down":
            # stride-2 conv = full-grid stride-1 conv + hoisted decimation matmul
            dec = sel_ref[s["dec_off"]:s["dec_off"] + s["hw"], 0:s["hw_out"]]
            y = jnp.dot(conv(x, s), dec, preferred_element_type=f32)
            x = inorm(y, s["n_off"], s["cout"], relu=True)
        elif kind == "resnet":
            h = inorm(conv(x, s["a"]), s["a"]["n_off"], s["a"]["cout"], relu=True)
            x = inorm(conv(h, s["b"]), s["b"]["n_off"], s["b"]["cout"], relu=False,
                      residual=x)
        elif kind == "up":
            # ConvTranspose2d: 4 parity convs in one matmul + hoisted scatter matmuls
            y = conv(x, s)                    # (4*cout, hw_in)
            cout, hw_in, hw_out = s["cout"], s["hw"], s["hw_out"]
            acc = None
            for q in range(4):
                so = s["scat_off"][q]
                part = jnp.dot(y[q * cout:(q + 1) * cout, :],
                               sel_ref[so:so + hw_in, 0:hw_out],
                               preferred_element_type=f32)
                acc = part if acc is None else acc + part
            x = inorm(acc, s["n_off"], cout, relu=True)
        else:  # "head": 4 heads fused along Cout (1+4+1+4 = 10)
            bias = norm_ref[s["bias_off"]:s["bias_off"] + s["cout"], 0:1]
            heads = conv(x, s) + bias

    c = IMAGE_CHANNELS
    bg_a = _sigmoid(heads[0:1, :])
    bg_c = jnp.tanh(heads[1:1 + c, :])
    eb_a = _sigmoid(heads[1 + c:2 + c, :])
    eb_c = jnp.tanh(heads[2 + c:2 + 2 * c, :])

    # apply_color_change(alpha, color_change, image) = color_change*a + image*(1-a)
    out_ref[0:c, :] = img4 * eb_a + eb_c * (1.0 - eb_a)                  # eyebrow layer
    out_ref[c:c + 1, :] = eb_a                                           # eyebrow alpha
    out_ref[c + 1:2 * c + 1, :] = eb_c                                   # eyebrow color change
    out_ref[2 * c + 1:3 * c + 1, :] = bg_c * bg_a + img4 * (1.0 - bg_a)  # background layer
    out_ref[3 * c + 1:3 * c + 2, :] = bg_a                               # background alpha
    out_ref[3 * c + 2:4 * c + 2, :] = bg_c                               # background color change


# ---------------- parameter packing (plain-JAX layout plumbing, outside kernel) ------

_T_KI = ({0: 1, -1: 3}, {0: 2, 1: 0})   # output parity -> {input offset: transposed tap}


def _wmat_s1(w):
    """(K, K, Cin, Cout) HWIO -> (Cout, K*K*Cin) in (ky, kx, ci) column order."""
    return jnp.transpose(w.reshape(-1, w.shape[-1]))


def _wmat_t(wt):
    """PyTorch ConvTranspose2d weight (Cin, Cout, 4, 4) -> (4*Cout, 9*Cin)."""
    cin, cout = wt.shape[0], wt.shape[1]
    zero = jnp.zeros((cout, cin), jnp.float32)
    rows = []
    for qy in range(2):
        for qx in range(2):
            cols = []
            for dy in (-1, 0, 1):
                for dx in (-1, 0, 1):
                    if dy in _T_KI[qy] and dx in _T_KI[qx]:
                        cols.append(jnp.transpose(wt[:, :, _T_KI[qy][dy], _T_KI[qx][dx]]))
                    else:
                        cols.append(zero)
            rows.append(jnp.concatenate(cols, axis=1))
    return jnp.concatenate(rows, axis=0)


def _pack_params(params):
    w_pack = jnp.zeros(W_PACK_SHAPE, jnp.float32)
    n_pack = jnp.zeros((NORM_PACK_ROWS, 2), jnp.float32)

    def put_w(spec, mat):
        nonlocal w_pack
        w_pack = w_pack.at[spec["w_off"]:spec["w_off"] + mat.shape[0],
                           0:mat.shape[1]].set(mat)

    def put_n(off, g, b):
        nonlocal n_pack
        n_pack = n_pack.at[off:off + g.shape[0], 0].set(g)
        n_pack = n_pack.at[off:off + b.shape[0], 1].set(b)

    it = iter(PLAN)

    _, s = next(it)                                  # first 7x7 conv (image padded to 8ch)
    d0 = params["down"][0]
    pad = jnp.zeros(d0["w"].shape[:2] + (CIN0 - IMAGE_CHANNELS, d0["w"].shape[3]),
                    jnp.float32)
    put_w(s, _wmat_s1(jnp.concatenate([d0["w"], pad], axis=2)))
    put_n(s["n_off"], d0["g"], d0["b"])

    for blk in params["down"][1:]:                   # stride-2 downsample convs
        _, s = next(it)
        put_w(s, _wmat_s1(blk["w"]))
        put_n(s["n_off"], blk["g"], blk["b"])

    _, s = next(it)                                  # bottleneck conv
    b0 = params["bottleneck0"]
    put_w(s, _wmat_s1(b0["w"]))
    put_n(s["n_off"], b0["g"], b0["b"])

    for blk in params["resnet"]:                     # resnet blocks
        _, s = next(it)
        put_w(s["a"], _wmat_s1(blk["w1"]))
        put_n(s["a"]["n_off"], blk["g1"], blk["b1"])
        put_w(s["b"], _wmat_s1(blk["w2"]))
        put_n(s["b"]["n_off"], blk["g2"], blk["b2"])

    for blk in params["up"]:                         # transposed convs
        _, s = next(it)
        put_w(s, _wmat_t(blk["wT"]))
        put_n(s["n_off"], blk["g"], blk["b"])

    _, s = next(it)                                  # fused heads + bias
    hw_ = jnp.concatenate([params["bg_alpha"]["w"], params["bg_color"]["w"],
                           params["eb_alpha"]["w"], params["eb_color"]["w"]], axis=-1)
    hb = jnp.concatenate([params["bg_alpha"]["b"], params["bg_color"]["b"],
                          params["eb_alpha"]["b"], params["eb_color"]["b"]], axis=0)
    put_w(s, _wmat_s1(hw_))
    n_pack = n_pack.at[s["bias_off"]:s["bias_off"] + hb.shape[0], 0].set(hb)
    return w_pack, n_pack


# ---------------- EyebrowDecomposer00.forward ----------------

def eyebrow_decomposer_forward(params, image_nchw):
    """image: (N, 4, 16, 16) NCHW; returns the module's 6 NCHW outputs."""
    n = image_nchw.shape[0]
    img = image_nchw.astype(jnp.float32).reshape(n, IMAGE_CHANNELS, HW)
    img8 = jnp.concatenate(
        [img, jnp.zeros((n, CIN0 - IMAGE_CHANNELS, HW), jnp.float32)], axis=1)
    w_pack, n_pack = _pack_params(params)
    mask_pack = jnp.asarray(MASK_PACK)
    sel_pack = jnp.asarray(SEL_PACK)

    out = pl.pallas_call(
        _fused_kernel,
        grid=(n,),
        in_specs=[
            pl.BlockSpec((None, CIN0, HW), lambda i: (i, 0, 0)),
            pl.BlockSpec(w_pack.shape, lambda i: (0, 0)),
            pl.BlockSpec(n_pack.shape, lambda i: (0, 0)),
            pl.BlockSpec(mask_pack.shape, lambda i: (0, 0)),
            pl.BlockSpec(sel_pack.shape, lambda i: (0, 0)),
        ],
        out_specs=pl.BlockSpec((None, OUT_CHANNELS, HW), lambda i: (i, 0, 0)),
        out_shape=jax.ShapeDtypeStruct((n, OUT_CHANNELS, HW), jnp.float32),
        scratch_shapes=[pltpu.VMEM((P_ROWS, HW), jnp.float32)],
        compiler_params=pltpu.CompilerParams(
            dimension_semantics=("parallel",),
            vmem_limit_bytes=32 * 1024 * 1024),
    )(img8, w_pack, n_pack, mask_pack, sel_pack)

    c = IMAGE_CHANNELS

    def img_out(c0, c1):
        return out[:, c0:c1, :].reshape(n, c1 - c0, IMAGE_SIZE, IMAGE_SIZE)

    return [img_out(0, c), img_out(c, c + 1), img_out(c + 1, 2 * c + 1),
            img_out(2 * c + 1, 3 * c + 1), img_out(3 * c + 1, 3 * c + 2),
            img_out(3 * c + 2, 4 * c + 2)]


# ---------------- deterministic synthetic parameters ----------------

def init_params(key):
    keys = iter(jax.random.split(key, 64))

    def w_init(shape, scale=0.1):
        return scale * jax.random.normal(next(keys), shape, jnp.float32)

    def norm_params(c):
        return (1.0 + 0.05 * jax.random.normal(next(keys), (c,), jnp.float32),
                0.05 * jax.random.normal(next(keys), (c,), jnp.float32))

    params = {}
    down = []
    g, b = norm_params(START_CHANNELS)
    down.append({"w": w_init((7, 7, IMAGE_CHANNELS, START_CHANNELS)), "g": g, "b": b})
    size, c_cur = IMAGE_SIZE, START_CHANNELS
    while size > BOTTLENECK_IMAGE_SIZE:
        nsize = size // 2
        c_next = _channels_at(nsize)
        g, b = norm_params(c_next)
        down.append({"w": w_init((4, 4, c_cur, c_next)), "g": g, "b": b})
        size, c_cur = nsize, c_next
    params["down"] = down

    g, b = norm_params(c_cur)
    params["bottleneck0"] = {"w": w_init((3, 3, c_cur, c_cur)), "g": g, "b": b}
    resnets = []
    for _ in range(1, NUM_BOTTLENECK_BLOCKS):
        g1, b1 = norm_params(c_cur)
        g2, b2 = norm_params(c_cur)
        resnets.append({"w1": w_init((3, 3, c_cur, c_cur)), "g1": g1, "b1": b1,
                        "w2": w_init((3, 3, c_cur, c_cur)), "g2": g2, "b2": b2})
    params["resnet"] = resnets

    ups = []
    while size < IMAGE_SIZE:
        nsize = size * 2
        c_next = _channels_at(nsize)
        g, b = norm_params(c_next)
        ups.append({"wT": w_init((c_cur, c_next, 4, 4)), "g": g, "b": b})
        size, c_cur = nsize, c_next
    params["up"] = ups

    def head(cout):
        return {"w": w_init((3, 3, START_CHANNELS, cout)),
                "b": w_init((cout,), 0.05)}

    params["bg_alpha"] = head(1)
    params["bg_color"] = head(IMAGE_CHANNELS)
    params["eb_alpha"] = head(1)
    params["eb_color"] = head(IMAGE_CHANNELS)
    return params


# ---------------- pure-JAX reference (correctness check only) ----------------

def _ref_forward(params, image_nchw):
    hi = jax.lax.Precision.HIGHEST
    x = jnp.transpose(image_nchw, (0, 2, 3, 1)).astype(jnp.float32)

    def conv(v, w, b=None, stride=1, pad=0):
        o = jax.lax.conv_general_dilated(
            v, w, (stride, stride), [(pad, pad), (pad, pad)],
            dimension_numbers=("NHWC", "HWIO", "NHWC"), precision=hi)
        return o if b is None else o + b

    def conv_t(v, wt):
        w = jnp.transpose(wt[:, :, ::-1, ::-1], (2, 3, 0, 1))
        return jax.lax.conv_general_dilated(
            v, w, (1, 1), [(2, 2), (2, 2)], lhs_dilation=(2, 2),
            dimension_numbers=("NHWC", "HWIO", "NHWC"), precision=hi)

    def inorm(v, g, b, relu, res=None):
        m = jnp.mean(v, axis=(1, 2), keepdims=True)
        var = jnp.mean((v - m) ** 2, axis=(1, 2), keepdims=True)
        y = (v - m) / jnp.sqrt(var + 1e-5) * g + b
        if relu:
            y = jnp.maximum(y, 0.0)
        return y if res is None else y + res

    d0 = params["down"][0]
    f = inorm(conv(x, d0["w"], pad=3), d0["g"], d0["b"], True)
    for blk in params["down"][1:]:
        f = inorm(conv(f, blk["w"], stride=2, pad=1), blk["g"], blk["b"], True)
    b0 = params["bottleneck0"]
    f = inorm(conv(f, b0["w"], pad=1), b0["g"], b0["b"], True)
    for blk in params["resnet"]:
        h = inorm(conv(f, blk["w1"], pad=1), blk["g1"], blk["b1"], True)
        h = conv(h, blk["w2"], pad=1)
        f = inorm(h, blk["g2"], blk["b2"], False, res=f)
    for blk in params["up"]:
        f = inorm(conv_t(f, blk["wT"]), blk["g"], blk["b"], True)

    def head(name):
        return conv(f, params[name]["w"], params[name]["b"], pad=1)

    bg_a = jax.nn.sigmoid(head("bg_alpha"))
    bg_c = jnp.tanh(head("bg_color"))
    eb_a = jax.nn.sigmoid(head("eb_alpha"))
    eb_c = jnp.tanh(head("eb_color"))
    bg_layer = bg_c * bg_a + x * (1.0 - bg_a)
    eb_layer = x * eb_a + eb_c * (1.0 - eb_a)
    outs = [eb_layer, eb_a, eb_c, bg_layer, bg_a, bg_c]
    return [jnp.transpose(o, (0, 3, 1, 2)) for o in outs]


# ---------------- main ----------------

if __name__ == "__main__":
    _detect_roll_convention()   # resolve pltpu.roll direction before tracing the kernel

    root = jax.random.PRNGKey(0)
    pkey, ikey = jax.random.split(root)
    params = init_params(pkey)
    image = jax.random.uniform(ikey, (BATCH, IMAGE_CHANNELS, IMAGE_SIZE, IMAGE_SIZE),
                               jnp.float32, minval=-1.0, maxval=1.0)

    outs = jax.jit(eyebrow_decomposer_forward)(params, image)
    outs = jax.block_until_ready(outs)

    assert len(outs) == 6
    assert outs[0].shape == (BATCH, IMAGE_CHANNELS, IMAGE_SIZE, IMAGE_SIZE)  # eyebrow layer
    assert outs[1].shape == (BATCH, 1, IMAGE_SIZE, IMAGE_SIZE)               # eyebrow alpha
    assert outs[2].shape == (BATCH, IMAGE_CHANNELS, IMAGE_SIZE, IMAGE_SIZE)  # eyebrow color change
    assert outs[3].shape == (BATCH, IMAGE_CHANNELS, IMAGE_SIZE, IMAGE_SIZE)  # background layer
    assert outs[4].shape == (BATCH, 1, IMAGE_SIZE, IMAGE_SIZE)               # background alpha
    assert outs[5].shape == (BATCH, IMAGE_CHANNELS, IMAGE_SIZE, IMAGE_SIZE)  # background color change

    refs = jax.jit(_ref_forward)(params, image)
    refs = jax.block_until_ready(refs)
    for o, r in zip(outs, refs):
        err = float(jnp.max(jnp.abs(o - r)))
        assert err < 5e-2, f"mismatch vs reference: max abs err = {err}"

    print("KERNEL_OK")
</pallas_src>

<mosaic_0001>
module attributes {stable_mosaic.version = 11 : i64} {
  func.func @probe(%arg0: memref<8x256xf32, #tpu.memory_space<vmem>>, %arg1: memref<8x256xf32, #tpu.memory_space<vmem>>) attributes {dimension_semantics = [], scalar_prefetch = 0 : i64, scratch_operands = 0 : i64, tpu.core_type = #tpu.core_type<tc>} {
    %c0 = arith.constant 0 : index
    %c0_0 = arith.constant 0 : index
    %0 = vector.load %arg0[%c0, %c0_0] : memref<8x256xf32, #tpu.memory_space<vmem>>, vector<8x256xf32>
    %c1_i32 = arith.constant 1 : i32
    %1 = tpu.dynamic_rotate %0 by %c1_i32 dim 1 : vector<8x256xf32>, i32 -> vector<8x256xf32>
    %c0_1 = arith.constant 0 : index
    %c0_2 = arith.constant 0 : index
    %2 = vector.load %arg1[%c0_1, %c0_2] : memref<8x256xf32, #tpu.memory_space<vmem>>, vector<8x256xf32>
    tpu.vector_store %arg1[%c0_1, %c0_2], %1 {strides = array<i32>} : memref<8x256xf32, #tpu.memory_space<vmem>>, vector<8x256xf32>,
    return
  }
}

module attributes {stable_mosaic.version = 11 : i64} {
  func.func @_fused_kernel(%arg0: i32, %arg1: memref<1x8x256xf32, #tpu.memory_space<vmem>>, %arg2: memref<264x392xf32, #tpu.memory_space<vmem>>, %arg3: memref<192x2xf32, #tpu.memory_space<vmem>>, %arg4: memref<136x256xf32, #tpu.memory_space<vmem>>, %arg5: memref<640x256xf32, #tpu.memory_space<vmem>>, %arg6: memref<1x18x256xf32, #tpu.memory_space<vmem>>, %arg7: memref<392x256xf32, #tpu.memory_space<vmem>>) attributes {dimension_semantics = [#tpu.dimension_semantics<parallel>], iteration_bounds = array<i64: 2>, scalar_prefetch = 0 : i64, scratch_operands = 1 : i64, tpu.core_type = #tpu.core_type<tc>, window_params = [{transform_indices = @transform_0, window_bounds = array<i64: 1, 8, 256>}, {pipeline_mode = #tpu.pipeline_mode<synchronous>, transform_indices = @transform_1, window_bounds = array<i64: 264, 392>}, {pipeline_mode = #tpu.pipeline_mode<synchronous>, transform_indices = @transform_2, window_bounds = array<i64: 192, 2>}, {pipeline_mode = #tpu.pipeline_mode<synchronous>, transform_indices = @transform_3, window_bounds = array<i64: 136, 256>}, {pipeline_mode = #tpu.pipeline_mode<synchronous>, transform_indices = @transform_4, window_bounds = array<i64: 640, 256>}, {transform_indices = @transform_5, window_bounds = array<i64: 1, 18, 256>}]} {
    %c0 = arith.constant 0 : index
    %c0_0 = arith.constant 0 : index
    %c0_1 = arith.constant 0 : index
    %0 = vector.load %arg1[%c0, %c0_0, %c0_1] : memref<1x8x256xf32, #tpu.memory_space<vmem>>, vector<1x8x256xf32>
    %1 = vector.shape_cast %0 : vector<1x8x256xf32> to vector<8x256xf32>
    %2 = vector.extract_strided_slice %1 {offsets = [0, 0], sizes = [4, 256], strides = [1, 1]} : vector<8x256xf32> to vector<4x256xf32>
    %3 = vector.extract_strided_slice %1 {offsets = [0, 205], sizes = [8, 51], strides = [1, 1]} : vector<8x256xf32> to vector<8x51xf32>
    %4 = vector.extract_strided_slice %1 {offsets = [0, 0], sizes = [8, 205], strides = [1, 1]} : vector<8x256xf32> to vector<8x205xf32>
    %5 = tpu.concatenate %3, %4 in 1 : vector<8x51xf32>, vector<8x205xf32> -> vector<8x256xf32>
    %c0_2 = arith.constant 0 : index
    %c0_3 = arith.constant 0 : index
    %6 = vector.load %arg4[%c0_2, %c0_3] : memref<136x256xf32, #tpu.memory_space<vmem>>, vector<1x256xf32>
    %7 = vector.broadcast %6 : vector<1x256xf32> to vector<8x256xf32>
    %8 = arith.mulf %5, %7 : vector<8x256xf32>
    %c0_4 = arith.constant 0 : index
    %c0_5 = arith.constant 0 : index
    %9 = vector.load %arg7[%c0_4, %c0_5] : memref<392x256xf32, #tpu.memory_space<vmem>>, vector<8x256xf32>
    tpu.vector_store %arg7[%c0_4, %c0_5], %8 {strides = array<i32>} : memref<392x256xf32, #tpu.memory_space<vmem>>, vector<8x256xf32>,
    %10 = vector.extract_strided_slice %1 {offsets = [0, 206], sizes = [8, 50], strides = [1, 1]} : vector<8x256xf32> to vector<8x50xf32>
    %11 = vector.extract_strided_slice %1 {offsets = [0, 0], sizes = [8, 206], strides = [1, 1]} : vector<8x256xf32> to vector<8x206xf32>
    %12 = tpu.concatenate %10, %11 in 1 : vector<8x50xf32>, vector<8x206xf32> -> vector<8x256xf32>
    %c1 = arith.constant 1 : index
    %c0_6 = arith.constant 0 : index
    %13 = vector.load %arg4[%c1, %c0_6] : memref<136x256xf32, #tpu.memory_space<vmem>>, vector<1x256xf32>
    %14 = vector.broadcast %13 : vector<1x256xf32> to vector<8x256xf32>
    %15 = arith.mulf %12, %14 : vector<8x256xf32>
    %c8 = arith.constant 8 : index
    %c0_7 = arith.constant 0 : index
    %16 = vector.load %arg7[%c8, %c0_7] : memref<392x256xf32, #tpu.memory_space<vmem>>, vector<8x256xf32>
    tpu.vector_store %arg7[%c8, %c0_7], %15 {strides = array<i32>} : memref<392x256xf32, #tpu.memory_space<vmem>>, vector<8x256xf32>,
    %17 = vector.extract_strided_slice %1 {offsets = [0, 207], sizes = [8, 49], strides = [1, 1]} : vector<8x256xf32> to vector<8x49xf32>
    %18 = vector.extract_strided_slice %1 {offsets = [0, 0], sizes = [8, 207], strides = [1, 1]} : vector<8x256xf32> to vector<8x207xf32>
    %19 = tpu.concatenate %17, %18 in 1 : vector<8x49xf32>, vector<8x207xf32> -> vector<8x256xf32>
    %c2 = arith.constant 2 : index
    %c0_8 = arith.constant 0 : index
    %20 = vector.load %arg4[%c2, %c0_8] : memref<136x256xf32, #tpu.memory_space<vmem>>, vector<1x256xf32>
    %21 = vector.broadcast %20 : vector<1x256xf32> to vector<8x256xf32>
    %22 = arith.mulf %19, %21 : vector<8x256xf32>
    %c16 = arith.constant 16 : index
    %c0_9 = arith.constant 0 : index
    %23 = vector.load %arg7[%c16, %c0_9] : memref<392x256xf32, #tpu.memory_space<vmem>>, vector<8x256xf32>
    tpu.vector_store %arg7[%c16, %c0_9], %22 {strides = array<i32>} : memref<392x256xf32, #tpu.memory_space<vmem>>, vector<8x256xf32>,
    %24 = vector.extract_strided_slice %1 {offsets = [0, 208], sizes = [8, 48], strides = [1, 1]} : vector<8x256xf32> to vector<8x48xf32>
    %25 = vector.extract_strided_slice %1 {offsets = [0, 0], sizes = [8, 208], strides = [1, 1]} : vector<8x256xf32> to vector<8x208xf32>
    %26 = tpu.concatenate %24, %25 in 1 : vector<8x48xf32>, vector<8x208xf32> -> vector<8x256xf32>
    %c3 = arith.constant 3 : index
    %c0_10 = arith.constant 0 : index
    %27 = vector.load %arg4[%c3, %c0_10] : memref<136x256xf32, #tpu.memory_space<vmem>>, vector<1x256xf32>
    %28 = vector.broadcast %27 : vector<1x256xf32> to vector<8x256xf32>
    %29 = arith.mulf %26, %28 : vector<8x256xf32>
    %c24 = arith.constant 24 : index
    %c0_11 = arith.constant 0 : index
    %30 = vector.load %arg7[%c24, %c0_11] : memref<392x256xf32, #tpu.memory_space<vmem>>, vector<8x256xf32>
    tpu.vector_store %arg7[%c24, %c0_11], %29 {strides = array<i32>} : memref<392x256xf32, #tpu.memory_space<vmem>>, vector<8x256xf32>,
    %31 = vector.extract_strided_slice %1 {offsets = [0, 209], sizes = [8, 47], strides = [1, 1]} : vector<8x256xf32> to vector<8x47xf32>
    %32 = vector.extract_strided_slice %1 {offsets = [0, 0], sizes = [8, 209], strides = [1, 1]} : vector<8x256xf32> to vector<8x209xf32>
    %33 = tpu.concatenate %31, %32 in 1 : vector<8x47xf32>, vector<8x209xf32> -> vector<8x256xf32>
    %c4 = arith.constant 4 : index
    %c0_12 = arith.constant 0 : index
    %34 = vector.load %arg4[%c4, %c0_12] : memref<136x256xf32, #tpu.memory_space<vmem>>, vector<1x256xf32>
    %35 = vector.broadcast %34 : vector<1x256xf32> to vector<8x256xf32>
    %36 = arith.mulf %33, %35 : vector<8x256xf32>
    %c32 = arith.constant 32 : index
    %c0_13 = arith.constant 0 : index
    %37 = vector.load %arg7[%c32, %c0_13] : memref<392x256xf32, #tpu.memory_space<vmem>>, vector<8x256xf32>
    tpu.vector_store %arg7[%c32, %c0_13], %36 {strides = array<i32>} : memref<392x256xf32, #tpu.memory_space<vmem>>, vector<8x256xf32>,
    %38 = vector.extract_strided_slice %1 {offsets = [0, 210], sizes = [8, 46], strides = [1, 1]} : vector<8x256xf32> to vector<8x46xf32>
    %39 = vector.extract_strided_slice %1 {offsets = [0, 0], sizes = [8, 210], strides = [1, 1]} : vector<8x256xf32> to vector<8x210xf32>
    %40 = tpu.concatenate %38, %39 in 1 : vector<8x46xf32>, vector<8x210xf32> -> vector<8x256xf32>
    %c5 = arith.constant 5 : index
    %c0_14 = arith.constant 0 : index
    %41 = vector.load %arg4[%c5, %c0_14] : memref<136x256xf32, #tpu.memory_space<vmem>>, vector<1x256xf32>
    %42 = vector.broadcast %41 : vector<1x256xf32> to vector<8x256xf32>
    %43 = arith.mulf %40, %42 : vector<8x256xf32>
    %c40 = arith.constant 40 : index
    %c0_15 = arith.constant 0 : index
    %44 = vector.load %arg7[%c40, %c0_15] : memref<392x256xf32, #tpu.memory_space<vmem>>, vector<8x256xf32>
    tpu.vector_store %arg7[%c40, %c0_15], %43 {strides = array<i32>} : memref<392x256xf32, #tpu.memory_space<vmem>>, vector<8x256xf32>,
    %45 = vector.extract_strided_slice %1 {offsets = [0, 211], sizes = [8, 45], strides = [1, 1]} : vector<8x256xf32> to vector<8x45xf32>
    %46 = vector.extract_strided_slice %1 {offsets = [0, 0], sizes = [8, 211], strides = [1, 1]} : vector<8x256xf32> to vector<8x211xf32>
    %47 = tpu.concatenate %45, %46 in 1 : vector<8x45xf32>, vector<8x211xf32> -> vector<8x256xf32>
    %c6 = arith.constant 6 : index
    %c0_16 = arith.constant 0 : index
    %48 = vector.load %arg4[%c6, %c0_16] : memref<136x256xf32, #tpu.memory_space<vmem>>, vector<1x256xf32>
    %49 = vector.broadcast %48 : vector<1x256xf32> to vector<8x256xf32>
    %50 = arith.mulf %47, %49 : vector<8x256xf32>
    %c48 = arith.constant 48 : index
    %c0_17 = arith.constant 0 : index
    %51 = vector.load %arg7[%c48, %c0_17] : memref<392x256xf32, #tpu.memory_space<vmem>>, vector<8x256xf32>
    tpu.vector_store %arg7[%c48, %c0_17], %50 {strides = array<i32>} : memref<392x256xf32, #tpu.memory_space<vmem>>, vector<8x256xf32>,
    %52 = vector.extract_strided_slice %1 {offsets = [0, 221], sizes = [8, 35], strides = [1, 1]} : vector<8x256xf32> to vector<8x35xf32>
    %53 = vector.extract_strided_slice %1 {offsets = [0, 0], sizes = [8, 221], strides = [1, 1]} : vector<8x256xf32> to vector<8x221xf32>
    %54 = tpu.concatenate %52, %53 in 1 : vector<8x35xf32>, vector<8x221xf32> -> vector<8x256xf32>
    %c7 = arith.constant 7 : index
    %c0_18 = arith.constant 0 : index
    %55 = vector.load %arg4[%c7, %c0_18] : memref<136x256xf32, #tpu.memory_space<vmem>>, vector<1x256xf32>
    %56 = vector.broadcast %55 : vector<1x256xf32> to vector<8x256xf32>
    %57 = arith.mulf %54, %56 : vector<8x256xf32>
    %c56 = arith.constant 56 : index
    %c0_19 = arith.constant 0 : index
    %58 = vector.load %arg7[%c56, %c0_19] : memref<392x256xf32, #tpu.memory_space<vmem>>, vector<8x256xf32>
    tpu.vector_store %arg7[%c56, %c0_19], %57 {strides = array<i32>} : memref<392x256xf32, #tpu.memory_space<vmem>>, vector<8x256xf32>,
    %59 = vector.extract_strided_slice %1 {offsets = [0, 222], sizes = [8, 34], strides = [1, 1]} : vector<8x256xf32> to vector<8x34xf32>
    %60 = vector.extract_strided_slice %1 {offsets = [0, 0], sizes = [8, 222], strides = [1, 1]} : vector<8x256xf32> to vector<8x222xf32>
    %61 = tpu.concatenate %59, %60 in 1 : vector<8x34xf32>, vector<8x222xf32> -> vector<8x256xf32>
    %c8_20 = arith.constant 8 : index
    %c0_21 = arith.constant 0 : index
    %62 = vector.load %arg4[%c8_20, %c0_21] : memref<136x256xf32, #tpu.memory_space<vmem>>, vector<1x256xf32>
    %63 = vector.broadcast %62 : vector<1x256xf32> to vector<8x256xf32>
    %64 = arith.mulf %61, %63 : vector<8x256xf32>
    %c64 = arith.constant 64 : index
    %c0_22 = arith.constant 0 : index
    %65 = vector.load %arg7[%c64, %c0_22] : memref<392x256xf32, #tpu.memory_space<vmem>>, vector<8x256xf32>
    tpu.vector_store %arg7[%c64, %c0_22], %64 {strides = array<i32>} : memref<392x256xf32, #tpu.memory_space<vmem>>, vector<8x256xf32>,
    %66 = vector.extract_strided_slice %1 {offsets = [0, 223], sizes = [8, 33], strides = [1, 1]} : vector<8x256xf32> to vector<8x33xf32>
    %67 = vector.extract_strided_slice %1 {offsets = [0, 0], sizes = [8, 223], strides = [1, 1]} : vector<8x256xf32> to vector<8x223xf32>
    %68 = tpu.concatenate %66, %67 in 1 : vector<8x33xf32>, vector<8x223xf32> -> vector<8x256xf32>
    %c9 = arith.constant 9 : index
    %c0_23 = arith.constant 0 : index
    %69 = vector.load %arg4[%c9, %c0_23] : memref<136x256xf32, #tpu.memory_space<vmem>>, vector<1x256xf32>
    %70 = vector.broadcast %69 : vector<1x256xf32> to vector<8x256xf32>
    %71 = arith.mulf %68, %70 : vector<8x256xf32>
    %c72 = arith.constant 72 : index
    %c0_24 = arith.constant 0 : index
    %72 = vector.load %arg7[%c72, %c0_24] : memref<392x256xf32, #tpu.memory_space<vmem>>, vector<8x256xf32>
    tpu.vector_store %arg7[%c72, %c0_24], %71 {strides = array<i32>} : memref<392x256xf32, #tpu.memory_space<vmem>>, vector<8x256xf32>,
    %73 = vector.extract_strided_slice %1 {offsets = [0, 224], sizes = [8, 32], strides = [1, 1]} : vector<8x256xf32> to vector<8x32xf32>
    %74 = vector.extract_strided_slice %1 {offsets = [0, 0], sizes = [8, 224], strides = [1, 1]} : vector<8x256xf32> to vector<8x224xf32>
    %75 = tpu.concatenate %73, %74 in 1 : vector<8x32xf32>, vector<8x224xf32> -> vector<8x256xf32>
    %c10 = arith.constant 10 : index
    %c0_25 = arith.constant 0 : index
    %76 = vector.load %arg4[%c10, %c0_25] : memref<136x256xf32, #tpu.memory_space<vmem>>, vector<1x256xf32>
    %77 = vector.broadcast %76 : vector<1x256xf32> to vector<8x256xf32>
    %78 = arith.mulf %75, %77 : vector<8x256xf32>
    %c80 = arith.constant 80 : index
    %c0_26 = arith.constant 0 : index
    %79 = vector.load %arg7[%c80, %c0_26] : memref<392x256xf32, #tpu.memory_space<vmem>>, vector<8x256xf32>
    tpu.vector_store %arg7[%c80, %c0_26], %78 {strides = array<i32>} : memref<392x256xf32, #tpu.memory_space<vmem>>, vector<8x256xf32>,
    %80 = vector.extract_strided_slice %1 {offsets = [0, 225], sizes = [8, 31], strides = [1, 1]} : vector<8x256xf32> to vector<8x31xf32>
    %81 = vector.extract_strided_slice %1 {offsets = [0, 0], sizes = [8, 225], strides = [1, 1]} : vector<8x256xf32> to vector<8x225xf32>
    %82 = tpu.concatenate %80, %81 in 1 : vector<8x31xf32>, vector<8x225xf32> -> vector<8x256xf32>
    %c11 = arith.constant 11 : index
    %c0_27 = arith.constant 0 : index
    %83 = vector.load %arg4[%c11, %c0_27] : memref<136x256xf32, #tpu.memory_space<vmem>>, vector<1x256xf32>
    %84 = vector.broadcast %83 : vector<1x256xf32> to vector<8x256xf32>
    %85 = arith.mulf %82, %84 : vector<8x256xf32>
    %c88 = arith.constant 88 : index
    %c0_28 = arith.constant 0 : index
    %86 = vector.load %arg7[%c88, %c0_28] : memref<392x256xf32, #tpu.memory_space<vmem>>, vector<8x256xf32>
    tpu.vector_store %arg7[%c88, %c0_28], %85 {strides = array<i32>} : memref<392x256xf32, #tpu.memory_space<vmem>>, vector<8x256xf32>,
    %87 = vector.extract_strided_slice %1 {offsets = [0, 226], sizes = [8, 30], strides = [1, 1]} : vector<8x256xf32> to vector<8x30xf32>
    %88 = vector.extract_strided_slice %1 {offsets = [0, 0], sizes = [8, 226], strides = [1, 1]} : vector<8x256xf32> to vector<8x226xf32>
    %89 = tpu.concatenate %87, %88 in 1 : vector<8x30xf32>, vector<8x226xf32> -> vector<8x256xf32>
    %c12 = arith.constant 12 : index
    %c0_29 = arith.constant 0 : index
    %90 = vector.load %arg4[%c12, %c0_29] : memref<136x256xf32, #tpu.memory_space<vmem>>, vector<1x256xf32>
    %91 = vector.broadcast %90 : vector<1x256xf32> to vector<8x256xf32>
    %92 = arith.mulf %89, %91 : vector<8x256xf32>
    %c96 = arith.constant 96 : index
    %c0_30 = arith.constant 0 : index
    %93 = vector.load %arg7[%c96, %c0_30] : memref<392x256xf32, #tpu.memory_space<vmem>>, vector<8x256xf32>
    tpu.vector_store %arg7[%c96, %c0_30], %92 {strides = array<i32>} : memref<392x256xf32, #tpu.memory_space<vmem>>, vector<8x256xf32>,
    %94 = vector.extract_strided_slice %1 {offsets = [0, 227], sizes = [8, 29], strides = [1, 1]} : vector<8x256xf32> to vector<8x29xf32>
    %95 = vector.extract_strided_slice %1 {offsets = [0, 0], sizes = [8, 227], strides = [1, 1]} : vector<8x256xf32> to vector<8x227xf32>
    %96 = tpu.concatenate %94, %95 in 1 : vector<8x29xf32>, vector<8x227xf32> -> vector<8x256xf32>
    %c13 = arith.constant 13 : index
    %c0_31 = arith.constant 0 : index
    %97 = vector.load %arg4[%c13, %c0_31] : memref<136x256xf32, #tpu.memory_space<vmem>>, vector<1x256xf32>
    %98 = vector.broadcast %97 : vector<1x256xf32> to vector<8x256xf32>
    %99 = arith.mulf %96, %98 : vector<8x256xf32>
    %c104 = arith.constant 104 : index
    %c0_32 = arith.constant 0 : index
    %100 = vector.load %arg7[%c104, %c0_32] : memref<392x256xf32, #tpu.memory_space<vmem>>, vector<8x256xf32>
    tpu.vector_store %arg7[%c104, %c0_32], %99 {strides = array<i32>} : memref<392x256xf32, #tpu.memory_space<vmem>>, vector<8x256xf32>,
    %101 = vector.extract_strided_slice %1 {offsets = [0, 237], sizes = [8, 19], strides = [1, 1]} : vector<8x256xf32> to vector<8x19xf32>
    %102 = vector.extract_strided_slice %1 {offsets = [0, 0], sizes = [8, 237], strides = [1, 1]} : vector<8x256xf32> to vector<8x237xf32>
    %103 = tpu.concatenate %101, %102 in 1 : vector<8x19xf32>, vector<8x237xf32> -> vector<8x256xf32>
    %c14 = arith.constant 14 : index
    %c0_33 = arith.constant 0 : index
    %104 = vector.load %arg4[%c14, %c0_33] : memref<136x256xf32, #tpu.memory_space<vmem>>, vector<1x256xf32>
    %105 = vector.broadcast %104 : vector<1x256xf32> to vector<8x256xf32>
    %106 = arith.mulf %103, %105 : vector<8x256xf32>
    %c112 = arith.constant 112 : index
    %c0_34 = arith.constant 0 : index
    %107 = vector.load %arg7[%c112, %c0_34] : memref<392x256xf32, #tpu.memory_space<vmem>>, vector<8x256xf32>
    tpu.vector_store %arg7[%c112, %c0_34], %106 {strides = array<i32>} : memref<392x256xf32, #tpu.memory_space<vmem>>, vector<8x256xf32>,
    %108 = vector.extract_strided_slice %1 {offsets = [0, 238], sizes = [8, 18], strides = [1, 1]} : vector<8x256xf32> to vector<8x18xf32>
    %109 = vector.extract_strided_slice %1 {offsets = [0, 0], sizes = [8, 238], strides = [1, 1]} : vector<8x256xf32> to vector<8x238xf32>
    %110 = tpu.concatenate %108, %109 in 1 : vector<8x18xf32>, vector<8x238xf32> -> vector<8x256xf32>
    %c15 = arith.constant 15 : index
    %c0_35 = arith.constant 0 : index
    %111 = vector.load %arg4[%c15, %c0_35] : memref<136x256xf32, #tpu.memory_space<vmem>>, vector<1x256xf32>
    %112 = vector.broadcast %111 : vector<1x256xf32> to vector<8x256xf32>
    %113 = arith.mulf %110, %112 : vector<8x256xf32>
    %c120 = arith.constant 120 : index
    %c0_36 = arith.constant 0 : index
    %114 = vector.load %arg7[%c120, %c0_36] : memref<392x256xf32, #tpu.memory_space<vmem>>, vector<8x256xf32>
    tpu.vector_store %arg7[%c120, %c0_36], %113 {strides = array<i32>} : memref<392x256xf32, #tpu.memory_space<vmem>>, vector<8x256xf32>,
    %115 = vector.extract_strided_slice %1 {offsets = [0, 239], sizes = [8, 17], strides = [1, 1]} : vector<8x256xf32> to vector<8x17xf32>
    %116 = vector.extract_strided_slice %1 {offsets = [0, 0], sizes = [8, 239], strides = [1, 1]} : vector<8x256xf32> to vector<8x239xf32>
    %117 = tpu.concatenate %115, %116 in 1 : vector<8x17xf32>, vector<8x239xf32> -> vector<8x256xf32>
    %c16_37 = arith.constant 16 : index
    %c0_38 = arith.constant 0 : index
    %118 = vector.load %arg4[%c16_37, %c0_38] : memref<136x256xf32, #tpu.memory_space<vmem>>, vector<1x256xf32>
    %119 = vector.broadcast %118 : vector<1x256xf32> to vector<8x256xf32>
    %120 = arith.mulf %117, %119 : vector<8x256xf32>
    %c128 = arith.constant 128 : index
    %c0_39 = arith.constant 0 : index
    %121 = vector.load %arg7[%c128, %c0_39] : memref<392x256xf32, #tpu.memory_space<vmem>>, vector<8x256xf32>
    tpu.vector_store %arg7[%c128, %c0_39], %120 {strides = array<i32>} : memref<392x256xf32, #tpu.memory_space<vmem>>, vector<8x256xf32>,
    %122 = vector.extract_strided_slice %1 {offsets = [0, 240], sizes = [8, 16], strides = [1, 1]} : vector<8x256xf32> to vector<8x16xf32>
    %123 = vector.extract_strided_slice %1 {offsets = [0, 0], sizes = [8, 240], strides = [1, 1]} : vector<8x256xf32> to vector<8x240xf32>
    %124 = tpu.concatenate %122, %123 in 1 : vector<8x16xf32>, vector<8x240xf32> -> vector<8x256xf32>
    %c17 = arith.constant 17 : index
    %c0_40 = arith.constant 0 : index
    %125 = vector.load %arg4[%c17, %c0_40] : memref<136x256xf32, #tpu.memory_space<vmem>>, vector<1x256xf32>
    %126 = vector.broadcast %125 : vector<1x256xf32> to vector<8x256xf32>
    %127 = arith.mulf %124, %126 : vector<8x256xf32>
    %c136 = arith.constant 136 : index
    %c0_41 = arith.constant 0 : index
    %128 = vector.load %arg7[%c136, %c0_41] : memref<392x256xf32, #tpu.memory_space<vmem>>, vector<8x256xf32>
    tpu.vector_store %arg7[%c136, %c0_41], %127 {strides = array<i32>} : memref<392x256xf32, #tpu.memory_space<vmem>>, vector<8x256xf32>,
    %129 = vector.extract_strided_slice %1 {offsets = [0, 241], sizes = [8, 15], strides = [1, 1]} : vector<8x256xf32> to vector<8x15xf32>
    %130 = vector.extract_strided_slice %1 {offsets = [0, 0], sizes = [8, 241], strides = [1, 1]} : vector<8x256xf32> to vector<8x241xf32>
    %131 = tpu.concatenate %129, %130 in 1 : vector<8x15xf32>, vector<8x241xf32> -> vector<8x256xf32>
    %c18 = arith.constant 18 : index
    %c0_42 = arith.constant 0 : index
    %132 = vector.load %arg4[%c18, %c0_42] : memref<136x256xf32, #tpu.memory_space<vmem>>, vector<1x256xf32>
    %133 = vector.broadcast %132 : vector<1x256xf32> to vector<8x256xf32>
    %134 = arith.mulf %131, %133 : vector<8x256xf32>
    %c144 = arith.constant 144 : index
    %c0_43 = arith.constant 0 : index
    %135 = vector.load %arg7[%c144, %c0_43] : memref<392x256xf32, #tpu.memory_space<vmem>>, vector<8x256xf32>
    tpu.vector_store %arg7[%c144, %c0_43], %134 {strides = array<i32>} : memref<392x256xf32, #tpu.memory_space<vmem>>, vector<8x256xf32>,
    %136 = vector.extract_strided_slice %1 {offsets = [0, 242], sizes = [8, 14], strides = [1, 1]} : vector<8x256xf32> to vector<8x14xf32>
    %137 = vector.extract_strided_slice %1 {offsets = [0, 0], sizes = [8, 242], strides = [1, 1]} : vector<8x256xf32> to vector<8x242xf32>
    %138 = tpu.concatenate %136, %137 in 1 : vector<8x14xf32>, vector<8x242xf32> -> vector<8x256xf32>
    %c19 = arith.constant 19 : index
    %c0_44 = arith.constant 0 : index
    %139 = vector.load %arg4[%c19, %c0_44] : memref<136x256xf32, #tpu.memory_space<vmem>>, vector<1x256xf32>
    %140 = vector.broadcast %139 : vector<1x256xf32> to vector<8x256xf32>
    %141 = arith.mulf %138, %140 : vector<8x256xf32>
    %c152 = arith.constant 152 : index
    %c0_45 = arith.constant 0 : index
    %142 = vector.load %arg7[%c152, %c0_45] : memref<392x256xf32, #tpu.memory_space<vmem>>, vector<8x256xf32>
    tpu.vector_store %arg7[%c152, %c0_45], %141 {strides = array<i32>} : memref<392x256xf32, #tpu.memory_space<vmem>>, vector<8x256xf32>,
    %143 = vector.extract_strided_slice %1 {offsets = [0, 243], sizes = [8, 13], strides = [1, 1]} : vector<8x256xf32> to vector<8x13xf32>
    %144 = vector.extract_strided_slice %1 {offsets = [0, 0], sizes = [8, 243], strides = [1, 1]} : vector<8x256xf32> to vector<8x243xf32>
    %145 = tpu.concatenate %143, %144 in 1 : vector<8x13xf32>, vector<8x243xf32> -> vector<8x256xf32>
    %c20 = arith.constant 20 : index
    %c0_46 = arith.constant 0 : index
    %146 = vector.load %arg4[%c20, %c0_46] : memref<136x256xf32, #tpu.memory_space<vmem>>, vector<1x256xf32>
    %147 = vector.broadcast %146 : vector<1x256xf32> to vector<8x256xf32>
    %148 = arith.mulf %145, %147 : vector<8x256xf32>
    %c160 = arith.constant 160 : index
    %c0_47 = arith.constant 0 : index
    %149 = vector.load %arg7[%c160, %c0_47] : memref<392x256xf32, #tpu.memory_space<vmem>>, vector<8x256xf32>
    tpu.vector_store %arg7[%c160, %c0_47], %148 {strides = array<i32>} : memref<392x256xf32, #tpu.memory_space<vmem>>, vector<8x256xf32>,
    %150 = vector.extract_strided_slice %1 {offsets = [0, 253], sizes = [8, 3], strides = [1, 1]} : vector<8x256xf32> to vector<8x3xf32>
    %151 = vector.extract_strided_slice %1 {offsets = [0, 0], sizes = [8, 253], strides = [1, 1]} : vector<8x256xf32> to vector<8x253xf32>
    %152 = tpu.concatenate %150, %151 in 1 : vector<8x3xf32>, vector<8x253xf32> -> vector<8x256xf32>
    %c21 = arith.constant 21 : index
    %c0_48 = arith.constant 0 : index
    %153 = vector.load %arg4[%c21, %c0_48] : memref<136x256xf32, #tpu.memory_space<vmem>>, vector<1x256xf32>
    %154 = vector.broadcast %153 : vector<1x256xf32> to vector<8x256xf32>
    %155 = arith.mulf %152, %154 : vector<8x256xf32>
    %c168 = arith.constant 168 : index
    %c0_49 = arith.constant 0 : index
    %156 = vector.load %arg7[%c168, %c0_49] : memref<392x256xf32, #tpu.memory_space<vmem>>, vector<8x256xf32>
    tpu.vector_store %arg7[%c168, %c0_49], %155 {strides = array<i32>} : memref<392x256xf32, #tpu.memory_space<vmem>>, vector<8x256xf32>,
    %157 = vector.extract_strided_slice %1 {offsets = [0, 254], sizes = [8, 2], strides = [1, 1]} : vector<8x256xf32> to vector<8x2xf32>
    %158 = vector.extract_strided_slice %1 {offsets = [0, 0], sizes = [8, 254], strides = [1, 1]} : vector<8x256xf32> to vector<8x254xf32>
    %159 = tpu.concatenate %157, %158 in 1 : vector<8x2xf32>, vector<8x254xf32> -> vector<8x256xf32>
    %c22 = arith.constant 22 : index
    %c0_50 = arith.constant 0 : index
    %160 = vector.load %arg4[%c22, %c0_50] : memref<136x256xf32, #tpu.memory_space<vmem>>, vector<1x256xf32>
    %161 = vector.broadcast %160 : vector<1x256xf32> to vector<8x256xf32>
    %162 = arith.mulf %159, %161 : vector<8x256xf32>
    %c176 = arith.constant 176 : index
    %c0_51 = arith.constant 0 : index
    %163 = vector.load %arg7[%c176, %c0_51] : memref<392x256xf32, #tpu.memory_space<vmem>>, vector<8x256xf32>
    tpu.vector_store %arg7[%c176, %c0_51], %162 {strides = array<i32>} : memref<392x256xf32, #tpu.memory_space<vmem>>, vector<8x256xf32>,
    %164 = vector.extract_strided_slice %1 {offsets = [0, 255], sizes = [8, 1], strides = [1, 1]} : vector<8x256xf32> to vector<8x1xf32>
    %165 = vector.extract_strided_slice %1 {offsets = [0, 0], sizes = [8, 255], strides = [1, 1]} : vector<8x256xf32> to vector<8x255xf32>
    %166 = tpu.concatenate %164, %165 in 1 : vector<8x1xf32>, vector<8x255xf32> -> vector<8x256xf32>
    %c23 = arith.constant 23 : index
    %c0_52 = arith.constant 0 : index
    %167 = vector.load %arg4[%c23, %c0_52] : memref<136x256xf32, #tpu.memory_space<vmem>>, vector<1x256xf32>
    %168 = vector.broadcast %167 : vector<1x256xf32> to vector<8x256xf32>
    %169 = arith.mulf %166, %168 : vector<8x256xf32>
    %c184 = arith.constant 184 : index
    %c0_53 = arith.constant 0 : index
    %170 = vector.load %arg7[%c184, %c0_53] : memref<392x256xf32, #tpu.memory_space<vmem>>, vector<8x256xf32>
    tpu.vector_store %arg7[%c184, %c0_53], %169 {strides = array<i32>} : memref<392x256xf32, #tpu.memory_space<vmem>>, vector<8x256xf32>,
    %c192 = arith.constant 192 : index
    %c0_54 = arith.constant 0 : index
    %171 = vector.load %arg7[%c192, %c0_54] : memref<392x256xf32, #tpu.memory_space<vmem>>, vector<8x256xf32>
    tpu.vector_store %arg7[%c192, %c0_54], %1 {strides = array<i32>} : memref<392x256xf32, #tpu.memory_space<vmem>>, vector<8x256xf32>,
    %172 = vector.extract_strided_slice %1 {offsets = [0, 1], sizes = [8, 255], strides = [1, 1]} : vector<8x256xf32> to vector<8x255xf32>
    %173 = vector.extract_strided_slice %1 {offsets = [0, 0], sizes = [8, 1], strides = [1, 1]} : vector<8x256xf32> to vector<8x1xf32>
    %174 = tpu.concatenate %172, %173 in 1 : vector<8x255xf32>, vector<8x1xf32> -> vector<8x256xf32>
    %c25 = arith.constant 25 : index
    %c0_55 = arith.constant 0 : index
    %175 = vector.load %arg4[%c25, %c0_55] : memref<136x256xf32, #tpu.memory_space<vmem>>, vector<1x256xf32>
    %176 = vector.broadcast %175 : vector<1x256xf32> to vector<8x256xf32>
    %177 = arith.mulf %174, %176 : vector<8x256xf32>
    %c200 = arith.constant 200 : index
    %c0_56 = arith.constant 0 : index
    %178 = vector.load %arg7[%c200, %c0_56] : memref<392x256xf32, #tpu.memory_space<vmem>>, vector<8x256xf32>
    tpu.vector_store %arg7[%c200, %c0_56], %177 {strides = array<i32>} : memref<392x256xf32, #tpu.memory_space<vmem>>, vector<8x256xf32>,
    %179 = vector.extract_strided_slice %1 {offsets = [0, 2], sizes = [8, 254], strides = [1, 1]} : vector<8x256xf32> to vector<8x254xf32>
    %180 = vector.extract_strided_slice %1 {offsets = [0, 0], sizes = [8, 2], strides = [1, 1]} : vector<8x256xf32> to vector<8x2xf32>
    %181 = tpu.concatenate %179, %180 in 1 : vector<8x254xf32>, vector<8x2xf32> -> vector<8x256xf32>
    %c26 = arith.constant 26 : index
    %c0_57 = arith.constant 0 : index
    %182 = vector.load %arg4[%c26, %c0_57] : memref<136x256xf32, #tpu.memory_space<vmem>>, vector<1x256xf32>
    %183 = vector.broadcast %182 : vector<1x256xf32> to vector<8x256xf32>
    %184 = arith.mulf %181, %183 : vector<8x256xf32>
    %c208 = arith.constant 208 : index
    %c0_58 = arith.constant 0 : index
    %185 = vector.load %arg7[%c208, %c0_58] : memref<392x256xf32, #tpu.memory_space<vmem>>, vector<8x256xf32>
    tpu.vector_store %arg7[%c208, %c0_58], %184 {strides = array<i32>} : memref<392x256xf32, #tpu.memory_space<vmem>>, vector<8x256xf32>,
    %186 = vector.extract_strided_slice %1 {offsets = [0, 3], sizes = [8, 253], strides = [1, 1]} : vector<8x256xf32> to vector<8x253xf32>
    %187 = vector.extract_strided_slice %1 {offsets = [0, 0], sizes = [8, 3], strides = [1, 1]} : vector<8x256xf32> to vector<8x3xf32>
    %188 = tpu.concatenate %186, %187 in 1 : vector<8x253xf32>, vector<8x3xf32> -> vector<8x256xf32>
    %c27 = arith.constant 27 : index
    %c0_59 = arith.constant 0 : index
    %189 = vector.load %arg4[%c27, %c0_59] : memref<136x256xf32, #tpu.memory_space<vmem>>, vector<1x256xf32>
    %190 = vector.broadcast %189 : vector<1x256xf32> to vector<8x256xf32>
    %191 = arith.mulf %188, %190 : vector<8x256xf32>
    %c216 = arith.constant 216 : index
    %c0_60 = arith.constant 0 : index
    %192 = vector.load %arg7[%c216, %c0_60] : memref<392x256xf32, #tpu.memory_space<vmem>>, vector<8x256xf32>
    tpu.vector_store %arg7[%c216, %c0_60], %191 {strides = array<i32>} : memref<392x256xf32, #tpu.memory_space<vmem>>, vector<8x256xf32>,
    %193 = vector.extract_strided_slice %1 {offsets = [0, 13], sizes = [8, 243], strides = [1, 1]} : vector<8x256xf32> to vector<8x243xf32>
    %194 = vector.extract_strided_slice %1 {offsets = [0, 0], sizes = [8, 13], strides = [1, 1]} : vector<8x256xf32> to vector<8x13xf32>
    %195 = tpu.concatenate %193, %194 in 1 : vector<8x243xf32>, vector<8x13xf32> -> vector<8x256xf32>
    %c28 = arith.constant 28 : index
    %c0_61 = arith.constant 0 : index
    %196 = vector.load %arg4[%c28, %c0_61] : memref<136x256xf32, #tpu.memory_space<vmem>>, vector<1x256xf32>
    %197 = vector.broadcast %196 : vector<1x256xf32> to vector<8x256xf32>
    %198 = arith.mulf %195, %197 : vector<8x256xf32>
    %c224 = arith.constant 224 : index
    %c0_62 = arith.constant 0 : index
    %199 = vector.load %arg7[%c224, %c0_62] : memref<392x256xf32, #tpu.memory_space<vmem>>, vector<8x256xf32>
    tpu.vector_store %arg7[%c224, %c0_62], %198 {strides = array<i32>} : memref<392x256xf32, #tpu.memory_space<vmem>>, vector<8x256xf32>,
    %200 = vector.extract_strided_slice %1 {offsets = [0, 14], sizes = [8, 242], strides = [1, 1]} : vector<8x256xf32> to vector<8x242xf32>
    %201 = vector.extract_strided_slice %1 {offsets = [0, 0], sizes = [8, 14], strides = [1, 1]} : vector<8x256xf32> to vector<8x14xf32>
    %202 = tpu.concatenate %200, %201 in 1 : vector<8x242xf32>, vector<8x14xf32> -> vector<8x256xf32>
    %c29 = arith.constant 29 : index
    %c0_63 = arith.constant 0 : index
    %203 = vector.load %arg4[%c29, %c0_63] : memref<136x256xf32, #tpu.memory_space<vmem>>, vector<1x256xf32>
    %204 = vector.broadcast %203 : vector<1x256xf32> to vector<8x256xf32>
    %205 = arith.mulf %202, %204 : vector<8x256xf32>
    %c232 = arith.constant 232 : index
    %c0_64 = arith.constant 0 : index
    %206 = vector.load %arg7[%c232, %c0_64] : memref<392x256xf32, #tpu.memory_space<vmem>>, vector<8x256xf32>
    tpu.vector_store %arg7[%c232, %c0_64], %205 {strides = array<i32>} : memref<392x256xf32, #tpu.memory_space<vmem>>, vector<8x256xf32>,
    %207 = vector.extract_strided_slice %1 {offsets = [0, 15], sizes = [8, 241], strides = [1, 1]} : vector<8x256xf32> to vector<8x241xf32>
    %208 = vector.extract_strided_slice %1 {offsets = [0, 0], sizes = [8, 15], strides = [1, 1]} : vector<8x256xf32> to vector<8x15xf32>
    %209 = tpu.concatenate %207, %208 in 1 : vector<8x241xf32>, vector<8x15xf32> -> vector<8x256xf32>
    %c30 = arith.constant 30 : index
    %c0_65 = arith.constant 0 : index
    %210 = vector.load %arg4[%c30, %c0_65] : memref<136x256xf32, #tpu.memory_space<vmem>>, vector<1x256xf32>
    %211 = vector.broadcast %210 : vector<1x256xf32> to vector<8x256xf32>
    %212 = arith.mulf %209, %211 : vector<8x256xf32>
    %c240 = arith.constant 240 : index
    %c0_66 = arith.constant 0 : index
    %213 = vector.load %arg7[%c240, %c0_66] : memref<392x256xf32, #tpu.memory_space<vmem>>, vector<8x256xf32>
    tpu.vector_store %arg7[%c240, %c0_66], %212 {strides = array<i32>} : memref<392x256xf32, #tpu.memory_space<vmem>>, vector<8x256xf32>,
    %214 = vector.extract_strided_slice %1 {offsets = [0, 16], sizes = [8, 240], strides = [1, 1]} : vector<8x256xf32> to vector<8x240xf32>
    %215 = vector.extract_strided_slice %1 {offsets = [0, 0], sizes = [8, 16], strides = [1, 1]} : vector<8x256xf32> to vector<8x16xf32>
    %216 = tpu.concatenate %214, %215 in 1 : vector<8x240xf32>, vector<8x16xf32> -> vector<8x256xf32>
    %c31 = arith.constant 31 : index
    %c0_67 = arith.constant 0 : index
    %217 = vector.load %arg4[%c31, %c0_67] : memref<136x256xf32, #tpu.memory_space<vmem>>, vector<1x256xf32>
    %218 = vector.broadcast %217 : vector<1x256xf32> to vector<8x256xf32>
    %219 = arith.mulf %216, %218 : vector<8x256xf32>
    %c248 = arith.constant 248 : index
    %c0_68 = arith.constant 0 : index
    %220 = vector.load %arg7[%c248, %c0_68] : memref<392x256xf32, #tpu.memory_space<vmem>>, vector<8x256xf32>
    tpu.vector_store %arg7[%c248, %c0_68], %219 {strides = array<i32>} : memref<392x256xf32, #tpu.memory_space<vmem>>, vector<8x256xf32>,
    %221 = vector.extract_strided_slice %1 {offsets = [0, 17], sizes = [8, 239], strides = [1, 1]} : vector<8x256xf32> to vector<8x239xf32>
    %222 = vector.extract_strided_slice %1 {offsets = [0, 0], sizes = [8, 17], strides = [1, 1]} : vector<8x256xf32> to vector<8x17xf32>
    %223 = tpu.concatenate %221, %222 in 1 : vector<8x239xf32>, vector<8x17xf32> -> vector<8x256xf32>
    %c32_69 = arith.constant 32 : index
    %c0_70 = arith.constant 0 : index
    %224 = vector.load %arg4[%c32_69, %c0_70] : memref<136x256xf32, #tpu.memory_space<vmem>>, vector<1x256xf32>
    %225 = vector.broadcast %224 : vector<1x256xf32> to vector<8x256xf32>
    %226 = arith.mulf %223, %225 : vector<8x256xf32>
    %c256 = arith.constant 256 : index
    %c0_71 = arith.constant 0 : index
    %227 = vector.load %arg7[%c256, %c0_71] : memref<392x256xf32, #tpu.memory_space<vmem>>, vector<8x256xf32>
    tpu.vector_store %arg7[%c256, %c0_71], %226 {strides = array<i32>} : memref<392x256xf32, #tpu.memory_space<vmem>>, vector<8x256xf32>,
    %228 = vector.extract_strided_slice %1 {offsets = [0, 18], sizes = [8, 238], strides = [1, 1]} : vector<8x256xf32> to vector<8x238xf32>
    %229 = vector.extract_strided_slice %1 {offsets = [0, 0], sizes = [8, 18], strides = [1, 1]} : vector<8x256xf32> to vector<8x18xf32>
    %230 = tpu.concatenate %228, %229 in 1 : vector<8x238xf32>, vector<8x18xf32> -> vector<8x256xf32>
    %c33 = arith.constant 33 : index
    %c0_72 = arith.constant 0 : index
    %231 = vector.load %arg4[%c33, %c0_72] : memref<136x256xf32, #tpu.memory_space<vmem>>, vector<1x256xf32>
    %232 = vector.broadcast %231 : vector<1x256xf32> to vector<8x256xf32>
    %233 = arith.mulf %230, %232 : vector<8x256xf32>
    %c264 = arith.constant 264 : index
    %c0_73 = arith.constant 0 : index
    %234 = vector.load %arg7[%c264, %c0_73] : memref<392x256xf32, #tpu.memory_space<vmem>>, vector<8x256xf32>
    tpu.vector_store %arg7[%c264, %c0_73], %233 {strides = array<i32>} : memref<392x256xf32, #tpu.memory_space<vmem>>, vector<8x256xf32>,
    %235 = vector.extract_strided_slice %1 {offsets = [0, 19], sizes = [8, 237], strides = [1, 1]} : vector<8x256xf32> to vector<8x237xf32>
    %236 = vector.extract_strided_slice %1 {offsets = [0, 0], sizes = [8, 19], strides = [1, 1]} : vector<8x256xf32> to vector<8x19xf32>
    %237 = tpu.concatenate %235, %236 in 1 : vector<8x237xf32>, vector<8x19xf32> -> vector<8x256xf32>
    %c34 = arith.constant 34 : index
    %c0_74 = arith.constant 0 : index
    %238 = vector.load %arg4[%c34, %c0_74] : memref<136x256xf32, #tpu.memory_space<vmem>>, vector<1x256xf32>
    %239 = vector.broadcast %238 : vector<1x256xf32> to vector<8x256xf32>
    %240 = arith.mulf %237, %239 : vector<8x256xf32>
    %c272 = arith.constant 272 : index
    %c0_75 = arith.constant 0 : index
    %241 = vector.load %arg7[%c272, %c0_75] : memref<392x256xf32, #tpu.memory_space<vmem>>, vector<8x256xf32>
    tpu.vector_store %arg7[%c272, %c0_75], %240 {strides = array<i32>} : memref<392x256xf32, #tpu.memory_space<vmem>>, vector<8x256xf32>,
    %242 = vector.extract_strided_slice %1 {offsets = [0, 29], sizes = [8, 227], strides = [1, 1]} : vector<8x256xf32> to vector<8x227xf32>
    %243 = vector.extract_strided_slice %1 {offsets = [0, 0], sizes = [8, 29], strides = [1, 1]} : vector<8x256xf32> to vector<8x29xf32>
    %244 = tpu.concatenate %242, %243 in 1 : vector<8x227xf32>, vector<8x29xf32> -> vector<8x256xf32>
    %c35 = arith.constant 35 : index
    %c0_76 = arith.constant 0 : index
    %245 = vector.load %arg4[%c35, %c0_76] : memref<136x256xf32, #tpu.memory_space<vmem>>, vector<1x256xf32>
    %246 = vector.broadcast %245 : vector<1x256xf32> to vector<8x256xf32>
    %247 = arith.mulf %244, %246 : vector<8x256xf32>
    %c280 = arith.constant 280 : index
    %c0_77 = arith.constant 0 : index
    %248 = vector.load %arg7[%c280, %c0_77] : memref<392x256xf32, #tpu.memory_space<vmem>>, vector<8x256xf32>
    tpu.vector_store %arg7[%c280, %c0_77], %247 {strides = array<i32>} : memref<392x256xf32, #tpu.memory_space<vmem>>, vector<8x256xf32>,
    %249 = vector.extract_strided_slice %1 {offsets = [0, 30], sizes = [8, 226], strides = [1, 1]} : vector<8x256xf32> to vector<8x226xf32>
    %250 = vector.extract_strided_slice %1 {offsets = [0, 0], sizes = [8, 30], strides = [1, 1]} : vector<8x256xf32> to vector<8x30xf32>
    %251 = tpu.concatenate %249, %250 in 1 : vector<8x226xf32>, vector<8x30xf32> -> vector<8x256xf32>
    %c36 = arith.constant 36 : index
    %c0_78 = arith.constant 0 : index
    %252 = vector.load %arg4[%c36, %c0_78] : memref<136x256xf32, #tpu.memory_space<vmem>>, vector<1x256xf32>
    %253 = vector.broadcast %252 : vector<1x256xf32> to vector<8x256xf32>
    %254 = arith.mulf %251, %253 : vector<8x256xf32>
    %c288 = arith.constant 288 : index
    %c0_79 = arith.constant 0 : index
    %255 = vector.load %arg7[%c288, %c0_79] : memref<392x256xf32, #tpu.memory_space<vmem>>, vector<8x256xf32>
    tpu.vector_store %arg7[%c288, %c0_79], %254 {strides = array<i32>} : memref<392x256xf32, #tpu.memory_space<vmem>>, vector<8x256xf32>,
    %256 = vector.extract_strided_slice %1 {offsets = [0, 31], sizes = [8, 225], strides = [1, 1]} : vector<8x256xf32> to vector<8x225xf32>
    %257 = vector.extract_strided_slice %1 {offsets = [0, 0], sizes = [8, 31], strides = [1, 1]} : vector<8x256xf32> to vector<8x31xf32>
    %258 = tpu.concatenate %256, %257 in 1 : vector<8x225xf32>, vector<8x31xf32> -> vector<8x256xf32>
    %c37 = arith.constant 37 : index
    %c0_80 = arith.constant 0 : index
    %259 = vector.load %arg4[%c37, %c0_80] : memref<136x256xf32, #tpu.memory_space<vmem>>, vector<1x256xf32>
    %260 = vector.broadcast %259 : vector<1x256xf32> to vector<8x256xf32>
    %261 = arith.mulf %258, %260 : vector<8x256xf32>
    %c296 = arith.constant 296 : index
    %c0_81 = arith.constant 0 : index
    %262 = vector.load %arg7[%c296, %c0_81] : memref<392x256xf32, #tpu.memory_space<vmem>>, vector<8x256xf32>
    tpu.vector_store %arg7[%c296, %c0_81], %261 {strides = array<i32>} : memref<392x256xf32, #tpu.memory_space<vmem>>, vector<8x256xf32>,
    %263 = vector.extract_strided_slice %1 {offsets = [0, 32], sizes = [8, 224], strides = [1, 1]} : vector<8x256xf32> to vector<8x224xf32>
    %264 = vector.extract_strided_slice %1 {offsets = [0, 0], sizes = [8, 32], strides = [1, 1]} : vector<8x256xf32> to vector<8x32xf32>
    %265 = tpu.concatenate %263, %264 in 1 : vector<8x224xf32>, vector<8x32xf32> -> vector<8x256xf32>
    %c38 = arith.constant 38 : index
    %c0_82 = arith.constant 0 : index
    %266 = vector.load %arg4[%c38, %c0_82] : memref<136x256xf32, #tpu.memory_space<vmem>>, vector<1x256xf32>
    %267 = vector.broadcast %266 : vector<1x256xf32> to vector<8x256xf32>
    %268 = arith.mulf %265, %267 : vector<8x256xf32>
    %c304 = arith.constant 304 : index
    %c0_83 = arith.constant 0 : index
    %269 = vector.load %arg7[%c304, %c0_83] : memref<392x256xf32, #tpu.memory_space<vmem>>, vector<8x256xf32>
    tpu.vector_store %arg7[%c304, %c0_83], %268 {strides = array<i32>} : memref<392x256xf32, #tpu.memory_space<vmem>>, vector<8x256xf32>,
    %270 = vector.extract_strided_slice %1 {offsets = [0, 33], sizes = [8, 223], strides = [1, 1]} : vector<8x256xf32> to vector<8x223xf32>
    %271 = vector.extract_strided_slice %1 {offsets = [0, 0], sizes = [8, 33], strides = [1, 1]} : vector<8x256xf32> to vector<8x33xf32>
    %272 = tpu.concatenate %270, %271 in 1 : vector<8x223xf32>, vector<8x33xf32> -> vector<8x256xf32>
    %c39 = arith.constant 39 : index
    %c0_84 = arith.constant 0 : index
    %273 = vector.load %arg4[%c39, %c0_84] : memref<136x256xf32, #tpu.memory_space<vmem>>, vector<1x256xf32>
    %274 = vector.broadcast %273 : vector<1x256xf32> to vector<8x256xf32>
    %275 = arith.mulf %272, %274 : vector<8x256xf32>
    %c312 = arith.constant 312 : index
    %c0_85 = arith.constant 0 : index
    %276 = vector.load %arg7[%c312, %c0_85] : memref<392x256xf32, #tpu.memory_space<vmem>>, vector<8x256xf32>
    tpu.vector_store %arg7[%c312, %c0_85], %275 {strides = array<i32>} : memref<392x256xf32, #tpu.memory_space<vmem>>, vector<8x256xf32>,
    %277 = vector.extract_strided_slice %1 {offsets = [0, 34], sizes = [8, 222], strides = [1, 1]} : vector<8x256xf32> to vector<8x222xf32>
    %278 = vector.extract_strided_slice %1 {offsets = [0, 0], sizes = [8, 34], strides = [1, 1]} : vector<8x256xf32> to vector<8x34xf32>
    %279 = tpu.concatenate %277, %278 in 1 : vector<8x222xf32>, vector<8x34xf32> -> vector<8x256xf32>
    %c40_86 = arith.constant 40 : index
    %c0_87 = arith.constant 0 : index
    %280 = vector.load %arg4[%c40_86, %c0_87] : memref<136x256xf32, #tpu.memory_space<vmem>>, vector<1x256xf32>
    %281 = vector.broadcast %280 : vector<1x256xf32> to vector<8x256xf32>
    %282 = arith.mulf %279, %281 : vector<8x256xf32>
    %c320 = arith.constant 320 : index
    %c0_88 = arith.constant 0 : index
    %283 = vector.load %arg7[%c320, %c0_88] : memref<392x256xf32, #tpu.memory_space<vmem>>, vector<8x256xf32>
    tpu.vector_store %arg7[%c320, %c0_88], %282 {strides = array<i32>} : memref<392x256xf32, #tpu.memory_space<vmem>>, vector<8x256xf32>,
    %284 = vector.extract_strided_slice %1 {offsets = [0, 35], sizes = [8, 221], strides = [1, 1]} : vector<8x256xf32> to vector<8x221xf32>
    %285 = vector.extract_strided_slice %1 {offsets = [0, 0], sizes = [8, 35], strides = [1, 1]} : vector<8x256xf32> to vector<8x35xf32>
    %286 = tpu.concatenate %284, %285 in 1 : vector<8x221xf32>, vector<8x35xf32> -> vector<8x256xf32>
    %c41 = arith.constant 41 : index
    %c0_89 = arith.constant 0 : index
    %287 = vector.load %arg4[%c41, %c0_89] : memref<136x256xf32, #tpu.memory_space<vmem>>, vector<1x256xf32>
    %288 = vector.broadcast %287 : vector<1x256xf32> to vector<8x256xf32>
    %289 = arith.mulf %286, %288 : vector<8x256xf32>
    %c328 = arith.constant 328 : index
    %c0_90 = arith.constant 0 : index
    %290 = vector.load %arg7[%c328, %c0_90] : memref<392x256xf32, #tpu.memory_space<vmem>>, vector<8x256xf32>
    tpu.vector_store %arg7[%c328, %c0_90], %289 {strides = array<i32>} : memref<392x256xf32, #tpu.memory_space<vmem>>, vector<8x256xf32>,
    %291 = vector.extract_strided_slice %1 {offsets = [0, 45], sizes = [8, 211], strides = [1, 1]} : vector<8x256xf32> to vector<8x211xf32>
    %292 = vector.extract_strided_slice %1 {offsets = [0, 0], sizes = [8, 45], strides = [1, 1]} : vector<8x256xf32> to vector<8x45xf32>
    %293 = tpu.concatenate %291, %292 in 1 : vector<8x211xf32>, vector<8x45xf32> -> vector<8x256xf32>
    %c42 = arith.constant 42 : index
    %c0_91 = arith.constant 0 : index
    %294 = vector.load %arg4[%c42, %c0_91] : memref<136x256xf32, #tpu.memory_space<vmem>>, vector<1x256xf32>
    %295 = vector.broadcast %294 : vector<1x256xf32> to vector<8x256xf32>
    %296 = arith.mulf %293, %295 : vector<8x256xf32>
    %c336 = arith.constant 336 : index
    %c0_92 = arith.constant 0 : index
    %297 = vector.load %arg7[%c336, %c0_92] : memref<392x256xf32, #tpu.memory_space<vmem>>, vector<8x256xf32>
    tpu.vector_store %arg7[%c336, %c0_92], %296 {strides = array<i32>} : memref<392x256xf32, #tpu.memory_space<vmem>>, vector<8x256xf32>,
    %298 = vector.extract_strided_slice %1 {offsets = [0, 46], sizes = [8, 210], strides = [1, 1]} : vector<8x256xf32> to vector<8x210xf32>
    %299 = vector.extract_strided_slice %1 {offsets = [0, 0], sizes = [8, 46], strides = [1, 1]} : vector<8x256xf32> to vector<8x46xf32>
    %300 = tpu.concatenate %298, %299 in 1 : vector<8x210xf32>, vector<8x46xf32> -> vector<8x256xf32>
    %c43 = arith.constant 43 : index
    %c0_93 = arith.constant 0 : index
    %301 = vector.load %arg4[%c43, %c0_93] : memref<136x256xf32, #tpu.memory_space<vmem>>, vector<1x256xf32>
    %302 = vector.broadcast %301 : vector<1x256xf32> to vector<8x256xf32>
    %303 = arith.mulf %300, %302 : vector<8x256xf32>
    %c344 = arith.constant 344 : index
    %c0_94 = arith.constant 0 : index
    %304 = vector.load %arg7[%c344, %c0_94] : memref<392x256xf32, #tpu.memory_space<vmem>>, vector<8x256xf32>
    tpu.vector_store %arg7[%c344, %c0_94], %303 {strides = array<i32>} : memref<392x256xf32, #tpu.memory_space<vmem>>, vector<8x256xf32>,
    %305 = vector.extract_strided_slice %1 {offsets = [0, 47], sizes = [8, 209], strides = [1, 1]} : vector<8x256xf32> to vector<8x209xf32>
    %306 = vector.extract_strided_slice %1 {offsets = [0, 0], sizes = [8, 47], strides = [1, 1]} : vector<8x256xf32> to vector<8x47xf32>
    %307 = tpu.concatenate %305, %306 in 1 : vector<8x209xf32>, vector<8x47xf32> -> vector<8x256xf32>
    %c44 = arith.constant 44 : index
    %c0_95 = arith.constant 0 : index
    %308 = vector.load %arg4[%c44, %c0_95] : memref<136x256xf32, #tpu.memory_space<vmem>>, vector<1x256xf32>
    %309 = vector.broadcast %308 : vector<1x256xf32> to vector<8x256xf32>
    %310 = arith.mulf %307, %309 : vector<8x256xf32>
    %c352 = arith.constant 352 : index
    %c0_96 = arith.constant 0 : index
    %311 = vector.load %arg7[%c352, %c0_96] : memref<392x256xf32, #tpu.memory_space<vmem>>, vector<8x256xf32>
    tpu.vector_store %arg7[%c352, %c0_96], %310 {strides = array<i32>} : memref<392x256xf32, #tpu.memory_space<vmem>>, vector<8x256xf32>,
    %312 = vector.extract_strided_slice %1 {offsets = [0, 48], sizes = [8, 208], strides = [1, 1]} : vector<8x256xf32> to vector<8x208xf32>
    %313 = vector.extract_strided_slice %1 {offsets = [0, 0], sizes = [8, 48], strides = [1, 1]} : vector<8x256xf32> to vector<8x48xf32>
    %314 = tpu.concatenate %312, %313 in 1 : vector<8x208xf32>, vector<8x48xf32> -> vector<8x256xf32>
    %c45 = arith.constant 45 : index
    %c0_97 = arith.constant 0 : index
    %315 = vector.load %arg4[%c45, %c0_97] : memref<136x256xf32, #tpu.memory_space<vmem>>, vector<1x256xf32>
    %316 = vector.broadcast %315 : vector<1x256xf32> to vector<8x256xf32>
    %317 = arith.mulf %314, %316 : vector<8x256xf32>
    %c360 = arith.constant 360 : index
    %c0_98 = arith.constant 0 : index
    %318 = vector.load %arg7[%c360, %c0_98] : memref<392x256xf32, #tpu.memory_space<vmem>>, vector<8x256xf32>
    tpu.vector_store %arg7[%c360, %c0_98], %317 {strides = array<i32>} : memref<392x256xf32, #tpu.memory_space<vmem>>, vector<8x256xf32>,
    %319 = vector.extract_strided_slice %1 {offsets = [0, 49], sizes = [8, 207], strides = [1, 1]} : vector<8x256xf32> to vector<8x207xf32>
    %320 = vector.extract_strided_slice %1 {offsets = [0, 0], sizes = [8, 49], strides = [1, 1]} : vector<8x256xf32> to vector<8x49xf32>
    %321 = tpu.concatenate %319, %320 in 1 : vector<8x207xf32>, vector<8x49xf32> -> vector<8x256xf32>
    %c46 = arith.constant 46 : index
    %c0_99 = arith.constant 0 : index
    %322 = vector.load %arg4[%c46, %c0_99] : memref<136x256xf32, #tpu.memory_space<vmem>>, vector<1x256xf32>
    %323 = vector.broadcast %322 : vector<1x256xf32> to vector<8x256xf32>
    %324 = arith.mulf %321, %323 : vector<8x256xf32>
    %c368 = arith.constant 368 : index
    %c0_100 = arith.constant 0 : index
    %325 = vector.load %arg7[%c368, %c0_100] : memref<392x256xf32, #tpu.memory_space<vmem>>, vector<8x256xf32>
    tpu.vector_store %arg7[%c368, %c0_100], %324 {strides = array<i32>} : memref<392x256xf32, #tpu.memory_space<vmem>>, vector<8x256xf32>,
    %326 = vector.extract_strided_slice %1 {offsets = [0, 50], sizes = [8, 206], strides = [1, 1]} : vector<8x256xf32> to vector<8x206xf32>
    %327 = vector.extract_strided_slice %1 {offsets = [0, 0], sizes = [8, 50], strides = [1, 1]} : vector<8x256xf32> to vector<8x50xf32>
    %328 = tpu.concatenate %326, %327 in 1 : vector<8x206xf32>, vector<8x50xf32> -> vector<8x256xf32>
    %c47 = arith.constant 47 : index
    %c0_101 = arith.constant 0 : index
    %329 = vector.load %arg4[%c47, %c0_101] : memref<136x256xf32, #tpu.memory_space<vmem>>, vector<1x256xf32>
    %330 = vector.broadcast %329 : vector<1x256xf32> to vector<8x256xf32>
    %331 = arith.mulf %328, %330 : vector<8x256xf32>
    %c376 = arith.constant 376 : index
    %c0_102 = arith.constant 0 : index
    %332 = vector.load %arg7[%c376, %c0_102] : memref<392x256xf32, #tpu.memory_space<vmem>>, vector<8x256xf32>
    tpu.vector_store %arg7[%c376, %c0_102], %331 {strides = array<i32>} : memref<392x256xf32, #tpu.memory_space<vmem>>, vector<8x256xf32>,
    %333 = vector.extract_strided_slice %1 {offsets = [0, 51], sizes = [8, 205], strides = [1, 1]} : vector<8x256xf32> to vector<8x205xf32>
    %334 = vector.extract_strided_slice %1 {offsets = [0, 0], sizes = [8, 51], strides = [1, 1]} : vector<8x256xf32> to vector<8x51xf32>
    %335 = tpu.concatenate %333, %334 in 1 : vector<8x205xf32>, vector<8x51xf32> -> vector<8x256xf32>
    %c48_103 = arith.constant 48 : index
    %c0_104 = arith.constant 0 : index
    %336 = vector.load %arg4[%c48_103, %c0_104] : memref<136x256xf32, #tpu.memory_space<vmem>>, vector<1x256xf32>
    %337 = vector.broadcast %336 : vector<1x256xf32> to vector<8x256xf32>
    %338 = arith.mulf %335, %337 : vector<8x256xf32>
    %c384 = arith.constant 384 : index
    %c0_105 = arith.constant 0 : index
    %339 = vector.load %arg7[%c384, %c0_105] : memref<392x256xf32, #tpu.memory_space<vmem>>, vector<8x256xf32>
    tpu.vector_store %arg7[%c384, %c0_105], %338 {strides = array<i32>} : memref<392x256xf32, #tpu.memory_space<vmem>>, vector<8x256xf32>,
    %c0_106 = arith.constant 0 : index
    %c0_107 = arith.constant 0 : index
    %340 = vector.load %arg2[%c0_106, %c0_107] : memref<264x392xf32, #tpu.memory_space<vmem>>, vector<8x392xf32>
    %c0_108 = arith.constant 0 : index
    %c0_109 = arith.constant 0 : index
    %341 = vector.load %arg7[%c0_108, %c0_109] : memref<392x256xf32, #tpu.memory_space<vmem>>, vector<392x256xf32>
    %cst = arith.constant dense<0.000000e+00> : vector<8x256xf32>
    %342 = tpu.matmul %340, %341, %cst {dimension_numbers = #tpu.dot_dimension_numbers<[1], [0], [0], [1], [0, 0, 1, 1], [], []>} : vector<8x392xf32>, vector<392x256xf32>, vector<8x256xf32> -> vector<8x256xf32>
    %c0_110 = arith.constant 0 : index
    %c0_111 = arith.constant 0 : index
    %343 = vector.load %arg3[%c0_110, %c0_111] : memref<192x2xf32, #tpu.memory_space<vmem>>, vector<8x1xf32>
    %c0_112 = arith.constant 0 : index
    %c1_113 = arith.constant 1 : index
    %344 = vector.load %arg3[%c0_112, %c1_113] : memref<192x2xf32, #tpu.memory_space<vmem>>, vector<8x1xf32>
    %cst_114 = arith.constant dense<0.000000e+00> : vector<8xf32>
    %345 = vector.multi_reduction <add>, %342, %cst_114 [1] : vector<8x256xf32> to vector<8xf32>
    %346 = vector.shape_cast %345 : vector<8xf32> to vector<8x1xf32>
    %cst_115 = arith.constant 3.906250e-03 : f32
    %347 = vector.broadcast %cst_115 : f32 to vector<8x1xf32>
    %348 = arith.mulf %346, %347 : vector<8x1xf32>
    %349 = arith.mulf %342, %342 : vector<8x256xf32>
    %cst_116 = arith.constant dense<0.000000e+00> : vector<8xf32>
    %350 = vector.multi_reduction <add>, %349, %cst_116 [1] : vector<8x256xf32> to vector<8xf32>
    %351 = vector.shape_cast %350 : vector<8xf32> to vector<8x1xf32>
    %cst_117 = arith.constant 3.906250e-03 : f32
    %352 = vector.broadcast %cst_117 : f32 to vector<8x1xf32>
    %353 = arith.mulf %351, %352 : vector<8x1xf32>
    %354 = arith.mulf %348, %348 : vector<8x1xf32>
    %355 = arith.subf %353, %354 : vector<8x1xf32>
    %cst_118 = arith.constant 0.000000e+00 : f32
    %356 = vector.broadcast %cst_118 : f32 to vector<8x1xf32>
    %357 = arith.maximumf %355, %356 : vector<8x1xf32>
    %358 = vector.broadcast %348 : vector<8x1xf32> to vector<8x256xf32>
    %359 = arith.subf %342, %358 : vector<8x256xf32>
    %cst_119 = arith.constant 9.99999974E-6 : f32
    %360 = vector.broadcast %cst_119 : f32 to vector<8x1xf32>
    %361 = arith.addf %357, %360 : vector<8x1xf32>
    %362 = math.rsqrt %361 : vector<8x1xf32>
    %363 = vector.broadcast %362 : vector<8x1xf32> to vector<8x256xf32>
    %364 = arith.mulf %359, %363 : vector<8x256xf32>
    %365 = vector.broadcast %343 : vector<8x1xf32> to vector<8x256xf32>
    %366 = arith.mulf %364, %365 : vector<8x256xf32>
    %367 = vector.broadcast %344 : vector<8x1xf32> to vector<8x256xf32>
    %368 = arith.addf %366, %367 : vector<8x256xf32>
    %cst_120 = arith.constant 0.000000e+00 : f32
    %369 = vector.broadcast %cst_120 : f32 to vector<8x256xf32>
    %370 = arith.maximumf %368, %369 : vector<8x256xf32>
    %c0_121 = arith.constant 0 : index
    %c0_122 = arith.constant 0 : index
    %371 = vector.load %arg5[%c0_121, %c0_122] : memref<640x256xf32, #tpu.memory_space<vmem>>, vector<256x64xf32>
    %372 = vector.extract_strided_slice %370 {offsets = [0, 239], sizes = [8, 17], strides = [1, 1]} : vector<8x256xf32> to vector<8x17xf32>
    %373 = vector.extract_strided_slice %370 {offsets = [0, 0], sizes = [8, 239], strides = [1, 1]} : vector<8x256xf32> to vector<8x239xf32>
    %374 = tpu.concatenate %372, %373 in 1 : vector<8x17xf32>, vector<8x239xf32> -> vector<8x256xf32>
    %c56_123 = arith.constant 56 : index
    %c0_124 = arith.constant 0 : index
    %375 = vector.load %arg4[%c56_123, %c0_124] : memref<136x256xf32, #tpu.memory_space<vmem>>, vector<1x256xf32>
    %376 = vector.broadcast %375 : vector<1x256xf32> to vector<8x256xf32>
    %377 = arith.mulf %374, %376 : vector<8x256xf32>
    %c0_125 = arith.constant 0 : index
    %c0_126 = arith.constant 0 : index
    %378 = vector.load %arg7[%c0_125, %c0_126] : memref<392x256xf32, #tpu.memory_space<vmem>>, vector<8x256xf32>
    tpu.vector_store %arg7[%c0_125, %c0_126], %377 {strides = array<i32>} : memref<392x256xf32, #tpu.memory_space<vmem>>, vector<8x256xf32>,
    %379 = vector.extract_strided_slice %370 {offsets = [0, 240], sizes = [8, 16], strides = [1, 1]} : vector<8x256xf32> to vector<8x16xf32>
    %380 = vector.extract_strided_slice %370 {offsets = [0, 0], sizes = [8, 240], strides = [1, 1]} : vector<8x256xf32> to vector<8x240xf32>
    %381 = tpu.concatenate %379, %380 in 1 : vector<8x16xf32>, vector<8x240xf32> -> vector<8x256xf32>
    %c57 = arith.constant 57 : index
    %c0_127 = arith.constant 0 : index
    %382 = vector.load %arg4[%c57, %c0_127] : memref<136x256xf32, #tpu.memory_space<vmem>>, vector<1x256xf32>
    %383 = vector.broadcast %382 : vector<1x256xf32> to vector<8x256xf32>
    %384 = arith.mulf %381, %383 : vector<8x256xf32>
    %c8_128 = arith.constant 8 : index
    %c0_129 = arith.constant 0 : index
    %385 = vector.load %arg7[%c8_128, %c0_129] : memref<392x256xf32, #tpu.memory_space<vmem>>, vector<8x256xf32>
    tpu.vector_store %arg7[%c8_128, %c0_129], %384 {strides = array<i32>} : memref<392x256xf32, #tpu.memory_space<vmem>>, vector<8x256xf32>,
    %386 = vector.extract_strided_slice %370 {offsets = [0, 241], sizes = [8, 15], strides = [1, 1]} : vector<8x256xf32> to vector<8x15xf32>
    %387 = vector.extract_strided_slice %370 {offsets = [0, 0], sizes = [8, 241], strides = [1, 1]} : vector<8x256xf32> to vector<8x241xf32>
    %388 = tpu.concatenate %386, %387 in 1 : vector<8x15xf32>, vector<8x241xf32> -> vector<8x256xf32>
    %c58 = arith.constant 58 : index
    %c0_130 = arith.constant 0 : index
    %389 = vector.load %arg4[%c58, %c0_130] : memref<136x256xf32, #tpu.memory_space<vmem>>, vector<1x256xf32>
    %390 = vector.broadcast %389 : vector<1x256xf32> to vector<8x256xf32>
    %391 = arith.mulf %388, %390 : vector<8x256xf32>
    %c16_131 = arith.constant 16 : index
    %c0_132 = arith.constant 0 : index
    %392 = vector.load %arg7[%c16_131, %c0_132] : memref<392x256xf32, #tpu.memory_space<vmem>>, vector<8x256xf32>
    tpu.vector_store %arg7[%c16_131, %c0_132], %391 {strides = array<i32>} : memref<392x256xf32, #tpu.memory_space<vmem>>, vector<8x256xf32>,
    %393 = vector.extract_strided_slice %370 {offsets = [0, 242], sizes = [8, 14], strides = [1, 1]} : vector<8x256xf32> to vector<8x14xf32>
    %394 = vector.extract_strided_slice %370 {offsets = [0, 0], sizes = [8, 242], strides = [1, 1]} : vector<8x256xf32> to vector<8x242xf32>
    %395 = tpu.concatenate %393, %394 in 1 : vector<8x14xf32>, vector<8x242xf32> -> vector<8x256xf32>
    %c59 = arith.constant 59 : index
    %c0_133 = arith.constant 0 : index
    %396 = vector.load %arg4[%c59, %c0_133] : memref<136x256xf32, #tpu.memory_space<vmem>>, vector<1x256xf32>
    %397 = vector.broadcast %396 : vector<1x256xf32> to vector<8x256xf32>
    %398 = arith.mulf %395, %397 : vector<8x256xf32>
    %c24_134 = arith.constant 24 : index
    %c0_135 = arith.constant 0 : index
    %399 = vector.load %arg7[%c24_134, %c0_135] : memref<392x256xf32, #tpu.memory_space<vmem>>, vector<8x256xf32>
    tpu.vector_store %arg7[%c24_134, %c0_135], %398 {strides = array<i32>} : memref<392x256xf32, #tpu.memory_space<vmem>>, vector<8x256xf32>,
    %400 = vector.extract_strided_slice %370 {offsets = [0, 255], sizes = [8, 1], strides = [1, 1]} : vector<8x256xf32> to vector<8x1xf32>
    %401 = vector.extract_strided_slice %370 {offsets = [0, 0], sizes = [8, 255], strides = [1, 1]} : vector<8x256xf32> to vector<8x255xf32>
    %402 = tpu.concatenate %400, %401 in 1 : vector<8x1xf32>, vector<8x255xf32> -> vector<8x256xf32>
    %c60 = arith.constant 60 : index
    %c0_136 = arith.constant 0 : index
    %403 = vector.load %arg4[%c60, %c0_136] : memref<136x256xf32, #tpu.memory_space<vmem>>, vector<1x256xf32>
    %404 = vector.broadcast %403 : vector<1x256xf32> to vector<8x256xf32>
    %405 = arith.mulf %402, %404 : vector<8x256xf32>
    %c32_137 = arith.constant 32 : index
    %c0_138 = arith.constant 0 : index
    %406 = vector.load %arg7[%c32_137, %c0_138] : memref<392x256xf32, #tpu.memory_space<vmem>>, vector<8x256xf32>
    tpu.vector_store %arg7[%c32_137, %c0_138], %405 {strides = array<i32>} : memref<392x256xf32, #tpu.memory_space<vmem>>, vector<8x256xf32>,
    %c40_139 = arith.constant 40 : index
    %c0_140 = arith.constant 0 : index
    %407 = vector.load %arg7[%c40_139, %c0_140] : memref<392x256xf32, #tpu.memory_space<vmem>>, vector<8x256xf32>
    tpu.vector_store %arg7[%c40_139, %c0_140], %370 {strides = array<i32>} : memref<392x256xf32, #tpu.memory_space<vmem>>, vector<8x256xf32>,
    %408 = vector.extract_strided_slice %370 {offsets = [0, 1], sizes = [8, 255], strides = [1, 1]} : vector<8x256xf32> to vector<8x255xf32>
    %409 = vector.extract_strided_slice %370 {offsets = [0, 0], sizes = [8, 1], strides = [1, 1]} : vector<8x256xf32> to vector<8x1xf32>
    %410 = tpu.concatenate %408, %409 in 1 : vector<8x255xf32>, vector<8x1xf32> -> vector<8x256xf32>
    %c62 = arith.constant 62 : index
    %c0_141 = arith.constant 0 : index
    %411 = vector.load %arg4[%c62, %c0_141] : memref<136x256xf32, #tpu.memory_space<vmem>>, vector<1x256xf32>
    %412 = vector.broadcast %411 : vector<1x256xf32> to vector<8x256xf32>
    %413 = arith.mulf %410, %412 : vector<8x256xf32>
    %c48_142 = arith.constant 48 : index
    %c0_143 = arith.constant 0 : index
    %414 = vector.load %arg7[%c48_142, %c0_143] : memref<392x256xf32, #tpu.memory_space<vmem>>, vector<8x256xf32>
    tpu.vector_store %arg7[%c48_142, %c0_143], %413 {strides = array<i32>} : memref<392x256xf32, #tpu.memory_space<vmem>>, vector<8x256xf32>,
    %415 = vector.extract_strided_slice %370 {offsets = [0, 2], sizes = [8, 254], strides = [1, 1]} : vector<8x256xf32> to vector<8x254xf32>
    %416 = vector.extract_strided_slice %370 {offsets = [0, 0], sizes = [8, 2], strides = [1, 1]} : vector<8x256xf32> to vector<8x2xf32>
    %417 = tpu.concatenate %415, %416 in 1 : vector<8x254xf32>, vector<8x2xf32> -> vector<8x256xf32>
    %c63 = arith.constant 63 : index
    %c0_144 = arith.constant 0 : index
    %418 = vector.load %arg4[%c63, %c0_144] : memref<136x256xf32, #tpu.memory_space<vmem>>, vector<1x256xf32>
    %419 = vector.broadcast %418 : vector<1x256xf32> to vector<8x256xf32>
    %420 = arith.mulf %417, %419 : vector<8x256xf32>
    %c56_145 = arith.constant 56 : index
    %c0_146 = arith.constant 0 : index
    %421 = vector.load %arg7[%c56_145, %c0_146] : memref<392x256xf32, #tpu.memory_space<vmem>>, vector<8x256xf32>
    tpu.vector_store %arg7[%c56_145, %c0_146], %420 {strides = array<i32>} : memref<392x256xf32, #tpu.memory_space<vmem>>, vector<8x256xf32>,
    %422 = vector.extract_strided_slice %370 {offsets = [0, 15], sizes = [8, 241], strides = [1, 1]} : vector<8x256xf32> to vector<8x241xf32>
    %423 = vector.extract_strided_slice %370 {offsets = [0, 0], sizes = [8, 15], strides = [1, 1]} : vector<8x256xf32> to vector<8x15xf32>
    %424 = tpu.concatenate %422, %423 in 1 : vector<8x241xf32>, vector<8x15xf32> -> vector<8x256xf32>
    %c64_147 = arith.constant 64 : index
    %c0_148 = arith.constant 0 : index
    %425 = vector.load %arg4[%c64_147, %c0_148] : memref<136x256xf32, #tpu.memory_space<vmem>>, vector<1x256xf32>
    %426 = vector.broadcast %425 : vector<1x256xf32> to vector<8x256xf32>
    %427 = arith.mulf %424, %426 : vector<8x256xf32>
    %c64_149 = arith.constant 64 : index
    %c0_150 = arith.constant 0 : index
    %428 = vector.load %arg7[%c64_149, %c0_150] : memref<392x256xf32, #tpu.memory_space<vmem>>, vector<8x256xf32>
    tpu.vector_store %arg7[%c64_149, %c0_150], %427 {strides = array<i32>} : memref<392x256xf32, #tpu.memory_space<vmem>>, vector<8x256xf32>,
    %429 = vector.extract_strided_slice %370 {offsets = [0, 16], sizes = [8, 240], strides = [1, 1]} : vector<8x256xf32> to vector<8x240xf32>
    %430 = vector.extract_strided_slice %370 {offsets = [0, 0], sizes = [8, 16], strides = [1, 1]} : vector<8x256xf32> to vector<8x16xf32>
    %431 = tpu.concatenate %429, %430 in 1 : vector<8x240xf32>, vector<8x16xf32> -> vector<8x256xf32>
    %c65 = arith.constant 65 : index
    %c0_151 = arith.constant 0 : index
    %432 = vector.load %arg4[%c65, %c0_151] : memref<136x256xf32, #tpu.memory_space<vmem>>, vector<1x256xf32>
    %433 = vector.broadcast %432 : vector<1x256xf32> to vector<8x256xf32>
    %434 = arith.mulf %431, %433 : vector<8x256xf32>
    %c72_152 = arith.constant 72 : index
    %c0_153 = arith.constant 0 : index
    %435 = vector.load %arg7[%c72_152, %c0_153] : memref<392x256xf32, #tpu.memory_space<vmem>>, vector<8x256xf32>
    tpu.vector_store %arg7[%c72_152, %c0_153], %434 {strides = array<i32>} : memref<392x256xf32, #tpu.memory_space<vmem>>, vector<8x256xf32>,
    %436 = vector.extract_strided_slice %370 {offsets = [0, 17], sizes = [8, 239], strides = [1, 1]} : vector<8x256xf32> to vector<8x239xf32>
    %437 = vector.extract_strided_slice %370 {offsets = [0, 0], sizes = [8, 17], strides = [1, 1]} : vector<8x256xf32> to vector<8x17xf32>
    %438 = tpu.concatenate %436, %437 in 1 : vector<8x239xf32>, vector<8x17xf32> -> vector<8x256xf32>
    %c66 = arith.constant 66 : index
    %c0_154 = arith.constant 0 : index
    %439 = vector.load %arg4[%c66, %c0_154] : memref<136x256xf32, #tpu.memory_space<vmem>>, vector<1x256xf32>
    %440 = vector.broadcast %439 : vector<1x256xf32> to vector<8x256xf32>
    %441 = arith.mulf %438, %440 : vector<8x256xf32>
    %c80_155 = arith.constant 80 : index
    %c0_156 = arith.constant 0 : index
    %442 = vector.load %arg7[%c80_155, %c0_156] : memref<392x256xf32, #tpu.memory_space<vmem>>, vector<8x256xf32>
    tpu.vector_store %arg7[%c80_155, %c0_156], %441 {strides = array<i32>} : memref<392x256xf32, #tpu.memory_space<vmem>>, vector<8x256xf32>,
    %443 = vector.extract_strided_slice %370 {offsets = [0, 18], sizes = [8, 238], strides = [1, 1]} : vector<8x256xf32> to vector<8x238xf32>
    %444 = vector.extract_strided_slice %370 {offsets = [0, 0], sizes = [8, 18], strides = [1, 1]} : vector<8x256xf32> to vector<8x18xf32>
    %445 = tpu.concatenate %443, %444 in 1 : vector<8x238xf32>, vector<8x18xf32> -> vector<8x256xf32>
    %c67 = arith.constant 67 : index
    %c0_157 = arith.constant 0 : index
    %446 = vector.load %arg4[%c67, %c0_157] : memref<136x256xf32, #tpu.memory_space<vmem>>, vector<1x256xf32>
    %447 = vector.broadcast %446 : vector<1x256xf32> to vector<8x256xf32>
    %448 = arith.mulf %445, %447 : vector<8x256xf32>
    %c88_158 = arith.constant 88 : index
    %c0_159 = arith.constant 0 : index
    %449 = vector.load %arg7[%c88_158, %c0_159] : memref<392x256xf32, #tpu.memory_space<vmem>>, vector<8x256xf32>
    tpu.vector_store %arg7[%c88_158, %c0_159], %448 {strides = array<i32>} : memref<392x256xf32, #tpu.memory_space<vmem>>, vector<8x256xf32>,
    %450 = vector.extract_strided_slice %370 {offsets = [0, 31], sizes = [8, 225], strides = [1, 1]} : vector<8x256xf32> to vector<8x225xf32>
    %451 = vector.extract_strided_slice %370 {offsets = [0, 0], sizes = [8, 31], strides = [1, 1]} : vector<8x256xf32> to vector<8x31xf32>
    %452 = tpu.concatenate %450, %451 in 1 : vector<8x225xf32>, vector<8x31xf32> -> vector<8x256xf32>
    %c68 = arith.constant 68 : index
    %c0_160 = arith.constant 0 : index
    %453 = vector.load %arg4[%c68, %c0_160] : memref<136x256xf32, #tpu.memory_space<vmem>>, vector<1x256xf32>
    %454 = vector.broadcast %453 : vector<1x256xf32> to vector<8x256xf32>
    %455 = arith.mulf %452, %454 : vector<8x256xf32>
    %c96_161 = arith.constant 96 : index
    %c0_162 = arith.constant 0 : index
    %456 = vector.load %arg7[%c96_161, %c0_162] : memref<392x256xf32, #tpu.memory_space<vmem>>, vector<8x256xf32>
    tpu.vector_store %arg7[%c96_161, %c0_162], %455 {strides = array<i32>} : memref<392x256xf32, #tpu.memory_space<vmem>>, vector<8x256xf32>,
    %457 = vector.extract_strided_slice %370 {offsets = [0, 32], sizes = [8, 224], strides = [1, 1]} : vector<8x256xf32> to vector<8x224xf32>
    %458 = vector.extract_strided_slice %370 {offsets = [0, 0], sizes = [8, 32], strides = [1, 1]} : vector<8x256xf32> to vector<8x32xf32>
    %459 = tpu.concatenate %457, %458 in 1 : vector<8x224xf32>, vector<8x32xf32> -> vector<8x256xf32>
    %c69 = arith.constant 69 : index
    %c0_163 = arith.constant 0 : index
    %460 = vector.load %arg4[%c69, %c0_163] : memref<136x256xf32, #tpu.memory_space<vmem>>, vector<1x256xf32>
    %461 = vector.broadcast %460 : vector<1x256xf32> to vector<8x256xf32>
    %462 = arith.mulf %459, %461 : vector<8x256xf32>
    %c104_164 = arith.constant 104 : index
    %c0_165 = arith.constant 0 : index
    %463 = vector.load %arg7[%c104_164, %c0_165] : memref<392x256xf32, #tpu.memory_space<vmem>>, vector<8x256xf32>
    tpu.vector_store %arg7[%c104_164, %c0_165], %462 {strides = array<i32>} : memref<392x256xf32, #tpu.memory_space<vmem>>, vector<8x256xf32>,
    %464 = vector.extract_strided_slice %370 {offsets = [0, 33], sizes = [8, 223], strides = [1, 1]} : vector<8x256xf32> to vector<8x223xf32>
    %465 = vector.extract_strided_slice %370 {offsets = [0, 0], sizes = [8, 33], strides = [1, 1]} : vector<8x256xf32> to vector<8x33xf32>
    %466 = tpu.concatenate %464, %465 in 1 : vector<8x223xf32>, vector<8x33xf32> -> vector<8x256xf32>
    %c70 = arith.constant 70 : index
    %c0_166 = arith.constant 0 : index
    %467 = vector.load %arg4[%c70, %c0_166] : memref<136x256xf32, #tpu.memory_space<vmem>>, vector<1x256xf32>
    %468 = vector.broadcast %467 : vector<1x256xf32> to vector<8x256xf32>
    %469 = arith.mulf %466, %468 : vector<8x256xf32>
    %c112_167 = arith.constant 112 : index
    %c0_168 = arith.constant 0 : index
    %470 = vector.load %arg7[%c112_167, %c0_168] : memref<392x256xf32, #tpu.memory_space<vmem>>, vector<8x256xf32>
    tpu.vector_store %arg7[%c112_167, %c0_168], %469 {strides = array<i32>} : memref<392x256xf32, #tpu.memory_space<vmem>>, vector<8x256xf32>,
    %471 = vector.extract_strided_slice %370 {offsets = [0, 34], sizes = [8, 222], strides = [1, 1]} : vector<8x256xf32> to vector<8x222xf32>
    %472 = vector.extract_strided_slice %370 {offsets = [0, 0], sizes = [8, 34], strides = [1, 1]} : vector<8x256xf32> to vector<8x34xf32>
    %473 = tpu.concatenate %471, %472 in 1 : vector<8x222xf32>, vector<8x34xf32> -> vector<8x256xf32>
    %c71 = arith.constant 71 : index
    %c0_169 = arith.constant 0 : index
    %474 = vector.load %arg4[%c71, %c0_169] : memref<136x256xf32, #tpu.memory_space<vmem>>, vector<1x256xf32>
    %475 = vector.broadcast %474 : vector<1x256xf32> to vector<8x256xf32>
    %476 = arith.mulf %473, %475 : vector<8x256xf32>
    %c120_170 = arith.constant 120 : index
    %c0_171 = arith.constant 0 : index
    %477 = vector.load %arg7[%c120_170, %c0_171] : memref<392x256xf32, #tpu.memory_space<vmem>>, vector<8x256xf32>
    tpu.vector_store %arg7[%c120_170, %c0_171], %476 {strides = array<i32>} : memref<392x256xf32, #tpu.memory_space<vmem>>, vector<8x256xf32>,
    %c8_172 = arith.constant 8 : index
    %c0_173 = arith.constant 0 : index
    %478 = vector.load %arg2[%c8_172, %c0_173] : memref<264x392xf32, #tpu.memory_space<vmem>>, vector<16x128xf32>
    %c0_174 = arith.constant 0 : index
    %c0_175 = arith.constant 0 : index
    %479 = vector.load %arg7[%c0_174, %c0_175] : memref<392x256xf32, #tpu.memory_space<vmem>>, vector<128x256xf32>
    %cst_176 = arith.constant dense<0.000000e+00> : vector<16x256xf32>
    %480 = tpu.matmul %478, %479, %cst_176 {dimension_numbers = #tpu.dot_dimension_numbers<[1], [0], [0], [1], [0, 0, 1, 1], [], []>} : vector<16x128xf32>, vector<128x256xf32>, vector<16x256xf32> -> vector<16x256xf32>
    %cst_177 = arith.constant dense<0.000000e+00> : vector<16x64xf32>
    %481 = tpu.matmul %480, %371, %cst_177 {dimension_numbers = #tpu.dot_dimension_numbers<[1], [0], [0], [1], [0, 0, 1, 1], [], []>} : vector<16x256xf32>, vector<256x64xf32>, vector<16x64xf32> -> vector<16x64xf32>
    %c8_178 = arith.constant 8 : index
    %c0_179 = arith.constant 0 : index
    %482 = vector.load %arg3[%c8_178, %c0_179] : memref<192x2xf32, #tpu.memory_space<vmem>>, vector<16x1xf32>
    %c8_180 = arith.constant 8 : index
    %c1_181 = arith.constant 1 : index
    %483 = vector.load %arg3[%c8_180, %c1_181] : memref<192x2xf32, #tpu.memory_space<vmem>>, vector<16x1xf32>
    %cst_182 = arith.constant dense<0.000000e+00> : vector<16xf32>
    %484 = vector.multi_reduction <add>, %481, %cst_182 [1] : vector<16x64xf32> to vector<16xf32>
    %485 = vector.shape_cast %484 : vector<16xf32> to vector<16x1xf32>
    %cst_183 = arith.constant 1.562500e-02 : f32
    %486 = vector.broadcast %cst_183 : f32 to vector<16x1xf32>
    %487 = arith.mulf %485, %486 : vector<16x1xf32>
    %488 = arith.mulf %481, %481 : vector<16x64xf32>
    %cst_184 = arith.constant dense<0.000000e+00> : vector<16xf32>
    %489 = vector.multi_reduction <add>, %488, %cst_184 [1] : vector<16x64xf32> to vector<16xf32>
    %490 = vector.shape_cast %489 : vector<16xf32> to vector<16x1xf32>
    %cst_185 = arith.constant 1.562500e-02 : f32
    %491 = vector.broadcast %cst_185 : f32 to vector<16x1xf32>
    %492 = arith.mulf %490, %491 : vector<16x1xf32>
    %493 = arith.mulf %487, %487 : vector<16x1xf32>
    %494 = arith.subf %492, %493 : vector<16x1xf32>
    %cst_186 = arith.constant 0.000000e+00 : f32
    %495 = vector.broadcast %cst_186 : f32 to vector<16x1xf32>
    %496 = arith.maximumf %494, %495 : vector<16x1xf32>
    %497 = vector.broadcast %487 : vector<16x1xf32> to vector<16x64xf32>
    %498 = arith.subf %481, %497 : vector<16x64xf32>
    %cst_187 = arith.constant 9.99999974E-6 : f32
    %499 = vector.broadcast %cst_187 : f32 to vector<16x1xf32>
    %500 = arith.addf %496, %499 : vector<16x1xf32>
    %501 = math.rsqrt %500 : vector<16x1xf32>
    %502 = vector.broadcast %501 : vector<16x1xf32> to vector<16x64xf32>
    %503 = arith.mulf %498, %502 : vector<16x64xf32>
    %504 = vector.broadcast %482 : vector<16x1xf32> to vector<16x64xf32>
    %505 = arith.mulf %503, %504 : vector<16x64xf32>
    %506 = vector.broadcast %483 : vector<16x1xf32> to vector<16x64xf32>
    %507 = arith.addf %505, %506 : vector<16x64xf32>
    %cst_188 = arith.constant 0.000000e+00 : f32
    %508 = vector.broadcast %cst_188 : f32 to vector<16x64xf32>
    %509 = arith.maximumf %507, %508 : vector<16x64xf32>
    %c256_189 = arith.constant 256 : index
    %c0_190 = arith.constant 0 : index
    %510 = vector.load %arg5[%c256_189, %c0_190] : memref<640x256xf32, #tpu.memory_space<vmem>>, vector<64x16xf32>
    %511 = vector.extract_strided_slice %509 {offsets = [0, 55], sizes = [16, 9], strides = [1, 1]} : vector<16x64xf32> to vector<16x9xf32>
    %512 = vector.extract_strided_slice %509 {offsets = [0, 0], sizes = [16, 55], strides = [1, 1]} : vector<16x64xf32> to vector<16x55xf32>
    %513 = tpu.concatenate %511, %512 in 1 : vector<16x9xf32>, vector<16x55xf32> -> vector<16x64xf32>
    %c72_191 = arith.constant 72 : index
    %c0_192 = arith.constant 0 : index
    %514 = vector.load %arg4[%c72_191, %c0_192] : memref<136x256xf32, #tpu.memory_space<vmem>>, vector<1x64xf32>
    %515 = vector.broadcast %514 : vector<1x64xf32> to vector<16x64xf32>
    %516 = arith.mulf %513, %515 : vector<16x64xf32>
    %c0_193 = arith.constant 0 : index
    %c0_194 = arith.constant 0 : index
    %517 = vector.load %arg7[%c0_193, %c0_194] : memref<392x256xf32, #tpu.memory_space<vmem>>, vector<16x64xf32>
    tpu.vector_store %arg7[%c0_193, %c0_194], %516 {strides = array<i32>} : memref<392x256xf32, #tpu.memory_space<vmem>>, vector<16x64xf32>,
    %518 = vector.extract_strided_slice %509 {offsets = [0, 56], sizes = [16, 8], strides = [1, 1]} : vector<16x64xf32> to vector<16x8xf32>
    %519 = vector.extract_strided_slice %509 {offsets = [0, 0], sizes = [16, 56], strides = [1, 1]} : vector<16x64xf32> to vector<16x56xf32>
    %520 = tpu.concatenate %518, %519 in 1 : vector<16x8xf32>, vector<16x56xf32> -> vector<16x64xf32>
    %c73 = arith.constant 73 : index
    %c0_195 = arith.constant 0 : index
    %521 = vector.load %arg4[%c73, %c0_195] : memref<136x256xf32, #tpu.memory_space<vmem>>, vector<1x64xf32>
    %522 = vector.broadcast %521 : vector<1x64xf32> to vector<16x64xf32>
    %523 = arith.mulf %520, %522 : vector<16x64xf32>
    %c16_196 = arith.constant 16 : index
    %c0_197 = arith.constant 0 : index
    %524 = vector.load %arg7[%c16_196, %c0_197] : memref<392x256xf32, #tpu.memory_space<vmem>>, vector<16x64xf32>
    tpu.vector_store %arg7[%c16_196, %c0_197], %523 {strides = array<i32>} : memref<392x256xf32, #tpu.memory_space<vmem>>, vector<16x64xf32>,
    %525 = vector.extract_strided_slice %509 {offsets = [0, 57], sizes = [16, 7], strides = [1, 1]} : vector<16x64xf32> to vector<16x7xf32>
    %526 = vector.extract_strided_slice %509 {offsets = [0, 0], sizes = [16, 57], strides = [1, 1]} : vector<16x64xf32> to vector<16x57xf32>
    %527 = tpu.concatenate %525, %526 in 1 : vector<16x7xf32>, vector<16x57xf32> -> vector<16x64xf32>
    %c74 = arith.constant 74 : index
    %c0_198 = arith.constant 0 : index
    %528 = vector.load %arg4[%c74, %c0_198] : memref<136x256xf32, #tpu.memory_space<vmem>>, vector<1x64xf32>
    %529 = vector.broadcast %528 : vector<1x64xf32> to vector<16x64xf32>
    %530 = arith.mulf %527, %529 : vector<16x64xf32>
    %c32_199 = arith.constant 32 : index
    %c0_200 = arith.constant 0 : index
    %531 = vector.load %arg7[%c32_199, %c0_200] : memref<392x256xf32, #tpu.memory_space<vmem>>, vector<16x64xf32>
    tpu.vector_store %arg7[%c32_199, %c0_200], %530 {strides = array<i32>} : memref<392x256xf32, #tpu.memory_space<vmem>>, vector<16x64xf32>,
    %532 = vector.extract_strided_slice %509 {offsets = [0, 58], sizes = [16, 6], strides = [1, 1]} : vector<16x64xf32> to vector<16x6xf32>
    %533 = vector.extract_strided_slice %509 {offsets = [0, 0], sizes = [16, 58], strides = [1, 1]} : vector<16x64xf32> to vector<16x58xf32>
    %534 = tpu.concatenate %532, %533 in 1 : vector<16x6xf32>, vector<16x58xf32> -> vector<16x64xf32>
    %c75 = arith.constant 75 : index
    %c0_201 = arith.constant 0 : index
    %535 = vector.load %arg4[%c75, %c0_201] : memref<136x256xf32, #tpu.memory_space<vmem>>, vector<1x64xf32>
    %536 = vector.broadcast %535 : vector<1x64xf32> to vector<16x64xf32>
    %537 = arith.mulf %534, %536 : vector<16x64xf32>
    %c48_202 = arith.constant 48 : index
    %c0_203 = arith.constant 0 : index
    %538 = vector.load %arg7[%c48_202, %c0_203] : memref<392x256xf32, #tpu.memory_space<vmem>>, vector<16x64xf32>
    tpu.vector_store %arg7[%c48_202, %c0_203], %537 {strides = array<i32>} : memref<392x256xf32, #tpu.memory_space<vmem>>, vector<16x64xf32>,
    %539 = vector.extract_strided_slice %509 {offsets = [0, 63], sizes = [16, 1], strides = [1, 1]} : vector<16x64xf32> to vector<16x1xf32>
    %540 = vector.extract_strided_slice %509 {offsets = [0, 0], sizes = [16, 63], strides = [1, 1]} : vector<16x64xf32> to vector<16x63xf32>
    %541 = tpu.concatenate %539, %540 in 1 : vector<16x1xf32>, vector<16x63xf32> -> vector<16x64xf32>
    %c76 = arith.constant 76 : index
    %c0_204 = arith.constant 0 : index
    %542 = vector.load %arg4[%c76, %c0_204] : memref<136x256xf32, #tpu.memory_space<vmem>>, vector<1x64xf32>
    %543 = vector.broadcast %542 : vector<1x64xf32> to vector<16x64xf32>
    %544 = arith.mulf %541, %543 : vector<16x64xf32>
    %c64_205 = arith.constant 64 : index
    %c0_206 = arith.constant 0 : index
    %545 = vector.load %arg7[%c64_205, %c0_206] : memref<392x256xf32, #tpu.memory_space<vmem>>, vector<16x64xf32>
    tpu.vector_store %arg7[%c64_205, %c0_206], %544 {strides = array<i32>} : memref<392x256xf32, #tpu.memory_space<vmem>>, vector<16x64xf32>,
    %c80_207 = arith.constant 80 : index
    %c0_208 = arith.constant 0 : index
    %546 = vector.load %arg7[%c80_207, %c0_208] : memref<392x256xf32, #tpu.memory_space<vmem>>, vector<16x64xf32>
    tpu.vector_store %arg7[%c80_207, %c0_208], %509 {strides = array<i32>} : memref<392x256xf32, #tpu.memory_space<vmem>>, vector<16x64xf32>,
    %547 = vector.extract_strided_slice %509 {offsets = [0, 1], sizes = [16, 63], strides = [1, 1]} : vector<16x64xf32> to vector<16x63xf32>
    %548 = vector.extract_strided_slice %509 {offsets = [0, 0], sizes = [16, 1], strides = [1, 1]} : vector<16x64xf32> to vector<16x1xf32>
    %549 = tpu.concatenate %547, %548 in 1 : vector<16x63xf32>, vector<16x1xf32> -> vector<16x64xf32>
    %c78 = arith.constant 78 : index
    %c0_209 = arith.constant 0 : index
    %550 = vector.load %arg4[%c78, %c0_209] : memref<136x256xf32, #tpu.memory_space<vmem>>, vector<1x64xf32>
    %551 = vector.broadcast %550 : vector<1x64xf32> to vector<16x64xf32>
    %552 = arith.mulf %549, %551 : vector<16x64xf32>
    %c96_210 = arith.constant 96 : index
    %c0_211 = arith.constant 0 : index
    %553 = vector.load %arg7[%c96_210, %c0_211] : memref<392x256xf32, #tpu.memory_space<vmem>>, vector<16x64xf32>
    tpu.vector_store %arg7[%c96_210, %c0_211], %552 {strides = array<i32>} : memref<392x256xf32, #tpu.memory_space<vmem>>, vector<16x64xf32>,
    %554 = vector.extract_strided_slice %509 {offsets = [0, 2], sizes = [16, 62], strides = [1, 1]} : vector<16x64xf32> to vector<16x62xf32>
    %555 = vector.extract_strided_slice %509 {offsets = [0, 0], sizes = [16, 2], strides = [1, 1]} : vector<16x64xf32> to vector<16x2xf32>
    %556 = tpu.concatenate %554, %555 in 1 : vector<16x62xf32>, vector<16x2xf32> -> vector<16x64xf32>
    %c79 = arith.constant 79 : index
    %c0_212 = arith.constant 0 : index
    %557 = vector.load %arg4[%c79, %c0_212] : memref<136x256xf32, #tpu.memory_space<vmem>>, vector<1x64xf32>
    %558 = vector.broadcast %557 : vector<1x64xf32> to vector<16x64xf32>
    %559 = arith.mulf %556, %558 : vector<16x64xf32>
    %c112_213 = arith.constant 112 : index
    %c0_214 = arith.constant 0 : index
    %560 = vector.load %arg7[%c112_213, %c0_214] : memref<392x256xf32, #tpu.memory_space<vmem>>, vector<16x64xf32>
    tpu.vector_store %arg7[%c112_213, %c0_214], %559 {strides = array<i32>} : memref<392x256xf32, #tpu.memory_space<vmem>>, vector<16x64xf32>,
    %561 = vector.extract_strided_slice %509 {offsets = [0, 7], sizes = [16, 57], strides = [1, 1]} : vector<16x64xf32> to vector<16x57xf32>
    %562 = vector.extract_strided_slice %509 {offsets = [0, 0], sizes = [16, 7], strides = [1, 1]} : vector<16x64xf32> to vector<16x7xf32>
    %563 = tpu.concatenate %561, %562 in 1 : vector<16x57xf32>, vector<16x7xf32> -> vector<16x64xf32>
    %c80_215 = arith.constant 80 : index
    %c0_216 = arith.constant 0 : index
    %564 = vector.load %arg4[%c80_215, %c0_216] : memref<136x256xf32, #tpu.memory_space<vmem>>, vector<1x64xf32>
    %565 = vector.broadcast %564 : vector<1x64xf32> to vector<16x64xf32>
    %566 = arith.mulf %563, %565 : vector<16x64xf32>
    %c128_217 = arith.constant 128 : index
    %c0_218 = arith.constant 0 : index
    %567 = vector.load %arg7[%c128_217, %c0_218] : memref<392x256xf32, #tpu.memory_space<vmem>>, vector<16x64xf32>
    tpu.vector_store %arg7[%c128_217, %c0_218], %566 {strides = array<i32>} : memref<392x256xf32, #tpu.memory_space<vmem>>, vector<16x64xf32>,
    %568 = vector.extract_strided_slice %509 {offsets = [0, 8], sizes = [16, 56], strides = [1, 1]} : vector<16x64xf32> to vector<16x56xf32>
    %569 = vector.extract_strided_slice %509 {offsets = [0, 0], sizes = [16, 8], strides = [1, 1]} : vector<16x64xf32> to vector<16x8xf32>
    %570 = tpu.concatenate %568, %569 in 1 : vector<16x56xf32>, vector<16x8xf32> -> vector<16x64xf32>
    %c81 = arith.constant 81 : index
    %c0_219 = arith.constant 0 : index
    %571 = vector.load %arg4[%c81, %c0_219] : memref<136x256xf32, #tpu.memory_space<vmem>>, vector<1x64xf32>
    %572 = vector.broadcast %571 : vector<1x64xf32> to vector<16x64xf32>
    %573 = arith.mulf %570, %572 : vector<16x64xf32>
    %c144_220 = arith.constant 144 : index
    %c0_221 = arith.constant 0 : index
    %574 = vector.load %arg7[%c144_220, %c0_221] : memref<392x256xf32, #tpu.memory_space<vmem>>, vector<16x64xf32>
    tpu.vector_store %arg7[%c144_220, %c0_221], %573 {strides = array<i32>} : memref<392x256xf32, #tpu.memory_space<vmem>>, vector<16x64xf32>,
    %575 = vector.extract_strided_slice %509 {offsets = [0, 9], sizes = [16, 55], strides = [1, 1]} : vector<16x64xf32> to vector<16x55xf32>
    %576 = vector.extract_strided_slice %509 {offsets = [0, 0], sizes = [16, 9], strides = [1, 1]} : vector<16x64xf32> to vector<16x9xf32>
    %577 = tpu.concatenate %575, %576 in 1 : vector<16x55xf32>, vector<16x9xf32> -> vector<16x64xf32>
    %c82 = arith.constant 82 : index
    %c0_222 = arith.constant 0 : index
    %578 = vector.load %arg4[%c82, %c0_222] : memref<136x256xf32, #tpu.memory_space<vmem>>, vector<1x64xf32>
    %579 = vector.broadcast %578 : vector<1x64xf32> to vector<16x64xf32>
    %580 = arith.mulf %577, %579 : vector<16x64xf32>
    %c160_223 = arith.constant 160 : index
    %c0_224 = arith.constant 0 : index
    %581 = vector.load %arg7[%c160_223, %c0_224] : memref<392x256xf32, #tpu.memory_space<vmem>>, vector<16x64xf32>
    tpu.vector_store %arg7[%c160_223, %c0_224], %580 {strides = array<i32>} : memref<392x256xf32, #tpu.memory_space<vmem>>, vector<16x64xf32>,
    %582 = vector.extract_strided_slice %509 {offsets = [0, 10], sizes = [16, 54], strides = [1, 1]} : vector<16x64xf32> to vector<16x54xf32>
    %583 = vector.extract_strided_slice %509 {offsets = [0, 0], sizes = [16, 10], strides = [1, 1]} : vector<16x64xf32> to vector<16x10xf32>
    %584 = tpu.concatenate %582, %583 in 1 : vector<16x54xf32>, vector<16x10xf32> -> vector<16x64xf32>
    %c83 = arith.constant 83 : index
    %c0_225 = arith.constant 0 : index
    %585 = vector.load %arg4[%c83, %c0_225] : memref<136x256xf32, #tpu.memory_space<vmem>>, vector<1x64xf32>
    %586 = vector.broadcast %585 : vector<1x64xf32> to vector<16x64xf32>
    %587 = arith.mulf %584, %586 : vector<16x64xf32>
    %c176_226 = arith.constant 176 : index
    %c0_227 = arith.constant 0 : index
    %588 = vector.load %arg7[%c176_226, %c0_227] : memref<392x256xf32, #tpu.memory_space<vmem>>, vector<16x64xf32>
    tpu.vector_store %arg7[%c176_226, %c0_227], %587 {strides = array<i32>} : memref<392x256xf32, #tpu.memory_space<vmem>>, vector<16x64xf32>,
    %589 = vector.extract_strided_slice %509 {offsets = [0, 15], sizes = [16, 49], strides = [1, 1]} : vector<16x64xf32> to vector<16x49xf32>
    %590 = vector.extract_strided_slice %509 {offsets = [0, 0], sizes = [16, 15], strides = [1, 1]} : vector<16x64xf32> to vector<16x15xf32>
    %591 = tpu.concatenate %589, %590 in 1 : vector<16x49xf32>, vector<16x15xf32> -> vector<16x64xf32>
    %c84 = arith.constant 84 : index
    %c0_228 = arith.constant 0 : index
    %592 = vector.load %arg4[%c84, %c0_228] : memref<136x256xf32, #tpu.memory_space<vmem>>, vector<1x64xf32>
    %593 = vector.broadcast %592 : vector<1x64xf32> to vector<16x64xf32>
    %594 = arith.mulf %591, %593 : vector<16x64xf32>
    %c192_229 = arith.constant 192 : index
    %c0_230 = arith.constant 0 : index
    %595 = vector.load %arg7[%c192_229, %c0_230] : memref<392x256xf32, #tpu.memory_space<vmem>>, vector<16x64xf32>
    tpu.vector_store %arg7[%c192_229, %c0_230], %594 {strides = array<i32>} : memref<392x256xf32, #tpu.memory_space<vmem>>, vector<16x64xf32>,
    %596 = vector.extract_strided_slice %509 {offsets = [0, 16], sizes = [16, 48], strides = [1, 1]} : vector<16x64xf32> to vector<16x48xf32>
    %597 = vector.extract_strided_slice %509 {offsets = [0, 0], sizes = [16, 16], strides = [1, 1]} : vector<16x64xf32> to vector<16x16xf32>
    %598 = tpu.concatenate %596, %597 in 1 : vector<16x48xf32>, vector<16x16xf32> -> vector<16x64xf32>
    %c85 = arith.constant 85 : index
    %c0_231 = arith.constant 0 : index
    %599 = vector.load %arg4[%c85, %c0_231] : memref<136x256xf32, #tpu.memory_space<vmem>>, vector<1x64xf32>
    %600 = vector.broadcast %599 : vector<1x64xf32> to vector<16x64xf32>
    %601 = arith.mulf %598, %600 : vector<16x64xf32>
    %c208_232 = arith.constant 208 : index
    %c0_233 = arith.constant 0 : index
    %602 = vector.load %arg7[%c208_232, %c0_233] : memref<392x256xf32, #tpu.memory_space<vmem>>, vector<16x64xf32>
    tpu.vector_store %arg7[%c208_232, %c0_233], %601 {strides = array<i32>} : memref<392x256xf32, #tpu.memory_space<vmem>>, vector<16x64xf32>,
    %603 = vector.extract_strided_slice %509 {offsets = [0, 17], sizes = [16, 47], strides = [1, 1]} : vector<16x64xf32> to vector<16x47xf32>
    %604 = vector.extract_strided_slice %509 {offsets = [0, 0], sizes = [16, 17], strides = [1, 1]} : vector<16x64xf32> to vector<16x17xf32>
    %605 = tpu.concatenate %603, %604 in 1 : vector<16x47xf32>, vector<16x17xf32> -> vector<16x64xf32>
    %c86 = arith.constant 86 : index
    %c0_234 = arith.constant 0 : index
    %606 = vector.load %arg4[%c86, %c0_234] : memref<136x256xf32, #tpu.memory_space<vmem>>, vector<1x64xf32>
    %607 = vector.broadcast %606 : vector<1x64xf32> to vector<16x64xf32>
    %608 = arith.mulf %605, %607 : vector<16x64xf32>
    %c224_235 = arith.constant 224 : index
    %c0_236 = arith.constant 0 : index
    %609 = vector.load %arg7[%c224_235, %c0_236] : memref<392x256xf32, #tpu.memory_space<vmem>>, vector<16x64xf32>
    tpu.vector_store %arg7[%c224_235, %c0_236], %608 {strides = array<i32>} : memref<392x256xf32, #tpu.memory_space<vmem>>, vector<16x64xf32>,
    %610 = vector.extract_strided_slice %509 {offsets = [0, 18], sizes = [16, 46], strides = [1, 1]} : vector<16x64xf32> to vector<16x46xf32>
    %611 = vector.extract_strided_slice %509 {offsets = [0, 0], sizes = [16, 18], strides = [1, 1]} : vector<16x64xf32> to vector<16x18xf32>
    %612 = tpu.concatenate %610, %611 in 1 : vector<16x46xf32>, vector<16x18xf32> -> vector<16x64xf32>
    %c87 = arith.constant 87 : index
    %c0_237 = arith.constant 0 : index
    %613 = vector.load %arg4[%c87, %c0_237] : memref<136x256xf32, #tpu.memory_space<vmem>>, vector<1x64xf32>
    %614 = vector.broadcast %613 : vector<1x64xf32> to vector<16x64xf32>
    %615 = arith.mulf %612, %614 : vector<16x64xf32>
    %c240_238 = arith.constant 240 : index
    %c0_239 = arith.constant 0 : index
    %616 = vector.load %arg7[%c240_238, %c0_239] : memref<392x256xf32, #tpu.memory_space<vmem>>, vector<16x64xf32>
    tpu.vector_store %arg7[%c240_238, %c0_239], %615 {strides = array<i32>} : memref<392x256xf32, #tpu.memory_space<vmem>>, vector<16x64xf32>,
    %c24_240 = arith.constant 24 : index
    %c0_241 = arith.constant 0 : index
    %617 = vector.load %arg2[%c24_240, %c0_241] : memref<264x392xf32, #tpu.memory_space<vmem>>, vector<32x256xf32>
    %c0_242 = arith.constant 0 : index
    %c0_243 = arith.constant 0 : index
    %618 = vector.load %arg7[%c0_242, %c0_243] : memref<392x256xf32, #tpu.memory_space<vmem>>, vector<256x64xf32>
    %cst_244 = arith.constant dense<0.000000e+00> : vector<32x64xf32>
    %619 = tpu.matmul %617, %618, %cst_244 {dimension_numbers = #tpu.dot_dimension_numbers<[1], [0], [0], [1], [0, 0, 1, 1], [], []>} : vector<32x256xf32>, vector<256x64xf32>, vector<32x64xf32> -> vector<32x64xf32>
    %cst_245 = arith.constant dense<0.000000e+00> : vector<32x16xf32>
    %620 = tpu.matmul %619, %510, %cst_245 {dimension_numbers = #tpu.dot_dimension_numbers<[1], [0], [0], [1], [0, 0, 1, 1], [], []>} : vector<32x64xf32>, vector<64x16xf32>, vector<32x16xf32> -> vector<32x16xf32>
    %c24_246 = arith.constant 24 : index
    %c0_247 = arith.constant 0 : index
    %621 = vector.load %arg3[%c24_246, %c0_247] : memref<192x2xf32, #tpu.memory_space<vmem>>, vector<32x1xf32>
    %c24_248 = arith.constant 24 : index
    %c1_249 = arith.constant 1 : index
    %622 = vector.load %arg3[%c24_248, %c1_249] : memref<192x2xf32, #tpu.memory_space<vmem>>, vector<32x1xf32>
    %cst_250 = arith.constant dense<0.000000e+00> : vector<32xf32>
    %623 = vector.multi_reduction <add>, %620, %cst_250 [1] : vector<32x16xf32> to vector<32xf32>
    %624 = vector.shape_cast %623 : vector<32xf32> to vector<32x1xf32>
    %cst_251 = arith.constant 6.250000e-02 : f32
    %625 = vector.broadcast %cst_251 : f32 to vector<32x1xf32>
    %626 = arith.mulf %624, %625 : vector<32x1xf32>
    %627 = arith.mulf %620, %620 : vector<32x16xf32>
    %cst_252 = arith.constant dense<0.000000e+00> : vector<32xf32>
    %628 = vector.multi_reduction <add>, %627, %cst_252 [1] : vector<32x16xf32> to vector<32xf32>
    %629 = vector.shape_cast %628 : vector<32xf32> to vector<32x1xf32>
    %cst_253 = arith.constant 6.250000e-02 : f32
    %630 = vector.broadcast %cst_253 : f32 to vector<32x1xf32>
    %631 = arith.mulf %629, %630 : vector<32x1xf32>
    %632 = arith.mulf %626, %626 : vector<32x1xf32>
    %633 = arith.subf %631, %632 : vector<32x1xf32>
    %cst_254 = arith.constant 0.000000e+00 : f32
    %634 = vector.broadcast %cst_254 : f32 to vector<32x1xf32>
    %635 = arith.maximumf %633, %634 : vector<32x1xf32>
    %636 = vector.broadcast %626 : vector<32x1xf32> to vector<32x16xf32>
    %637 = arith.subf %620, %636 : vector<32x16xf32>
    %cst_255 = arith.constant 9.99999974E-6 : f32
    %638 = vector.broadcast %cst_255 : f32 to vector<32x1xf32>
    %639 = arith.addf %635, %638 : vector<32x1xf32>
    %640 = math.rsqrt %639 : vector<32x1xf32>
    %641 = vector.broadcast %640 : vector<32x1xf32> to vector<32x16xf32>
    %642 = arith.mulf %637, %641 : vector<32x16xf32>
    %643 = vector.broadcast %621 : vector<32x1xf32> to vector<32x16xf32>
    %644 = arith.mulf %642, %643 : vector<32x16xf32>
    %645 = vector.broadcast %622 : vector<32x1xf32> to vector<32x16xf32>
    %646 = arith.addf %644, %645 : vector<32x16xf32>
    %cst_256 = arith.constant 0.000000e+00 : f32
    %647 = vector.broadcast %cst_256 : f32 to vector<32x16xf32>
    %648 = arith.maximumf %646, %647 : vector<32x16xf32>
    %649 = vector.extract_strided_slice %648 {offsets = [0, 11], sizes = [32, 5], strides = [1, 1]} : vector<32x16xf32> to vector<32x5xf32>
    %650 = vector.extract_strided_slice %648 {offsets = [0, 0], sizes = [32, 11], strides = [1, 1]} : vector<32x16xf32> to vector<32x11xf32>
    %651 = tpu.concatenate %649, %650 in 1 : vector<32x5xf32>, vector<32x11xf32> -> vector<32x16xf32>
    %c88_257 = arith.constant 88 : index
    %c0_258 = arith.constant 0 : index
    %652 = vector.load %arg4[%c88_257, %c0_258] : memref<136x256xf32, #tpu.memory_space<vmem>>, vector<1x16xf32>
    %653 = vector.broadcast %652 : vector<1x16xf32> to vector<32x16xf32>
    %654 = arith.mulf %651, %653 : vector<32x16xf32>
    %c0_259 = arith.constant 0 : index
    %c0_260 = arith.constant 0 : index
    %655 = vector.load %arg7[%c0_259, %c0_260] : memref<392x256xf32, #tpu.memory_space<vmem>>, vector<32x16xf32>
    tpu.vector_store %arg7[%c0_259, %c0_260], %654 {strides = array<i32>} : memref<392x256xf32, #tpu.memory_space<vmem>>, vector<32x16xf32>,
    %656 = vector.extract_strided_slice %648 {offsets = [0, 12], sizes = [32, 4], strides = [1, 1]} : vector<32x16xf32> to vector<32x4xf32>
    %657 = vector.extract_strided_slice %648 {offsets = [0, 0], sizes = [32, 12], strides = [1, 1]} : vector<32x16xf32> to vector<32x12xf32>
    %658 = tpu.concatenate %656, %657 in 1 : vector<32x4xf32>, vector<32x12xf32> -> vector<32x16xf32>
    %c89 = arith.constant 89 : index
    %c0_261 = arith.constant 0 : index
    %659 = vector.load %arg4[%c89, %c0_261] : memref<136x256xf32, #tpu.memory_space<vmem>>, vector<1x16xf32>
    %660 = vector.broadcast %659 : vector<1x16xf32> to vector<32x16xf32>
    %661 = arith.mulf %658, %660 : vector<32x16xf32>
    %c32_262 = arith.constant 32 : index
    %c0_263 = arith.constant 0 : index
    %662 = vector.load %arg7[%c32_262, %c0_263] : memref<392x256xf32, #tpu.memory_space<vmem>>, vector<32x16xf32>
    tpu.vector_store %arg7[%c32_262, %c0_263], %661 {strides = array<i32>} : memref<392x256xf32, #tpu.memory_space<vmem>>, vector<32x16xf32>,
    %663 = vector.extract_strided_slice %648 {offsets = [0, 13], sizes = [32, 3], strides = [1, 1]} : vector<32x16xf32> to vector<32x3xf32>
    %664 = vector.extract_strided_slice %648 {offsets = [0, 0], sizes = [32, 13], strides = [1, 1]} : vector<32x16xf32> to vector<32x13xf32>
    %665 = tpu.concatenate %663, %664 in 1 : vector<32x3xf32>, vector<32x13xf32> -> vector<32x16xf32>
    %c90 = arith.constant 90 : index
    %c0_264 = arith.constant 0 : index
    %666 = vector.load %arg4[%c90, %c0_264] : memref<136x256xf32, #tpu.memory_space<vmem>>, vector<1x16xf32>
    %667 = vector.broadcast %666 : vector<1x16xf32> to vector<32x16xf32>
    %668 = arith.mulf %665, %667 : vector<32x16xf32>
    %c64_265 = arith.constant 64 : index
    %c0_266 = arith.constant 0 : index
    %669 = vector.load %arg7[%c64_265, %c0_266] : memref<392x256xf32, #tpu.memory_space<vmem>>, vector<32x16xf32>
    tpu.vector_store %arg7[%c64_265, %c0_266], %668 {strides = array<i32>} : memref<392x256xf32, #tpu.memory_space<vmem>>, vector<32x16xf32>,
    %670 = vector.extract_strided_slice %648 {offsets = [0, 15], sizes = [32, 1], strides = [1, 1]} : vector<32x16xf32> to vector<32x1xf32>
    %671 = vector.extract_strided_slice %648 {offsets = [0, 0], sizes = [32, 15], strides = [1, 1]} : vector<32x16xf32> to vector<32x15xf32>
    %672 = tpu.concatenate %670, %671 in 1 : vector<32x1xf32>, vector<32x15xf32> -> vector<32x16xf32>
    %c91 = arith.constant 91 : index
    %c0_267 = arith.constant 0 : index
    %673 = vector.load %arg4[%c91, %c0_267] : memref<136x256xf32, #tpu.memory_space<vmem>>, vector<1x16xf32>
    %674 = vector.broadcast %673 : vector<1x16xf32> to vector<32x16xf32>
    %675 = arith.mulf %672, %674 : vector<32x16xf32>
    %c96_268 = arith.constant 96 : index
    %c0_269 = arith.constant 0 : index
    %676 = vector.load %arg7[%c96_268, %c0_269] : memref<392x256xf32, #tpu.memory_space<vmem>>, vector<32x16xf32>
    tpu.vector_store %arg7[%c96_268, %c0_269], %675 {strides = array<i32>} : memref<392x256xf32, #tpu.memory_space<vmem>>, vector<32x16xf32>,
    %c128_270 = arith.constant 128 : index
    %c0_271 = arith.constant 0 : index
    %677 = vector.load %arg7[%c128_270, %c0_271] : memref<392x256xf32, #tpu.memory_space<vmem>>, vector<32x16xf32>
    tpu.vector_store %arg7[%c128_270, %c0_271], %648 {strides = array<i32>} : memref<392x256xf32, #tpu.memory_space<vmem>>, vector<32x16xf32>,
    %678 = vector.extract_strided_slice %648 {offsets = [0, 1], sizes = [32, 15], strides = [1, 1]} : vector<32x16xf32> to vector<32x15xf32>
    %679 = vector.extract_strided_slice %648 {offsets = [0, 0], sizes = [32, 1], strides = [1, 1]} : vector<32x16xf32> to vector<32x1xf32>
    %680 = tpu.concatenate %678, %679 in 1 : vector<32x15xf32>, vector<32x1xf32> -> vector<32x16xf32>
    %c93 = arith.constant 93 : index
    %c0_272 = arith.constant 0 : index
    %681 = vector.load %arg4[%c93, %c0_272] : memref<136x256xf32, #tpu.memory_space<vmem>>, vector<1x16xf32>
    %682 = vector.broadcast %681 : vector<1x16xf32> to vector<32x16xf32>
    %683 = arith.mulf %680, %682 : vector<32x16xf32>
    %c160_273 = arith.constant 160 : index
    %c0_274 = arith.constant 0 : index
    %684 = vector.load %arg7[%c160_273, %c0_274] : memref<392x256xf32, #tpu.memory_space<vmem>>, vector<32x16xf32>
    tpu.vector_store %arg7[%c160_273, %c0_274], %683 {strides = array<i32>} : memref<392x256xf32, #tpu.memory_space<vmem>>, vector<32x16xf32>,
    %685 = vector.extract_strided_slice %648 {offsets = [0, 3], sizes = [32, 13], strides = [1, 1]} : vector<32x16xf32> to vector<32x13xf32>
    %686 = vector.extract_strided_slice %648 {offsets = [0, 0], sizes = [32, 3], strides = [1, 1]} : vector<32x16xf32> to vector<32x3xf32>
    %687 = tpu.concatenate %685, %686 in 1 : vector<32x13xf32>, vector<32x3xf32> -> vector<32x16xf32>
    %c94 = arith.constant 94 : index
    %c0_275 = arith.constant 0 : index
    %688 = vector.load %arg4[%c94, %c0_275] : memref<136x256xf32, #tpu.memory_space<vmem>>, vector<1x16xf32>
    %689 = vector.broadcast %688 : vector<1x16xf32> to vector<32x16xf32>
    %690 = arith.mulf %687, %689 : vector<32x16xf32>
    %c192_276 = arith.constant 192 : index
    %c0_277 = arith.constant 0 : index
    %691 = vector.load %arg7[%c192_276, %c0_277] : memref<392x256xf32, #tpu.memory_space<vmem>>, vector<32x16xf32>
    tpu.vector_store %arg7[%c192_276, %c0_277], %690 {strides = array<i32>} : memref<392x256xf32, #tpu.memory_space<vmem>>, vector<32x16xf32>,
    %692 = vector.extract_strided_slice %648 {offsets = [0, 4], sizes = [32, 12], strides = [1, 1]} : vector<32x16xf32> to vector<32x12xf32>
    %693 = vector.extract_strided_slice %648 {offsets = [0, 0], sizes = [32, 4], strides = [1, 1]} : vector<32x16xf32> to vector<32x4xf32>
    %694 = tpu.concatenate %692, %693 in 1 : vector<32x12xf32>, vector<32x4xf32> -> vector<32x16xf32>
    %c95 = arith.constant 95 : index
    %c0_278 = arith.constant 0 : index
    %695 = vector.load %arg4[%c95, %c0_278] : memref<136x256xf32, #tpu.memory_space<vmem>>, vector<1x16xf32>
    %696 = vector.broadcast %695 : vector<1x16xf32> to vector<32x16xf32>
    %697 = arith.mulf %694, %696 : vector<32x16xf32>
    %c224_279 = arith.constant 224 : index
    %c0_280 = arith.constant 0 : index
    %698 = vector.load %arg7[%c224_279, %c0_280] : memref<392x256xf32, #tpu.memory_space<vmem>>, vector<32x16xf32>
    tpu.vector_store %arg7[%c224_279, %c0_280], %697 {strides = array<i32>} : memref<392x256xf32, #tpu.memory_space<vmem>>, vector<32x16xf32>,
    %699 = vector.extract_strided_slice %648 {offsets = [0, 5], sizes = [32, 11], strides = [1, 1]} : vector<32x16xf32> to vector<32x11xf32>
    %700 = vector.extract_strided_slice %648 {offsets = [0, 0], sizes = [32, 5], strides = [1, 1]} : vector<32x16xf32> to vector<32x5xf32>
    %701 = tpu.concatenate %699, %700 in 1 : vector<32x11xf32>, vector<32x5xf32> -> vector<32x16xf32>
    %c96_281 = arith.constant 96 : index
    %c0_282 = arith.constant 0 : index
    %702 = vector.load %arg4[%c96_281, %c0_282] : memref<136x256xf32, #tpu.memory_space<vmem>>, vector<1x16xf32>
    %703 = vector.broadcast %702 : vector<1x16xf32> to vector<32x16xf32>
    %704 = arith.mulf %701, %703 : vector<32x16xf32>
    %c256_283 = arith.constant 256 : index
    %c0_284 = arith.constant 0 : index
    %705 = vector.load %arg7[%c256_283, %c0_284] : memref<392x256xf32, #tpu.memory_space<vmem>>, vector<32x16xf32>
    tpu.vector_store %arg7[%c256_283, %c0_284], %704 {strides = array<i32>} : memref<392x256xf32, #tpu.memory_space<vmem>>, vector<32x16xf32>,
    %c56_285 = arith.constant 56 : index
    %c0_286 = arith.constant 0 : index
    %706 = vector.load %arg2[%c56_285, %c0_286] : memref<264x392xf32, #tpu.memory_space<vmem>>, vector<32x288xf32>
    %c0_287 = arith.constant 0 : index
    %c0_288 = arith.constant 0 : index
    %707 = vector.load %arg7[%c0_287, %c0_288] : memref<392x256xf32, #tpu.memory_space<vmem>>, vector<288x16xf32>
    %cst_289 = arith.constant dense<0.000000e+00> : vector<32x16xf32>
    %708 = tpu.matmul %706, %707, %cst_289 {dimension_numbers = #tpu.dot_dimension_numbers<[1], [0], [0], [1], [0, 0, 1, 1], [], []>} : vector<32x288xf32>, vector<288x16xf32>, vector<32x16xf32> -> vector<32x16xf32>
    %c56_290 = arith.constant 56 : index
    %c0_291 = arith.constant 0 : index
    %709 = vector.load %arg3[%c56_290, %c0_291] : memref<192x2xf32, #tpu.memory_space<vmem>>, vector<32x1xf32>
    %c56_292 = arith.constant 56 : index
    %c1_293 = arith.constant 1 : index
    %710 = vector.load %arg3[%c56_292, %c1_293] : memref<192x2xf32, #tpu.memory_space<vmem>>, vector<32x1xf32>
    %cst_294 = arith.constant dense<0.000000e+00> : vector<32xf32>
    %711 = vector.multi_reduction <add>, %708, %cst_294 [1] : vector<32x16xf32> to vector<32xf32>
    %712 = vector.shape_cast %711 : vector<32xf32> to vector<32x1xf32>
    %cst_295 = arith.constant 6.250000e-02 : f32
    %713 = vector.broadcast %cst_295 : f32 to vector<32x1xf32>
    %714 = arith.mulf %712, %713 : vector<32x1xf32>
    %715 = arith.mulf %708, %708 : vector<32x16xf32>
    %cst_296 = arith.constant dense<0.000000e+00> : vector<32xf32>
    %716 = vector.multi_reduction <add>, %715, %cst_296 [1] : vector<32x16xf32> to vector<32xf32>
    %717 = vector.shape_cast %716 : vector<32xf32> to vector<32x1xf32>
    %cst_297 = arith.constant 6.250000e-02 : f32
    %718 = vector.broadcast %cst_297 : f32 to vector<32x1xf32>
    %719 = arith.mulf %717, %718 : vector<32x1xf32>
    %720 = arith.mulf %714, %714 : vector<32x1xf32>
    %721 = arith.subf %719, %720 : vector<32x1xf32>
    %cst_298 = arith.constant 0.000000e+00 : f32
    %722 = vector.broadcast %cst_298 : f32 to vector<32x1xf32>
    %723 = arith.maximumf %721, %722 : vector<32x1xf32>
    %724 = vector.broadcast %714 : vector<32x1xf32> to vector<32x16xf32>
    %725 = arith.subf %708, %724 : vector<32x16xf32>
    %cst_299 = arith.constant 9.99999974E-6 : f32
    %726 = vector.broadcast %cst_299 : f32 to vector<32x1xf32>
    %727 = arith.addf %723, %726 : vector<32x1xf32>
    %728 = math.rsqrt %727 : vector<32x1xf32>
    %729 = vector.broadcast %728 : vector<32x1xf32> to vector<32x16xf32>
    %730 = arith.mulf %725, %729 : vector<32x16xf32>
    %731 = vector.broadcast %709 : vector<32x1xf32> to vector<32x16xf32>
    %732 = arith.mulf %730, %731 : vector<32x16xf32>
    %733 = vector.broadcast %710 : vector<32x1xf32> to vector<32x16xf32>
    %734 = arith.addf %732, %733 : vector<32x16xf32>
    %cst_300 = arith.constant 0.000000e+00 : f32
    %735 = vector.broadcast %cst_300 : f32 to vector<32x16xf32>
    %736 = arith.maximumf %734, %735 : vector<32x16xf32>
    %737 = vector.extract_strided_slice %736 {offsets = [0, 11], sizes = [32, 5], strides = [1, 1]} : vector<32x16xf32> to vector<32x5xf32>
    %738 = vector.extract_strided_slice %736 {offsets = [0, 0], sizes = [32, 11], strides = [1, 1]} : vector<32x16xf32> to vector<32x11xf32>
    %739 = tpu.concatenate %737, %738 in 1 : vector<32x5xf32>, vector<32x11xf32> -> vector<32x16xf32>
    %c88_301 = arith.constant 88 : index
    %c0_302 = arith.constant 0 : index
    %740 = vector.load %arg4[%c88_301, %c0_302] : memref<136x256xf32, #tpu.memory_space<vmem>>, vector<1x16xf32>
    %741 = vector.broadcast %740 : vector<1x16xf32> to vector<32x16xf32>
    %742 = arith.mulf %739, %741 : vector<32x16xf32>
    %c0_303 = arith.constant 0 : index
    %c0_304 = arith.constant 0 : index
    %743 = vector.load %arg7[%c0_303, %c0_304] : memref<392x256xf32, #tpu.memory_space<vmem>>, vector<32x16xf32>
    tpu.vector_store %arg7[%c0_303, %c0_304], %742 {strides = array<i32>} : memref<392x256xf32, #tpu.memory_space<vmem>>, vector<32x16xf32>,
    %744 = vector.extract_strided_slice %736 {offsets = [0, 12], sizes = [32, 4], strides = [1, 1]} : vector<32x16xf32> to vector<32x4xf32>
    %745 = vector.extract_strided_slice %736 {offsets = [0, 0], sizes = [32, 12], strides = [1, 1]} : vector<32x16xf32> to vector<32x12xf32>
    %746 = tpu.concatenate %744, %745 in 1 : vector<32x4xf32>, vector<32x12xf32> -> vector<32x16xf32>
    %c89_305 = arith.constant 89 : index
    %c0_306 = arith.constant 0 : index
    %747 = vector.load %arg4[%c89_305, %c0_306] : memref<136x256xf32, #tpu.memory_space<vmem>>, vector<1x16xf32>
    %748 = vector.broadcast %747 : vector<1x16xf32> to vector<32x16xf32>
    %749 = arith.mulf %746, %748 : vector<32x16xf32>
    %c32_307 = arith.constant 32 : index
    %c0_308 = arith.constant 0 : index
    %750 = vector.load %arg7[%c32_307, %c0_308] : memref<392x256xf32, #tpu.memory_space<vmem>>, vector<32x16xf32>
    tpu.vector_store %arg7[%c32_307, %c0_308], %749 {strides = array<i32>} : memref<392x256xf32, #tpu.memory_space<vmem>>, vector<32x16xf32>,
    %751 = vector.extract_strided_slice %736 {offsets = [0, 13], sizes = [32, 3], strides = [1, 1]} : vector<32x16xf32> to vector<32x3xf32>
    %752 = vector.extract_strided_slice %736 {offsets = [0, 0], sizes = [32, 13], strides = [1, 1]} : vector<32x16xf32> to vector<32x13xf32>
    %753 = tpu.concatenate %751, %752 in 1 : vector<32x3xf32>, vector<32x13xf32> -> vector<32x16xf32>
    %c90_309 = arith.constant 90 : index
    %c0_310 = arith.constant 0 : index
    %754 = vector.load %arg4[%c90_309, %c0_310] : memref<136x256xf32, #tpu.memory_space<vmem>>, vector<1x16xf32>
    %755 = vector.broadcast %754 : vector<1x16xf32> to vector<32x16xf32>
    %756 = arith.mulf %753, %755 : vector<32x16xf32>
    %c64_311 = arith.constant 64 : index
    %c0_312 = arith.constant 0 : index
    %757 = vector.load %arg7[%c64_311, %c0_312] : memref<392x256xf32, #tpu.memory_space<vmem>>, vector<32x16xf32>
    tpu.vector_store %arg7[%c64_311, %c0_312], %756 {strides = array<i32>} : memref<392x256xf32, #tpu.memory_space<vmem>>, vector<32x16xf32>,
    %758 = vector.extract_strided_slice %736 {offsets = [0, 15], sizes = [32, 1], strides = [1, 1]} : vector<32x16xf32> to vector<32x1xf32>
    %759 = vector.extract_strided_slice %736 {offsets = [0, 0], sizes = [32, 15], strides = [1, 1]} : vector<32x16xf32> to vector<32x15xf32>
    %760 = tpu.concatenate %758, %759 in 1 : vector<32x1xf32>, vector<32x15xf32> -> vector<32x16xf32>
    %c91_313 = arith.constant 91 : index
    %c0_314 = arith.constant 0 : index
    %761 = vector.load %arg4[%c91_313, %c0_314] : memref<136x256xf32, #tpu.memory_space<vmem>>, vector<1x16xf32>
    %762 = vector.broadcast %761 : vector<1x16xf32> to vector<32x16xf32>
    %763 = arith.mulf %760, %762 : vector<32x16xf32>
    %c96_315 = arith.constant 96 : index
    %c0_316 = arith.constant 0 : index
    %764 = vector.load %arg7[%c96_315, %c0_316] : memref<392x256xf32, #tpu.memory_space<vmem>>, vector<32x16xf32>
    tpu.vector_store %arg7[%c96_315, %c0_316], %763 {strides = array<i32>} : memref<392x256xf32, #tpu.memory_space<vmem>>, vector<32x16xf32>,
    %c128_317 = arith.constant 128 : index
    %c0_318 = arith.constant 0 : index
    %765 = vector.load %arg7[%c128_317, %c0_318] : memref<392x256xf32, #tpu.memory_space<vmem>>, vector<32x16xf32>
    tpu.vector_store %arg7[%c128_317, %c0_318], %736 {strides = array<i32>} : memref<392x256xf32, #tpu.memory_space<vmem>>, vector<32x16xf32>,
    %766 = vector.extract_strided_slice %736 {offsets = [0, 1], sizes = [32, 15], strides = [1, 1]} : vector<32x16xf32> to vector<32x15xf32>
    %767 = vector.extract_strided_slice %736 {offsets = [0, 0], sizes = [32, 1], strides = [1, 1]} : vector<32x16xf32> to vector<32x1xf32>
    %768 = tpu.concatenate %766, %767 in 1 : vector<32x15xf32>, vector<32x1xf32> -> vector<32x16xf32>
    %c93_319 = arith.constant 93 : index
    %c0_320 = arith.constant 0 : index
    %769 = vector.load %arg4[%c93_319, %c0_320] : memref<136x256xf32, #tpu.memory_space<vmem>>, vector<1x16xf32>
    %770 = vector.broadcast %769 : vector<1x16xf32> to vector<32x16xf32>
    %771 = arith.mulf %768, %770 : vector<32x16xf32>
    %c160_321 = arith.constant 160 : index
    %c0_322 = arith.constant 0 : index
    %772 = vector.load %arg7[%c160_321, %c0_322] : memref<392x256xf32, #tpu.memory_space<vmem>>, vector<32x16xf32>
    tpu.vector_store %arg7[%c160_321, %c0_322], %771 {strides = array<i32>} : memref<392x256xf32, #tpu.memory_space<vmem>>, vector<32x16xf32>,
    %773 = vector.extract_strided_slice %736 {offsets = [0, 3], sizes = [32, 13], strides = [1, 1]} : vector<32x16xf32> to vector<32x13xf32>
    %774 = vector.extract_strided_slice %736 {offsets = [0, 0], sizes = [32, 3], strides = [1, 1]} : vector<32x16xf32> to vector<32x3xf32>
    %775 = tpu.concatenate %773, %774 in 1 : vector<32x13xf32>, vector<32x3xf32> -> vector<32x16xf32>
    %c94_323 = arith.constant 94 : index
    %c0_324 = arith.constant 0 : index
    %776 = vector.load %arg4[%c94_323, %c0_324] : memref<136x256xf32, #tpu.memory_space<vmem>>, vector<1x16xf32>
    %777 = vector.broadcast %776 : vector<1x16xf32> to vector<32x16xf32>
    %778 = arith.mulf %775, %777 : vector<32x16xf32>
    %c192_325 = arith.constant 192 : index
    %c0_326 = arith.constant 0 : index
    %779 = vector.load %arg7[%c192_325, %c0_326] : memref<392x256xf32, #tpu.memory_space<vmem>>, vector<32x16xf32>
    tpu.vector_store %arg7[%c192_325, %c0_326], %778 {strides = array<i32>} : memref<392x256xf32, #tpu.memory_space<vmem>>, vector<32x16xf32>,
    %780 = vector.extract_strided_slice %736 {offsets = [0, 4], sizes = [32, 12], strides = [1, 1]} : vector<32x16xf32> to vector<32x12xf32>
    %781 = vector.extract_strided_slice %736 {offsets = [0, 0], sizes = [32, 4], strides = [1, 1]} : vector<32x16xf32> to vector<32x4xf32>
    %782 = tpu.concatenate %780, %781 in 1 : vector<32x12xf32>, vector<32x4xf32> -> vector<32x16xf32>
    %c95_327 = arith.constant 95 : index
    %c0_328 = arith.constant 0 : index
    %783 = vector.load %arg4[%c95_327, %c0_328] : memref<136x256xf32, #tpu.memory_space<vmem>>, vector<1x16xf32>
    %784 = vector.broadcast %783 : vector<1x16xf32> to vector<32x16xf32>
    %785 = arith.mulf %782, %784 : vector<32x16xf32>
    %c224_329 = arith.constant 224 : index
    %c0_330 = arith.constant 0 : index
    %786 = vector.load %arg7[%c224_329, %c0_330] : memref<392x256xf32, #tpu.memory_space<vmem>>, vector<32x16xf32>
    tpu.vector_store %arg7[%c224_329, %c0_330], %785 {strides = array<i32>} : memref<392x256xf32, #tpu.memory_space<vmem>>, vector<32x16xf32>,
    %787 = vector.extract_strided_slice %736 {offsets = [0, 5], sizes = [32, 11], strides = [1, 1]} : vector<32x16xf32> to vector<32x11xf32>
    %788 = vector.extract_strided_slice %736 {offsets = [0, 0], sizes = [32, 5], strides = [1, 1]} : vector<32x16xf32> to vector<32x5xf32>
    %789 = tpu.concatenate %787, %788 in 1 : vector<32x11xf32>, vector<32x5xf32> -> vector<32x16xf32>
    %c96_331 = arith.constant 96 : index
    %c0_332 = arith.constant 0 : index
    %790 = vector.load %arg4[%c96_331, %c0_332] : memref<136x256xf32, #tpu.memory_space<vmem>>, vector<1x16xf32>
    %791 = vector.broadcast %790 : vector<1x16xf32> to vector<32x16xf32>
    %792 = arith.mulf %789, %791 : vector<32x16xf32>
    %c256_333 = arith.constant 256 : index
    %c0_334 = arith.constant 0 : index
    %793 = vector.load %arg7[%c256_333, %c0_334] : memref<392x256xf32, #tpu.memory_space<vmem>>, vector<32x16xf32>
    tpu.vector_store %arg7[%c256_333, %c0_334], %792 {strides = array<i32>} : memref<392x256xf32, #tpu.memory_space<vmem>>, vector<32x16xf32>,
    %c88_335 = arith.constant 88 : index
    %c0_336 = arith.constant 0 : index
    %794 = vector.load %arg2[%c88_335, %c0_336] : memref<264x392xf32, #tpu.memory_space<vmem>>, vector<32x288xf32>
    %c0_337 = arith.constant 0 : index
    %c0_338 = arith.constant 0 : index
    %795 = vector.load %arg7[%c0_337, %c0_338] : memref<392x256xf32, #tpu.memory_space<vmem>>, vector<288x16xf32>
    %cst_339 = arith.constant dense<0.000000e+00> : vector<32x16xf32>
    %796 = tpu.matmul %794, %795, %cst_339 {dimension_numbers = #tpu.dot_dimension_numbers<[1], [0], [0], [1], [0, 0, 1, 1], [], []>} : vector<32x288xf32>, vector<288x16xf32>, vector<32x16xf32> -> vector<32x16xf32>
    %c88_340 = arith.constant 88 : index
    %c0_341 = arith.constant 0 : index
    %797 = vector.load %arg3[%c88_340, %c0_341] : memref<192x2xf32, #tpu.memory_space<vmem>>, vector<32x1xf32>
    %c88_342 = arith.constant 88 : index
    %c1_343 = arith.constant 1 : index
    %798 = vector.load %arg3[%c88_342, %c1_343] : memref<192x2xf32, #tpu.memory_space<vmem>>, vector<32x1xf32>
    %cst_344 = arith.constant dense<0.000000e+00> : vector<32xf32>
    %799 = vector.multi_reduction <add>, %796, %cst_344 [1] : vector<32x16xf32> to vector<32xf32>
    %800 = vector.shape_cast %799 : vector<32xf32> to vector<32x1xf32>
    %cst_345 = arith.constant 6.250000e-02 : f32
    %801 = vector.broadcast %cst_345 : f32 to vector<32x1xf32>
    %802 = arith.mulf %800, %801 : vector<32x1xf32>
    %803 = arith.mulf %796, %796 : vector<32x16xf32>
    %cst_346 = arith.constant dense<0.000000e+00> : vector<32xf32>
    %804 = vector.multi_reduction <add>, %803, %cst_346 [1] : vector<32x16xf32> to vector<32xf32>
    %805 = vector.shape_cast %804 : vector<32xf32> to vector<32x1xf32>
    %cst_347 = arith.constant 6.250000e-02 : f32
    %806 = vector.broadcast %cst_347 : f32 to vector<32x1xf32>
    %807 = arith.mulf %805, %806 : vector<32x1xf32>
    %808 = arith.mulf %802, %802 : vector<32x1xf32>
    %809 = arith.subf %807, %808 : vector<32x1xf32>
    %cst_348 = arith.constant 0.000000e+00 : f32
    %810 = vector.broadcast %cst_348 : f32 to vector<32x1xf32>
    %811 = arith.maximumf %809, %810 : vector<32x1xf32>
    %812 = vector.broadcast %802 : vector<32x1xf32> to vector<32x16xf32>
    %813 = arith.subf %796, %812 : vector<32x16xf32>
    %cst_349 = arith.constant 9.99999974E-6 : f32
    %814 = vector.broadcast %cst_349 : f32 to vector<32x1xf32>
    %815 = arith.addf %811, %814 : vector<32x1xf32>
    %816 = math.rsqrt %815 : vector<32x1xf32>
    %817 = vector.broadcast %816 : vector<32x1xf32> to vector<32x16xf32>
    %818 = arith.mulf %813, %817 : vector<32x16xf32>
    %819 = vector.broadcast %797 : vector<32x1xf32> to vector<32x16xf32>
    %820 = arith.mulf %818, %819 : vector<32x16xf32>
    %821 = vector.broadcast %798 : vector<32x1xf32> to vector<32x16xf32>
    %822 = arith.addf %820, %821 : vector<32x16xf32>
    %cst_350 = arith.constant 0.000000e+00 : f32
    %823 = vector.broadcast %cst_350 : f32 to vector<32x16xf32>
    %824 = arith.maximumf %822, %823 : vector<32x16xf32>
    %825 = vector.extract_strided_slice %824 {offsets = [0, 11], sizes = [32, 5], strides = [1, 1]} : vector<32x16xf32> to vector<32x5xf32>
    %826 = vector.extract_strided_slice %824 {offsets = [0, 0], sizes = [32, 11], strides = [1, 1]} : vector<32x16xf32> to vector<32x11xf32>
    %827 = tpu.concatenate %825, %826 in 1 : vector<32x5xf32>, vector<32x11xf32> -> vector<32x16xf32>
    %c88_351 = arith.constant 88 : index
    %c0_352 = arith.constant 0 : index
    %828 = vector.load %arg4[%c88_351, %c0_352] : memref<136x256xf32, #tpu.memory_space<vmem>>, vector<1x16xf32>
    %829 = vector.broadcast %828 : vector<1x16xf32> to vector<32x16xf32>
    %830 = arith.mulf %827, %829 : vector<32x16xf32>
    %c0_353 = arith.constant 0 : index
    %c0_354 = arith.constant 0 : index
    %831 = vector.load %arg7[%c0_353, %c0_354] : memref<392x256xf32, #tpu.memory_space<vmem>>, vector<32x16xf32>
    tpu.vector_store %arg7[%c0_353, %c0_354], %830 {strides = array<i32>} : memref<392x256xf32, #tpu.memory_space<vmem>>, vector<32x16xf32>,
    %832 = vector.extract_strided_slice %824 {offsets = [0, 12], sizes = [32, 4], strides = [1, 1]} : vector<32x16xf32> to vector<32x4xf32>
    %833 = vector.extract_strided_slice %824 {offsets = [0, 0], sizes = [32, 12], strides = [1, 1]} : vector<32x16xf32> to vector<32x12xf32>
    %834 = tpu.concatenate %832, %833 in 1 : vector<32x4xf32>, vector<32x12xf32> -> vector<32x16xf32>
    %c89_355 = arith.constant 89 : index
    %c0_356 = arith.constant 0 : index
    %835 = vector.load %arg4[%c89_355, %c0_356] : memref<136x256xf32, #tpu.memory_space<vmem>>, vector<1x16xf32>
    %836 = vector.broadcast %835 : vector<1x16xf32> to vector<32x16xf32>
    %837 = arith.mulf %834, %836 : vector<32x16xf32>
    %c32_357 = arith.constant 32 : index
    %c0_358 = arith.constant 0 : index
    %838 = vector.load %arg7[%c32_357, %c0_358] : memref<392x256xf32, #tpu.memory_space<vmem>>, vector<32x16xf32>
    tpu.vector_store %arg7[%c32_357, %c0_358], %837 {strides = array<i32>} : memref<392x256xf32, #tpu.memory_space<vmem>>, vector<32x16xf32>,
    %839 = vector.extract_strided_slice %824 {offsets = [0, 13], sizes = [32, 3], strides = [1, 1]} : vector<32x16xf32> to vector<32x3xf32>
    %840 = vector.extract_strided_slice %824 {offsets = [0, 0], sizes = [32, 13], strides = [1, 1]} : vector<32x16xf32> to vector<32x13xf32>
    %841 = tpu.concatenate %839, %840 in 1 : vector<32x3xf32>, vector<32x13xf32> -> vector<32x16xf32>
    %c90_359 = arith.constant 90 : index
    %c0_360 = arith.constant 0 : index
    %842 = vector.load %arg4[%c90_359, %c0_360] : memref<136x256xf32, #tpu.memory_space<vmem>>, vector<1x16xf32>
    %843 = vector.broadcast %842 : vector<1x16xf32> to vector<32x16xf32>
    %844 = arith.mulf %841, %843 : vector<32x16xf32>
    %c64_361 = arith.constant 64 : index
    %c0_362 = arith.constant 0 : index
    %845 = vector.load %arg7[%c64_361, %c0_362] : memref<392x256xf32, #tpu.memory_space<vmem>>, vector<32x16xf32>
    tpu.vector_store %arg7[%c64_361, %c0_362], %844 {strides = array<i32>} : memref<392x256xf32, #tpu.memory_space<vmem>>, vector<32x16xf32>,
    %846 = vector.extract_strided_slice %824 {offsets = [0, 15], sizes = [32, 1], strides = [1, 1]} : vector<32x16xf32> to vector<32x1xf32>
    %847 = vector.extract_strided_slice %824 {offsets = [0, 0], sizes = [32, 15], strides = [1, 1]} : vector<32x16xf32> to vector<32x15xf32>
    %848 = tpu.concatenate %846, %847 in 1 : vector<32x1xf32>, vector<32x15xf32> -> vector<32x16xf32>
    %c91_363 = arith.constant 91 : index
    %c0_364 = arith.constant 0 : index
    %849 = vector.load %arg4[%c91_363, %c0_364] : memref<136x256xf32, #tpu.memory_space<vmem>>, vector<1x16xf32>
    %850 = vector.broadcast %849 : vector<1x16xf32> to vector<32x16xf32>
    %851 = arith.mulf %848, %850 : vector<32x16xf32>
    %c96_365 = arith.constant 96 : index
    %c0_366 = arith.constant 0 : index
    %852 = vector.load %arg7[%c96_365, %c0_366] : memref<392x256xf32, #tpu.memory_space<vmem>>, vector<32x16xf32>
    tpu.vector_store %arg7[%c96_365, %c0_366], %851 {strides = array<i32>} : memref<392x256xf32, #tpu.memory_space<vmem>>, vector<32x16xf32>,
    %c128_367 = arith.constant 128 : index
    %c0_368 = arith.constant 0 : index
    %853 = vector.load %arg7[%c128_367, %c0_368] : memref<392x256xf32, #tpu.memory_space<vmem>>, vector<32x16xf32>
    tpu.vector_store %arg7[%c128_367, %c0_368], %824 {strides = array<i32>} : memref<392x256xf32, #tpu.memory_space<vmem>>, vector<32x16xf32>,
    %854 = vector.extract_strided_slice %824 {offsets = [0, 1], sizes = [32, 15], strides = [1, 1]} : vector<32x16xf32> to vector<32x15xf32>
    %855 = vector.extract_strided_slice %824 {offsets = [0, 0], sizes = [32, 1], strides = [1, 1]} : vector<32x16xf32> to vector<32x1xf32>
    %856 = tpu.concatenate %854, %855 in 1 : vector<32x15xf32>, vector<32x1xf32> -> vector<32x16xf32>
    %c93_369 = arith.constant 93 : index
    %c0_370 = arith.constant 0 : index
    %857 = vector.load %arg4[%c93_369, %c0_370] : memref<136x256xf32, #tpu.memory_space<vmem>>, vector<1x16xf32>
    %858 = vector.broadcast %857 : vector<1x16xf32> to vector<32x16xf32>
    %859 = arith.mulf %856, %858 : vector<32x16xf32>
    %c160_371 = arith.constant 160 : index
    %c0_372 = arith.constant 0 : index
    %860 = vector.load %arg7[%c160_371, %c0_372] : memref<392x256xf32, #tpu.memory_space<vmem>>, vector<32x16xf32>
    tpu.vector_store %arg7[%c160_371, %c0_372], %859 {strides = array<i32>} : memref<392x256xf32, #tpu.memory_space<vmem>>, vector<32x16xf32>,
    %861 = vector.extract_strided_slice %824 {offsets = [0, 3], sizes = [32, 13], strides = [1, 1]} : vector<32x16xf32> to vector<32x13xf32>
    %862 = vector.extract_strided_slice %824 {offsets = [0, 0], sizes = [32, 3], strides = [1, 1]} : vector<32x16xf32> to vector<32x3xf32>
    %863 = tpu.concatenate %861, %862 in 1 : vector<32x13xf32>, vector<32x3xf32> -> vector<32x16xf32>
    %c94_373 = arith.constant 94 : index
    %c0_374 = arith.constant 0 : index
    %864 = vector.load %arg4[%c94_373, %c0_374] : memref<136x256xf32, #tpu.memory_space<vmem>>, vector<1x16xf32>
    %865 = vector.broadcast %864 : vector<1x16xf32> to vector<32x16xf32>
    %866 = arith.mulf %863, %865 : vector<32x16xf32>
    %c192_375 = arith.constant 192 : index
    %c0_376 = arith.constant 0 : index
    %867 = vector.load %arg7[%c192_375, %c0_376] : memref<392x256xf32, #tpu.memory_space<vmem>>, vector<32x16xf32>
    tpu.vector_store %arg7[%c192_375, %c0_376], %866 {strides = array<i32>} : memref<392x256xf32, #tpu.memory_space<vmem>>, vector<32x16xf32>,
    %868 = vector.extract_strided_slice %824 {offsets = [0, 4], sizes = [32, 12], strides = [1, 1]} : vector<32x16xf32> to vector<32x12xf32>
    %869 = vector.extract_strided_slice %824 {offsets = [0, 0], sizes = [32, 4], strides = [1, 1]} : vector<32x16xf32> to vector<32x4xf32>
    %870 = tpu.concatenate %868, %869 in 1 : vector<32x12xf32>, vector<32x4xf32> -> vector<32x16xf32>
    %c95_377 = arith.constant 95 : index
    %c0_378 = arith.constant 0 : index
    %871 = vector.load %arg4[%c95_377, %c0_378] : memref<136x256xf32, #tpu.memory_space<vmem>>, vector<1x16xf32>
    %872 = vector.broadcast %871 : vector<1x16xf32> to vector<32x16xf32>
    %873 = arith.mulf %870, %872 : vector<32x16xf32>
    %c224_379 = arith.constant 224 : index
    %c0_380 = arith.constant 0 : index
    %874 = vector.load %arg7[%c224_379, %c0_380] : memref<392x256xf32, #tpu.memory_space<vmem>>, vector<32x16xf32>
    tpu.vector_store %arg7[%c224_379, %c0_380], %873 {strides = array<i32>} : memref<392x256xf32, #tpu.memory_space<vmem>>, vector<32x16xf32>,
    %875 = vector.extract_strided_slice %824 {offsets = [0, 5], sizes = [32, 11], strides = [1, 1]} : vector<32x16xf32> to vector<32x11xf32>
    %876 = vector.extract_strided_slice %824 {offsets = [0, 0], sizes = [32, 5], strides = [1, 1]} : vector<32x16xf32> to vector<32x5xf32>
    %877 = tpu.concatenate %875, %876 in 1 : vector<32x11xf32>, vector<32x5xf32> -> vector<32x16xf32>
    %c96_381 = arith.constant 96 : index
    %c0_382 = arith.constant 0 : index
    %878 = vector.load %arg4[%c96_381, %c0_382] : memref<136x256xf32, #tpu.memory_space<vmem>>, vector<1x16xf32>
    %879 = vector.broadcast %878 : vector<1x16xf32> to vector<32x16xf32>
    %880 = arith.mulf %877, %879 : vector<32x16xf32>
    %c256_383 = arith.constant 256 : index
    %c0_384 = arith.constant 0 : index
    %881 = vector.load %arg7[%c256_383, %c0_384] : memref<392x256xf32, #tpu.memory_space<vmem>>, vector<32x16xf32>
    tpu.vector_store %arg7[%c256_383, %c0_384], %880 {strides = array<i32>} : memref<392x256xf32, #tpu.memory_space<vmem>>, vector<32x16xf32>,
    %c120_385 = arith.constant 120 : index
    %c0_386 = arith.constant 0 : index
    %882 = vector.load %arg2[%c120_385, %c0_386] : memref<264x392xf32, #tpu.memory_space<vmem>>, vector<32x288xf32>
    %c0_387 = arith.constant 0 : index
    %c0_388 = arith.constant 0 : index
    %883 = vector.load %arg7[%c0_387, %c0_388] : memref<392x256xf32, #tpu.memory_space<vmem>>, vector<288x16xf32>
    %cst_389 = arith.constant dense<0.000000e+00> : vector<32x16xf32>
    %884 = tpu.matmul %882, %883, %cst_389 {dimension_numbers = #tpu.dot_dimension_numbers<[1], [0], [0], [1], [0, 0, 1, 1], [], []>} : vector<32x288xf32>, vector<288x16xf32>, vector<32x16xf32> -> vector<32x16xf32>
    %c120_390 = arith.constant 120 : index
    %c0_391 = arith.constant 0 : index
    %885 = vector.load %arg3[%c120_390, %c0_391] : memref<192x2xf32, #tpu.memory_space<vmem>>, vector<32x1xf32>
    %c120_392 = arith.constant 120 : index
    %c1_393 = arith.constant 1 : index
    %886 = vector.load %arg3[%c120_392, %c1_393] : memref<192x2xf32, #tpu.memory_space<vmem>>, vector<32x1xf32>
    %cst_394 = arith.constant dense<0.000000e+00> : vector<32xf32>
    %887 = vector.multi_reduction <add>, %884, %cst_394 [1] : vector<32x16xf32> to vector<32xf32>
    %888 = vector.shape_cast %887 : vector<32xf32> to vector<32x1xf32>
    %cst_395 = arith.constant 6.250000e-02 : f32
    %889 = vector.broadcast %cst_395 : f32 to vector<32x1xf32>
    %890 = arith.mulf %888, %889 : vector<32x1xf32>
    %891 = arith.mulf %884, %884 : vector<32x16xf32>
    %cst_396 = arith.constant dense<0.000000e+00> : vector<32xf32>
    %892 = vector.multi_reduction <add>, %891, %cst_396 [1] : vector<32x16xf32> to vector<32xf32>
    %893 = vector.shape_cast %892 : vector<32xf32> to vector<32x1xf32>
    %cst_397 = arith.constant 6.250000e-02 : f32
    %894 = vector.broadcast %cst_397 : f32 to vector<32x1xf32>
    %895 = arith.mulf %893, %894 : vector<32x1xf32>
    %896 = arith.mulf %890, %890 : vector<32x1xf32>
    %897 = arith.subf %895, %896 : vector<32x1xf32>
    %cst_398 = arith.constant 0.000000e+00 : f32
    %898 = vector.broadcast %cst_398 : f32 to vector<32x1xf32>
    %899 = arith.maximumf %897, %898 : vector<32x1xf32>
    %900 = vector.broadcast %890 : vector<32x1xf32> to vector<32x16xf32>
    %901 = arith.subf %884, %900 : vector<32x16xf32>
    %cst_399 = arith.constant 9.99999974E-6 : f32
    %902 = vector.broadcast %cst_399 : f32 to vector<32x1xf32>
    %903 = arith.addf %899, %902 : vector<32x1xf32>
    %904 = math.rsqrt %903 : vector<32x1xf32>
    %905 = vector.broadcast %904 : vector<32x1xf32> to vector<32x16xf32>
    %906 = arith.mulf %901, %905 : vector<32x16xf32>
    %907 = vector.broadcast %885 : vector<32x1xf32> to vector<32x16xf32>
    %908 = arith.mulf %906, %907 : vector<32x16xf32>
    %909 = vector.broadcast %886 : vector<32x1xf32> to vector<32x16xf32>
    %910 = arith.addf %908, %909 : vector<32x16xf32>
    %911 = arith.addf %910, %736 : vector<32x16xf32>
    %912 = vector.extract_strided_slice %911 {offsets = [0, 11], sizes = [32, 5], strides = [1, 1]} : vector<32x16xf32> to vector<32x5xf32>
    %913 = vector.extract_strided_slice %911 {offsets = [0, 0], sizes = [32, 11], strides = [1, 1]} : vector<32x16xf32> to vector<32x11xf32>
    %914 = tpu.concatenate %912, %913 in 1 : vector<32x5xf32>, vector<32x11xf32> -> vector<32x16xf32>
    %c88_400 = arith.constant 88 : index
    %c0_401 = arith.constant 0 : index
    %915 = vector.load %arg4[%c88_400, %c0_401] : memref<136x256xf32, #tpu.memory_space<vmem>>, vector<1x16xf32>
    %916 = vector.broadcast %915 : vector<1x16xf32> to vector<32x16xf32>
    %917 = arith.mulf %914, %916 : vector<32x16xf32>
    %c0_402 = arith.constant 0 : index
    %c0_403 = arith.constant 0 : index
    %918 = vector.load %arg7[%c0_402, %c0_403] : memref<392x256xf32, #tpu.memory_space<vmem>>, vector<32x16xf32>
    tpu.vector_store %arg7[%c0_402, %c0_403], %917 {strides = array<i32>} : memref<392x256xf32, #tpu.memory_space<vmem>>, vector<32x16xf32>,
    %919 = vector.extract_strided_slice %911 {offsets = [0, 12], sizes = [32, 4], strides = [1, 1]} : vector<32x16xf32> to vector<32x4xf32>
    %920 = vector.extract_strided_slice %911 {offsets = [0, 0], sizes = [32, 12], strides = [1, 1]} : vector<32x16xf32> to vector<32x12xf32>
    %921 = tpu.concatenate %919, %920 in 1 : vector<32x4xf32>, vector<32x12xf32> -> vector<32x16xf32>
    %c89_404 = arith.constant 89 : index
    %c0_405 = arith.constant 0 : index
    %922 = vector.load %arg4[%c89_404, %c0_405] : memref<136x256xf32, #tpu.memory_space<vmem>>, vector<1x16xf32>
    %923 = vector.broadcast %922 : vector<1x16xf32> to vector<32x16xf32>
    %924 = arith.mulf %921, %923 : vector<32x16xf32>
    %c32_406 = arith.constant 32 : index
    %c0_407 = arith.constant 0 : index
    %925 = vector.load %arg7[%c32_406, %c0_407] : memref<392x256xf32, #tpu.memory_space<vmem>>, vector<32x16xf32>
    tpu.vector_store %arg7[%c32_406, %c0_407], %924 {strides = array<i32>} : memref<392x256xf32, #tpu.memory_space<vmem>>, vector<32x16xf32>,
    %926 = vector.extract_strided_slice %911 {offsets = [0, 13], sizes = [32, 3], strides = [1, 1]} : vector<32x16xf32> to vector<32x3xf32>
    %927 = vector.extract_strided_slice %911 {offsets = [0, 0], sizes = [32, 13], strides = [1, 1]} : vector<32x16xf32> to vector<32x13xf32>
    %928 = tpu.concatenate %926, %927 in 1 : vector<32x3xf32>, vector<32x13xf32> -> vector<32x16xf32>
    %c90_408 = arith.constant 90 : index
    %c0_409 = arith.constant 0 : index
    %929 = vector.load %arg4[%c90_408, %c0_409] : memref<136x256xf32, #tpu.memory_space<vmem>>, vector<1x16xf32>
    %930 = vector.broadcast %929 : vector<1x16xf32> to vector<32x16xf32>
    %931 = arith.mulf %928, %930 : vector<32x16xf32>
    %c64_410 = arith.constant 64 : index
    %c0_411 = arith.constant 0 : index
    %932 = vector.load %arg7[%c64_410, %c0_411] : memref<392x256xf32, #tpu.memory_space<vmem>>, vector<32x16xf32>
    tpu.vector_store %arg7[%c64_410, %c0_411], %931 {strides = array<i32>} : memref<392x256xf32, #tpu.memory_space<vmem>>, vector<32x16xf32>,
    %933 = vector.extract_strided_slice %911 {offsets = [0, 15], sizes = [32, 1], strides = [1, 1]} : vector<32x16xf32> to vector<32x1xf32>
    %934 = vector.extract_strided_slice %911 {offsets = [0, 0], sizes = [32, 15], strides = [1, 1]} : vector<32x16xf32> to vector<32x15xf32>
    %935 = tpu.concatenate %933, %934 in 1 : vector<32x1xf32>, vector<32x15xf32> -> vector<32x16xf32>
    %c91_412 = arith.constant 91 : index
    %c0_413 = arith.constant 0 : index
    %936 = vector.load %arg4[%c91_412, %c0_413] : memref<136x256xf32, #tpu.memory_space<vmem>>, vector<1x16xf32>
    %937 = vector.broadcast %936 : vector<1x16xf32> to vector<32x16xf32>
    %938 = arith.mulf %935, %937 : vector<32x16xf32>
    %c96_414 = arith.constant 96 : index
    %c0_415 = arith.constant 0 : index
    %939 = vector.load %arg7[%c96_414, %c0_415] : memref<392x256xf32, #tpu.memory_space<vmem>>, vector<32x16xf32>
    tpu.vector_store %arg7[%c96_414, %c0_415], %938 {strides = array<i32>} : memref<392x256xf32, #tpu.memory_space<vmem>>, vector<32x16xf32>,
    %c128_416 = arith.constant 128 : index
    %c0_417 = arith.constant 0 : index
    %940 = vector.load %arg7[%c128_416, %c0_417] : memref<392x256xf32, #tpu.memory_space<vmem>>, vector<32x16xf32>
    tpu.vector_store %arg7[%c128_416, %c0_417], %911 {strides = array<i32>} : memref<392x256xf32, #tpu.memory_space<vmem>>, vector<32x16xf32>,
    %941 = vector.extract_strided_slice %911 {offsets = [0, 1], sizes = [32, 15], strides = [1, 1]} : vector<32x16xf32> to vector<32x15xf32>
    %942 = vector.extract_strided_slice %911 {offsets = [0, 0], sizes = [32, 1], strides = [1, 1]} : vector<32x16xf32> to vector<32x1xf32>
    %943 = tpu.concatenate %941, %942 in 1 : vector<32x15xf32>, vector<32x1xf32> -> vector<32x16xf32>
    %c93_418 = arith.constant 93 : index
    %c0_419 = arith.constant 0 : index
    %944 = vector.load %arg4[%c93_418, %c0_419] : memref<136x256xf32, #tpu.memory_space<vmem>>, vector<1x16xf32>
    %945 = vector.broadcast %944 : vector<1x16xf32> to vector<32x16xf32>
    %946 = arith.mulf %943, %945 : vector<32x16xf32>
    %c160_420 = arith.constant 160 : index
    %c0_421 = arith.constant 0 : index
    %947 = vector.load %arg7[%c160_420, %c0_421] : memref<392x256xf32, #tpu.memory_space<vmem>>, vector<32x16xf32>
    tpu.vector_store %arg7[%c160_420, %c0_421], %946 {strides = array<i32>} : memref<392x256xf32, #tpu.memory_space<vmem>>, vector<32x16xf32>,
    %948 = vector.extract_strided_slice %911 {offsets = [0, 3], sizes = [32, 13], strides = [1, 1]} : vector<32x16xf32> to vector<32x13xf32>
    %949 = vector.extract_strided_slice %911 {offsets = [0, 0], sizes = [32, 3], strides = [1, 1]} : vector<32x16xf32> to vector<32x3xf32>
    %950 = tpu.concatenate %948, %949 in 1 : vector<32x13xf32>, vector<32x3xf32> -> vector<32x16xf32>
    %c94_422 = arith.constant 94 : index
    %c0_423 = arith.constant 0 : index
    %951 = vector.load %arg4[%c94_422, %c0_423] : memref<136x256xf32, #tpu.memory_space<vmem>>, vector<1x16xf32>
    %952 = vector.broadcast %951 : vector<1x16xf32> to vector<32x16xf32>
    %953 = arith.mulf %950, %952 : vector<32x16xf32>
    %c192_424 = arith.constant 192 : index
    %c0_425 = arith.constant 0 : index
    %954 = vector.load %arg7[%c192_424, %c0_425] : memref<392x256xf32, #tpu.memory_space<vmem>>, vector<32x16xf32>
    tpu.vector_store %arg7[%c192_424, %c0_425], %953 {strides = array<i32>} : memref<392x256xf32, #tpu.memory_space<vmem>>, vector<32x16xf32>,
    %955 = vector.extract_strided_slice %911 {offsets = [0, 4], sizes = [32, 12], strides = [1, 1]} : vector<32x16xf32> to vector<32x12xf32>
    %956 = vector.extract_strided_slice %911 {offsets = [0, 0], sizes = [32, 4], strides = [1, 1]} : vector<32x16xf32> to vector<32x4xf32>
    %957 = tpu.concatenate %955, %956 in 1 : vector<32x12xf32>, vector<32x4xf32> -> vector<32x16xf32>
    %c95_426 = arith.constant 95 : index
    %c0_427 = arith.constant 0 : index
    %958 = vector.load %arg4[%c95_426, %c0_427] : memref<136x256xf32, #tpu.memory_space<vmem>>, vector<1x16xf32>
    %959 = vector.broadcast %958 : vector<1x16xf32> to vector<32x16xf32>
    %960 = arith.mulf %957, %959 : vector<32x16xf32>
    %c224_428 = arith.constant 224 : index
    %c0_429 = arith.constant 0 : index
    %961 = vector.load %arg7[%c224_428, %c0_429] : memref<392x256xf32, #tpu.memory_space<vmem>>, vector<32x16xf32>
    tpu.vector_store %arg7[%c224_428, %c0_429], %960 {strides = array<i32>} : memref<392x256xf32, #tpu.memory_space<vmem>>, vector<32x16xf32>,
    %962 = vector.extract_strided_slice %911 {offsets = [0, 5], sizes = [32, 11], strides = [1, 1]} : vector<32x16xf32> to vector<32x11xf32>
    %963 = vector.extract_strided_slice %911 {offsets = [0, 0], sizes = [32, 5], strides = [1, 1]} : vector<32x16xf32> to vector<32x5xf32>
    %964 = tpu.concatenate %962, %963 in 1 : vector<32x11xf32>, vector<32x5xf32> -> vector<32x16xf32>
    %c96_430 = arith.constant 96 : index
    %c0_431 = arith.constant 0 : index
    %965 = vector.load %arg4[%c96_430, %c0_431] : memref<136x256xf32, #tpu.memory_space<vmem>>, vector<1x16xf32>
    %966 = vector.broadcast %965 : vector<1x16xf32> to vector<32x16xf32>
    %967 = arith.mulf %964, %966 : vector<32x16xf32>
    %c256_432 = arith.constant 256 : index
    %c0_433 = arith.constant 0 : index
    %968 = vector.load %arg7[%c256_432, %c0_433] : memref<392x256xf32, #tpu.memory_space<vmem>>, vector<32x16xf32>
    tpu.vector_store %arg7[%c256_432, %c0_433], %967 {strides = array<i32>} : memref<392x256xf32, #tpu.memory_space<vmem>>, vector<32x16xf32>,
    %c152_434 = arith.constant 152 : index
    %c0_435 = arith.constant 0 : index
    %969 = vector.load %arg2[%c152_434, %c0_435] : memref<264x392xf32, #tpu.memory_space<vmem>>, vector<64x288xf32>
    %c0_436 = arith.constant 0 : index
    %c0_437 = arith.constant 0 : index
    %970 = vector.load %arg7[%c0_436, %c0_437] : memref<392x256xf32, #tpu.memory_space<vmem>>, vector<288x16xf32>
    %cst_438 = arith.constant dense<0.000000e+00> : vector<64x16xf32>
    %971 = tpu.matmul %969, %970, %cst_438 {dimension_numbers = #tpu.dot_dimension_numbers<[1], [0], [0], [1], [0, 0, 1, 1], [], []>} : vector<64x288xf32>, vector<288x16xf32>, vector<64x16xf32> -> vector<64x16xf32>
    %972 = vector.extract_strided_slice %971 {offsets = [0, 0], sizes = [16, 16], strides = [1, 1]} : vector<64x16xf32> to vector<16x16xf32>
    %c320_439 = arith.constant 320 : index
    %c0_440 = arith.constant 0 : index
    %973 = vector.load %arg5[%c320_439, %c0_440] : memref<640x256xf32, #tpu.memory_space<vmem>>, vector<16x64xf32>
    %cst_441 = arith.constant dense<0.000000e+00> : vector<16x64xf32>
    %974 = tpu.matmul %972, %973, %cst_441 {dimension_numbers = #tpu.dot_dimension_numbers<[1], [0], [0], [1], [0, 0, 1, 1], [], []>} : vector<16x16xf32>, vector<16x64xf32>, vector<16x64xf32> -> vector<16x64xf32>
    %975 = vector.extract_strided_slice %971 {offsets = [16, 0], sizes = [16, 16], strides = [1, 1]} : vector<64x16xf32> to vector<16x16xf32>
    %c336_442 = arith.constant 336 : index
    %c0_443 = arith.constant 0 : index
    %976 = vector.load %arg5[%c336_442, %c0_443] : memref<640x256xf32, #tpu.memory_space<vmem>>, vector<16x64xf32>
    %cst_444 = arith.constant dense<0.000000e+00> : vector<16x64xf32>
    %977 = tpu.matmul %975, %976, %cst_444 {dimension_numbers = #tpu.dot_dimension_numbers<[1], [0], [0], [1], [0, 0, 1, 1], [], []>} : vector<16x16xf32>, vector<16x64xf32>, vector<16x64xf32> -> vector<16x64xf32>
    %978 = arith.addf %974, %977 : vector<16x64xf32>
    %979 = vector.extract_strided_slice %971 {offsets = [32, 0], sizes = [16, 16], strides = [1, 1]} : vector<64x16xf32> to vector<16x16xf32>
    %c352_445 = arith.constant 352 : index
    %c0_446 = arith.constant 0 : index
    %980 = vector.load %arg5[%c352_445, %c0_446] : memref<640x256xf32, #tpu.memory_space<vmem>>, vector<16x64xf32>
    %cst_447 = arith.constant dense<0.000000e+00> : vector<16x64xf32>
    %981 = tpu.matmul %979, %980, %cst_447 {dimension_numbers = #tpu.dot_dimension_numbers<[1], [0], [0], [1], [0, 0, 1, 1], [], []>} : vector<16x16xf32>, vector<16x64xf32>, vector<16x64xf32> -> vector<16x64xf32>
    %982 = arith.addf %978, %981 : vector<16x64xf32>
    %983 = vector.extract_strided_slice %971 {offsets = [48, 0], sizes = [16, 16], strides = [1, 1]} : vector<64x16xf32> to vector<16x16xf32>
    %c368_448 = arith.constant 368 : index
    %c0_449 = arith.constant 0 : index
    %984 = vector.load %arg5[%c368_448, %c0_449] : memref<640x256xf32, #tpu.memory_space<vmem>>, vector<16x64xf32>
    %cst_450 = arith.constant dense<0.000000e+00> : vector<16x64xf32>
    %985 = tpu.matmul %983, %984, %cst_450 {dimension_numbers = #tpu.dot_dimension_numbers<[1], [0], [0], [1], [0, 0, 1, 1], [], []>} : vector<16x16xf32>, vector<16x64xf32>, vector<16x64xf32> -> vector<16x64xf32>
    %986 = arith.addf %982, %985 : vector<16x64xf32>
    %c152_451 = arith.constant 152 : index
    %c0_452 = arith.constant 0 : index
    %987 = vector.load %arg3[%c152_451, %c0_452] : memref<192x2xf32, #tpu.memory_space<vmem>>, vector<16x1xf32>
    %c152_453 = arith.constant 152 : index
    %c1_454 = arith.constant 1 : index
    %988 = vector.load %arg3[%c152_453, %c1_454] : memref<192x2xf32, #tpu.memory_space<vmem>>, vector<16x1xf32>
    %cst_455 = arith.constant dense<0.000000e+00> : vector<16xf32>
    %989 = vector.multi_reduction <add>, %986, %cst_455 [1] : vector<16x64xf32> to vector<16xf32>
    %990 = vector.shape_cast %989 : vector<16xf32> to vector<16x1xf32>
    %cst_456 = arith.constant 1.562500e-02 : f32
    %991 = vector.broadcast %cst_456 : f32 to vector<16x1xf32>
    %992 = arith.mulf %990, %991 : vector<16x1xf32>
    %993 = arith.mulf %986, %986 : vector<16x64xf32>
    %cst_457 = arith.constant dense<0.000000e+00> : vector<16xf32>
    %994 = vector.multi_reduction <add>, %993, %cst_457 [1] : vector<16x64xf32> to vector<16xf32>
    %995 = vector.shape_cast %994 : vector<16xf32> to vector<16x1xf32>
    %cst_458 = arith.constant 1.562500e-02 : f32
    %996 = vector.broadcast %cst_458 : f32 to vector<16x1xf32>
    %997 = arith.mulf %995, %996 : vector<16x1xf32>
    %998 = arith.mulf %992, %992 : vector<16x1xf32>
    %999 = arith.subf %997, %998 : vector<16x1xf32>
    %cst_459 = arith.constant 0.000000e+00 : f32
    %1000 = vector.broadcast %cst_459 : f32 to vector<16x1xf32>
    %1001 = arith.maximumf %999, %1000 : vector<16x1xf32>
    %1002 = vector.broadcast %992 : vector<16x1xf32> to vector<16x64xf32>
    %1003 = arith.subf %986, %1002 : vector<16x64xf32>
    %cst_460 = arith.constant 9.99999974E-6 : f32
    %1004 = vector.broadcast %cst_460 : f32 to vector<16x1xf32>
    %1005 = arith.addf %1001, %1004 : vector<16x1xf32>
    %1006 = math.rsqrt %1005 : vector<16x1xf32>
    %1007 = vector.broadcast %1006 : vector<16x1xf32> to vector<16x64xf32>
    %1008 = arith.mulf %1003, %1007 : vector<16x64xf32>
    %1009 = vector.broadcast %987 : vector<16x1xf32> to vector<16x64xf32>
    %1010 = arith.mulf %1008, %1009 : vector<16x64xf32>
    %1011 = vector.broadcast %988 : vector<16x1xf32> to vector<16x64xf32>
    %1012 = arith.addf %1010, %1011 : vector<16x64xf32>
    %cst_461 = arith.constant 0.000000e+00 : f32
    %1013 = vector.broadcast %cst_461 : f32 to vector<16x64xf32>
    %1014 = arith.maximumf %1012, %1013 : vector<16x64xf32>
    %1015 = vector.extract_strided_slice %1014 {offsets = [0, 55], sizes = [16, 9], strides = [1, 1]} : vector<16x64xf32> to vector<16x9xf32>
    %1016 = vector.extract_strided_slice %1014 {offsets = [0, 0], sizes = [16, 55], strides = [1, 1]} : vector<16x64xf32> to vector<16x55xf32>
    %1017 = tpu.concatenate %1015, %1016 in 1 : vector<16x9xf32>, vector<16x55xf32> -> vector<16x64xf32>
    %c104_462 = arith.constant 104 : index
    %c0_463 = arith.constant 0 : index
    %1018 = vector.load %arg4[%c104_462, %c0_463] : memref<136x256xf32, #tpu.memory_space<vmem>>, vector<1x64xf32>
    %1019 = vector.broadcast %1018 : vector<1x64xf32> to vector<16x64xf32>
    %1020 = arith.mulf %1017, %1019 : vector<16x64xf32>
    %c0_464 = arith.constant 0 : index
    %c0_465 = arith.constant 0 : index
    %1021 = vector.load %arg7[%c0_464, %c0_465] : memref<392x256xf32, #tpu.memory_space<vmem>>, vector<16x64xf32>
    tpu.vector_store %arg7[%c0_464, %c0_465], %1020 {strides = array<i32>} : memref<392x256xf32, #tpu.memory_space<vmem>>, vector<16x64xf32>,
    %1022 = vector.extract_strided_slice %1014 {offsets = [0, 56], sizes = [16, 8], strides = [1, 1]} : vector<16x64xf32> to vector<16x8xf32>
    %1023 = vector.extract_strided_slice %1014 {offsets = [0, 0], sizes = [16, 56], strides = [1, 1]} : vector<16x64xf32> to vector<16x56xf32>
    %1024 = tpu.concatenate %1022, %1023 in 1 : vector<16x8xf32>, vector<16x56xf32> -> vector<16x64xf32>
    %c105 = arith.constant 105 : index
    %c0_466 = arith.constant 0 : index
    %1025 = vector.load %arg4[%c105, %c0_466] : memref<136x256xf32, #tpu.memory_space<vmem>>, vector<1x64xf32>
    %1026 = vector.broadcast %1025 : vector<1x64xf32> to vector<16x64xf32>
    %1027 = arith.mulf %1024, %1026 : vector<16x64xf32>
    %c16_467 = arith.constant 16 : index
    %c0_468 = arith.constant 0 : index
    %1028 = vector.load %arg7[%c16_467, %c0_468] : memref<392x256xf32, #tpu.memory_space<vmem>>, vector<16x64xf32>
    tpu.vector_store %arg7[%c16_467, %c0_468], %1027 {strides = array<i32>} : memref<392x256xf32, #tpu.memory_space<vmem>>, vector<16x64xf32>,
    %1029 = vector.extract_strided_slice %1014 {offsets = [0, 57], sizes = [16, 7], strides = [1, 1]} : vector<16x64xf32> to vector<16x7xf32>
    %1030 = vector.extract_strided_slice %1014 {offsets = [0, 0], sizes = [16, 57], strides = [1, 1]} : vector<16x64xf32> to vector<16x57xf32>
    %1031 = tpu.concatenate %1029, %1030 in 1 : vector<16x7xf32>, vector<16x57xf32> -> vector<16x64xf32>
    %c106 = arith.constant 106 : index
    %c0_469 = arith.constant 0 : index
    %1032 = vector.load %arg4[%c106, %c0_469] : memref<136x256xf32, #tpu.memory_space<vmem>>, vector<1x64xf32>
    %1033 = vector.broadcast %1032 : vector<1x64xf32> to vector<16x64xf32>
    %1034 = arith.mulf %1031, %1033 : vector<16x64xf32>
    %c32_470 = arith.constant 32 : index
    %c0_471 = arith.constant 0 : index
    %1035 = vector.load %arg7[%c32_470, %c0_471] : memref<392x256xf32, #tpu.memory_space<vmem>>, vector<16x64xf32>
    tpu.vector_store %arg7[%c32_470, %c0_471], %1034 {strides = array<i32>} : memref<392x256xf32, #tpu.memory_space<vmem>>, vector<16x64xf32>,
    %1036 = vector.extract_strided_slice %1014 {offsets = [0, 63], sizes = [16, 1], strides = [1, 1]} : vector<16x64xf32> to vector<16x1xf32>
    %1037 = vector.extract_strided_slice %1014 {offsets = [0, 0], sizes = [16, 63], strides = [1, 1]} : vector<16x64xf32> to vector<16x63xf32>
    %1038 = tpu.concatenate %1036, %1037 in 1 : vector<16x1xf32>, vector<16x63xf32> -> vector<16x64xf32>
    %c107 = arith.constant 107 : index
    %c0_472 = arith.constant 0 : index
    %1039 = vector.load %arg4[%c107, %c0_472] : memref<136x256xf32, #tpu.memory_space<vmem>>, vector<1x64xf32>
    %1040 = vector.broadcast %1039 : vector<1x64xf32> to vector<16x64xf32>
    %1041 = arith.mulf %1038, %1040 : vector<16x64xf32>
    %c48_473 = arith.constant 48 : index
    %c0_474 = arith.constant 0 : index
    %1042 = vector.load %arg7[%c48_473, %c0_474] : memref<392x256xf32, #tpu.memory_space<vmem>>, vector<16x64xf32>
    tpu.vector_store %arg7[%c48_473, %c0_474], %1041 {strides = array<i32>} : memref<392x256xf32, #tpu.memory_space<vmem>>, vector<16x64xf32>,
    %c64_475 = arith.constant 64 : index
    %c0_476 = arith.constant 0 : index
    %1043 = vector.load %arg7[%c64_475, %c0_476] : memref<392x256xf32, #tpu.memory_space<vmem>>, vector<16x64xf32>
    tpu.vector_store %arg7[%c64_475, %c0_476], %1014 {strides = array<i32>} : memref<392x256xf32, #tpu.memory_space<vmem>>, vector<16x64xf32>,
    %1044 = vector.extract_strided_slice %1014 {offsets = [0, 1], sizes = [16, 63], strides = [1, 1]} : vector<16x64xf32> to vector<16x63xf32>
    %1045 = vector.extract_strided_slice %1014 {offsets = [0, 0], sizes = [16, 1], strides = [1, 1]} : vector<16x64xf32> to vector<16x1xf32>
    %1046 = tpu.concatenate %1044, %1045 in 1 : vector<16x63xf32>, vector<16x1xf32> -> vector<16x64xf32>
    %c109 = arith.constant 109 : index
    %c0_477 = arith.constant 0 : index
    %1047 = vector.load %arg4[%c109, %c0_477] : memref<136x256xf32, #tpu.memory_space<vmem>>, vector<1x64xf32>
    %1048 = vector.broadcast %1047 : vector<1x64xf32> to vector<16x64xf32>
    %1049 = arith.mulf %1046, %1048 : vector<16x64xf32>
    %c80_478 = arith.constant 80 : index
    %c0_479 = arith.constant 0 : index
    %1050 = vector.load %arg7[%c80_478, %c0_479] : memref<392x256xf32, #tpu.memory_space<vmem>>, vector<16x64xf32>
    tpu.vector_store %arg7[%c80_478, %c0_479], %1049 {strides = array<i32>} : memref<392x256xf32, #tpu.memory_space<vmem>>, vector<16x64xf32>,
    %1051 = vector.extract_strided_slice %1014 {offsets = [0, 7], sizes = [16, 57], strides = [1, 1]} : vector<16x64xf32> to vector<16x57xf32>
    %1052 = vector.extract_strided_slice %1014 {offsets = [0, 0], sizes = [16, 7], strides = [1, 1]} : vector<16x64xf32> to vector<16x7xf32>
    %1053 = tpu.concatenate %1051, %1052 in 1 : vector<16x57xf32>, vector<16x7xf32> -> vector<16x64xf32>
    %c110 = arith.constant 110 : index
    %c0_480 = arith.constant 0 : index
    %1054 = vector.load %arg4[%c110, %c0_480] : memref<136x256xf32, #tpu.memory_space<vmem>>, vector<1x64xf32>
    %1055 = vector.broadcast %1054 : vector<1x64xf32> to vector<16x64xf32>
    %1056 = arith.mulf %1053, %1055 : vector<16x64xf32>
    %c96_481 = arith.constant 96 : index
    %c0_482 = arith.constant 0 : index
    %1057 = vector.load %arg7[%c96_481, %c0_482] : memref<392x256xf32, #tpu.memory_space<vmem>>, vector<16x64xf32>
    tpu.vector_store %arg7[%c96_481, %c0_482], %1056 {strides = array<i32>} : memref<392x256xf32, #tpu.memory_space<vmem>>, vector<16x64xf32>,
    %1058 = vector.extract_strided_slice %1014 {offsets = [0, 8], sizes = [16, 56], strides = [1, 1]} : vector<16x64xf32> to vector<16x56xf32>
    %1059 = vector.extract_strided_slice %1014 {offsets = [0, 0], sizes = [16, 8], strides = [1, 1]} : vector<16x64xf32> to vector<16x8xf32>
    %1060 = tpu.concatenate %1058, %1059 in 1 : vector<16x56xf32>, vector<16x8xf32> -> vector<16x64xf32>
    %c111 = arith.constant 111 : index
    %c0_483 = arith.constant 0 : index
    %1061 = vector.load %arg4[%c111, %c0_483] : memref<136x256xf32, #tpu.memory_space<vmem>>, vector<1x64xf32>
    %1062 = vector.broadcast %1061 : vector<1x64xf32> to vector<16x64xf32>
    %1063 = arith.mulf %1060, %1062 : vector<16x64xf32>
    %c112_484 = arith.constant 112 : index
    %c0_485 = arith.constant 0 : index
    %1064 = vector.load %arg7[%c112_484, %c0_485] : memref<392x256xf32, #tpu.memory_space<vmem>>, vector<16x64xf32>
    tpu.vector_store %arg7[%c112_484, %c0_485], %1063 {strides = array<i32>} : memref<392x256xf32, #tpu.memory_space<vmem>>, vector<16x64xf32>,
    %1065 = vector.extract_strided_slice %1014 {offsets = [0, 9], sizes = [16, 55], strides = [1, 1]} : vector<16x64xf32> to vector<16x55xf32>
    %1066 = vector.extract_strided_slice %1014 {offsets = [0, 0], sizes = [16, 9], strides = [1, 1]} : vector<16x64xf32> to vector<16x9xf32>
    %1067 = tpu.concatenate %1065, %1066 in 1 : vector<16x55xf32>, vector<16x9xf32> -> vector<16x64xf32>
    %c112_486 = arith.constant 112 : index
    %c0_487 = arith.constant 0 : index
    %1068 = vector.load %arg4[%c112_486, %c0_487] : memref<136x256xf32, #tpu.memory_space<vmem>>, vector<1x64xf32>
    %1069 = vector.broadcast %1068 : vector<1x64xf32> to vector<16x64xf32>
    %1070 = arith.mulf %1067, %1069 : vector<16x64xf32>
    %c128_488 = arith.constant 128 : index
    %c0_489 = arith.constant 0 : index
    %1071 = vector.load %arg7[%c128_488, %c0_489] : memref<392x256xf32, #tpu.memory_space<vmem>>, vector<16x64xf32>
    tpu.vector_store %arg7[%c128_488, %c0_489], %1070 {strides = array<i32>} : memref<392x256xf32, #tpu.memory_space<vmem>>, vector<16x64xf32>,
    %c216_490 = arith.constant 216 : index
    %c0_491 = arith.constant 0 : index
    %1072 = vector.load %arg2[%c216_490, %c0_491] : memref<264x392xf32, #tpu.memory_space<vmem>>, vector<32x144xf32>
    %c0_492 = arith.constant 0 : index
    %c0_493 = arith.constant 0 : index
    %1073 = vector.load %arg7[%c0_492, %c0_493] : memref<392x256xf32, #tpu.memory_space<vmem>>, vector<144x64xf32>
    %cst_494 = arith.constant dense<0.000000e+00> : vector<32x64xf32>
    %1074 = tpu.matmul %1072, %1073, %cst_494 {dimension_numbers = #tpu.dot_dimension_numbers<[1], [0], [0], [1], [0, 0, 1, 1], [], []>} : vector<32x144xf32>, vector<144x64xf32>, vector<32x64xf32> -> vector<32x64xf32>
    %1075 = vector.extract_strided_slice %1074 {offsets = [0, 0], sizes = [8, 64], strides = [1, 1]} : vector<32x64xf32> to vector<8x64xf32>
    %c384_495 = arith.constant 384 : index
    %c0_496 = arith.constant 0 : index
    %1076 = vector.load %arg5[%c384_495, %c0_496] : memref<640x256xf32, #tpu.memory_space<vmem>>, vector<64x256xf32>
    %cst_497 = arith.constant dense<0.000000e+00> : vector<8x256xf32>
    %1077 = tpu.matmul %1075, %1076, %cst_497 {dimension_numbers = #tpu.dot_dimension_numbers<[1], [0], [0], [1], [0, 0, 1, 1], [], []>} : vector<8x64xf32>, vector<64x256xf32>, vector<8x256xf32> -> vector<8x256xf32>
    %1078 = vector.extract_strided_slice %1074 {offsets = [8, 0], sizes = [8, 64], strides = [1, 1]} : vector<32x64xf32> to vector<8x64xf32>
    %c448 = arith.constant 448 : index
    %c0_498 = arith.constant 0 : index
    %1079 = vector.load %arg5[%c448, %c0_498] : memref<640x256xf32, #tpu.memory_space<vmem>>, vector<64x256xf32>
    %cst_499 = arith.constant dense<0.000000e+00> : vector<8x256xf32>
    %1080 = tpu.matmul %1078, %1079, %cst_499 {dimension_numbers = #tpu.dot_dimension_numbers<[1], [0], [0], [1], [0, 0, 1, 1], [], []>} : vector<8x64xf32>, vector<64x256xf32>, vector<8x256xf32> -> vector<8x256xf32>
    %1081 = arith.addf %1077, %1080 : vector<8x256xf32>
    %1082 = vector.extract_strided_slice %1074 {offsets = [16, 0], sizes = [8, 64], strides = [1, 1]} : vector<32x64xf32> to vector<8x64xf32>
    %c512 = arith.constant 512 : index
    %c0_500 = arith.constant 0 : index
    %1083 = vector.load %arg5[%c512, %c0_500] : memref<640x256xf32, #tpu.memory_space<vmem>>, vector<64x256xf32>
    %cst_501 = arith.constant dense<0.000000e+00> : vector<8x256xf32>
    %1084 = tpu.matmul %1082, %1083, %cst_501 {dimension_numbers = #tpu.dot_dimension_numbers<[1], [0], [0], [1], [0, 0, 1, 1], [], []>} : vector<8x64xf32>, vector<64x256xf32>, vector<8x256xf32> -> vector<8x256xf32>
    %1085 = arith.addf %1081, %1084 : vector<8x256xf32>
    %1086 = vector.extract_strided_slice %1074 {offsets = [24, 0], sizes = [8, 64], strides = [1, 1]} : vector<32x64xf32> to vector<8x64xf32>
    %c576 = arith.constant 576 : index
    %c0_502 = arith.constant 0 : index
    %1087 = vector.load %arg5[%c576, %c0_502] : memref<640x256xf32, #tpu.memory_space<vmem>>, vector<64x256xf32>
    %cst_503 = arith.constant dense<0.000000e+00> : vector<8x256xf32>
    %1088 = tpu.matmul %1086, %1087, %cst_503 {dimension_numbers = #tpu.dot_dimension_numbers<[1], [0], [0], [1], [0, 0, 1, 1], [], []>} : vector<8x64xf32>, vector<64x256xf32>, vector<8x256xf32> -> vector<8x256xf32>
    %1089 = arith.addf %1085, %1088 : vector<8x256xf32>
    %c168_504 = arith.constant 168 : index
    %c0_505 = arith.constant 0 : index
    %1090 = vector.load %arg3[%c168_504, %c0_505] : memref<192x2xf32, #tpu.memory_space<vmem>>, vector<8x1xf32>
    %c168_506 = arith.constant 168 : index
    %c1_507 = arith.constant 1 : index
    %1091 = vector.load %arg3[%c168_506, %c1_507] : memref<192x2xf32, #tpu.memory_space<vmem>>, vector<8x1xf32>
    %cst_508 = arith.constant dense<0.000000e+00> : vector<8xf32>
    %1092 = vector.multi_reduction <add>, %1089, %cst_508 [1] : vector<8x256xf32> to vector<8xf32>
    %1093 = vector.shape_cast %1092 : vector<8xf32> to vector<8x1xf32>
    %cst_509 = arith.constant 3.906250e-03 : f32
    %1094 = vector.broadcast %cst_509 : f32 to vector<8x1xf32>
    %1095 = arith.mulf %1093, %1094 : vector<8x1xf32>
    %1096 = arith.mulf %1089, %1089 : vector<8x256xf32>
    %cst_510 = arith.constant dense<0.000000e+00> : vector<8xf32>
    %1097 = vector.multi_reduction <add>, %1096, %cst_510 [1] : vector<8x256xf32> to vector<8xf32>
    %1098 = vector.shape_cast %1097 : vector<8xf32> to vector<8x1xf32>
    %cst_511 = arith.constant 3.906250e-03 : f32
    %1099 = vector.broadcast %cst_511 : f32 to vector<8x1xf32>
    %1100 = arith.mulf %1098, %1099 : vector<8x1xf32>
    %1101 = arith.mulf %1095, %1095 : vector<8x1xf32>
    %1102 = arith.subf %1100, %1101 : vector<8x1xf32>
    %cst_512 = arith.constant 0.000000e+00 : f32
    %1103 = vector.broadcast %cst_512 : f32 to vector<8x1xf32>
    %1104 = arith.maximumf %1102, %1103 : vector<8x1xf32>
    %1105 = vector.broadcast %1095 : vector<8x1xf32> to vector<8x256xf32>
    %1106 = arith.subf %1089, %1105 : vector<8x256xf32>
    %cst_513 = arith.constant 9.99999974E-6 : f32
    %1107 = vector.broadcast %cst_513 : f32 to vector<8x1xf32>
    %1108 = arith.addf %1104, %1107 : vector<8x1xf32>
    %1109 = math.rsqrt %1108 : vector<8x1xf32>
    %1110 = vector.broadcast %1109 : vector<8x1xf32> to vector<8x256xf32>
    %1111 = arith.mulf %1106, %1110 : vector<8x256xf32>
    %1112 = vector.broadcast %1090 : vector<8x1xf32> to vector<8x256xf32>
    %1113 = arith.mulf %1111, %1112 : vector<8x256xf32>
    %1114 = vector.broadcast %1091 : vector<8x1xf32> to vector<8x256xf32>
    %1115 = arith.addf %1113, %1114 : vector<8x256xf32>
    %cst_514 = arith.constant 0.000000e+00 : f32
    %1116 = vector.broadcast %cst_514 : f32 to vector<8x256xf32>
    %1117 = arith.maximumf %1115, %1116 : vector<8x256xf32>
    %c176_515 = arith.constant 176 : index
    %c0_516 = arith.constant 0 : index
    %1118 = vector.load %arg3[%c176_515, %c0_516] : memref<192x2xf32, #tpu.memory_space<vmem>>, vector<10x1xf32>
    %1119 = vector.extract_strided_slice %1117 {offsets = [0, 239], sizes = [8, 17], strides = [1, 1]} : vector<8x256xf32> to vector<8x17xf32>
    %1120 = vector.extract_strided_slice %1117 {offsets = [0, 0], sizes = [8, 239], strides = [1, 1]} : vector<8x256xf32> to vector<8x239xf32>
    %1121 = tpu.concatenate %1119, %1120 in 1 : vector<8x17xf32>, vector<8x239xf32> -> vector<8x256xf32>
    %c120_517 = arith.constant 120 : index
    %c0_518 = arith.constant 0 : index
    %1122 = vector.load %arg4[%c120_517, %c0_518] : memref<136x256xf32, #tpu.memory_space<vmem>>, vector<1x256xf32>
    %1123 = vector.broadcast %1122 : vector<1x256xf32> to vector<8x256xf32>
    %1124 = arith.mulf %1121, %1123 : vector<8x256xf32>
    %c0_519 = arith.constant 0 : index
    %c0_520 = arith.constant 0 : index
    %1125 = vector.load %arg7[%c0_519, %c0_520] : memref<392x256xf32, #tpu.memory_space<vmem>>, vector<8x256xf32>
    tpu.vector_store %arg7[%c0_519, %c0_520], %1124 {strides = array<i32>} : memref<392x256xf32, #tpu.memory_space<vmem>>, vector<8x256xf32>,
    %1126 = vector.extract_strided_slice %1117 {offsets = [0, 240], sizes = [8, 16], strides = [1, 1]} : vector<8x256xf32> to vector<8x16xf32>
    %1127 = vector.extract_strided_slice %1117 {offsets = [0, 0], sizes = [8, 240], strides = [1, 1]} : vector<8x256xf32> to vector<8x240xf32>
    %1128 = tpu.concatenate %1126, %1127 in 1 : vector<8x16xf32>, vector<8x240xf32> -> vector<8x256xf32>
    %c121 = arith.constant 121 : index
    %c0_521 = arith.constant 0 : index
    %1129 = vector.load %arg4[%c121, %c0_521] : memref<136x256xf32, #tpu.memory_space<vmem>>, vector<1x256xf32>
    %1130 = vector.broadcast %1129 : vector<1x256xf32> to vector<8x256xf32>
    %1131 = arith.mulf %1128, %1130 : vector<8x256xf32>
    %c8_522 = arith.constant 8 : index
    %c0_523 = arith.constant 0 : index
    %1132 = vector.load %arg7[%c8_522, %c0_523] : memref<392x256xf32, #tpu.memory_space<vmem>>, vector<8x256xf32>
    tpu.vector_store %arg7[%c8_522, %c0_523], %1131 {strides = array<i32>} : memref<392x256xf32, #tpu.memory_space<vmem>>, vector<8x256xf32>,
    %1133 = vector.extract_strided_slice %1117 {offsets = [0, 241], sizes = [8, 15], strides = [1, 1]} : vector<8x256xf32> to vector<8x15xf32>
    %1134 = vector.extract_strided_slice %1117 {offsets = [0, 0], sizes = [8, 241], strides = [1, 1]} : vector<8x256xf32> to vector<8x241xf32>
    %1135 = tpu.concatenate %1133, %1134 in 1 : vector<8x15xf32>, vector<8x241xf32> -> vector<8x256xf32>
    %c122 = arith.constant 122 : index
    %c0_524 = arith.constant 0 : index
    %1136 = vector.load %arg4[%c122, %c0_524] : memref<136x256xf32, #tpu.memory_space<vmem>>, vector<1x256xf32>
    %1137 = vector.broadcast %1136 : vector<1x256xf32> to vector<8x256xf32>
    %1138 = arith.mulf %1135, %1137 : vector<8x256xf32>
    %c16_525 = arith.constant 16 : index
    %c0_526 = arith.constant 0 : index
    %1139 = vector.load %arg7[%c16_525, %c0_526] : memref<392x256xf32, #tpu.memory_space<vmem>>, vector<8x256xf32>
    tpu.vector_store %arg7[%c16_525, %c0_526], %1138 {strides = array<i32>} : memref<392x256xf32, #tpu.memory_space<vmem>>, vector<8x256xf32>,
    %1140 = vector.extract_strided_slice %1117 {offsets = [0, 255], sizes = [8, 1], strides = [1, 1]} : vector<8x256xf32> to vector<8x1xf32>
    %1141 = vector.extract_strided_slice %1117 {offsets = [0, 0], sizes = [8, 255], strides = [1, 1]} : vector<8x256xf32> to vector<8x255xf32>
    %1142 = tpu.concatenate %1140, %1141 in 1 : vector<8x1xf32>, vector<8x255xf32> -> vector<8x256xf32>
    %c123 = arith.constant 123 : index
    %c0_527 = arith.constant 0 : index
    %1143 = vector.load %arg4[%c123, %c0_527] : memref<136x256xf32, #tpu.memory_space<vmem>>, vector<1x256xf32>
    %1144 = vector.broadcast %1143 : vector<1x256xf32> to vector<8x256xf32>
    %1145 = arith.mulf %1142, %1144 : vector<8x256xf32>
    %c24_528 = arith.constant 24 : index
    %c0_529 = arith.constant 0 : index
    %1146 = vector.load %arg7[%c24_528, %c0_529] : memref<392x256xf32, #tpu.memory_space<vmem>>, vector<8x256xf32>
    tpu.vector_store %arg7[%c24_528, %c0_529], %1145 {strides = array<i32>} : memref<392x256xf32, #tpu.memory_space<vmem>>, vector<8x256xf32>,
    %c32_530 = arith.constant 32 : index
    %c0_531 = arith.constant 0 : index
    %1147 = vector.load %arg7[%c32_530, %c0_531] : memref<392x256xf32, #tpu.memory_space<vmem>>, vector<8x256xf32>
    tpu.vector_store %arg7[%c32_530, %c0_531], %1117 {strides = array<i32>} : memref<392x256xf32, #tpu.memory_space<vmem>>, vector<8x256xf32>,
    %1148 = vector.extract_strided_slice %1117 {offsets = [0, 1], sizes = [8, 255], strides = [1, 1]} : vector<8x256xf32> to vector<8x255xf32>
    %1149 = vector.extract_strided_slice %1117 {offsets = [0, 0], sizes = [8, 1], strides = [1, 1]} : vector<8x256xf32> to vector<8x1xf32>
    %1150 = tpu.concatenate %1148, %1149 in 1 : vector<8x255xf32>, vector<8x1xf32> -> vector<8x256xf32>
    %c125 = arith.constant 125 : index
    %c0_532 = arith.constant 0 : index
    %1151 = vector.load %arg4[%c125, %c0_532] : memref<136x256xf32, #tpu.memory_space<vmem>>, vector<1x256xf32>
    %1152 = vector.broadcast %1151 : vector<1x256xf32> to vector<8x256xf32>
    %1153 = arith.mulf %1150, %1152 : vector<8x256xf32>
    %c40_533 = arith.constant 40 : index
    %c0_534 = arith.constant 0 : index
    %1154 = vector.load %arg7[%c40_533, %c0_534] : memref<392x256xf32, #tpu.memory_space<vmem>>, vector<8x256xf32>
    tpu.vector_store %arg7[%c40_533, %c0_534], %1153 {strides = array<i32>} : memref<392x256xf32, #tpu.memory_space<vmem>>, vector<8x256xf32>,
    %1155 = vector.extract_strided_slice %1117 {offsets = [0, 15], sizes = [8, 241], strides = [1, 1]} : vector<8x256xf32> to vector<8x241xf32>
    %1156 = vector.extract_strided_slice %1117 {offsets = [0, 0], sizes = [8, 15], strides = [1, 1]} : vector<8x256xf32> to vector<8x15xf32>
    %1157 = tpu.concatenate %1155, %1156 in 1 : vector<8x241xf32>, vector<8x15xf32> -> vector<8x256xf32>
    %c126 = arith.constant 126 : index
    %c0_535 = arith.constant 0 : index
    %1158 = vector.load %arg4[%c126, %c0_535] : memref<136x256xf32, #tpu.memory_space<vmem>>, vector<1x256xf32>
    %1159 = vector.broadcast %1158 : vector<1x256xf32> to vector<8x256xf32>
    %1160 = arith.mulf %1157, %1159 : vector<8x256xf32>
    %c48_536 = arith.constant 48 : index
    %c0_537 = arith.constant 0 : index
    %1161 = vector.load %arg7[%c48_536, %c0_537] : memref<392x256xf32, #tpu.memory_space<vmem>>, vector<8x256xf32>
    tpu.vector_store %arg7[%c48_536, %c0_537], %1160 {strides = array<i32>} : memref<392x256xf32, #tpu.memory_space<vmem>>, vector<8x256xf32>,
    %1162 = vector.extract_strided_slice %1117 {offsets = [0, 16], sizes = [8, 240], strides = [1, 1]} : vector<8x256xf32> to vector<8x240xf32>
    %1163 = vector.extract_strided_slice %1117 {offsets = [0, 0], sizes = [8, 16], strides = [1, 1]} : vector<8x256xf32> to vector<8x16xf32>
    %1164 = tpu.concatenate %1162, %1163 in 1 : vector<8x240xf32>, vector<8x16xf32> -> vector<8x256xf32>
    %c127 = arith.constant 127 : index
    %c0_538 = arith.constant 0 : index
    %1165 = vector.load %arg4[%c127, %c0_538] : memref<136x256xf32, #tpu.memory_space<vmem>>, vector<1x256xf32>
    %1166 = vector.broadcast %1165 : vector<1x256xf32> to vector<8x256xf32>
    %1167 = arith.mulf %1164, %1166 : vector<8x256xf32>
    %c56_539 = arith.constant 56 : index
    %c0_540 = arith.constant 0 : index
    %1168 = vector.load %arg7[%c56_539, %c0_540] : memref<392x256xf32, #tpu.memory_space<vmem>>, vector<8x256xf32>
    tpu.vector_store %arg7[%c56_539, %c0_540], %1167 {strides = array<i32>} : memref<392x256xf32, #tpu.memory_space<vmem>>, vector<8x256xf32>,
    %1169 = vector.extract_strided_slice %1117 {offsets = [0, 17], sizes = [8, 239], strides = [1, 1]} : vector<8x256xf32> to vector<8x239xf32>
    %1170 = vector.extract_strided_slice %1117 {offsets = [0, 0], sizes = [8, 17], strides = [1, 1]} : vector<8x256xf32> to vector<8x17xf32>
    %1171 = tpu.concatenate %1169, %1170 in 1 : vector<8x239xf32>, vector<8x17xf32> -> vector<8x256xf32>
    %c128_541 = arith.constant 128 : index
    %c0_542 = arith.constant 0 : index
    %1172 = vector.load %arg4[%c128_541, %c0_542] : memref<136x256xf32, #tpu.memory_space<vmem>>, vector<1x256xf32>
    %1173 = vector.broadcast %1172 : vector<1x256xf32> to vector<8x256xf32>
    %1174 = arith.mulf %1171, %1173 : vector<8x256xf32>
    %c64_543 = arith.constant 64 : index
    %c0_544 = arith.constant 0 : index
    %1175 = vector.load %arg7[%c64_543, %c0_544] : memref<392x256xf32, #tpu.memory_space<vmem>>, vector<8x256xf32>
    tpu.vector_store %arg7[%c64_543, %c0_544], %1174 {strides = array<i32>} : memref<392x256xf32, #tpu.memory_space<vmem>>, vector<8x256xf32>,
    %c248_545 = arith.constant 248 : index
    %c0_546 = arith.constant 0 : index
    %1176 = vector.load %arg2[%c248_545, %c0_546] : memref<264x392xf32, #tpu.memory_space<vmem>>, vector<10x72xf32>
    %c0_547 = arith.constant 0 : index
    %c0_548 = arith.constant 0 : index
    %1177 = vector.load %arg7[%c0_547, %c0_548] : memref<392x256xf32, #tpu.memory_space<vmem>>, vector<72x256xf32>
    %cst_549 = arith.constant dense<0.000000e+00> : vector<10x256xf32>
    %1178 = tpu.matmul %1176, %1177, %cst_549 {dimension_numbers = #tpu.dot_dimension_numbers<[1], [0], [0], [1], [0, 0, 1, 1], [], []>} : vector<10x72xf32>, vector<72x256xf32>, vector<10x256xf32> -> vector<10x256xf32>
    %1179 = vector.broadcast %1118 : vector<10x1xf32> to vector<10x256xf32>
    %1180 = arith.addf %1178, %1179 : vector<10x256xf32>
    %1181 = vector.extract_strided_slice %1180 {offsets = [0, 0], sizes = [1, 256], strides = [1, 1]} : vector<10x256xf32> to vector<1x256xf32>
    %cst_550 = arith.constant 5.000000e-01 : f32
    %1182 = vector.broadcast %cst_550 : f32 to vector<1x256xf32>
    %1183 = arith.mulf %1182, %1181 : vector<1x256xf32>
    %1184 = math.tanh %1183 : vector<1x256xf32>
    %cst_551 = arith.constant 1.000000e+00 : f32
    %1185 = vector.broadcast %cst_551 : f32 to vector<1x256xf32>
    %1186 = arith.addf %1184, %1185 : vector<1x256xf32>
    %cst_552 = arith.constant 5.000000e-01 : f32
    %1187 = vector.broadcast %cst_552 : f32 to vector<1x256xf32>
    %1188 = arith.mulf %1187, %1186 : vector<1x256xf32>
    %1189 = vector.extract_strided_slice %1180 {offsets = [1, 0], sizes = [4, 256], strides = [1, 1]} : vector<10x256xf32> to vector<4x256xf32>
    %1190 = math.tanh %1189 : vector<4x256xf32>
    %1191 = vector.extract_strided_slice %1180 {offsets = [5, 0], sizes = [1, 256], strides = [1, 1]} : vector<10x256xf32> to vector<1x256xf32>
    %cst_553 = arith.constant 5.000000e-01 : f32
    %1192 = vector.broadcast %cst_553 : f32 to vector<1x256xf32>
    %1193 = arith.mulf %1192, %1191 : vector<1x256xf32>
    %1194 = math.tanh %1193 : vector<1x256xf32>
    %cst_554 = arith.constant 1.000000e+00 : f32
    %1195 = vector.broadcast %cst_554 : f32 to vector<1x256xf32>
    %1196 = arith.addf %1194, %1195 : vector<1x256xf32>
    %cst_555 = arith.constant 5.000000e-01 : f32
    %1197 = vector.broadcast %cst_555 : f32 to vector<1x256xf32>
    %1198 = arith.mulf %1197, %1196 : vector<1x256xf32>
    %1199 = vector.extract_strided_slice %1180 {offsets = [6, 0], sizes = [4, 256], strides = [1, 1]} : vector<10x256xf32> to vector<4x256xf32>
    %1200 = math.tanh %1199 : vector<4x256xf32>
    %1201 = vector.broadcast %1198 : vector<1x256xf32> to vector<4x256xf32>
    %1202 = arith.mulf %2, %1201 : vector<4x256xf32>
    %cst_556 = arith.constant 1.000000e+00 : f32
    %1203 = vector.broadcast %cst_556 : f32 to vector<1x256xf32>
    %1204 = arith.subf %1203, %1198 : vector<1x256xf32>
    %1205 = vector.broadcast %1204 : vector<1x256xf32> to vector<4x256xf32>
    %1206 = arith.mulf %1200, %1205 : vector<4x256xf32>
    %1207 = arith.addf %1202, %1206 : vector<4x256xf32>
    %c0_557 = arith.constant 0 : index
    %c0_558 = arith.constant 0 : index
    %c0_559 = arith.constant 0 : index
    %1208 = vector.load %arg6[%c0_557, %c0_558, %c0_559] : memref<1x18x256xf32, #tpu.memory_space<vmem>>, vector<1x4x256xf32>
    %1209 = vector.shape_cast %1208 : vector<1x4x256xf32> to vector<4x256xf32>
    %1210 = vector.shape_cast %1207 : vector<4x256xf32> to vector<1x4x256xf32>
    tpu.vector_store %arg6[%c0_557, %c0_558, %c0_559], %1210 {strides = array<i32>} : memref<1x18x256xf32, #tpu.memory_space<vmem>>, vector<1x4x256xf32>,
    %c0_560 = arith.constant 0 : index
    %c4_561 = arith.constant 4 : index
    %c0_562 = arith.constant 0 : index
    %1211 = vector.load %arg6[%c0_560, %c4_561, %c0_562] : memref<1x18x256xf32, #tpu.memory_space<vmem>>, vector<1x1x256xf32>
    %1212 = vector.shape_cast %1211 : vector<1x1x256xf32> to vector<1x256xf32>
    %1213 = vector.shape_cast %1198 : vector<1x256xf32> to vector<1x1x256xf32>
    tpu.vector_store %arg6[%c0_560, %c4_561, %c0_562], %1213 {strides = array<i32>} : memref<1x18x256xf32, #tpu.memory_space<vmem>>, vector<1x1x256xf32>,
    %c0_563 = arith.constant 0 : index
    %c5_564 = arith.constant 5 : index
    %c0_565 = arith.constant 0 : index
    %1214 = vector.load %arg6[%c0_563, %c5_564, %c0_565] : memref<1x18x256xf32, #tpu.memory_space<vmem>>, vector<1x4x256xf32>
    %1215 = vector.shape_cast %1214 : vector<1x4x256xf32> to vector<4x256xf32>
    %1216 = vector.shape_cast %1200 : vector<4x256xf32> to vector<1x4x256xf32>
    tpu.vector_store %arg6[%c0_563, %c5_564, %c0_565], %1216 {strides = array<i32>} : memref<1x18x256xf32, #tpu.memory_space<vmem>>, vector<1x4x256xf32>,
    %1217 = vector.broadcast %1188 : vector<1x256xf32> to vector<4x256xf32>
    %1218 = arith.mulf %1190, %1217 : vector<4x256xf32>
    %cst_566 = arith.constant 1.000000e+00 : f32
    %1219 = vector.broadcast %cst_566 : f32 to vector<1x256xf32>
    %1220 = arith.subf %1219, %1188 : vector<1x256xf32>
    %1221 = vector.broadcast %1220 : vector<1x256xf32> to vector<4x256xf32>
    %1222 = arith.mulf %2, %1221 : vector<4x256xf32>
    %1223 = arith.addf %1218, %1222 : vector<4x256xf32>
    %c0_567 = arith.constant 0 : index
    %c9_568 = arith.constant 9 : index
    %c0_569 = arith.constant 0 : index
    %1224 = vector.load %arg6[%c0_567, %c9_568, %c0_569] : memref<1x18x256xf32, #tpu.memory_space<vmem>>, vector<1x4x256xf32>
    %1225 = vector.shape_cast %1224 : vector<1x4x256xf32> to vector<4x256xf32>
    %1226 = vector.shape_cast %1223 : vector<4x256xf32> to vector<1x4x256xf32>
    tpu.vector_store %arg6[%c0_567, %c9_568, %c0_569], %1226 {strides = array<i32>} : memref<1x18x256xf32, #tpu.memory_space<vmem>>, vector<1x4x256xf32>,
    %c0_570 = arith.constant 0 : index
    %c13_571 = arith.constant 13 : index
    %c0_572 = arith.constant 0 : index
    %1227 = vector.load %arg6[%c0_570, %c13_571, %c0_572] : memref<1x18x256xf32, #tpu.memory_space<vmem>>, vector<1x1x256xf32>
    %1228 = vector.shape_cast %1227 : vector<1x1x256xf32> to vector<1x256xf32>
    %1229 = vector.shape_cast %1188 : vector<1x256xf32> to vector<1x1x256xf32>
    tpu.vector_store %arg6[%c0_570, %c13_571, %c0_572], %1229 {strides = array<i32>} : memref<1x18x256xf32, #tpu.memory_space<vmem>>, vector<1x1x256xf32>,
    %c0_573 = arith.constant 0 : index
    %c14_574 = arith.constant 14 : index
    %c0_575 = arith.constant 0 : index
    %1230 = vector.load %arg6[%c0_573, %c14_574, %c0_575] : memref<1x18x256xf32, #tpu.memory_space<vmem>>, vector<1x4x256xf32>
    %1231 = vector.shape_cast %1230 : vector<1x4x256xf32> to vector<4x256xf32>
    %1232 = vector.shape_cast %1190 : vector<4x256xf32> to vector<1x4x256xf32>
    tpu.vector_store %arg6[%c0_573, %c14_574, %c0_575], %1232 {strides = array<i32>} : memref<1x18x256xf32, #tpu.memory_space<vmem>>, vector<1x4x256xf32>,
    return
  }
  func.func @transform_0(%arg0: i32) -> (i32, i32, i32) {
    %c0_i32 = arith.constant 0 : i32
    %c0_i32_0 = arith.constant 0 : i32
    %c0_i32_1 = arith.constant 0 : i32
    return %arg0, %c0_i32, %c0_i32_0 : i32, i32, i32
  }
  func.func @transform_1(%arg0: i32) -> (i32, i32) {
    %c0_i32 = arith.constant 0 : i32
    %c0_i32_0 = arith.constant 0 : i32
    %c0_i32_1 = arith.constant 0 : i32
    return %c0_i32, %c0_i32_0 : i32, i32
  }
  func.func @transform_2(%arg0: i32) -> (i32, i32) {
    %c0_i32 = arith.constant 0 : i32
    %c0_i32_0 = arith.constant 0 : i32
    %c0_i32_1 = arith.constant 0 : i32
    return %c0_i32, %c0_i32_0 : i32, i32
  }
  func.func @transform_3(%arg0: i32) -> (i32, i32) {
    %c0_i32 = arith.constant 0 : i32
    %c0_i32_0 = arith.constant 0 : i32
    %c0_i32_1 = arith.constant 0 : i32
    return %c0_i32, %c0_i32_0 : i32, i32
  }
  func.func @transform_4(%arg0: i32) -> (i32, i32) {
    %c0_i32 = arith.constant 0 : i32
    %c0_i32_0 = arith.constant 0 : i32
    %c0_i32_1 = arith.constant 0 : i32
    return %c0_i32, %c0_i32_0 : i32, i32
  }
  func.func @transform_5(%arg0: i32) -> (i32, i32, i32) {
    %c0_i32 = arith.constant 0 : i32
    %c0_i32_0 = arith.constant 0 : i32
    %c0_i32_1 = arith.constant 0 : i32
    return %arg0, %c0_i32, %c0_i32_0 : i32, i32, i32
  }
}

</mosaic_0001>

<bundles_post_ra>
// kernel: tpu_custom_call.1
= control target key start
LH: loop header
LB: loop body
LE: loop exit
PB: predicated region body
PF: predicated region fallthrough
CT: control target
= control target key end

     0   :  { %6 = vsyncpa [#allocation3], 0  ;;  %s115_s0 = inlined_call_operand.hbm [shape: f32[8,256], index: 0, kind: input, shape index: {}]   ;;  %s116_s1 = inlined_call_operand.hbm [shape: f32[8,256], index: 1, kind: output, shape index: {}]  }
   0x1   :  { %7 = vsyncpa [#allocation4], 0  ;;  %s96_s6 = smov [#allocation2]  }
   0x2   :  { %s14_s7 = sshll.u32 %s96_s6, 4  ;;  %s15_s7 = int_to_ptr.vmem [resolvable:$true] %s14_s7 }
   0x3   :  { %s60_s8 = scalar_lea.vmem %s15_s7, 256  ;;  %p65_p1 = scmp.lt.s32.totalorder %s15_s7, %s15_s7 }
   0x4   :  { %p61_p0 = scmp.ne.s32.totalorder %s15_s7, %s60_s8  ;;  %p66_p2 = scmp.lt.s32.totalorder %s60_s8, %s60_s8 }
   0x6   :  { %p67_p3 = por %p66_p2, %p65_p1 }
   0x8   :  { %p68_p4 = pnand %p67_p3, %p61_p0 }
   0xa   :  { %71 = shalt.err (!%p68_p4)
}
   0xb   :  { %17 = dma.hbm_to_vmem [thread:$0]  %s115_s0, 256, %s15_s7, [#allocation3]  }
   0xc   :  { %92 = dma.done.wait [#allocation3], 256  }
   0xd   :  { %93 = vsyncadd [#allocation3], 4294967040  ;;  %v21_v0 = vld [vmem:[#allocation2] sm:$0xff]  ;;  %s97_s11 = smov 1   ;;  %v22_v1 = vld [vmem:[#allocation2 + $0x8] sm:$0xff]  ;;  %v27_v2 = vlaneseq  ;;  %s98_s12 = smov [#allocation5]  }
   0xe   :  { %23 = vrot.lane.b32.xlu0 %v21_v0, %s97_s11  ;;  %s40_s13 = sshll.u32 %s98_s12, 4  ;;  %s41_s13 = int_to_ptr.vmem [resolvable:$true] %s40_s13 }
   0xf   :  { %v28_v3 = vand.u32 127, %v27_v2  ;;  %s72_s0 = scalar_lea.vmem %s41_s13, 256  ;;  %p77_p6 = scmp.lt.s32.totalorder %s41_s13, %s41_s13 }
  0x10   :  { %p73_p5 = scmp.ne.s32.totalorder %s41_s13, %s72_s0  ;;  %p78_p7 = scmp.lt.s32.totalorder %s72_s0, %s72_s0 }
  0x11   :  { %vm29_vm0 = vcmp.lt.s32.totalorder %v28_v3, 1 }
  0x12   :  { %25 = vrot.lane.b32.xlu0 %v22_v1, %s97_s11  ;;  %p79_p8 = por %p78_p7, %p77_p6 }
  0x14   :  { %p80_p9 = pnand %p79_p8, %p73_p5 }
  0x80   :  { %v24_v4 = vpop.permute.xlu0 %23 }
  0x84   :  { %v26_v5 = vpop.permute.xlu0 %25 }
  0x85   :  { %v30_v6 = vsel %vm29_vm0, %v24_v4, %v26_v5  ;;  %v31_v7 = vsel %vm29_vm0, %v26_v5, %v24_v4 }
  0x86   :  { %32 = vst [vmem:[#allocation5] sm:$0xff] %v31_v7  ;;  %33 = vst [vmem:[#allocation5 + $0x8] sm:$0xff] %v30_v6 }
  0x87   :  { %83 = shalt.err (!%p80_p9)
}
  0x88   :  { %43 = dma.vmem_to_hbm [thread:$0]  %s41_s13, 256, %s116_s1, [#allocation4]  }
  0x89   :  { %94 = dma.done.wait [#allocation4], 256  }
  0x8a   :  { %95 = vsyncadd [#allocation4], 4294967040 }
  0x8b   :  { %47 = vsyncpa [#allocation3], 1 }
  0x8c   :  { %48 = vsyncpa [#allocation4], 1 }

// kernel: eyebrow_decomposer_forward.1
= control target key start
LH: loop header
LB: loop body
LE: loop exit
PB: predicated region body
PF: predicated region fallthrough
CT: control target
= control target key end

     0   :  { %s8166_s18 = smov 0   ;;  %s11281_s0 = inlined_call_operand.vmem [shape: f32[2,8,256], index: 0, kind: input, shape index: {}]   ;;  %s11282_s1 = inlined_call_operand.vmem [shape: f32[264,392], index: 1, kind: input, shape index: {}]   ;;  %s11283_s2 = inlined_call_operand.vmem [shape: f32[192,2], index: 2, kind: input, shape index: {}]   ;;  %s11284_s3 = inlined_call_operand.vmem [shape: f32[136,256], index: 3, kind: input, shape index: {}]   ;;  %s11285_s4 = inlined_call_operand.vmem [shape: f32[640,256], index: 4, kind: input, shape index: {}]   ;;  %s11286_s5 = inlined_call_operand.vmem [shape: f32[2,18,256], index: 5, kind: output, shape index: {}]  }
   0x1   :  { %11371 = sst [smem:[#allocation4_spill]] %s11281_s0 }
   0x2 LB: > { %11372 = sst [smem:[#allocation3_spill]] %s8055_s18  ;;  %s7286_s19 = sadd.s32 4294967295, %s8055_s18   ;;  %s8055_s18 = sphi %s8166_s18, %s15_s18  }
   0x3   : > { %p7290_p0 = scmp.ge.s32.totalorder %s8055_s18, 1  ;;  %p187_p1 = scmp.lt.s32.totalorder %s8055_s18, 3 }
   0x5   : > { %p188_p2 = pnand %p7290_p0, %p187_p1 }
   0x6   : > { %p215_p3 = scmp.lt.s32.totalorder (!%p188_p2), %s7286_s19, 1  ;;  %s11373_s0 = sld [smem:[#allocation4_spill]] (!%p188_p2) }
   0x7   : > { %191 = sbr.rel (%p188_p2) target bundleno = 6142 (0x17fe), region = 40  ;;  %s8057_s24 = smov (!%p188_p2), 19  }
   0x8   : > { %s8058_s25 = smov (!%p188_p2), 18   ;;  %s8059_s26 = smov (!%p188_p2), 29  }
   0x9   : > { %s8060_s27 = smov (!%p188_p2), 30   ;;  %s8061_s28 = smov (!%p188_p2), 31  }
   0xa   : > { %s8062_s29 = smov (!%p188_p2), 32   ;;  %s8063_s30 = smov (!%p188_p2), 33  }
   0xb   : > { %s8064_s6 = smov (!%p188_p2), 34   ;;  %s8065_s7 = smov (!%p188_p2), 35  }
   0xc   : > { %s11484_s19 = smov (!%p215_p3, %s7286_s19), 1  ;;  %s8066_s8 = smov 45   ;;  %v241_v2 = vlaneseq  ;;  %v7308_v6 = vld [vmem:[%s11284_s3 + $0x17] ss:$8 sm:$0x3]  ;;  %vm611_vm0 = vcmask 154624  }
   0xd   : > { %s7411_s20 = sshll.u32 %s11484_s19, 4  ;;  %s8067_s9 = smov 46   ;;  %v7307_v9 = vld [vmem:[%s11284_s3 + $0x16] ss:$8 sm:$0x3]  ;;  %vm638_vm1 = vcmask 146432  }
   0xe   : > { %s219_s23 = scalar_lea.vmem %s11373_s0, %s7411_s20  ;;  %s8068_s10 = smov 47   ;;  %v8261_v3 = vshrl.u32 %v241_v2, 7  ;;  %v7306_v12 = vld [vmem:[%s11284_s3 + $0x15] ss:$8 sm:$0x3]  ;;  %vm584_vm2 = vcmask 236544  }
   0xf   : > { %v8180_v0 = vld [vmem:[%s219_s23 + $0x8] sm:$0xff]  ;;  %v8182_v1 = vld [vmem:[%s219_s23] sm:$0xff]  ;;  %s8069_s11 = smov 48   ;;  %s8070_s12 = smov 49   ;;  %vm557_vm3 = vcmask 244736   ;;  %vm530_vm4 = vcmask 252928  }
  0x10   : > { %606 = vrot.lane.b32.xlu1 %v8180_v0, %s8057_s24  ;;  %877 = vst [vmem:[#allocation2 + $0x188] sm:$0xff] %v8180_v0  ;;  %633 = vrot.lane.b32.xlu0 %v8180_v0, %s8058_s25  ;;  %876 = vst [vmem:[#allocation2 + $0x180] sm:$0xff] %v8182_v1  ;;  %s8071_s13 = smov 50   ;;  %s8072_s14 = smov 51   ;;  %v8266_v4 = vsub.s32 0, %v8261_v3  ;;  %v8269_v5 = vsub.s32 1, %v8261_v3 }
  0x11   : > { %s8073_s15 = smov 78   ;;  %s11318_s16 = smov 112   ;;  %v7305_v25 = vld [vmem:[%s11284_s3 + $0x14] ss:$8 sm:$0x3]  ;;  %vm11295_vm5 = vcmask 261120  }
  0x12   : > { %s8075_s17 = smov 79   ;;  %s11362_s20 = smov 113   ;;  %v649_v10 = vrot.slane %v7308_v6, %v8266_v4  ;;  %v653_v11 = vrot.slane %v7308_v6, %v8269_v5  ;;  %v622_v13 = vrot.slane %v7307_v9, %v8266_v4  ;;  %v626_v14 = vrot.slane %v7307_v9, %v8269_v5  ;;  %v7304_v36 = vld [vmem:[%s11284_s3 + $0x13] ss:$8 sm:$0x3] }
  0x13   : > { %s8077_s21 = smov 80   ;;  %s8078_s22 = smov 114   ;;  %v595_v20 = vrot.slane %v7306_v12, %v8266_v4  ;;  %v599_v24 = vrot.slane %v7306_v12, %v8269_v5  ;;  %v568_v32 = vrot.slane %v7305_v25, %v8266_v4  ;;  %v572_v35 = vrot.slane %v7305_v25, %v8269_v5  ;;  %v7303_v45 = vld [vmem:[%s11284_s3 + $0x12] ss:$8 sm:$0x3] }
  0x14   : > { %609 = vrot.lane.b32.xlu1 %v8182_v1, %s8057_s24  ;;  %636 = vrot.lane.b32.xlu0 %v8182_v1, %s8058_s25  ;;  %s8079_s23 = smov 81   ;;  %s11287_s24 = smov 115   ;;  %v541_v43 = vrot.slane %v7304_v36, %v8266_v4  ;;  %v545_v44 = vrot.slane %v7304_v36, %v8269_v5  ;;  %v514_v52 = vrot.slane %v7303_v45, %v8266_v4  ;;  %v7302_v54 = vld [vmem:[%s11284_s3 + $0x11] ss:$8 sm:$0x3]  ;;  %vm476_vm6 = vcmask 269312  }
  0x15   : > { %s8081_s25 = smov 82   ;;  %v518_v53 = vrot.slane %v7303_v45, %v8269_v5  ;;  %v487_v61 = vrot.slane %v7302_v54, %v8266_v4  ;;  %v491_v62 = vrot.slane %v7302_v54, %v8269_v5  ;;  %v7301_v63 = vld [vmem:[%s11284_s3 + $0x10] ss:$8 sm:$0x3]  ;;  %vm449_vm7 = vcmask 277504   ;;  %s11435_s18 = smov 12  }
  0x16   : > { %v460_v12 = vrot.slane %v7301_v63, %v8266_v4  ;;  %vm422_vm8 = vcmask 285696   ;;  %vm395_vm9 = vcmask 367616   ;;  %vm11302_vm10 = vcmask 375808  }
  0x17   : > { %vm11301_vm11 = vcmask 384000   ;;  %vm11300_vm12 = vcmask 392192   ;;  %vm11299_vm13 = vcmask 400384   ;;  %vm260_vm14 = vcmask 408576  }
  0x18   : > { %582 = vrot.lane.b32.xlu1 %v8182_v1, %s8059_s26  ;;  %579 = vrot.lane.b32.xlu0 %v8180_v0, %s8059_s26  ;;  %s11291_s26 = smov 125   ;;  %vm234_vm15 = vcmask 416768  }
  0x1c   : > { %555 = vrot.lane.b32.xlu1 %v8182_v1, %s8060_s27  ;;  %552 = vrot.lane.b32.xlu0 %v8180_v0, %s8060_s27  ;;  %s8083_s27 = smov 83  }
  0x20   : > { %528 = vrot.lane.b32.xlu1 %v8182_v1, %s8061_s28  ;;  %525 = vrot.lane.b32.xlu0 %v8180_v0, %s8061_s28  ;;  %s8084_s28 = smov 126  }
  0x24   : > { %501 = vrot.lane.b32.xlu1 %v8182_v1, %s8062_s29  ;;  %498 = vrot.lane.b32.xlu0 %v8180_v0, %s8062_s29  ;;  %s8085_s29 = smov 93  }
  0x28   : > { %474 = vrot.lane.b32.xlu1 %v8182_v1, %s8063_s30  ;;  %471 = vrot.lane.b32.xlu0 %v8180_v0, %s8063_s30  ;;  %s11307_s30 = smov 15  }
  0x2c   : > { %447 = vrot.lane.b32.xlu1 %v8182_v1, %s8064_s6  ;;  %444 = vrot.lane.b32.xlu0 %v8180_v0, %s8064_s6  ;;  %s11289_s6 = smov 3  }
  0x30   : > { %420 = vrot.lane.b32.xlu1 %v8182_v1, %s8065_s7  ;;  %417 = vrot.lane.b32.xlu0 %v8180_v0, %s8065_s7  ;;  %s8090_s7 = smov 96  }
  0x34   : > { %393 = vrot.lane.b32.xlu1 %v8182_v1, %s8066_s8  ;;  %390 = vrot.lane.b32.xlu0 %v8180_v0, %s8066_s8  ;;  %s8104_s8 = smov 77  }
  0x38   : > { %366 = vrot.lane.b32.xlu1 %v8182_v1, %s8067_s9  ;;  %363 = vrot.lane.b32.xlu0 %v8180_v0, %s8067_s9 }
  0x3c   : > { %339 = vrot.lane.b32.xlu1 %v8182_v1, %s8068_s10  ;;  %336 = vrot.lane.b32.xlu0 %v8180_v0, %s8068_s10 }
  0x40   : > { %312 = vrot.lane.b32.xlu1 %v8182_v1, %s8069_s11  ;;  %309 = vrot.lane.b32.xlu0 %v8180_v0, %s8069_s11 }
  0x44   : > { %285 = vrot.lane.b32.xlu1 %v8182_v1, %s8070_s12  ;;  %282 = vrot.lane.b32.xlu0 %v8180_v0, %s8070_s12 }
  0x48   : > { %258 = vrot.lane.b32.xlu1 %v8182_v1, %s8071_s13  ;;  %255 = vrot.lane.b32.xlu0 %v8180_v0, %s8071_s13  ;;  %s11360_s13 = smov 127  }
  0x4c   : > { %232 = vrot.lane.b32.xlu1 %v8182_v1, %s8072_s14  ;;  %228 = vrot.lane.b32.xlu0 %v8180_v0, %s8072_s14  ;;  %s8096_s14 = smov 99  }
  0x50   : > { %1474 = vrot.lane.b32.xlu1 %v8180_v0, %s8073_s15  ;;  %1472 = vrot.lane.b32.xlu0 %v8182_v1, %s8073_s15  ;;  %s8091_s15 = smov 2  }
  0x54   : > { %1042 = vrot.lane.b32.xlu1 %v8180_v0, %s11318_s16  ;;  %1040 = vrot.lane.b32.xlu0 %v8182_v1, %s11318_s16 }
  0x58   : > { %1447 = vrot.lane.b32.xlu1 %v8180_v0, %s8075_s17  ;;  %1445 = vrot.lane.b32.xlu0 %v8182_v1, %s8075_s17  ;;  %s8087_s17 = smov 94  }
  0x5c   : > { %1015 = vrot.lane.b32.xlu1 %v8180_v0, %s11362_s20  ;;  %1013 = vrot.lane.b32.xlu0 %v8182_v1, %s11362_s20 }
  0x60   : > { %1420 = vrot.lane.b32.xlu1 %v8180_v0, %s8077_s21  ;;  %1418 = vrot.lane.b32.xlu0 %v8182_v1, %s8077_s21  ;;  %s8113_s21 = smov 6  }
  0x64   : > { %988 = vrot.lane.b32.xlu1 %v8180_v0, %s8078_s22  ;;  %986 = vrot.lane.b32.xlu0 %v8182_v1, %s8078_s22  ;;  %s8097_s22 = smov 14  }
  0x68   : > { %1393 = vrot.lane.b32.xlu1 %v8180_v0, %s8079_s23  ;;  %1391 = vrot.lane.b32.xlu0 %v8182_v1, %s8079_s23  ;;  %s8088_s23 = smov 95  }
  0x6c   : > { %961 = vrot.lane.b32.xlu1 %v8180_v0, %s11287_s24  ;;  %959 = vrot.lane.b32.xlu0 %v8182_v1, %s11287_s24  ;;  %s11305_s24 = smov 17  }
  0x70   : > { %1366 = vrot.lane.b32.xlu1 %v8180_v0, %s8081_s25  ;;  %1364 = vrot.lane.b32.xlu0 %v8182_v1, %s8081_s25  ;;  %s8092_s25 = smov 97  }
  0x74   : > { %934 = vrot.lane.b32.xlu1 %v8180_v0, %s11291_s26  ;;  %932 = vrot.lane.b32.xlu0 %v8182_v1, %s11291_s26  ;;  %s8112_s26 = smov 118  }
  0x78   : > { %1339 = vrot.lane.b32.xlu1 %v8180_v0, %s8083_s27  ;;  %1337 = vrot.lane.b32.xlu0 %v8182_v1, %s8083_s27  ;;  %s11293_s27 = smov 13  }
  0x7c   : > { %907 = vrot.lane.b32.xlu1 %v8180_v0, %s8084_s28  ;;  %905 = vrot.lane.b32.xlu0 %v8182_v1, %s8084_s28 }
  0x80   : > { %1312 = vrot.lane.b32.xlu1 %v8180_v0, %s8085_s29  ;;  %1310 = vrot.lane.b32.xlu0 %v8182_v1, %s8085_s29  ;;  %s11364_s29 = smov 1  }
  0x82   : > { %v607_v7 = vpop.permute.xlu1 %606  ;;  %v634_v8 = vpop.permute.xlu0 %633 }
  0x84   : > { %880 = vrot.lane.b32.xlu1 %v8180_v0, %s11360_s13  ;;  %878 = vrot.lane.b32.xlu0 %v8182_v1, %s11360_s13 }
  0x86   : > { %v610_v15 = vpop.permute.xlu1 %609  ;;  %v637_v16 = vpop.permute.xlu0 %636 }
  0x87   : > { %v612_v17 = vsel %vm611_vm0, %v610_v15, %v607_v7  ;;  %v639_v18 = vsel %vm638_vm1, %v637_v16, %v634_v8  ;;  %v642_v19 = vsel %vm638_vm1, %v634_v8, %v637_v16  ;;  %v615_v21 = vsel %vm611_vm0, %v607_v7, %v610_v15 }
  0x88   : > { %v656_v22 = vmul.f32 %v649_v10, %v642_v19  ;;  %v657_v23 = vmul.f32 %v653_v11, %v639_v18  ;;  %1285 = vrot.lane.b32.xlu1 %v8180_v0, %s8087_s17  ;;  %1283 = vrot.lane.b32.xlu0 %v8182_v1, %s8087_s17  ;;  %v630_v26 = vmul.f32 %v626_v14, %v612_v17  ;;  %v7300_v14 = vld [vmem:[%s11284_s3 + $0x7] ss:$8 sm:$0x3]  ;;  %vm1476_vm0 = vcmask 637952  }
  0x89   : > { %v629_v29 = vmul.f32 %v622_v13, %v615_v21  ;;  %v464_v13 = vrot.slane %v7301_v63, %v8269_v5  ;;  %v433_v21 = vrot.slane %v7300_v14, %v8266_v4  ;;  %vm11296_vm1 = vcmask 64512  }
  0x8a   : > { %v583_v27 = vpop.permute.xlu1 %582  ;;  %v580_v28 = vpop.permute.xlu0 %579  ;;  %1632 = vmatprep.subr.mxu0 %v657_v23  ;;  %v7299_v23 = vld [vmem:[%s11284_s3 + $0x6] ss:$8 sm:$0x3] }
  0x8b   : > { %v585_v30 = vsel %vm584_vm2, %v583_v27, %v580_v28  ;;  %v588_v31 = vsel %vm584_vm2, %v580_v28, %v583_v27  ;;  %1633 = vmatpush1.msra.mxu0 %v656_v22  ;;  %v437_v22 = vrot.slane %v7300_v14, %v8269_v5  ;;  %vm11351_vm2 = vcmask 916480  }
  0x8c   : > { %v602_v33 = vmul.f32 %v595_v20, %v588_v31  ;;  %v603_v34 = vmul.f32 %v599_v24, %v585_v30  ;;  %1258 = vrot.lane.b32.xlu1 %v8180_v0, %s8088_s23  ;;  %1634 = vmatprep.subr.mxu0 %v630_v26  ;;  %v406_v30 = vrot.slane %v7299_v23, %v8266_v4 }
  0x8d   : > { %1256 = vrot.lane.b32.xlu0 %v8182_v1, %s8088_s23  ;;  %1635 = vmatpush1.msra.mxu0 %v629_v29  ;;  %v410_v31 = vrot.slane %v7299_v23, %v8269_v5 }
  0x8e   : > { %v556_v37 = vpop.permute.xlu1 %555  ;;  %v553_v38 = vpop.permute.xlu0 %552  ;;  %1636 = vmatprep.subr.mxu0 %v603_v34 }
  0x8f   : > { %v558_v39 = vsel %vm557_vm3, %v556_v37, %v553_v38  ;;  %v561_v40 = vsel %vm557_vm3, %v553_v38, %v556_v37  ;;  %1637 = vmatpush1.msra.mxu0 %v602_v33  ;;  %vm1449_vm3 = vcmask 646144  }
  0x90   : > { %v575_v41 = vmul.f32 %v568_v32, %v561_v40  ;;  %v576_v42 = vmul.f32 %v572_v35, %v558_v39  ;;  %852 = vrot.lane.b32.xlu1 %v8182_v1, %s11364_s29  ;;  %v7298_v32 = vld [vmem:[%s11284_s3 + $0x5] ss:$8 sm:$0x3] }
  0x91   : > { %849 = vrot.lane.b32.xlu0 %v8180_v0, %s11364_s29  ;;  %v379_v39 = vrot.slane %v7298_v32, %v8266_v4  ;;  %v383_v40 = vrot.slane %v7298_v32, %v8269_v5 }
  0x92   : > { %v529_v46 = vpop.permute.xlu1 %528  ;;  %v526_v47 = vpop.permute.xlu0 %525  ;;  %1638 = vmatprep.subr.mxu0 %v576_v42 }
  0x93   : > { %v531_v48 = vsel %vm530_vm4, %v529_v46, %v526_v47  ;;  %v534_v49 = vsel %vm530_vm4, %v526_v47, %v529_v46  ;;  %1639 = vmatpush1.msra.mxu0 %v575_v41  ;;  %v7297_v41 = vld [vmem:[%s11284_s3 + $0x4] ss:$8 sm:$0x3]  ;;  %vm11328_vm4 = vcmask 924672  }
  0x94   : > { %v548_v50 = vmul.f32 %v541_v43, %v534_v49  ;;  %v549_v51 = vmul.f32 %v545_v44, %v531_v48  ;;  %1231 = vrot.lane.b32.xlu1 %v8180_v0, %s8090_s7  ;;  %v352_v48 = vrot.slane %v7297_v41, %v8266_v4  ;;  %v356_v49 = vrot.slane %v7297_v41, %v8269_v5 }
  0x95   : > { %1229 = vrot.lane.b32.xlu0 %v8182_v1, %s8090_s7 }
  0x96   : > { %v502_v55 = vpop.permute.xlu1 %501  ;;  %v499_v56 = vpop.permute.xlu0 %498  ;;  %1640 = vmatprep.subr.mxu0 %v549_v51 }
  0x97   : > { %v504_v57 = vsel %vm11295_vm5, %v502_v55, %v499_v56  ;;  %v507_v58 = vsel %vm11295_vm5, %v499_v56, %v502_v55  ;;  %1641 = vmatpush1.msra.mxu0 %v548_v50  ;;  %v7296_v50 = vld [vmem:[%s11284_s3 + $0x3] ss:$8 sm:$0x3]  ;;  %vm1179_vm5 = vcmask 801792  }
  0x98   : > { %v521_v59 = vmul.f32 %v514_v52, %v507_v58  ;;  %v522_v60 = vmul.f32 %v518_v53, %v504_v57  ;;  %825 = vrot.lane.b32.xlu1 %v8182_v1, %s8091_s15  ;;  %v325_v57 = vrot.slane %v7296_v50, %v8266_v4  ;;  %v329_v58 = vrot.slane %v7296_v50, %v8269_v5 }
  0x99   : > { %822 = vrot.lane.b32.xlu0 %v8180_v0, %s8091_s15  ;;  %s8094_s15 = smov 98  }
  0x9a   : > { %v475_v6 = vpop.permute.xlu1 %474  ;;  %v472_v7 = vpop.permute.xlu0 %471  ;;  %1642 = vmatprep.subr.mxu0 %v522_v60 }
  0x9b   : > { %v477_v8 = vsel %vm476_vm6, %v475_v6, %v472_v7  ;;  %v480_v9 = vsel %vm476_vm6, %v472_v7, %v475_v6  ;;  %1643 = vmatpush1.msra.mxu0 %v521_v59  ;;  %v7295_v59 = vld [vmem:[%s11284_s3 + $0x2] ss:$8 sm:$0x3]  ;;  %vm1422_vm6 = vcmask 654336  }
  0x9c   : > { %v494_v10 = vmul.f32 %v487_v61, %v480_v9  ;;  %v495_v11 = vmul.f32 %v491_v62, %v477_v8  ;;  %1204 = vrot.lane.b32.xlu1 %v8180_v0, %s8092_s25  ;;  %v298_v8 = vrot.slane %v7295_v59, %v8266_v4  ;;  %v302_v9 = vrot.slane %v7295_v59, %v8269_v5 }
  0x9d   : > { %1202 = vrot.lane.b32.xlu0 %v8182_v1, %s8092_s25 }
  0x9e   : > { %v448_v15 = vpop.permute.xlu1 %447  ;;  %v445_v16 = vpop.permute.xlu0 %444  ;;  %1644 = vmatprep.subr.mxu0 %v495_v11 }
  0x9f   : > { %v450_v17 = vsel %vm449_vm7, %v448_v15, %v445_v16  ;;  %v453_v18 = vsel %vm449_vm7, %v445_v16, %v448_v15  ;;  %1645 = vmatpush1.msra.mxu0 %v494_v10  ;;  %v7294_v10 = vld [vmem:[%s11284_s3 + $0x1] ss:$8 sm:$0x3]  ;;  %vm990_vm7 = vcmask 932864  }
  0xa0   : > { %v467_v19 = vmul.f32 %v460_v12, %v453_v18  ;;  %v468_v20 = vmul.f32 %v464_v13, %v450_v17  ;;  %798 = vrot.lane.b32.xlu1 %v8182_v1, %s11289_s6  ;;  %v271_v17 = vrot.slane %v7294_v10, %v8266_v4  ;;  %v275_v18 = vrot.slane %v7294_v10, %v8269_v5 }
  0xa1   : > { %795 = vrot.lane.b32.xlu0 %v8180_v0, %s11289_s6  ;;  %s11320_s6 = smov 111  }
  0xa2   : > { %v421_v24 = vpop.permute.xlu1 %420  ;;  %v418_v25 = vpop.permute.xlu0 %417  ;;  %1646 = vmatprep.subr.mxu0 %v468_v20 }
  0xa3   : > { %v423_v26 = vsel %vm422_vm8, %v421_v24, %v418_v25  ;;  %v426_v27 = vsel %vm422_vm8, %v418_v25, %v421_v24  ;;  %1647 = vmatpush1.msra.mxu0 %v467_v19  ;;  %v239_v19 = vld [vmem:[%s11284_s3] ss:$8 sm:$0x3]  ;;  %vm1395_vm8 = vcmask 662528  }
  0xa4   : > { %v440_v28 = vmul.f32 %v433_v21, %v426_v27  ;;  %v441_v29 = vmul.f32 %v437_v22, %v423_v26  ;;  %1177 = vrot.lane.b32.xlu1 %v8180_v0, %s8094_s15  ;;  %v244_v26 = vrot.slane %v239_v19, %v8266_v4  ;;  %v248_v27 = vrot.slane %v239_v19, %v8269_v5 }
  0xa5   : > { %1175 = vrot.lane.b32.xlu0 %v8182_v1, %s8094_s15  ;;  %s8100_s15 = smov 110  }
  0xa6   : > { %v394_v33 = vpop.permute.xlu1 %393  ;;  %v391_v34 = vpop.permute.xlu0 %390  ;;  %1648 = vmatprep.subr.mxu0 %v441_v29 }
  0xa7   : > { %v396_v35 = vsel %vm395_vm9, %v394_v33, %v391_v34  ;;  %v399_v36 = vsel %vm395_vm9, %v391_v34, %v394_v33  ;;  %1649 = vmatpush1.msra.mxu0 %v440_v28  ;;  %v7339_v28 = vld [vmem:[%s11284_s3 + $0x57] ss:$8 sm:$0x3]  ;;  %vm963_vm9 = vcmask 941056  }
  0xa8   : > { %v413_v37 = vmul.f32 %v406_v30, %v399_v36  ;;  %v414_v38 = vmul.f32 %v410_v31, %v396_v35  ;;  %771 = vrot.lane.b32.xlu1 %v8182_v1, %s11293_s27  ;;  %v1488_v35 = vrot.slane %v7339_v28, %v8266_v4  ;;  %v1492_v36 = vrot.slane %v7339_v28, %v8269_v5 }
  0xa9   : > { %768 = vrot.lane.b32.xlu0 %v8180_v0, %s11293_s27  ;;  %s11337_s27 = smov 65  }
  0xaa   : > { %v367_v42 = vpop.permute.xlu1 %366  ;;  %v364_v43 = vpop.permute.xlu0 %363  ;;  %1650 = vmatprep.subr.mxu0 %v414_v38  ;;  %v1527_v38 = vld [vmem:[%s11282_s1 + $0x8] sm:$0xff] }
  0xab   : > { %v369_v44 = vsel %vm11302_vm10, %v367_v42, %v364_v43  ;;  %v372_v45 = vsel %vm11302_vm10, %v364_v43, %v367_v42  ;;  %1651 = vmatpush1.msra.mxu0 %v413_v37  ;;  %v7323_v37 = vld [vmem:[%s11284_s3 + $0x37] ss:$8 sm:$0x3]  ;;  %1696 = vmatprep.mubr.f32.mxu0 %v1527_v38  ;;  %vm1503_vm10 = vcmask 629760  }
  0xac   : > { %v386_v46 = vmul.f32 %v379_v39, %v372_v45  ;;  %v387_v47 = vmul.f32 %v383_v40, %v369_v44  ;;  %1150 = vrot.lane.b32.xlu1 %v8180_v0, %s8096_s14  ;;  %v1056_v43 = vrot.slane %v7323_v37, %v8266_v4  ;;  %v1529_v44 = vld [vmem:[%s11282_s1 + $0x18] sm:$0xff] }
  0xad   : > { %1148 = vrot.lane.b32.xlu0 %v8182_v1, %s8096_s14  ;;  %s8098_s14 = smov 109   ;;  %7341 = vmatprep.mubr.msk.f32.mxu1 %vm11296_vm1, %v1529_v44  ;;  %vm11298_vm1 = vcmask 105472  }
  0xae   : > { %v340_v51 = vpop.permute.xlu1 %339  ;;  %v337_v52 = vpop.permute.xlu0 %336  ;;  %1652 = vmatprep.subr.mxu0 %v387_v47  ;;  %v1060_v47 = vrot.slane %v7323_v37, %v8269_v5 }
  0xaf   : > { %v342_v53 = vsel %vm11301_vm11, %v340_v51, %v337_v52  ;;  %v345_v54 = vsel %vm11301_vm11, %v337_v52, %v340_v51  ;;  %1653 = vmatpush1.msra.mxu0 %v386_v46  ;;  %vm11326_vm11 = vcmask 138240  }
  0xb0   : > { %v359_v55 = vmul.f32 %v352_v48, %v345_v54  ;;  %v360_v56 = vmul.f32 %v356_v49, %v342_v53  ;;  %744 = vrot.lane.b32.xlu1 %v8182_v1, %s8097_s22  ;;  %v7338_v48 = vld [vmem:[%s11284_s3 + $0x56] ss:$8 sm:$0x3] }
  0xb1   : > { %741 = vrot.lane.b32.xlu0 %v8180_v0, %s8097_s22 }
  0xb2   : > { %v313_v60 = vpop.permute.xlu1 %312  ;;  %v310_v61 = vpop.permute.xlu0 %309  ;;  %1654 = vmatprep.subr.mxu0 %v360_v56  ;;  %v1465_v56 = vrot.slane %v7338_v48, %v8269_v5 }
  0xb3   : > { %v315_v62 = vsel %vm11300_vm12, %v313_v60, %v310_v61  ;;  %v318_v63 = vsel %vm11300_vm12, %v310_v61, %v313_v60  ;;  %1655 = vmatpush1.msra.mxu0 %v359_v55  ;;  %v1461_v55 = vrot.slane %v7338_v48, %v8266_v4  ;;  %vm11356_vm12 = vcmask 908288  }
  0xb4   : > { %v332_v6 = vmul.f32 %v325_v57, %v318_v63  ;;  %v333_v7 = vmul.f32 %v329_v58, %v315_v62  ;;  %1123 = vrot.lane.b32.xlu1 %v8180_v0, %s8098_s14  ;;  %v7322_v57 = vld [vmem:[%s11284_s3 + $0x36] ss:$8 sm:$0x3] }
  0xb5   : > { %1121 = vrot.lane.b32.xlu0 %v8182_v1, %s8098_s14  ;;  %s11303_s14 = smov 16  }
  0xb6   : > { %v286_v11 = vpop.permute.xlu1 %285  ;;  %v283_v12 = vpop.permute.xlu0 %282  ;;  %1656 = vmatprep.subr.mxu0 %v333_v7  ;;  %v1033_v7 = vrot.slane %v7322_v57, %v8269_v5 }
  0xb7   : > { %v288_v13 = vsel %vm11299_vm13, %v286_v11, %v283_v12  ;;  %v291_v14 = vsel %vm11299_vm13, %v283_v12, %v286_v11  ;;  %1657 = vmatpush1.msra.mxu0 %v332_v6  ;;  %v1029_v6 = vrot.slane %v7322_v57, %v8266_v4  ;;  %vm692_vm13 = vcmask 130048  }
  0xb8   : > { %v305_v15 = vmul.f32 %v298_v8, %v291_v14  ;;  %v306_v16 = vmul.f32 %v302_v9, %v288_v13  ;;  %717 = vrot.lane.b32.xlu1 %v8182_v1, %s11307_s30  ;;  %v7337_v8 = vld [vmem:[%s11284_s3 + $0x55] ss:$8 sm:$0x3] }
  0xb9   : > { %714 = vrot.lane.b32.xlu0 %v8180_v0, %s11307_s30  ;;  %v1434_v14 = vrot.slane %v7337_v8, %v8266_v4 }
  0xba   : > { %v259_v20 = vpop.permute.xlu1 %258  ;;  %v256_v21 = vpop.permute.xlu0 %255  ;;  %1658 = vmatprep.subr.mxu0 %v306_v16  ;;  %v7321_v16 = vld [vmem:[%s11284_s3 + $0x35] ss:$8 sm:$0x3] }
  0xbb   : > { %v261_v22 = vsel %vm260_vm14, %v259_v20, %v256_v21  ;;  %v264_v23 = vsel %vm260_vm14, %v256_v21, %v259_v20  ;;  %1659 = vmatpush1.msra.mxu0 %v305_v15  ;;  %v1438_v15 = vrot.slane %v7337_v8, %v8269_v5  ;;  %vm1368_vm14 = vcmask 670720  }
  0xbc   : > { %v278_v24 = vmul.f32 %v271_v17, %v264_v23  ;;  %v279_v25 = vmul.f32 %v275_v18, %v261_v22  ;;  %1096 = vrot.lane.b32.xlu1 %v8180_v0, %s8100_s15  ;;  %v1002_v23 = vrot.slane %v7321_v16, %v8266_v4 }
  0xbd   : > { %1094 = vrot.lane.b32.xlu0 %v8182_v1, %s8100_s15 }
  0xbe   : > { %v233_v29 = vpop.permute.xlu1 %232  ;;  %v229_v30 = vpop.permute.xlu0 %228  ;;  %1660 = vmatprep.subr.mxu0 %v279_v25  ;;  %v7336_v25 = vld [vmem:[%s11284_s3 + $0x54] ss:$8 sm:$0x3] }
  0xbf   : > { %v235_v31 = vsel %vm234_vm15, %v233_v29, %v229_v30  ;;  %v238_v32 = vsel %vm234_vm15, %v229_v30, %v233_v29  ;;  %1661 = vmatpush1.msra.mxu0 %v278_v24  ;;  %v1006_v24 = vrot.slane %v7321_v16, %v8269_v5  ;;  %vm936_vm15 = vcmask 1022976  }
  0xc0   : > { %v251_v33 = vmul.f32 %v244_v26, %v238_v32  ;;  %v252_v34 = vmul.f32 %v248_v27, %v235_v31  ;;  %690 = vrot.lane.b32.xlu1 %v8182_v1, %s11303_s14  ;;  %v1407_v32 = vrot.slane %v7336_v25, %v8266_v4 }
  0xc1   : > { %687 = vrot.lane.b32.xlu0 %v8180_v0, %s11303_s14 }
  0xc2   : > { %v1475_v39 = vpop.permute.xlu1 %1474  ;;  %v1473_v40 = vpop.permute.xlu0 %1472  ;;  %1662 = vmatprep.subr.mxu0 %v252_v34  ;;  %v7320_v34 = vld [vmem:[%s11284_s3 + $0x34] ss:$8 sm:$0x3] }
  0xc3   : > { %v1477_v41 = vsel %vm1476_vm0, %v1473_v40, %v1475_v39  ;;  %v1481_v42 = vsel %vm1476_vm0, %v1475_v39, %v1473_v40  ;;  %1663 = vmatpush1.msra.mxu0 %v251_v33  ;;  %v1411_v33 = vrot.slane %v7336_v25, %v8269_v5  ;;  %vm1341_vm0 = vcmask 678912  }
  0xc4   : > { %v1495_v45 = vmul.f32 %v1488_v35, %v1477_v41  ;;  %v1496_v46 = vmul.f32 %v1492_v36, %v1481_v42  ;;  %1069 = vrot.lane.b32.xlu1 %v8180_v0, %s11320_s6  ;;  %v975_v41 = vrot.slane %v7320_v34, %v8266_v4  ;;  %v979_v42 = vrot.slane %v7320_v34, %v8269_v5 }
  0xc5   : > { %1067 = vrot.lane.b32.xlu0 %v8182_v1, %s11320_s6 }
  0xc6   : > { %v1043_v49 = vpop.permute.xlu1 %1042  ;;  %v1041_v50 = vpop.permute.xlu0 %1040  ;;  %1703 = vmatprep.subr.mxu1 %v1496_v46 }
  0xc7   : > { %v1045_v51 = vsel %vm11351_vm2, %v1041_v50, %v1043_v49  ;;  %v1049_v52 = vsel %vm11351_vm2, %v1043_v49, %v1041_v50  ;;  %1704 = vmatpush1.msra.mxu1 %v1495_v45 }
  0xc8   : > { %v1063_v53 = vmul.f32 %v1056_v43, %v1045_v51  ;;  %v1064_v54 = vmul.f32 %v1060_v47, %v1049_v52  ;;  %663 = vrot.lane.b32.xlu1 %v8182_v1, %s11305_s24  ;;  %v7335_v43 = vld [vmem:[%s11284_s3 + $0x53] ss:$8 sm:$0x3] }
  0xc9   : > { %660 = vrot.lane.b32.xlu0 %v8180_v0, %s11305_s24  ;;  %v1380_v50 = vrot.slane %v7335_v43, %v8266_v4  ;;  %v1384_v51 = vrot.slane %v7335_v43, %v8269_v5  ;;  %v7319_v52 = vld [vmem:[%s11284_s3 + $0x33] ss:$8 sm:$0x3] }
  0xca   : > { %1065 = vst [vmem:[#allocation2 + $0x1f0] sm:$0xff] %v1063_v53  ;;  %v1448_v58 = vpop.permute.xlu1 %1447  ;;  %v1446_v59 = vpop.permute.xlu0 %1445  ;;  %1664 = vmatprep.subr.mxu0 %v1064_v54 }
  0xcb   : > { %v1450_v60 = vsel %vm1449_vm3, %v1446_v59, %v1448_v58  ;;  %v1454_v61 = vsel %vm1449_vm3, %v1448_v58, %v1446_v59  ;;  %1665 = vmatpush2.msra.mxu0 %v1063_v53  ;;  %v948_v59 = vrot.slane %v7319_v52, %v8266_v4  ;;  %vm909_vm3 = vcmask 1031168  }
  0xcc   : > { %v1468_v62 = vmul.f32 %v1461_v55, %v1450_v60  ;;  %v1469_v63 = vmul.f32 %v1465_v56, %v1454_v61  ;;  %1501 = vrot.lane.b32.xlu1 %v8180_v0, %s8104_s8  ;;  %v952_v60 = vrot.slane %v7319_v52, %v8269_v5  ;;  %v7334_v61 = vld [vmem:[%s11284_s3 + $0x52] ss:$8 sm:$0x3] }
  0xcd   : > { %1499 = vrot.lane.b32.xlu0 %v8182_v1, %s8104_s8  ;;  %s8111_s8 = smov 54  }
  0xce   : > { %v1016_v9 = vpop.permute.xlu1 %1015  ;;  %v1014_v10 = vpop.permute.xlu0 %1013  ;;  %1705 = vmatprep.subr.mxu1 %v1469_v63 }
  0xcf   : > { %v1018_v11 = vsel %vm11328_vm4, %v1014_v10, %v1016_v9  ;;  %v1022_v12 = vsel %vm11328_vm4, %v1016_v9, %v1014_v10  ;;  %1706 = vmatpush1.msra.mxu1 %v1468_v62  ;;  %v1353_v10 = vrot.slane %v7334_v61, %v8266_v4 }
  0xd0   : > { %v1036_v0 = vmul.f32 %v1029_v6, %v1018_v11  ;;  %v1037_v13 = vmul.f32 %v1033_v7, %v1022_v12  ;;  %v1357_v11 = vrot.slane %v7334_v61, %v8269_v5  ;;  %v7318_v12 = vld [vmem:[%s11284_s3 + $0x32] ss:$8 sm:$0x3] }
  0xd2   : > { %1038 = vst [vmem:[#allocation2 + $0x1e0] sm:$0xff] %v1036_v0  ;;  %v1421_v17 = vpop.permute.xlu1 %1420  ;;  %v1419_v18 = vpop.permute.xlu0 %1418  ;;  %1666 = vmatprep.subr.mxu0 %v1037_v13 }
  0xd3   : > { %v1423_v19 = vsel %vm1422_vm6, %v1419_v18, %v1421_v17  ;;  %v1427_v20 = vsel %vm1422_vm6, %v1421_v17, %v1419_v18  ;;  %1667 = vmatpush2.msra.mxu0 %v1036_v0  ;;  %v921_v18 = vrot.slane %v7318_v12, %v8266_v4  ;;  %vm1314_vm6 = vcmask 760832  }
  0xd4   : > { %v1441_v21 = vmul.f32 %v1434_v14, %v1423_v19  ;;  %v1442_v22 = vmul.f32 %v1438_v15, %v1427_v20  ;;  %v925_v19 = vrot.slane %v7318_v12, %v8269_v5  ;;  %v7333_v20 = vld [vmem:[%s11284_s3 + $0x51] ss:$8 sm:$0x3] }
  0xd6   : > { %v989_v26 = vpop.permute.xlu1 %988  ;;  %v987_v27 = vpop.permute.xlu0 %986  ;;  %1707 = vmatprep.subr.mxu1 %v1442_v22 }
  0xd7   : > { %v991_v28 = vsel %vm990_vm7, %v987_v27, %v989_v26  ;;  %v995_v29 = vsel %vm990_vm7, %v989_v26, %v987_v27  ;;  %1708 = vmatpush1.msra.mxu1 %v1441_v21  ;;  %v1326_v27 = vrot.slane %v7333_v20, %v8266_v4  ;;  %vm11327_vm7 = vcmask 1039360  }
  0xd8   : > { %v1009_v30 = vmul.f32 %v1002_v23, %v991_v28  ;;  %v1010_v31 = vmul.f32 %v1006_v24, %v995_v29  ;;  %v1330_v28 = vrot.slane %v7333_v20, %v8269_v5  ;;  %v7317_v29 = vld [vmem:[%s11284_s3 + $0x31] ss:$8 sm:$0x3] }
  0xda   : > { %1011 = vst [vmem:[#allocation2 + $0x1d0] sm:$0xff] %v1009_v30  ;;  %v1394_v35 = vpop.permute.xlu1 %1393  ;;  %v1392_v36 = vpop.permute.xlu0 %1391  ;;  %1668 = vmatprep.subr.mxu0 %v1010_v31 }
  0xdb   : > { %v1396_v37 = vsel %vm1395_vm8, %v1392_v36, %v1394_v35  ;;  %v1400_v38 = vsel %vm1395_vm8, %v1394_v35, %v1392_v36  ;;  %1669 = vmatpush2.msra.mxu0 %v1009_v30  ;;  %v894_v36 = vrot.slane %v7317_v29, %v8266_v4  ;;  %vm1287_vm8 = vcmask 769024  }
  0xdc   : > { %v1414_v39 = vmul.f32 %v1407_v32, %v1396_v37  ;;  %v1415_v40 = vmul.f32 %v1411_v33, %v1400_v38  ;;  %v898_v37 = vrot.slane %v7317_v29, %v8269_v5 }
  0xde   : > { %v962_v44 = vpop.permute.xlu1 %961  ;;  %v960_v45 = vpop.permute.xlu0 %959  ;;  %1709 = vmatprep.subr.mxu1 %v1415_v40  ;;  %v7332_v40 = vld [vmem:[%s11284_s3 + $0x50] ss:$8 sm:$0x3] }
  0xdf   : > { %v964_v46 = vsel %vm963_vm9, %v960_v45, %v962_v44  ;;  %v968_v47 = vsel %vm963_vm9, %v962_v44, %v960_v45  ;;  %1710 = vmatpush1.msra.mxu1 %v1414_v39  ;;  %v1299_v45 = vrot.slane %v7332_v40, %v8266_v4  ;;  %vm1260_vm9 = vcmask 777216  }
  0xe0   : > { %v982_v48 = vmul.f32 %v975_v41, %v964_v46  ;;  %v983_v49 = vmul.f32 %v979_v42, %v968_v47  ;;  %v1303_v46 = vrot.slane %v7332_v40, %v8269_v5  ;;  %v1579_v47 = vld [vmem:[#allocation2 + $0x188] sm:$0xff] }
  0xe2   : > { %984 = vst [vmem:[#allocation2 + $0x1c0] sm:$0xff] %v982_v48  ;;  %v1367_v53 = vpop.permute.xlu1 %1366  ;;  %v1365_v54 = vpop.permute.xlu0 %1364  ;;  %1670 = vmatprep.subr.mxu0 %v983_v49  ;;  %v7331_v49 = vld [vmem:[%s11284_s3 + $0x47] ss:$8 sm:$0x3] }
  0xe3   : > { %v1369_v55 = vsel %vm1368_vm14, %v1365_v54, %v1367_v53  ;;  %v1373_v56 = vsel %vm1368_vm14, %v1367_v53, %v1365_v54  ;;  %1671 = vmatpush2.msra.mxu0 %v982_v48  ;;  %vm854_vm14 = vcmask 7168  }
  0xe4   : > { %v1387_v57 = vmul.f32 %v1380_v50, %v1369_v55  ;;  %v1388_v58 = vmul.f32 %v1384_v51, %v1373_v56  ;;  %v1578_v50 = vld [vmem:[#allocation2 + $0x180] sm:$0xff]  ;;  %v1272_v56 = vrot.slane %v7331_v49, %v8266_v4 }
  0xe6   : > { %v935_v62 = vpop.permute.xlu1 %934  ;;  %v933_v63 = vpop.permute.xlu0 %932  ;;  %1711 = vmatprep.subr.mxu1 %v1388_v58 }
  0xe7   : > { %v937_v6 = vsel %vm936_vm15, %v933_v63, %v935_v62  ;;  %v941_v7 = vsel %vm936_vm15, %v935_v62, %v933_v63  ;;  %1712 = vmatpush1.msra.mxu1 %v1387_v57  ;;  %v1276_v57 = vrot.slane %v7331_v49, %v8269_v5  ;;  %vm1233_vm15 = vcmask 785408  }
  0xe8   : > { %v955_v8 = vmul.f32 %v948_v59, %v937_v6  ;;  %v956_v9 = vmul.f32 %v952_v60, %v941_v7  ;;  %v7316_v59 = vld [vmem:[%s11284_s3 + $0x27] ss:$8 sm:$0x3] }
  0xe9   : > { %v865_v7 = vrot.slane %v7316_v59, %v8266_v4 }
  0xea   : > { %957 = vst [vmem:[#allocation2 + $0x1b0] sm:$0xff] %v955_v8  ;;  %v1340_v0 = vpop.permute.xlu1 %1339  ;;  %v1338_v13 = vpop.permute.xlu0 %1337  ;;  %1672 = vmatprep.subr.mxu0 %v956_v9 }
  0xeb   : > { %v1342_v14 = vsel %vm1341_vm0, %v1338_v13, %v1340_v0  ;;  %v1346_v15 = vsel %vm1341_vm0, %v1340_v0, %v1338_v13  ;;  %1673 = vmatpush2.msra.mxu0 %v955_v8  ;;  %v869_v8 = vrot.slane %v7316_v59, %v8269_v5  ;;  %vm827_vm0 = vcmask 15360  }
  0xec   : > { %v1360_v16 = vmul.f32 %v1353_v10, %v1342_v14  ;;  %v1361_v17 = vmul.f32 %v1357_v11, %v1346_v15  ;;  %v7330_v10 = vld [vmem:[%s11284_s3 + $0x46] ss:$8 sm:$0x3] }
  0xed   : > { %v1245_v15 = vrot.slane %v7330_v10, %v8266_v4 }
  0xee   : > { %v908_v21 = vpop.permute.xlu1 %907  ;;  %v906_v22 = vpop.permute.xlu0 %905  ;;  %1713 = vmatprep.subr.mxu1 %v1361_v17 }
  0xef   : > { %v910_v23 = vsel %vm909_vm3, %v906_v22, %v908_v21  ;;  %v914_v24 = vsel %vm909_vm3, %v908_v21, %v906_v22  ;;  %1714 = vmatpush1.msra.mxu1 %v1360_v16  ;;  %v1249_v16 = vrot.slane %v7330_v10, %v8269_v5 }
  0xf0   : > { %v928_v25 = vmul.f32 %v921_v18, %v910_v23  ;;  %v929_v26 = vmul.f32 %v925_v19, %v914_v24  ;;  %v7315_v18 = vld [vmem:[%s11284_s3 + $0x26] ss:$8 sm:$0x3] }
  0xf1   : > { %v838_v24 = vrot.slane %v7315_v18, %v8266_v4 }
  0xf2   : > { %930 = vst [vmem:[#allocation2 + $0x1a0] sm:$0xff] %v928_v25  ;;  %v1313_v30 = vpop.permute.xlu1 %1312  ;;  %v1311_v31 = vpop.permute.xlu0 %1310  ;;  %1674 = vmatprep.subr.mxu0 %v929_v26 }
  0xf3   : > { %v1315_v32 = vsel %vm1314_vm6, %v1311_v31, %v1313_v30  ;;  %v1319_v33 = vsel %vm1314_vm6, %v1313_v30, %v1311_v31  ;;  %1675 = vmatpush2.msra.mxu0 %v928_v25  ;;  %v842_v25 = vrot.slane %v7315_v18, %v8269_v5  ;;  %vm1206_vm6 = vcmask 793600  }
  0xf4   : > { %v1333_v34 = vmul.f32 %v1326_v27, %v1315_v32  ;;  %v1334_v35 = vmul.f32 %v1330_v28, %v1319_v33  ;;  %v7329_v27 = vld [vmem:[%s11284_s3 + $0x45] ss:$8 sm:$0x3] }
  0xf5   : > { %v1218_v33 = vrot.slane %v7329_v27, %v8266_v4 }
  0xf6   : > { %v881_v38 = vpop.permute.xlu1 %880  ;;  %v879_v39 = vpop.permute.xlu0 %878  ;;  %1715 = vmatprep.subr.mxu1 %v1334_v35 }
  0xf7   : > { %v883_v41 = vsel %vm11327_vm7, %v879_v39, %v881_v38  ;;  %v887_v42 = vsel %vm11327_vm7, %v881_v38, %v879_v39  ;;  %1716 = vmatpush1.msra.mxu1 %v1333_v34  ;;  %v1222_v34 = vrot.slane %v7329_v27, %v8269_v5 }
  0xf8   : > { %v901_v43 = vmul.f32 %v894_v36, %v883_v41  ;;  %v902_v44 = vmul.f32 %v898_v37, %v887_v42  ;;  %v7314_v36 = vld [vmem:[%s11284_s3 + $0x25] ss:$8 sm:$0x3] }
  0xf9   : > { %v811_v42 = vrot.slane %v7314_v36, %v8266_v4 }
  0xfa   : > { %903 = vst [vmem:[#allocation2 + $0x190] sm:$0xff] %v901_v43  ;;  %v1286_v48 = vpop.permute.xlu1 %1285  ;;  %1676 = vmatprep.subr.mxu0 %v902_v44  ;;  %v1284_v51 = vpop.permute.xlu0 %1283 }
  0xfb   : > { %1677 = vmatpush2.msra.mxu0 %v901_v43  ;;  %v1288_v52 = vsel %vm1287_vm8, %v1284_v51, %v1286_v48  ;;  %v1292_v53 = vsel %vm1287_vm8, %v1286_v48, %v1284_v51  ;;  %v815_v43 = vrot.slane %v7314_v36, %v8269_v5 }
  0xfc   : > { %1678 = vmatprep.subr.mxu0 %v1579_v47  ;;  %v1306_v54 = vmul.f32 %v1299_v45, %v1288_v52  ;;  %v1307_v55 = vmul.f32 %v1303_v46, %v1292_v53  ;;  %v7328_v45 = vld [vmem:[%s11284_s3 + $0x44] ss:$8 sm:$0x3] }
  0xfd   : > { %1679 = vmatpush2.msra.mxu0 %v1578_v50  ;;  %v1191_v51 = vrot.slane %v7328_v45, %v8266_v4  ;;  %v1195_v52 = vrot.slane %v7328_v45, %v8269_v5 }
  0xfe   : > { %v1259_v58 = vpop.permute.xlu1 %1258  ;;  %1717 = vmatprep.subr.mxu1 %v1307_v55 }
  0xff   : > { %v1257_v60 = vpop.permute.xlu0 %1256  ;;  %1718 = vmatpush1.msra.mxu1 %v1306_v54  ;;  %v7313_v54 = vld [vmem:[%s11284_s3 + $0x24] ss:$8 sm:$0x3] }
 0x100   : > { %v1261_v61 = vsel %vm1260_vm9, %v1257_v60, %v1259_v58  ;;  %v1265_v62 = vsel %vm1260_vm9, %v1259_v58, %v1257_v60  ;;  %v784_v60 = vrot.slane %v7313_v54, %v8266_v4 }
 0x101   : > { %v1279_v63 = vmul.f32 %v1272_v56, %v1261_v61  ;;  %v1280_v6 = vmul.f32 %v1276_v57, %v1265_v62  ;;  %v788_v61 = vrot.slane %v7313_v54, %v8269_v5 }
 0x102   : > { %v853_v9 = vpop.permute.xlu1 %852 }
 0x103   : > { %v850_v11 = vpop.permute.xlu0 %849  ;;  %1719 = vmatprep.subr.mxu1 %v1280_v6 }
 0x104   : > { %v855_v12 = vsel %vm854_vm14, %v853_v9, %v850_v11  ;;  %v858_v0 = vsel %vm854_vm14, %v850_v11, %v853_v9  ;;  %1720 = vmatpush1.msra.mxu1 %v1279_v63  ;;  %v7327_v63 = vld [vmem:[%s11284_s3 + $0x43] ss:$8 sm:$0x3] }
 0x105   : > { %v872_v13 = vmul.f32 %v865_v7, %v858_v0  ;;  %v873_v14 = vmul.f32 %v869_v8, %v855_v12  ;;  %v1164_v11 = vrot.slane %v7327_v63, %v8266_v4  ;;  %v1168_v12 = vrot.slane %v7327_v63, %v8269_v5 }
 0x106   : > { %v1232_v17 = vpop.permute.xlu1 %1231 }
 0x107   : > { %874 = vst [vmem:[#allocation2 + $0x170] sm:$0xff] %v872_v13  ;;  %v1230_v19 = vpop.permute.xlu0 %1229  ;;  %1680 = vmatprep.subr.mxu0 %v873_v14 }
 0x108   : > { %v1234_v20 = vsel %vm1233_vm15, %v1230_v19, %v1232_v17  ;;  %v1238_v21 = vsel %vm1233_vm15, %v1232_v17, %v1230_v19  ;;  %1681 = vmatpush2.msra.mxu0 %v872_v13  ;;  %v7312_v13 = vld [vmem:[%s11284_s3 + $0x23] ss:$8 sm:$0x3] }
 0x109   : > { %v1252_v22 = vmul.f32 %v1245_v15, %v1234_v20  ;;  %v1253_v23 = vmul.f32 %v1249_v16, %v1238_v21  ;;  %v757_v19 = vrot.slane %v7312_v13, %v8266_v4  ;;  %v761_v20 = vrot.slane %v7312_v13, %v8269_v5 }
 0x10a   : > { %v826_v26 = vpop.permute.xlu1 %825 }
 0x10b   : > { %v823_v28 = vpop.permute.xlu0 %822  ;;  %1721 = vmatprep.subr.mxu1 %v1253_v23 }
 0x10c   : > { %v828_v29 = vsel %vm827_vm0, %v826_v26, %v823_v28  ;;  %v831_v30 = vsel %vm827_vm0, %v823_v28, %v826_v26  ;;  %1722 = vmatpush1.msra.mxu1 %v1252_v22  ;;  %vm11297_vm0 = vcmask 23552   ;;  %v7326_v22 = vld [vmem:[%s11284_s3 + $0x42] ss:$8 sm:$0x3] }
 0x10d   : > { %v845_v31 = vmul.f32 %v838_v24, %v831_v30  ;;  %v846_v32 = vmul.f32 %v842_v25, %v828_v29  ;;  %v1137_v28 = vrot.slane %v7326_v22, %v8266_v4  ;;  %v1141_v29 = vrot.slane %v7326_v22, %v8269_v5 }
 0x10e   : > { %v1205_v35 = vpop.permute.xlu1 %1204 }
 0x10f   : > { %847 = vst [vmem:[#allocation2 + $0x160] sm:$0xff] %v845_v31  ;;  %v1203_v37 = vpop.permute.xlu0 %1202  ;;  %1682 = vmatprep.subr.mxu0 %v846_v32 }
 0x110   : > { %v1207_v38 = vsel %vm1206_vm6, %v1203_v37, %v1205_v35  ;;  %v1211_v39 = vsel %vm1206_vm6, %v1205_v35, %v1203_v37  ;;  %1683 = vmatpush2.msra.mxu0 %v845_v31  ;;  %v7311_v31 = vld [vmem:[%s11284_s3 + $0x22] ss:$8 sm:$0x3] }
 0x111   : > { %v1225_v40 = vmul.f32 %v1218_v33, %v1207_v38  ;;  %v1226_v41 = vmul.f32 %v1222_v34, %v1211_v39  ;;  %v730_v37 = vrot.slane %v7311_v31, %v8266_v4  ;;  %v734_v38 = vrot.slane %v7311_v31, %v8269_v5 }
 0x112   : > { %v799_v44 = vpop.permute.xlu1 %798 }
 0x113   : > { %v796_v46 = vpop.permute.xlu0 %795  ;;  %1723 = vmatprep.subr.mxu1 %v1226_v41 }
 0x114   : > { %v801_v47 = vsel %vm11297_vm0, %v799_v44, %v796_v46  ;;  %v804_v48 = vsel %vm11297_vm0, %v796_v46, %v799_v44  ;;  %1724 = vmatpush1.msra.mxu1 %v1225_v40  ;;  %vm746_vm0 = vcmask 113664   ;;  %v7325_v40 = vld [vmem:[%s11284_s3 + $0x41] ss:$8 sm:$0x3] }
 0x115   : > { %v818_v49 = vmul.f32 %v811_v42, %v804_v48  ;;  %v819_v50 = vmul.f32 %v815_v43, %v801_v47  ;;  %v1110_v46 = vrot.slane %v7325_v40, %v8266_v4  ;;  %v1114_v47 = vrot.slane %v7325_v40, %v8269_v5 }
 0x116   : > { %v1178_v53 = vpop.permute.xlu1 %1177 }
 0x117   : > { %820 = vst [vmem:[#allocation2 + $0x150] sm:$0xff] %v818_v49  ;;  %v1176_v55 = vpop.permute.xlu0 %1175  ;;  %1684 = vmatprep.subr.mxu0 %v819_v50 }
 0x118   : > { %v1180_v56 = vsel %vm1179_vm5, %v1176_v55, %v1178_v53  ;;  %v1184_v57 = vsel %vm1179_vm5, %v1178_v53, %v1176_v55  ;;  %1685 = vmatpush2.msra.mxu0 %v818_v49  ;;  %vm1152_vm5 = vcmask 809984   ;;  %v7310_v49 = vld [vmem:[%s11284_s3 + $0x21] ss:$8 sm:$0x3] }
 0x119   : > { %v1198_v58 = vmul.f32 %v1191_v51, %v1180_v56  ;;  %v1199_v59 = vmul.f32 %v1195_v52, %v1184_v57  ;;  %v703_v55 = vrot.slane %v7310_v49, %v8266_v4  ;;  %v707_v56 = vrot.slane %v7310_v49, %v8269_v5 }
 0x11a   : > { %v772_v62 = vpop.permute.xlu1 %771 }
 0x11b   : > { %v769_v6 = vpop.permute.xlu0 %768  ;;  %1725 = vmatprep.subr.mxu1 %v1199_v59 }
 0x11c   : > { %v774_v7 = vsel %vm11298_vm1, %v772_v62, %v769_v6  ;;  %v777_v8 = vsel %vm11298_vm1, %v769_v6, %v772_v62  ;;  %1726 = vmatpush1.msra.mxu1 %v1198_v58  ;;  %vm719_vm1 = vcmask 121856   ;;  %v7324_v58 = vld [vmem:[%s11284_s3 + $0x40] ss:$8 sm:$0x3] }
 0x11d   : > { %v791_v9 = vmul.f32 %v784_v60, %v777_v8  ;;  %v792_v10 = vmul.f32 %v788_v61, %v774_v7  ;;  %v1083_v6 = vrot.slane %v7324_v58, %v8266_v4  ;;  %v1087_v7 = vrot.slane %v7324_v58, %v8269_v5 }
 0x11e   : > { %v1151_v0 = vpop.permute.xlu1 %1150 }
 0x11f   : > { %793 = vst [vmem:[#allocation2 + $0x140] sm:$0xff] %v791_v9  ;;  %v1149_v14 = vpop.permute.xlu0 %1148  ;;  %1686 = vmatprep.subr.mxu0 %v792_v10 }
 0x120   : > { %v1153_v15 = vsel %vm1152_vm5, %v1149_v14, %v1151_v0  ;;  %v1157_v16 = vsel %vm1152_vm5, %v1151_v0, %v1149_v14  ;;  %1687 = vmatpush2.msra.mxu0 %v791_v9  ;;  %vm1125_vm5 = vcmask 891904   ;;  %v7309_v9 = vld [vmem:[%s11284_s3 + $0x20] ss:$8 sm:$0x3] }
 0x121   : > { %v1171_v17 = vmul.f32 %v1164_v11, %v1153_v15  ;;  %v1172_v18 = vmul.f32 %v1168_v12, %v1157_v16  ;;  %v676_v14 = vrot.slane %v7309_v9, %v8266_v4  ;;  %v680_v15 = vrot.slane %v7309_v9, %v8269_v5  ;;  %v8700_v9 = vld [vmem:[%s11283_s2 + $0x8] sm:$0xff] }
 0x122   : > { %v745_v21 = vpop.permute.xlu1 %744 }
 0x123   : > { %1173 = vst [vmem:[#allocation2 + $0x230] sm:$0xff] %v1171_v17  ;;  %v742_v23 = vpop.permute.xlu0 %741  ;;  %1727 = vmatprep.subr.mxu1 %v1172_v18 }
 0x124   : > { %v747_v24 = vsel %vm746_vm0, %v745_v21, %v742_v23  ;;  %v750_v25 = vsel %vm746_vm0, %v742_v23, %v745_v21  ;;  %1728 = vmatpush1.msra.mxu1 %v1171_v17  ;;  %v7340_v17 = vld [vmem:[%s11284_s3 + $0x60] ss:$8 sm:$0x3] }
 0x125   : > { %v764_v26 = vmul.f32 %v757_v19, %v750_v25  ;;  %v765_v27 = vmul.f32 %v761_v20, %v747_v24  ;;  %v1515_v23 = vrot.slane %v7340_v17, %v8266_v4  ;;  %v1519_v24 = vrot.slane %v7340_v17, %v8269_v5  ;;  %v1821_v17 = vld [vmem:[%s11285_s4 + $0xc0] sm:$0xff] }
 0x126   : > { %v1124_v30 = vpop.permute.xlu1 %1123 }
 0x127   : > { %766 = vst [vmem:[#allocation2 + $0x130] sm:$0xff] %v764_v26  ;;  %v1122_v32 = vpop.permute.xlu0 %1121  ;;  %1688 = vmatprep.subr.mxu0 %v765_v27 }
 0x128   : > { %v1126_v33 = vsel %vm1125_vm5, %v1122_v32, %v1124_v30  ;;  %v1130_v34 = vsel %vm1125_vm5, %v1124_v30, %v1122_v32  ;;  %1689 = vmatpush2.msra.mxu0 %v764_v26  ;;  %vm1098_vm5 = vcmask 900096   ;;  %v1526_v26 = vld [vmem:[%s11282_s1] sm:$0xff]  ;;  %v1528_v32 = vld [vmem:[%s11282_s1 + $0x10] sm:$0xff] }
 0x129   : > { %v1144_v35 = vmul.f32 %v1137_v28, %v1126_v33  ;;  %v1145_v36 = vmul.f32 %v1141_v29, %v1130_v34  ;;  %v8105_v33 = vmov 0   ;;  %v8106_v34 = vmov 1  }
 0x12a   : > { %v718_v39 = vpop.permute.xlu1 %717  ;;  %7946 = vset.pattern.permute.xlu0 %v8105_v33  ;;  %7947 = vset.pattern.permute.xlu1 %v8106_v34 }
 0x12b   : > { %1146 = vst [vmem:[#allocation2 + $0x220] sm:$0xff] %v1144_v35  ;;  %v715_v41 = vpop.permute.xlu0 %714  ;;  %1729 = vmatprep.subr.mxu1 %v1145_v36 }
 0x12c   : > { %v720_v42 = vsel %vm719_vm1, %v718_v39, %v715_v41  ;;  %v723_v43 = vsel %vm719_vm1, %v715_v41, %v718_v39  ;;  %1730 = vmatpush1.msra.mxu1 %v1144_v35 }
 0x12d   : > { %v737_v44 = vmul.f32 %v730_v37, %v723_v43  ;;  %v738_v45 = vmul.f32 %v734_v38, %v720_v42 }
 0x12e   : > { %v1097_v48 = vpop.permute.xlu1 %1096 }
 0x12f   : > { %739 = vst [vmem:[#allocation2 + $0x120] sm:$0xff] %v737_v44  ;;  %v1095_v50 = vpop.permute.xlu0 %1094  ;;  %1690 = vmatprep.subr.mxu0 %v738_v45  ;;  %v1774_v45 = vld [vmem:[%s11283_s2] sm:$0xff] }
 0x130   : > { %v1099_v51 = vsel %vm1098_vm5, %v1095_v50, %v1097_v48  ;;  %v1103_v52 = vsel %vm1098_vm5, %v1097_v48, %v1095_v50  ;;  %1691 = vmatpush2.msra.mxu0 %v737_v44 }
 0x131   : > { %v1117_v53 = vmul.f32 %v1110_v46, %v1099_v51  ;;  %v1118_v54 = vmul.f32 %v1114_v47, %v1103_v52 }
 0x132   : > { %v691_v57 = vpop.permute.xlu1 %690 }
 0x133   : > { %1119 = vst [vmem:[#allocation2 + $0x210] sm:$0xff] %v1117_v53  ;;  %v688_v59 = vpop.permute.xlu0 %687  ;;  %1731 = vmatprep.subr.mxu1 %v1118_v54 }
 0x134   : > { %v693_v60 = vsel %vm692_vm13, %v691_v57, %v688_v59  ;;  %v696_v61 = vsel %vm692_vm13, %v688_v59, %v691_v57  ;;  %1732 = vmatpush1.msra.mxu1 %v1117_v53 }
 0x135   : > { %v710_v62 = vmul.f32 %v703_v55, %v696_v61  ;;  %v711_v63 = vmul.f32 %v707_v56, %v693_v60 }
 0x136   : > { %v1070_v8 = vpop.permute.xlu1 %1069 }
 0x137   : > { %712 = vst [vmem:[#allocation2 + $0x110] sm:$0xff] %v710_v62  ;;  %v1068_v10 = vpop.permute.xlu0 %1067  ;;  %1692 = vmatprep.subr.mxu0 %v711_v63 }
 0x138   : > { %v1072_v11 = vsel %vm11356_vm12, %v1068_v10, %v1070_v8  ;;  %v1076_v12 = vsel %vm11356_vm12, %v1070_v8, %v1068_v10  ;;  %1693 = vmatpush2.msra.mxu0 %v710_v62  ;;  %v8107_v10 = vmov 0.0  }
 0x139   : > { %v1090_v0 = vmul.f32 %v1083_v6, %v1072_v11  ;;  %v1091_v13 = vmul.f32 %v1087_v7, %v1076_v12  ;;  %v1840_v11 = vld [vmem:[%s11285_s4 + $0x1f0] sm:$0xff] }
 0x13a   : > { %v664_v16 = vpop.permute.xlu1 %663  ;;  %v1824_v12 = vld [vmem:[%s11285_s4 + $0xf0] sm:$0xff] }
 0x13b   : > { %1092 = vst [vmem:[#allocation2 + $0x200] sm:$0xff] %v1090_v0  ;;  %v661_v18 = vpop.permute.xlu0 %660  ;;  %1733 = vmatprep.subr.mxu1 %v1091_v13  ;;  %v1823_v13 = vld [vmem:[%s11285_s4 + $0xe0] sm:$0xff] }
 0x13c   : > { %v666_v19 = vsel %vm11326_vm11, %v664_v16, %v661_v18  ;;  %v669_v20 = vsel %vm11326_vm11, %v661_v18, %v664_v16  ;;  %1734 = vmatpush1.msra.mxu1 %v1090_v0  ;;  %v1839_v0 = vld [vmem:[%s11285_s4 + $0x1e0] sm:$0xff]  ;;  %v1836_v18 = vld [vmem:[%s11285_s4 + $0x1b0] sm:$0xff] }
 0x13d   : > { %v683_v21 = vmul.f32 %v676_v14, %v669_v20  ;;  %v684_v22 = vmul.f32 %v680_v15, %v666_v19  ;;  %v1838_v14 = vld [vmem:[%s11285_s4 + $0x1d0] sm:$0xff]  ;;  %v1837_v16 = vld [vmem:[%s11285_s4 + $0x1c0] sm:$0xff] }
 0x13e   : > { %v1502_v25 = vpop.permute.xlu1 %1501  ;;  %v1822_v15 = vld [vmem:[%s11285_s4 + $0xd0] sm:$0xff]  ;;  %v1835_v20 = vld [vmem:[%s11285_s4 + $0x1a0] sm:$0xff] }
 0x13f   : > { %685 = vst [vmem:[#allocation2 + $0x100] sm:$0xff] %v683_v21  ;;  %v1500_v27 = vpop.permute.xlu0 %1499  ;;  %1694 = vmatprep.subr.mxu0 %v684_v22  ;;  %v1820_v19 = vld [vmem:[%s11285_s4 + $0xb0] sm:$0xff] }
 0x140   : > { %v1504_v28 = vsel %vm1503_vm10, %v1500_v27, %v1502_v25  ;;  %v1508_v29 = vsel %vm1503_vm10, %v1502_v25, %v1500_v27  ;;  %1695 = vmatpush2.msra.mxu0 %v683_v21  ;;  %v1819_v21 = vld [vmem:[%s11285_s4 + $0xa0] sm:$0xff]  ;;  %v1834_v22 = vld [vmem:[%s11285_s4 + $0x190] sm:$0xff]  ;;  %vm2423_vm10 = vcmask 523264  }
 0x141   : > { %v1522_v30 = vmul.f32 %v1515_v23, %v1504_v28  ;;  %v1523_v31 = vmul.f32 %v1519_v24, %v1508_v29  ;;  %1697 = vmatmul.mubr.f32.vlgmr.msra.gmra.mxu0 %v1526_v26  ;;  %7412 = vmatprep.subr.mxu0 %v1840_v11  ;;  %v1818_v23 = vld [vmem:[%s11285_s4 + $0x90] sm:$0xff]  ;;  %v1833_v24 = vld [vmem:[%s11285_s4 + $0x180] sm:$0xff] }
 0x142   : > { %7413 = vmatpush3.msra.mxu0 %v1824_v12  ;;  %v1817_v25 = vld [vmem:[%s11285_s4 + $0x80] sm:$0xff]  ;;  %v1832_v26 = vld [vmem:[%s11285_s4 + $0x170] sm:$0xff] }
 0x143   : > { %1765 = vmatprep.subr.mxu1 %v1523_v31  ;;  %7414 = vmatprep.subr.mxu0 %v1839_v0  ;;  %v1816_v27 = vld [vmem:[%s11285_s4 + $0x70] sm:$0xff]  ;;  %v1831_v28 = vld [vmem:[%s11285_s4 + $0x160] sm:$0xff] }
 0x144   : > { %1766 = vmatpush2.msra.mxu1 %v1522_v30  ;;  %7415 = vmatpush3.msra.mxu0 %v1823_v13  ;;  %v1815_v29 = vld [vmem:[%s11285_s4 + $0x60] sm:$0xff]  ;;  %v1830_v30 = vld [vmem:[%s11285_s4 + $0x150] sm:$0xff] }
 0x145   : > { %1768 = vmatmul.mubr.f32.vlgmr.msra.gmra.mxu1 %v1528_v32  ;;  %7416 = vmatprep.subr.mxu0 %v1838_v14  ;;  %v1814_v31 = vld [vmem:[%s11285_s4 + $0x50] sm:$0xff]  ;;  %v1829_v32 = vld [vmem:[%s11285_s4 + $0x140] sm:$0xff] }
 0x146   : > { %2333 = vmatprep.mubr.f32.mxu1 %v8107_v10  ;;  %7417 = vmatpush3.msra.mxu0 %v1822_v15  ;;  %v7353_v11 = vld [vmem:[%s11284_s3 + $0x84] ss:$8 sm:$0x3] }
 0x147   : > { %7418 = vmatprep.subr.mxu0 %v1837_v16 }
 0x148   : > { %7419 = vmatpush3.msra.mxu0 %v1821_v17  ;;  %v2146_v17 = vrot.slane %v7353_v11, %v8266_v4 }
 0x149   : > { %7420 = vmatprep.subr.mxu0 %v1836_v18  ;;  %v2150_v18 = vrot.slane %v7353_v11, %v8269_v5 }
 0x14a   : > { %7421 = vmatpush3.msra.mxu0 %v1820_v19  ;;  %v7352_v19 = vld [vmem:[%s11284_s3 + $0x83] ss:$8 sm:$0x3] }
 0x14b   : > { %7422 = vmatprep.subr.mxu0 %v1835_v20 }
 0x14c   : > { %7423 = vmatpush3.msra.mxu0 %v1819_v21 }
 0x14d   : > { %7424 = vmatprep.subr.mxu0 %v1834_v22 }
 0x14e   : > { %7425 = vmatpush3.msra.mxu0 %v1818_v23 }
 0x14f   : > { %7426 = vmatprep.subr.mxu0 %v1833_v24 }
 0x150   : > { %7427 = vmatpush3.msra.mxu0 %v1817_v25 }
 0x151   : > { %7428 = vmatprep.subr.mxu0 %v1832_v26  ;;  %v2120_v26 = vrot.slane %v7352_v19, %v8266_v4 }
 0x152   : > { %7429 = vmatpush3.msra.mxu0 %v1816_v27  ;;  %v2124_v27 = vrot.slane %v7352_v19, %v8269_v5 }
 0x153   : > { %7430 = vmatprep.subr.mxu0 %v1831_v28  ;;  %v7351_v28 = vld [vmem:[%s11284_s3 + $0x82] ss:$8 sm:$0x3] }
 0x154   : > { %7431 = vmatpush3.msra.mxu0 %v1815_v29 }
 0x155   : > { %7432 = vmatprep.subr.mxu0 %v1830_v30 }
 0x156   : > { %7433 = vmatpush3.msra.mxu0 %v1814_v31 }
 0x157   : > { %7434 = vmatprep.subr.mxu0 %v1829_v32 }
 0x201   : > { %v1698_v35 = vpop.f32.mrf.mxu0 }
 0x203   : > { %v1700_v38 = vpop.f32.mrf.mxu0 }
 0x205   : > { %v1769_v36 = vpop.f32.mrf.mxu1 }
 0x206   : > { %v1770_v37 = vadd.f32 %v1769_v36, %v1698_v35  ;;  %v1813_v35 = vld [vmem:[%s11285_s4 + $0x40] sm:$0xff]  ;;  %v1828_v36 = vld [vmem:[%s11285_s4 + $0x130] sm:$0xff] }
 0x207   : > { %v1771_v39 = vpop.f32.mrf.mxu1  ;;  %7435 = vmatpush3.msra.mxu0 %v1813_v35 }
 0x208   : > { %v1772_v40 = vadd.f32 %v1771_v39, %v1700_v38  ;;  %v1779_v42 = vmul.f32 %v1770_v37, %v1770_v37  ;;  %v1827_v38 = vld [vmem:[%s11285_s4 + $0x120] sm:$0xff]  ;;  %7436 = vmatprep.subr.mxu0 %v1828_v36  ;;  %v2094_v36 = vrot.slane %v7351_v28, %v8266_v4 }
 0x209   : > { %v1811_v39 = vld [vmem:[%s11285_s4 + $0x20] sm:$0xff] }
 0x20a   : > { %v1775_v41 = vadd.f32 %v1772_v40, %v1770_v37  ;;  %v1780_v43 = vmul.f32 %v1772_v40, %v1772_v40 }
 0x20c   : > { %1776 = vadd.xlane.f32.xlu0 %v1775_v41  ;;  %v1781_v44 = vadd.f32 %v1780_v43, %v1779_v42 }
 0x20e   : > { %1782 = vadd.xlane.f32.xlu1 %v1781_v44 }
 0x21f   : > { %1802 = vperm.xlu1 %7947, %v1774_v45  }
 0x222   : > { %1796 = vperm.xlu0 %7946, %v1774_v45  }
 0x223   : > { %7948 = vset.pattern.permute.xlu1 %v8105_v33 }
 0x295   : > { %v1777_v46 = vpop.xlane.xlu0 %1776 }
 0x296   : > { %v1778_v47 = vmul.f32 0.00390625, %v1777_v46 }
 0x297   : > { %v1783_v48 = vpop.xlane.xlu1 %1782 }
 0x298   : > { %v1784_v49 = vmul.f32 0.00390625, %v1783_v48  ;;  %v1785_v50 = vmul.f32 %v1778_v47, %v1778_v47  ;;  %v1788_v54 = vsub.f32 %v1770_v37, %v1778_v47  ;;  %v1789_v55 = vsub.f32 %v1772_v40, %v1778_v47  ;;  %v1812_v37 = vld [vmem:[%s11285_s4 + $0x30] sm:$0xff]  ;;  %v7356_v40 = vld [vmem:[%s11284_s3 + $0x87] ss:$8 sm:$0x3] }
 0x299   : > { %7437 = vmatpush3.msra.mxu0 %v1812_v37  ;;  %v2224_v43 = vrot.slane %v7356_v40, %v8266_v4  ;;  %v2228_v44 = vrot.slane %v7356_v40, %v8269_v5  ;;  %v2098_v37 = vrot.slane %v7351_v28, %v8269_v5 }
 0x29a   : > { %v1786_v51 = vsub.f32 %v1784_v49, %v1785_v50  ;;  %7438 = vmatprep.subr.mxu0 %v1827_v38  ;;  %v7355_v50 = vld [vmem:[%s11284_s3 + $0x86] ss:$8 sm:$0x3]  ;;  %v7350_v38 = vld [vmem:[%s11284_s3 + $0x81] ss:$8 sm:$0x3] }
 0x29b   : > { %v1803_v60 = vpop.permute.xlu1 %1802  ;;  %7439 = vmatpush3.msra.mxu0 %v1811_v39 }
 0x29c   : > { %v1787_v52 = vmax.f32 %v1786_v51, 0.0 }
 0x29d   : > { %v1797_v57 = vpop.permute.xlu0 %1796 }
 0x29e   : > { %v1790_v53 = vadd.f32 1e-05, %v1787_v52 }
 0x2a0   : > { %7979 = vrsqrt.f32 %v1790_v53  ;;  %v2198_v53 = vrot.slane %v7355_v50, %v8266_v4 }
 0x2ad   : > { %v7980_v56 = vpop.eup %7979 }
 0x2ae   : > { %v1792_v58 = vmul.f32 %v7980_v56, %v1788_v54  ;;  %v1793_v59 = vmul.f32 %v7980_v56, %v1789_v55  ;;  %v2202_v54 = vrot.slane %v7355_v50, %v8269_v5 }
 0x2b0   : > { %v1799_v61 = vmul.f32 %v1797_v57, %v1792_v58  ;;  %v1800_v62 = vmul.f32 %v1797_v57, %v1793_v59 }
 0x2b2   : > { %v1805_v63 = vadd.f32 %v1803_v60, %v1799_v61  ;;  %v1806_v6 = vadd.f32 %v1803_v60, %v1800_v62  ;;  %v7354_v61 = vld [vmem:[%s11284_s3 + $0x85] ss:$8 sm:$0x3] }
 0x2b4   : > { %v8644_v7 = vmax.f32 %v1805_v63, 0.0  ;;  %v8651_v8 = vmax.f32 %v1806_v6, 0.0  ;;  %v2172_v63 = vrot.slane %v7354_v61, %v8266_v4  ;;  %v2176_v6 = vrot.slane %v7354_v61, %v8269_v5 }
 0x2b6   : > { %1973 = vst [vmem:[#allocation2 + $0x50] sm:$0xff] %v8644_v7  ;;  %2131 = vrot.lane.b32.xlu0 %v8644_v7, %s8092_s25  ;;  %2209 = vrot.lane.b32.xlu1 %v8644_v7, %s8087_s17 }
 0x2ba   : > { %2105 = vrot.lane.b32.xlu0 %v8644_v7, %s8100_s15  ;;  %2211 = vrot.lane.b32.xlu1 %v8651_v8, %s8087_s17  ;;  %s11312_s17 = smov 119  }
 0x2be   : > { %2079 = vrot.lane.b32.xlu0 %v8644_v7, %s11320_s6  ;;  %2183 = vrot.lane.b32.xlu1 %v8644_v7, %s8088_s23 }
 0x2c2   : > { %2053 = vrot.lane.b32.xlu0 %v8644_v7, %s11318_s16  ;;  %2185 = vrot.lane.b32.xlu1 %v8651_v8, %s8088_s23  ;;  %s11314_s23 = smov 7  }
 0x2c6   : > { %2027 = vrot.lane.b32.xlu0 %v8644_v7, %s11362_s20  ;;  %2157 = vrot.lane.b32.xlu1 %v8644_v7, %s8090_s7 }
 0x2ca   : > { %2001 = vrot.lane.b32.xlu0 %v8644_v7, %s8084_s28  ;;  %2159 = vrot.lane.b32.xlu1 %v8651_v8, %s8090_s7  ;;  %s8108_s7 = smov 62  }
 0x2ce   : > { %1975 = vrot.lane.b32.xlu0 %v8644_v7, %s11360_s13  ;;  %2133 = vrot.lane.b32.xlu1 %v8651_v8, %s8092_s25  ;;  %s11333_s25 = smov 63  }
 0x2d2   : > { %1947 = vrot.lane.b32.xlu0 %v8651_v8, %s11364_s29  ;;  %2107 = vrot.lane.b32.xlu1 %v8651_v8, %s8100_s15 }
 0x2d6   : > { %1921 = vrot.lane.b32.xlu0 %v8651_v8, %s8097_s22  ;;  %2081 = vrot.lane.b32.xlu1 %v8651_v8, %s11320_s6 }
 0x2da   : > { %1895 = vrot.lane.b32.xlu0 %v8651_v8, %s11307_s30  ;;  %2055 = vrot.lane.b32.xlu1 %v8651_v8, %s11318_s16 }
 0x2de   : > { %1869 = vrot.lane.b32.xlu0 %v8651_v8, %s11303_s14  ;;  %2029 = vrot.lane.b32.xlu1 %v8651_v8, %s11362_s20 }
 0x2e2   : > { %1842 = vrot.lane.b32.xlu0 %v8651_v8, %s11305_s24  ;;  %2003 = vrot.lane.b32.xlu1 %v8651_v8, %s8084_s28 }
 0x2e6   : > { %2458 = vperm.xlu0 %7946, %v8700_v9   ;;  %1977 = vrot.lane.b32.xlu1 %v8651_v8, %s11360_s13 }
 0x2ea   : > { %1950 = vrot.lane.b32.xlu1 %v8644_v7, %s11364_s29  ;;  %7953 = vset.pattern.permute.xlu0 %v8106_v34 }
 0x2ee   : > { %1924 = vrot.lane.b32.xlu1 %v8644_v7, %s8097_s22  ;;  %s11310_s22 = smov 55  }
 0x2f2   : > { %1898 = vrot.lane.b32.xlu1 %v8644_v7, %s11307_s30  ;;  %s11339_s30 = smov 56  }
 0x2f6   : > { %1872 = vrot.lane.b32.xlu1 %v8644_v7, %s11303_s14  ;;  %s11309_s14 = smov 70  }
 0x2fa   : > { %1846 = vrot.lane.b32.xlu1 %v8644_v7, %s11305_s24  ;;  %s11316_s24 = smov 71  }
 0x328   : > { %v2210_v41 = vpop.permute.xlu1 %2209  ;;  %v2132_v42 = vpop.permute.xlu0 %2131 }
 0x32c   : > { %v2212_v45 = vpop.permute.xlu1 %2211  ;;  %v2106_v51 = vpop.permute.xlu0 %2105 }
 0x32d   : > { %v2213_v46 = vsel %vm1287_vm8, %v2210_v41, %v2212_v45  ;;  %v2217_v47 = vsel %vm1287_vm8, %v2212_v45, %v2210_v41  ;;  %v2068_v45 = vrot.slane %v7350_v38, %v8266_v4  ;;  %vm2622_vm8 = vcmask 506880  }
 0x32e   : > { %v2231_v48 = vmul.f32 %v2224_v43, %v2213_v46  ;;  %v2232_v49 = vmul.f32 %v2228_v44, %v2217_v47  ;;  %v2072_v46 = vrot.slane %v7350_v38, %v8269_v5  ;;  %v7349_v47 = vld [vmem:[%s11284_s3 + $0x80] ss:$8 sm:$0x3] }
 0x330   : > { %2233 = vst [vmem:[#allocation2 + $0xf0] sm:$0xff] %v2231_v48  ;;  %v2184_v52 = vpop.permute.xlu1 %2183  ;;  %2269 = vmatprep.subr.mxu1 %v2232_v49  ;;  %v2080_v58 = vpop.permute.xlu0 %2079 }
 0x331   : > { %2270 = vmatpush1.msra.mxu1 %v2231_v48 }
 0x334   : > { %v2186_v55 = vpop.permute.xlu1 %2185  ;;  %v2054_v12 = vpop.permute.xlu0 %2053 }
 0x335   : > { %v2187_v56 = vsel %vm1260_vm9, %v2184_v52, %v2186_v55  ;;  %v2191_v57 = vsel %vm1260_vm9, %v2186_v55, %v2184_v52  ;;  %v2046_v55 = vrot.slane %v7349_v47, %v8269_v5  ;;  %vm11380_vm9 = vcmask 384000  }
 0x336   : > { %v2205_v59 = vmul.f32 %v2198_v53, %v2187_v56  ;;  %v2206_v60 = vmul.f32 %v2202_v54, %v2191_v57  ;;  %v2042_v54 = vrot.slane %v7349_v47, %v8266_v4  ;;  %v7348_v56 = vld [vmem:[%s11284_s3 + $0x77] ss:$8 sm:$0x3] }
 0x338   : > { %2207 = vst [vmem:[#allocation2 + $0xe0] sm:$0xff] %v2205_v59  ;;  %v2158_v62 = vpop.permute.xlu1 %2157  ;;  %2271 = vmatprep.subr.mxu1 %v2206_v60  ;;  %v2028_v23 = vpop.permute.xlu0 %2027 }
 0x339   : > { %2272 = vmatpush1.msra.mxu1 %v2205_v59 }
 0x33c   : > { %v2160_v0 = vpop.permute.xlu1 %2159  ;;  %v2002_v39 = vpop.permute.xlu0 %2001 }
 0x33d   : > { %v2161_v13 = vsel %vm1233_vm15, %v2158_v62, %v2160_v0  ;;  %v2165_v14 = vsel %vm1233_vm15, %v2160_v0, %v2158_v62  ;;  %v2016_v62 = vrot.slane %v7348_v56, %v8266_v4  ;;  %vm2602_vm15 = vcmask 515072  }
 0x33e   : > { %v2179_v15 = vmul.f32 %v2172_v63, %v2161_v13  ;;  %v2180_v16 = vmul.f32 %v2176_v6, %v2165_v14  ;;  %v2020_v63 = vrot.slane %v7348_v56, %v8269_v5  ;;  %v7347_v6 = vld [vmem:[%s11284_s3 + $0x76] ss:$8 sm:$0x3] }
 0x340   : > { %2181 = vst [vmem:[#allocation2 + $0xd0] sm:$0xff] %v2179_v15  ;;  %v2134_v20 = vpop.permute.xlu1 %2133  ;;  %2273 = vmatprep.subr.mxu1 %v2180_v16  ;;  %v1990_v16 = vrot.slane %v7347_v6, %v8266_v4 }
 0x341   : > { %v2135_v21 = vsel %vm1206_vm6, %v2132_v42, %v2134_v20  ;;  %v2139_v22 = vsel %vm1206_vm6, %v2134_v20, %v2132_v42  ;;  %2274 = vmatpush1.msra.mxu1 %v2179_v15  ;;  %vm11381_vm6 = vcmask 392192  }
 0x342   : > { %v2153_v24 = vmul.f32 %v2146_v17, %v2135_v21  ;;  %v2154_v25 = vmul.f32 %v2150_v18, %v2139_v22  ;;  %v1994_v17 = vrot.slane %v7347_v6, %v8269_v5  ;;  %v7346_v18 = vld [vmem:[%s11284_s3 + $0x74] ss:$8 sm:$0x3] }
 0x344   : > { %2155 = vst [vmem:[#allocation2 + $0xc0] sm:$0xff] %v2153_v24  ;;  %v2108_v29 = vpop.permute.xlu1 %2107  ;;  %2275 = vmatprep.subr.mxu1 %v2154_v25  ;;  %v1962_v25 = vrot.slane %v7346_v18, %v8266_v4 }
 0x345   : > { %v2109_v30 = vsel %vm1098_vm5, %v2106_v51, %v2108_v29  ;;  %v2113_v31 = vsel %vm1098_vm5, %v2108_v29, %v2106_v51  ;;  %2276 = vmatpush1.msra.mxu1 %v2153_v24  ;;  %v1976_v51 = vpop.permute.xlu0 %1975  ;;  %vm2702_vm5 = vcmask 441344  }
 0x346   : > { %v2127_v32 = vmul.f32 %v2120_v26, %v2109_v30  ;;  %v2128_v35 = vmul.f32 %v2124_v27, %v2113_v31  ;;  %v1966_v26 = vrot.slane %v7346_v18, %v8269_v5  ;;  %v7345_v27 = vld [vmem:[%s11284_s3 + $0x73] ss:$8 sm:$0x3] }
 0x347   : > { %v2422_v18 = vld [vmem:[%s11283_s2 + $0x10] sm:$0xff] }
 0x348   : > { %2129 = vst [vmem:[#allocation2 + $0xb0] sm:$0xff] %v2127_v32  ;;  %v2082_v40 = vpop.permute.xlu1 %2081  ;;  %2277 = vmatprep.subr.mxu1 %v2128_v35  ;;  %v1936_v35 = vrot.slane %v7345_v27, %v8266_v4  ;;  %2463 = vperm.xlu1 %7948, %v2422_v18  }
 0x349   : > { %v2083_v41 = vsel %vm11356_vm12, %v2080_v58, %v2082_v40  ;;  %v2087_v42 = vsel %vm11356_vm12, %v2082_v40, %v2080_v58  ;;  %2278 = vmatpush1.msra.mxu1 %v2127_v32  ;;  %v1948_v11 = vpop.permute.xlu0 %1947 }
 0x34a   : > { %v2101_v43 = vmul.f32 %v2094_v36, %v2083_v41  ;;  %v2102_v44 = vmul.f32 %v2098_v37, %v2087_v42  ;;  %v1940_v36 = vrot.slane %v7345_v27, %v8269_v5  ;;  %v7344_v37 = vld [vmem:[%s11284_s3 + $0x72] ss:$8 sm:$0x3] }
 0x34c   : > { %2103 = vst [vmem:[#allocation2 + $0xa0] sm:$0xff] %v2101_v43  ;;  %v2056_v48 = vpop.permute.xlu1 %2055  ;;  %2279 = vmatprep.subr.mxu1 %v2102_v44  ;;  %v1910_v44 = vrot.slane %v7344_v37, %v8266_v4  ;;  %7949 = vset.pattern.permute.xlu1 %v8106_v34 }
 0x34d   : > { %v2057_v49 = vsel %vm11351_vm2, %v2054_v12, %v2056_v48  ;;  %v2061_v50 = vsel %vm11351_vm2, %v2056_v48, %v2054_v12  ;;  %2280 = vmatpush1.msra.mxu1 %v2101_v43  ;;  %v1922_v22 = vpop.permute.xlu0 %1921  ;;  %2473 = vperm.xlu1 %7949, %v2422_v18   ;;  %vm11398_vm2 = vcmask 23552  }
 0x34e   : > { %v2075_v52 = vmul.f32 %v2068_v45, %v2057_v49  ;;  %v2076_v53 = vmul.f32 %v2072_v46, %v2061_v50  ;;  %v7343_v45 = vld [vmem:[%s11284_s3 + $0x71] ss:$8 sm:$0x3] }
 0x350   : > { %2077 = vst [vmem:[#allocation2 + $0x90] sm:$0xff] %v2075_v52  ;;  %v2030_v57 = vpop.permute.xlu1 %2029  ;;  %2281 = vmatprep.subr.mxu1 %v2076_v53  ;;  %v7342_v53 = vld [vmem:[%s11284_s3 + $0x70] ss:$8 sm:$0x3] }
 0x351   : > { %v2031_v58 = vsel %vm11328_vm4, %v2028_v23, %v2030_v57  ;;  %v2035_v59 = vsel %vm11328_vm4, %v2030_v57, %v2028_v23  ;;  %2282 = vmatpush1.msra.mxu1 %v2075_v52  ;;  %v1896_v38 = vpop.permute.xlu0 %1895  ;;  %v1888_v52 = vrot.slane %v7343_v45, %v8269_v5  ;;  %2469 = vperm.xlu1 %7949, %v8700_v9   ;;  %vm11385_vm4 = vcmask 384000  }
 0x352   : > { %v2049_v60 = vmul.f32 %v2042_v54, %v2031_v58  ;;  %v2050_v61 = vmul.f32 %v2046_v55, %v2035_v59  ;;  %v1858_v59 = vrot.slane %v7342_v53, %v8266_v4 }
 0x354   : > { %2051 = vst [vmem:[#allocation2 + $0x80] sm:$0xff] %v2049_v60  ;;  %v2004_v12 = vpop.permute.xlu1 %2003  ;;  %2283 = vmatprep.subr.mxu1 %v2050_v61 }
 0x355   : > { %v2005_v0 = vsel %vm909_vm3, %v2002_v39, %v2004_v12  ;;  %v2009_v13 = vsel %vm909_vm3, %v2004_v12, %v2002_v39  ;;  %2284 = vmatpush1.msra.mxu1 %v2049_v60  ;;  %v1870_v48 = vpop.permute.xlu0 %1869  ;;  %v1862_v60 = vrot.slane %v7342_v53, %v8269_v5  ;;  %7950 = vset.pattern.permute.xlu1 %v8105_v33  ;;  %vm11379_vm3 = vcmask 375808  }
 0x356   : > { %v2023_v14 = vmul.f32 %v2016_v62, %v2005_v0  ;;  %v2024_v15 = vmul.f32 %v2020_v63, %v2009_v13  ;;  %v2235_v0 = vld [vmem:[%s11282_s1 + $0x20] sm:$0xff] }
 0x357   : > { %v2236_v13 = vld [vmem:[%s11282_s1 + $0x40] sm:$0xff] }
 0x358   : > { %2025 = vst [vmem:[#allocation2 + $0x70] sm:$0xff] %v2023_v14  ;;  %v1978_v19 = vpop.permute.xlu1 %1977  ;;  %2285 = vmatprep.subr.mxu1 %v2024_v15  ;;  %v1810_v15 = vld [vmem:[%s11285_s4 + $0x10] sm:$0xff] }
 0x359   : > { %v1979_v20 = vsel %vm11327_vm7, %v1976_v51, %v1978_v19  ;;  %v1983_v21 = vsel %vm11327_vm7, %v1978_v19, %v1976_v51  ;;  %2286 = vmatpush1.msra.mxu1 %v2023_v14  ;;  %v1884_v51 = vrot.slane %v7343_v45, %v8266_v4  ;;  %v1843_v61 = vpop.permute.xlu0 %1842  ;;  %v1826_v14 = vld [vmem:[%s11285_s4 + $0x110] sm:$0xff]  ;;  %vm2642_vm7 = vcmask 465920  }
 0x35a   : > { %v1997_v23 = vmul.f32 %v1990_v16, %v1979_v20  ;;  %v1998_v24 = vmul.f32 %v1994_v17, %v1983_v21  ;;  %7440 = vmatprep.subr.mxu0 %v1826_v14  ;;  %v1825_v16 = vld [vmem:[%s11285_s4 + $0x100] sm:$0xff] }
 0x35b   : > { %7441 = vmatpush3.msra.mxu0 %v1810_v15  ;;  %v1809_v17 = vld [vmem:[%s11285_s4] sm:$0xff] }
 0x35c   : > { %1999 = vst [vmem:[#allocation2 + $0x60] sm:$0xff] %v1997_v23  ;;  %v1951_v28 = vpop.permute.xlu1 %1950  ;;  %2287 = vmatprep.subr.mxu1 %v1998_v24  ;;  %7442 = vmatprep.subr.mxu0 %v1825_v16 }
 0x35d   : > { %v1952_v29 = vsel %vm854_vm14, %v1951_v28, %v1948_v11  ;;  %v1955_v30 = vsel %vm854_vm14, %v1948_v11, %v1951_v28  ;;  %2288 = vmatpush1.msra.mxu1 %v1997_v23  ;;  %7443 = vmatpush3.msra.mxu0 %v1809_v17  ;;  %v9078_v17 = vld [vmem:[%s11284_s3 + $0x97] ss:$0 sm:$0xff] }
 0x35e   : > { %v1969_v31 = vmul.f32 %v1962_v25, %v1955_v30  ;;  %v1970_v32 = vmul.f32 %v1966_v26, %v1952_v29  ;;  %2289 = vmatprep.subr.mxu1 %v8651_v8  ;;  %v1914_v8 = vrot.slane %v7344_v37, %v8269_v5 }
 0x35f   : > { %2290 = vmatpush1.msra.mxu1 %v8644_v7 }
 0x360   : > { %1971 = vst [vmem:[#allocation2 + $0x40] sm:$0xff] %v1969_v31  ;;  %v1925_v39 = vpop.permute.xlu1 %1924  ;;  %2291 = vmatprep.subr.mxu1 %v1970_v32 }
 0x361   : > { %v1926_v40 = vsel %vm746_vm0, %v1925_v39, %v1922_v22  ;;  %v1929_v41 = vsel %vm746_vm0, %v1922_v22, %v1925_v39  ;;  %2292 = vmatpush1.msra.mxu1 %v1969_v31  ;;  %v2459_v39 = vpop.permute.xlu0 %2458  ;;  %vm11382_vm0 = vcmask 400384  }
 0x362   : > { %v1943_v42 = vmul.f32 %v1936_v35, %v1929_v41  ;;  %v1944_v43 = vmul.f32 %v1940_v36, %v1926_v40 }
 0x364   : > { %1945 = vst [vmem:[#allocation2 + $0x30] sm:$0xff] %v1943_v42  ;;  %v1899_v7 = vpop.permute.xlu1 %1898  ;;  %2293 = vmatprep.subr.mxu1 %v1944_v43 }
 0x365   : > { %v1900_v46 = vsel %vm719_vm1, %v1899_v7, %v1896_v38  ;;  %v1903_v47 = vsel %vm719_vm1, %v1896_v38, %v1899_v7  ;;  %2294 = vmatpush1.msra.mxu1 %v1943_v42 }
 0x366   : > { %v1917_v49 = vmul.f32 %v1910_v44, %v1903_v47  ;;  %v1918_v50 = vmul.f32 %v1914_v8, %v1900_v46 }
 0x368   : > { %1919 = vst [vmem:[#allocation2 + $0x20] sm:$0xff] %v1917_v49  ;;  %v1873_v54 = vpop.permute.xlu1 %1872  ;;  %2295 = vmatprep.subr.mxu1 %v1918_v50 }
 0x369   : > { %v1874_v55 = vsel %vm692_vm13, %v1873_v54, %v1870_v48  ;;  %v1877_v56 = vsel %vm692_vm13, %v1870_v48, %v1873_v54  ;;  %2296 = vmatpush1.msra.mxu1 %v1917_v49 }
 0x36a   : > { %v1891_v57 = vmul.f32 %v1884_v51, %v1877_v56  ;;  %v1892_v58 = vmul.f32 %v1888_v52, %v1874_v55 }
 0x36c   : > { %1893 = vst [vmem:[#allocation2 + $0x10] sm:$0xff] %v1891_v57  ;;  %v1847_v62 = vpop.permute.xlu1 %1846  ;;  %2297 = vmatprep.subr.mxu1 %v1892_v58 }
 0x36d   : > { %v1848_v63 = vsel %vm11326_vm11, %v1847_v62, %v1843_v61  ;;  %v1851_v6 = vsel %vm11326_vm11, %v1843_v61, %v1847_v62  ;;  %2298 = vmatpush1.msra.mxu1 %v1891_v57  ;;  %vm11383_vm11 = vcmask 64512  }
 0x36e   : > { %v1865_v11 = vmul.f32 %v1858_v59, %v1851_v6  ;;  %v1866_v12 = vmul.f32 %v1862_v60, %v1848_v63 }
 0x370   : > { %1867 = vst [vmem:[#allocation2] sm:$0xff] %v1865_v11  ;;  %2299 = vmatprep.subr.mxu1 %v1866_v12  ;;  %v9064_v12 = vld [vmem:[%s11284_s3 + $0xa7] ss:$0 sm:$0xff] }
 0x371   : > { %2300 = vmatpush1.msra.mxu1 %v1865_v11 }
 0x372   : > { %2334 = vmatmul.mubr.f32.vlgmr.msra.gmra.mxu1 %v2235_v0  ;;  %v2787_v0 = vld [vmem:[%s11282_s1 + $0x68] sm:$0xff] }
 0x373   : > { %2339 = vmatprep.mubr.f32.mxu1 %v8107_v10 }
 0x376   : > { %2340 = vmatmul.mubr.f32.gmra.mxu1 %v2236_v13 }
 0x377   : > { %2890 = vmatprep.mubr.f32.mxu1 %v2787_v0 }
 0x3c3   : > { %v2464_v36 = vpop.permute.xlu1 %2463 }
 0x3c8   : > { %v2474_v37 = vpop.permute.xlu1 %2473 }
 0x3cc   : > { %v2470_v38 = vpop.permute.xlu1 %2469 }
 0x432   : > { %v2335_v19 = vpop.f32.mrf.mxu1 }
 0x434   : > { %v2337_v20 = vpop.f32.mrf.mxu1 }
 0x435   : > { %2410 = vmatprep.mubr.f32.mxu0 %v2337_v20 }
 0x436   : > { %2411 = vmatmul.mubr.f32.vlgmr.msra.gmra.mxu0 %v2335_v19  ;;  %v2341_v21 = vpop.f32.mrf.mxu1 }
 0x438   : > { %v2343_v22 = vpop.f32.mrf.mxu1 }
 0x439   : > { %2415 = vmatprep.mubr.f32.mxu0 %v2343_v22  ;;  %v9086_v22 = vld [vmem:[%s11284_s3 + $0xa6] ss:$0 sm:$0xff] }
 0x43a   : > { %2416 = vmatmul.mubr.f32.gmra.mxu0 %v2341_v21 }
 0x4f6   : > { %v7444_v23 = vpop.f32.mrf.mxu0 }
 0x4f8   : > { %v7445_v24 = vpop.f32.mrf.mxu0 }
 0x4f9   : > { %v7446_v25 = vadd.f32 %v7445_v24, %v7444_v23 }
 0x4fa   : > { %v7447_v26 = vpop.f32.mrf.mxu0 }
 0x4fb   : > { %v2424_v27 = vsel %vm2423_vm10, %v7446_v25, 0.0  ;;  %v2432_v28 = vmul.f32 %v7446_v25, %v7446_v25 }
 0x4fc   : > { %2425 = vadd.xlane.f32.xlu1 %v2424_v27  ;;  %v7448_v9 = vpop.f32.mrf.mxu0  ;;  %v9094_v27 = vld [vmem:[%s11284_s3 + $0x96] ss:$0 sm:$0xff] }
 0x4fd   : > { %v2434_v29 = vsel %vm2423_vm10, %v2432_v28, 0.0  ;;  %v7449_v30 = vadd.f32 %v7448_v9, %v7447_v26 }
 0x4fe   : > { %2435 = vadd.xlane.f32.xlu0 %v2434_v29 }
 0x4ff   : > { %v2427_v31 = vsel %vm2423_vm10, %v7449_v30, 0.0  ;;  %v2433_v32 = vmul.f32 %v7449_v30, %v7449_v30 }
 0x501   : > { %v2437_v35 = vsel %vm2423_vm10, %v2433_v32, 0.0 }
 0x502   : > { %2428 = vadd.xlane.f32.xlu0 %v2427_v31  ;;  %v2486_v31 = vld [vmem:[%s11285_s4 + $0x260] sm:$0xff] }
 0x506   : > { %2438 = vadd.xlane.f32.xlu0 %v2437_v35  ;;  %v9108_v35 = vld [vmem:[%s11284_s3 + $0xa5] ss:$0 sm:$0xff] }
 0x585   : > { %v2426_v40 = vpop.xlane.xlu1 %2425 }
 0x586   : > { %v2430_v41 = vmul.f32 0.015625, %v2426_v40  ;;  %v2484_v40 = vld [vmem:[%s11285_s4 + $0x240] sm:$0xff] }
 0x587   : > { %v2436_v42 = vpop.xlane.xlu0 %2435 }
 0x588   : > { %v2442_v43 = vmul.f32 %v2430_v41, %v2430_v41  ;;  %v2440_v44 = vmul.f32 0.015625, %v2436_v42  ;;  %v2448_v54 = vsub.f32 %v7446_v25, %v2430_v41  ;;  %v9122_v42 = vld [vmem:[%s11284_s3 + $0xa4] ss:$0 sm:$0xff] }
 0x58a   : > { %v2444_v8 = vsub.f32 %v2440_v44, %v2442_v43 }
 0x58b   : > { %v2429_v45 = vpop.xlane.xlu0 %2428 }
 0x58c   : > { %v2446_v7 = vmax.f32 %v2444_v8, 0.0  ;;  %v2431_v46 = vmul.f32 0.015625, %v2429_v45 }
 0x58e   : > { %v2450_v47 = vadd.f32 1e-05, %v2446_v7  ;;  %v2443_v48 = vmul.f32 %v2431_v46, %v2431_v46  ;;  %v2449_v60 = vsub.f32 %v7449_v30, %v2431_v46  ;;  %v2487_v30 = vld [vmem:[%s11285_s4 + $0x270] sm:$0xff] }
 0x58f   : > { %v2439_v49 = vpop.xlane.xlu0 %2438  ;;  %7746 = vmatprep.subr.mxu0 %v2487_v30  ;;  %v9130_v7 = vld [vmem:[%s11284_s3 + $0x94] ss:$0 sm:$0xff] }
 0x590   : > { %7981 = vrsqrt.f32 %v2450_v47  ;;  %v2441_v50 = vmul.f32 0.015625, %v2439_v49  ;;  %7747 = vmatpush3.msra.mxu0 %v2487_v30 }
 0x591   : > { %7748 = vmatprep.subr.mxu0 %v2486_v31 }
 0x592   : > { %v2445_v51 = vsub.f32 %v2441_v50, %v2443_v48  ;;  %7749 = vmatpush3.msra.mxu0 %v2486_v31  ;;  %v9138_v50 = vld [vmem:[%s11284_s3 + $0xa3] ss:$0 sm:$0xff] }
 0x594   : > { %v2447_v52 = vmax.f32 %v2445_v51, 0.0 }
 0x596   : > { %v2451_v53 = vadd.f32 1e-05, %v2447_v52 }
 0x598   : > { %7983 = vrsqrt.f32 %v2451_v53 }
 0x59d   : > { %v7982_v55 = vpop.eup %7981 }
 0x59e   : > { %v2454_v56 = vmul.f32 %v7982_v55, %v2448_v54  ;;  %v9146_v55 = vld [vmem:[%s11284_s3 + $0x93] ss:$0 sm:$0xff] }
 0x5a0   : > { %v2466_v57 = vmul.f32 %v2459_v39, %v2454_v56 }
 0x5a2   : > { %v2476_v58 = vadd.f32 %v2470_v38, %v2466_v57 }
 0x5a4   : > { %v8937_v59 = vmax.f32 %v2476_v58, 0.0 }
 0x5a5   : > { %v7984_v61 = vpop.eup %7983 }
 0x5a6   : > { %2588 = vst.msk [vmem:[#allocation2 + $0xa0] sm:$0xff] %vm2423_vm10, %v8937_v59  ;;  %v2455_v62 = vmul.f32 %v7984_v61, %v2449_v60  ;;  %2773 = vrot.lane.b32.xlu1 %v8937_v59, %s8067_s9  ;;  %2767 = vrot.lane.b32.xlu0 %v8937_v59, %s8100_s15  ;;  %v9154_v60 = vld [vmem:[%s11284_s3 + $0xa2] ss:$0 sm:$0xff] }
 0x5a8   : > { %v2467_v63 = vmul.f32 %v2464_v36, %v2455_v62  ;;  %v2485_v36 = vld [vmem:[%s11285_s4 + $0x250] sm:$0xff] }
 0x5a9   : > { %7750 = vmatprep.subr.mxu0 %v2485_v36 }
 0x5aa   : > { %v2477_v6 = vadd.f32 %v2474_v37, %v2467_v63  ;;  %2616 = vrot.lane.b32.xlu1 %v8937_v59, %s8108_s7  ;;  %2610 = vrot.lane.b32.xlu0 %v8937_v59, %s8084_s28 }
 0x5ab   : > { %7751 = vmatpush3.msra.mxu0 %v2485_v36 }
 0x5ac   : > { %v8949_v11 = vmax.f32 %v2477_v6, 0.0  ;;  %7752 = vmatprep.subr.mxu0 %v2484_v40 }
 0x5ad   : > { %7753 = vmatpush3.msra.mxu0 %v2484_v40 }
 0x5ae   : > { %2589 = vst.msk [vmem:[#allocation2 + $0xb0] sm:$0xff] %vm2423_vm10, %v8949_v11  ;;  %2754 = vrot.lane.b32.xlu1 %v8937_v59, %s8068_s10  ;;  %2748 = vrot.lane.b32.xlu0 %v8937_v59, %s11320_s6 }
 0x5b2   : > { %2596 = vrot.lane.b32.xlu1 %v8937_v59, %s11333_s25  ;;  %2590 = vrot.lane.b32.xlu0 %v8937_v59, %s11360_s13 }
 0x5b6   : > { %2735 = vrot.lane.b32.xlu1 %v8937_v59, %s8069_s11  ;;  %2729 = vrot.lane.b32.xlu0 %v8937_v59, %s11318_s16 }
 0x5ba   : > { %2716 = vrot.lane.b32.xlu1 %v8937_v59, %s8070_s12  ;;  %2710 = vrot.lane.b32.xlu0 %v8937_v59, %s11362_s20 }
 0x5be   : > { %2575 = vrot.lane.b32.xlu1 %v8937_v59, %s11364_s29  ;;  %2569 = vrot.lane.b32.xlu0 %v8937_v59, %s11337_s27 }
 0x5c2   : > { %2696 = vrot.lane.b32.xlu1 %v8937_v59, %s8111_s8  ;;  %2690 = vrot.lane.b32.xlu0 %v8937_v59, %s8112_s26 }
 0x5c6   : > { %2555 = vrot.lane.b32.xlu1 %v8937_v59, %s8113_s21  ;;  %2549 = vrot.lane.b32.xlu0 %v8937_v59, %s11309_s14  ;;  %s11341_s14 = smov 120  }
 0x5ca   : > { %2676 = vrot.lane.b32.xlu1 %v8937_v59, %s11310_s22  ;;  %2670 = vrot.lane.b32.xlu0 %v8937_v59, %s11312_s17  ;;  %s11324_s22 = smov 8   ;;  %s11331_s17 = smov 72  }
 0x5ce   : > { %2535 = vrot.lane.b32.xlu1 %v8937_v59, %s11314_s23  ;;  %2529 = vrot.lane.b32.xlu0 %v8937_v59, %s11316_s24  ;;  %s11335_s23 = smov 57   ;;  %s11343_s24 = smov 121  }
 0x5d2   : > { %2656 = vrot.lane.b32.xlu1 %v8937_v59, %s11339_s30  ;;  %2650 = vrot.lane.b32.xlu0 %v8937_v59, %s11341_s14 }
 0x5d6   : > { %2516 = vrot.lane.b32.xlu1 %v8937_v59, %s11324_s22  ;;  %2510 = vrot.lane.b32.xlu0 %v8937_v59, %s11331_s17 }
 0x5da   : > { %2636 = vrot.lane.b32.xlu1 %v8937_v59, %s11335_s23  ;;  %2630 = vrot.lane.b32.xlu0 %v8937_v59, %s11343_s24 }
 0x5de   : > { %2775 = vrot.lane.b32.xlu1 %v8949_v11, %s8067_s9  ;;  %2769 = vrot.lane.b32.xlu0 %v8949_v11, %s8100_s15  ;;  %s11374_s9 = smov 70   ;;  %s11322_s15 = smov 9  }
 0x5e2   : > { %2618 = vrot.lane.b32.xlu1 %v8949_v11, %s8108_s7  ;;  %2612 = vrot.lane.b32.xlu0 %v8949_v11, %s8084_s28  ;;  %s11378_s28 = smov 71   ;;  %s11329_s7 = smov 73  }
 0x5e6   : > { %2756 = vrot.lane.b32.xlu1 %v8949_v11, %s8068_s10  ;;  %2750 = vrot.lane.b32.xlu0 %v8949_v11, %s11320_s6  ;;  %s11375_s10 = smov 55   ;;  %s11390_s6 = smov 125  }
 0x5ea   : > { %2598 = vrot.lane.b32.xlu1 %v8949_v11, %s11333_s25  ;;  %2592 = vrot.lane.b32.xlu0 %v8949_v11, %s11360_s13  ;;  %s11347_s25 = smov 117  }
 0x5ee   : > { %2737 = vrot.lane.b32.xlu1 %v8949_v11, %s8069_s11  ;;  %2731 = vrot.lane.b32.xlu0 %v8949_v11, %s11318_s16  ;;  %s11376_s11 = smov 119   ;;  %s11389_s16 = smov 13  }
 0x5f2   : > { %2718 = vrot.lane.b32.xlu1 %v8949_v11, %s8070_s12  ;;  %2712 = vrot.lane.b32.xlu0 %v8949_v11, %s11362_s20  ;;  %s11377_s12 = smov 7  }
 0x5f6   : > { %2577 = vrot.lane.b32.xlu1 %v8949_v11, %s11364_s29  ;;  %2571 = vrot.lane.b32.xlu0 %v8949_v11, %s11337_s27  ;;  %s11349_s27 = smov 123  }
 0x5fa   : > { %2698 = vrot.lane.b32.xlu1 %v8949_v11, %s8111_s8  ;;  %2692 = vrot.lane.b32.xlu0 %v8949_v11, %s8112_s26  ;;  %s11366_s26 = smov 124   ;;  %s11354_s8 = smov 5  }
 0x5fe   : > { %2557 = vrot.lane.b32.xlu1 %v8949_v11, %s8113_s21  ;;  %2551 = vrot.lane.b32.xlu0 %v8949_v11, %s11374_s9  ;;  %s11391_s21 = smov 3   ;;  %s11392_s9 = smov 115  }
 0x602   : > { %2678 = vrot.lane.b32.xlu1 %v8949_v11, %s11375_s10  ;;  %2672 = vrot.lane.b32.xlu0 %v8949_v11, %s11376_s11 }
 0x606   : > { %2537 = vrot.lane.b32.xlu1 %v8949_v11, %s11377_s12  ;;  %2531 = vrot.lane.b32.xlu0 %v8949_v11, %s11378_s28 }
 0x60a   : > { %2658 = vrot.lane.b32.xlu1 %v8949_v11, %s11339_s30  ;;  %2652 = vrot.lane.b32.xlu0 %v8949_v11, %s11341_s14  ;;  %s11404_s30 = smov 116   ;;  %s11405_s14 = smov 5  }
 0x60e   : > { %2518 = vrot.lane.b32.xlu1 %v8949_v11, %s11324_s22  ;;  %2512 = vrot.lane.b32.xlu0 %v8949_v11, %s11331_s17  ;;  %s11368_s17 = smov 12   ;;  %s11393_s22 = smov 15  }
 0x612   : > { %2638 = vrot.lane.b32.xlu1 %v8949_v11, %s11335_s23  ;;  %2632 = vrot.lane.b32.xlu0 %v8949_v11, %s11343_s24  ;;  %s11352_s23 = smov 11   ;;  %s11406_s24 = smov 117  }
 0x616   : > { %2498 = vrot.lane.b32.xlu1 %v8949_v11, %s11322_s15  ;;  %2492 = vrot.lane.b32.xlu0 %v8949_v11, %s11329_s7  ;;  %v9162_v11 = vld [vmem:[%s11284_s3 + $0x92] ss:$0 sm:$0xff] }
 0x618   : > { %v2774_v13 = vpop.permute.xlu1 %2773  ;;  %v2768_v14 = vpop.permute.xlu0 %2767 }
 0x619   : > { %v2779_v15 = vsel %vm11379_vm3, %v2768_v14, %v2774_v13  ;;  %vm2561_vm3 = vcmask 48128  }
 0x61a   : > { %v2782_v16 = vmul.f32 %v9064_v12, %v2779_v15  ;;  %2496 = vrot.lane.b32.xlu1 %v8937_v59, %s11322_s15  ;;  %2490 = vrot.lane.b32.xlu0 %v8937_v59, %s11329_s7  ;;  %s11358_s15 = smov 4   ;;  %s11345_s7 = smov 116  }
 0x61c   : > { %2784 = vst.msk [vmem:[#allocation2 + $0x1e0] sm:$0xff] %vm2423_vm10, %v2782_v16  ;;  %v2617_v18 = vpop.permute.xlu1 %2616  ;;  %v2611_v19 = vpop.permute.xlu0 %2610  ;;  %v9170_v16 = vld [vmem:[%s11284_s3 + $0xa1] ss:$0 sm:$0xff] }
 0x61d   : > { %v2623_v20 = vsel %vm2622_vm8, %v2611_v19, %v2617_v18 }
 0x61e   : > { %v2626_v21 = vmul.f32 %v9078_v17, %v2623_v20 }
 0x620   : > { %2628 = vst.msk [vmem:[#allocation2 + $0xe0] sm:$0xff] %vm2423_vm10, %v2626_v21  ;;  %v2755_v23 = vpop.permute.xlu1 %2754  ;;  %v2749_v24 = vpop.permute.xlu0 %2748 }
 0x621   : > { %v2760_v25 = vsel %vm11380_vm9, %v2749_v24, %v2755_v23  ;;  %vm11357_vm9 = vcmask 449536   ;;  %v9178_v23 = vld [vmem:[%s11284_s3 + $0x91] ss:$0 sm:$0xff] }
 0x622   : > { %v2763_v26 = vmul.f32 %v9086_v22, %v2760_v25 }
 0x624   : > { %2765 = vst.msk [vmem:[#allocation2 + $0x1c0] sm:$0xff] %vm2423_vm10, %v2763_v26  ;;  %v2597_v28 = vpop.permute.xlu1 %2596  ;;  %v2591_v9 = vpop.permute.xlu0 %2590 }
 0x625   : > { %v2603_v29 = vsel %vm2602_vm15, %v2591_v9, %v2597_v28  ;;  %v9186_v9 = vld [vmem:[%s11284_s3 + $0xa0] ss:$0 sm:$0xff] }
 0x626   : > { %v2606_v32 = vmul.f32 %v9094_v27, %v2603_v29 }
 0x628   : > { %2608 = vst.msk [vmem:[#allocation2 + $0xc0] sm:$0xff] %vm2423_vm10, %v2606_v32  ;;  %v2736_v37 = vpop.permute.xlu1 %2735  ;;  %v2730_v38 = vpop.permute.xlu0 %2729 }
 0x629   : > { %v2741_v39 = vsel %vm11381_vm6, %v2730_v38, %v2736_v37  ;;  %vm2541_vm6 = vcmask 56320  }
 0x62a   : > { %v2744_v41 = vmul.f32 %v9108_v35, %v2741_v39 }
 0x62c   : > { %2746 = vst.msk [vmem:[#allocation2 + $0x1a0] sm:$0xff] %vm2423_vm10, %v2744_v41  ;;  %v2717_v43 = vpop.permute.xlu1 %2716  ;;  %v2711_v44 = vpop.permute.xlu0 %2710 }
 0x62d   : > { %v2722_v8 = vsel %vm11382_vm0, %v2711_v44, %v2717_v43  ;;  %vm2662_vm0 = vcmask 457728  }
 0x62e   : > { %v2725_v45 = vmul.f32 %v9122_v42, %v2722_v8 }
 0x630   : > { %2727 = vst.msk [vmem:[#allocation2 + $0x180] sm:$0xff] %vm2423_vm10, %v2725_v45  ;;  %v2576_v46 = vpop.permute.xlu1 %2575  ;;  %v2570_v47 = vpop.permute.xlu0 %2569 }
 0x631   : > { %v2581_v48 = vsel %vm854_vm14, %v2570_v47, %v2576_v46 }
 0x632   : > { %v2584_v49 = vmul.f32 %v9130_v7, %v2581_v48 }
 0x634   : > { %2586 = vst.msk [vmem:[#allocation2 + $0x80] sm:$0xff] %vm2423_vm10, %v2584_v49  ;;  %v2697_v51 = vpop.permute.xlu1 %2696  ;;  %v2691_v52 = vpop.permute.xlu0 %2690 }
 0x635   : > { %v2703_v53 = vsel %vm2702_vm5, %v2691_v52, %v2697_v51 }
 0x636   : > { %v2706_v54 = vmul.f32 %v9138_v50, %v2703_v53 }
 0x638   : > { %2708 = vst.msk [vmem:[#allocation2 + $0x160] sm:$0xff] %vm2423_vm10, %v2706_v54  ;;  %v2556_v56 = vpop.permute.xlu1 %2555  ;;  %v2550_v57 = vpop.permute.xlu0 %2549 }
 0x639   : > { %v2562_v58 = vsel %vm2561_vm3, %v2550_v57, %v2556_v56  ;;  %v2824_v56 = vld [vmem:[#allocation2 + $0x1e0] sm:$0xff] }
 0x63a   : > { %v2565_v59 = vmul.f32 %v9146_v55, %v2562_v58 }
 0x63c   : > { %2567 = vst.msk [vmem:[#allocation2 + $0x60] sm:$0xff] %vm2423_vm10, %v2565_v59  ;;  %v2677_v61 = vpop.permute.xlu1 %2676  ;;  %v2671_v62 = vpop.permute.xlu0 %2670 }
 0x63d   : > { %v2683_v63 = vsel %vm11357_vm9, %v2671_v62, %v2677_v61 }
 0x63e   : > { %v2686_v6 = vmul.f32 %v9154_v60, %v2683_v63 }
 0x640   : > { %2688 = vst.msk [vmem:[#allocation2 + $0x140] sm:$0xff] %vm2423_vm10, %v2686_v6  ;;  %v2536_v0 = vpop.permute.xlu1 %2535  ;;  %v2530_v13 = vpop.permute.xlu0 %2529 }
 0x641   : > { %v2542_v14 = vsel %vm2541_vm6, %v2530_v13, %v2536_v0 }
 0x642   : > { %v2545_v15 = vmul.f32 %v9162_v11, %v2542_v14  ;;  %v2822_v14 = vld [vmem:[#allocation2 + $0x1c0] sm:$0xff] }
 0x644   : > { %2547 = vst.msk [vmem:[#allocation2 + $0x40] sm:$0xff] %vm2423_vm10, %v2545_v15  ;;  %v2657_v18 = vpop.permute.xlu1 %2656  ;;  %v2651_v19 = vpop.permute.xlu0 %2650  ;;  %v2806_v15 = vld [vmem:[#allocation2 + $0xc0] sm:$0xff] }
 0x645   : > { %v2663_v20 = vsel %vm2662_vm0, %v2651_v19, %v2657_v18 }
 0x646   : > { %v2666_v21 = vmul.f32 %v9170_v16, %v2663_v20 }
 0x648   : > { %2668 = vst.msk [vmem:[#allocation2 + $0x120] sm:$0xff] %vm2423_vm10, %v2666_v21  ;;  %v2517_v24 = vpop.permute.xlu1 %2516  ;;  %v2511_v25 = vpop.permute.xlu0 %2510  ;;  %v2805_v21 = vld [vmem:[#allocation2 + $0xb0] sm:$0xff] }
 0x649   : > { %v2522_v26 = vsel %vm11383_vm11, %v2511_v25, %v2517_v24  ;;  %vm11384_vm11 = vcmask 375808   ;;  %v2820_v25 = vld [vmem:[#allocation2 + $0x1a0] sm:$0xff] }
 0x64a   : > { %v2525_v28 = vmul.f32 %v9178_v23, %v2522_v26 }
 0x64c   : > { %2527 = vst.msk [vmem:[#allocation2 + $0x20] sm:$0xff] %vm2423_vm10, %v2525_v28  ;;  %v2637_v29 = vpop.permute.xlu1 %2636  ;;  %v2631_v30 = vpop.permute.xlu0 %2630  ;;  %v2804_v28 = vld [vmem:[#allocation2 + $0xa0] sm:$0xff] }
 0x64d   : > { %v2643_v31 = vsel %vm2642_vm7, %v2631_v30, %v2637_v29 }
 0x64e   : > { %v2646_v32 = vmul.f32 %v9186_v9, %v2643_v31 }
 0x650   : > { %2648 = vst.msk [vmem:[#allocation2 + $0x100] sm:$0xff] %vm2423_vm10, %v2646_v32  ;;  %v2776_v36 = vpop.permute.xlu1 %2775  ;;  %v2770_v37 = vpop.permute.xlu0 %2769 }
 0x651   : > { %v2780_v38 = vsel %vm11384_vm11, %v2770_v37, %v2776_v36  ;;  %vm3380_vm11 = vcmask 97280  }
 0x652   : > { %v2783_v39 = vmul.f32 %v9064_v12, %v2780_v38 }
 0x654   : > { %2785 = vst.msk [vmem:[#allocation2 + $0x1f0] sm:$0xff] %vm2423_vm10, %v2783_v39  ;;  %v2619_v40 = vpop.permute.xlu1 %2618  ;;  %v2613_v41 = vpop.permute.xlu0 %2612 }
 0x655   : > { %v2624_v43 = vsel %vm2622_vm8, %v2613_v41, %v2619_v40  ;;  %vm11387_vm8 = vcmask 400384   ;;  %v2802_v40 = vld [vmem:[#allocation2 + $0x80] sm:$0xff] }
 0x656   : > { %v2627_v44 = vmul.f32 %v9078_v17, %v2624_v43 }
 0x658   : > { %2629 = vst.msk [vmem:[#allocation2 + $0xf0] sm:$0xff] %vm2423_vm10, %v2627_v44  ;;  %v2757_v8 = vpop.permute.xlu1 %2756  ;;  %v2751_v45 = vpop.permute.xlu0 %2750 }
 0x659   : > { %v2761_v46 = vsel %vm11385_vm4, %v2751_v45, %v2757_v8  ;;  %vm11386_vm4 = vcmask 392192  }
 0x65a   : > { %v2764_v47 = vmul.f32 %v9086_v22, %v2761_v46  ;;  %v2808_v22 = vld [vmem:[#allocation2 + $0xe0] sm:$0xff] }
 0x65b   : > { %v2825_v48 = vld [vmem:[#allocation2 + $0x1f0] sm:$0xff] }
 0x65c   : > { %2766 = vst.msk [vmem:[#allocation2 + $0x1d0] sm:$0xff] %vm2423_vm10, %v2764_v47  ;;  %v2599_v12 = vpop.permute.xlu1 %2598  ;;  %7450 = vmatprep.subr.mxu1 %v2825_v48  ;;  %v2593_v49 = vpop.permute.xlu0 %2592 }
 0x65d   : > { %v2604_v51 = vsel %vm2602_vm15, %v2593_v49, %v2599_v12  ;;  %v2816_v12 = vld [vmem:[#allocation2 + $0x160] sm:$0xff] }
 0x65e   : > { %v2607_v52 = vmul.f32 %v9094_v27, %v2604_v51  ;;  %v2800_v49 = vld [vmem:[#allocation2 + $0x60] sm:$0xff] }
 0x65f   : > { %v2809_v53 = vld [vmem:[#allocation2 + $0xf0] sm:$0xff] }
 0x660   : > { %2609 = vst.msk [vmem:[#allocation2 + $0xd0] sm:$0xff] %vm2423_vm10, %v2607_v52  ;;  %v2738_v17 = vpop.permute.xlu1 %2737  ;;  %7451 = vmatpush3.msra.mxu1 %v2809_v53  ;;  %v2732_v54 = vpop.permute.xlu0 %2731 }
 0x661   : > { %v2742_v57 = vsel %vm11386_vm4, %v2732_v54, %v2738_v17  ;;  %7452 = vmatprep.subr.mxu1 %v2824_v56  ;;  %vm11394_vm4 = vcmask 105472  }
 0x662   : > { %v2745_v58 = vmul.f32 %v9108_v35, %v2742_v57  ;;  %7453 = vmatpush3.msra.mxu1 %v2808_v22 }
 0x663   : > { %v2823_v59 = vld [vmem:[#allocation2 + $0x1d0] sm:$0xff] }
 0x664   : > { %2747 = vst.msk [vmem:[#allocation2 + $0x1b0] sm:$0xff] %vm2423_vm10, %v2745_v58  ;;  %v2719_v61 = vpop.permute.xlu1 %2718  ;;  %7454 = vmatprep.subr.mxu1 %v2823_v59  ;;  %v2713_v27 = vpop.permute.xlu0 %2712  ;;  %v2814_v58 = vld [vmem:[#allocation2 + $0x140] sm:$0xff] }
 0x665   : > { %v2723_v62 = vsel %vm11387_vm8, %v2713_v27, %v2719_v61  ;;  %v2798_v59 = vld [vmem:[#allocation2 + $0x40] sm:$0xff]  ;;  %vm11395_vm8 = vcmask 261120  }
 0x666   : > { %v2726_v63 = vmul.f32 %v9122_v42, %v2723_v62 }
 0x667   : > { %v2807_v6 = vld [vmem:[#allocation2 + $0xd0] sm:$0xff] }
 0x668   : > { %2728 = vst.msk [vmem:[#allocation2 + $0x190] sm:$0xff] %vm2423_vm10, %v2726_v63  ;;  %v2578_v0 = vpop.permute.xlu1 %2577  ;;  %7455 = vmatpush3.msra.mxu1 %v2807_v6  ;;  %v2572_v13 = vpop.permute.xlu0 %2571 }
 0x669   : > { %v2582_v35 = vsel %vm854_vm14, %v2572_v13, %v2578_v0  ;;  %7456 = vmatprep.subr.mxu1 %v2822_v14 }
 0x66a   : > { %v2585_v18 = vmul.f32 %v9130_v7, %v2582_v35  ;;  %7457 = vmatpush3.msra.mxu1 %v2806_v15  ;;  %v2812_v35 = vld [vmem:[#allocation2 + $0x120] sm:$0xff] }
 0x66b   : > { %v2821_v19 = vld [vmem:[#allocation2 + $0x1b0] sm:$0xff] }
 0x66c   : > { %2587 = vst.msk [vmem:[#allocation2 + $0x90] sm:$0xff] %vm2423_vm10, %v2585_v18  ;;  %v2699_v20 = vpop.permute.xlu1 %2698  ;;  %7458 = vmatprep.subr.mxu1 %v2821_v19  ;;  %v2693_v42 = vpop.permute.xlu0 %2692  ;;  %v2796_v18 = vld [vmem:[#allocation2 + $0x20] sm:$0xff] }
 0x66d   : > { %v2704_v24 = vsel %vm2702_vm5, %v2693_v42, %v2699_v20  ;;  %7459 = vmatpush3.msra.mxu1 %v2805_v21  ;;  %vm11388_vm5 = vcmask 64512   ;;  %v2810_v21 = vld [vmem:[#allocation2 + $0x100] sm:$0xff] }
 0x66e   : > { %v2707_v26 = vmul.f32 %v9138_v50, %v2704_v24  ;;  %7460 = vmatprep.subr.mxu1 %v2820_v25  ;;  %v2818_v50 = vld [vmem:[#allocation2 + $0x180] sm:$0xff] }
 0x66f   : > { %7461 = vmatpush3.msra.mxu1 %v2804_v28  ;;  %v2819_v29 = vld [vmem:[#allocation2 + $0x190] sm:$0xff]  ;;  %v2786_v24 = vld [vmem:[%s11282_s1 + $0x60] sm:$0xff] }
 0x670   : > { %2709 = vst.msk [vmem:[#allocation2 + $0x170] sm:$0xff] %vm2423_vm10, %v2707_v26  ;;  %v2558_v7 = vpop.permute.xlu1 %2557  ;;  %7462 = vmatprep.subr.mxu1 %v2819_v29  ;;  %v2552_v30 = vpop.permute.xlu0 %2551  ;;  %v2789_v26 = vld [vmem:[%s11282_s1 + $0x88] sm:$0xff]  ;;  %v2788_v28 = vld [vmem:[%s11282_s1 + $0x80] sm:$0xff] }
 0x671   : > { %v2563_v31 = vsel %vm2561_vm3, %v2552_v30, %v2558_v7  ;;  %vm2502_vm3 = vcmask 72704   ;;  %v2791_v29 = vld [vmem:[%s11282_s1 + $0xa8] sm:$0xff]  ;;  %v2790_v7 = vld [vmem:[%s11282_s1 + $0xa0] sm:$0xff] }
 0x672   : > { %v2566_v32 = vmul.f32 %v9146_v55, %v2563_v31  ;;  %v2793_v30 = vld [vmem:[%s11282_s1 + $0xc8] sm:$0xff]  ;;  %v2792_v31 = vld [vmem:[%s11282_s1 + $0xc0] sm:$0xff] }
 0x673   : > { %v2803_v36 = vld [vmem:[#allocation2 + $0x90] sm:$0xff] }
 0x674   : > { %2568 = vst.msk [vmem:[#allocation2 + $0x70] sm:$0xff] %vm2423_vm10, %v2566_v32  ;;  %v2679_v37 = vpop.permute.xlu1 %2678  ;;  %7463 = vmatpush3.msra.mxu1 %v2803_v36  ;;  %v2673_v38 = vpop.permute.xlu0 %2672  ;;  %v2483_v32 = vld [vmem:[%s11285_s4 + $0x230] sm:$0xff]  ;;  %v2482_v36 = vld [vmem:[%s11285_s4 + $0x220] sm:$0xff] }
 0x675   : > { %v2684_v39 = vsel %vm11357_vm9, %v2673_v38, %v2679_v37  ;;  %7464 = vmatprep.subr.mxu1 %v2818_v50  ;;  %7754 = vmatprep.subr.mxu0 %v2483_v32  ;;  %v2481_v37 = vld [vmem:[%s11285_s4 + $0x210] sm:$0xff]  ;;  %v2480_v38 = vld [vmem:[%s11285_s4 + $0x200] sm:$0xff] }
 0x676   : > { %v2687_v41 = vmul.f32 %v9154_v60, %v2684_v39  ;;  %7465 = vmatpush3.msra.mxu1 %v2802_v40  ;;  %7755 = vmatpush3.msra.mxu0 %v2483_v32  ;;  %v3011_v50 = vld [vmem:[%s11283_s2 + $0x30] sm:$0xff]  ;;  %v3010_v39 = vld [vmem:[%s11283_s2 + $0x28] sm:$0xff]  ;;  %v3008_v40 = vld [vmem:[%s11283_s2 + $0x18] sm:$0xff] }
 0x677   : > { %v2817_v43 = vld [vmem:[#allocation2 + $0x170] sm:$0xff]  ;;  %7756 = vmatprep.subr.mxu0 %v2482_v36  ;;  %3093 = vperm.xlu1 %7950, %v3011_v50  }
 0x678   : > { %2689 = vst.msk [vmem:[#allocation2 + $0x150] sm:$0xff] %vm2423_vm10, %v2687_v41  ;;  %v2538_v44 = vpop.permute.xlu1 %2537  ;;  %7466 = vmatprep.subr.mxu1 %v2817_v43  ;;  %v2532_v55 = vpop.permute.xlu0 %2531  ;;  %7757 = vmatpush3.msra.mxu0 %v2482_v36  ;;  %v3009_v41 = vld [vmem:[%s11283_s2 + $0x20] sm:$0xff] }
 0x679   : > { %v2543_v8 = vsel %vm2541_vm6, %v2532_v55, %v2538_v44  ;;  %7758 = vmatprep.subr.mxu0 %v2481_v37  ;;  %3109 = vperm.xlu0 %7953, %v3010_v39  }
 0x67a   : > { %v2546_v45 = vmul.f32 %v9162_v11, %v2543_v8  ;;  %7759 = vmatpush3.msra.mxu0 %v2481_v37 }
 0x67b   : > { %v2801_v46 = vld [vmem:[#allocation2 + $0x70] sm:$0xff]  ;;  %7760 = vmatprep.subr.mxu0 %v2480_v38  ;;  %7951 = vset.pattern.permute.xlu1 %v8106_v34 }
 0x67c   : > { %2548 = vst.msk [vmem:[#allocation2 + $0x50] sm:$0xff] %vm2423_vm10, %v2546_v45  ;;  %v2659_v47 = vpop.permute.xlu1 %2658  ;;  %7467 = vmatpush3.msra.mxu1 %v2801_v46  ;;  %v2653_v48 = vpop.permute.xlu0 %2652  ;;  %7761 = vmatpush3.msra.mxu0 %v2480_v38 }
 0x67d   : > { %v2664_v60 = vsel %vm2662_vm0, %v2653_v48, %v2659_v47  ;;  %7468 = vmatprep.subr.mxu1 %v2816_v12  ;;  %3101 = vperm.xlu0 %7953, %v3008_v40  }
 0x67e   : > { %v2667_v51 = vmul.f32 %v9170_v16, %v2664_v60  ;;  %7469 = vmatpush3.msra.mxu1 %v2800_v49  ;;  %3113 = vperm.xlu1 %7951, %v3011_v50  }
 0x67f   : > { %v2815_v52 = vld [vmem:[#allocation2 + $0x150] sm:$0xff] }
 0x680   : > { %2669 = vst.msk [vmem:[#allocation2 + $0x130] sm:$0xff] %vm2423_vm10, %v2667_v51  ;;  %v2519_v53 = vpop.permute.xlu1 %2518  ;;  %7470 = vmatprep.subr.mxu1 %v2815_v52  ;;  %v2513_v11 = vpop.permute.xlu0 %2512 }
 0x681   : > { %v2523_v17 = vsel %vm11388_vm5, %v2513_v11, %v2519_v53  ;;  %7955 = vset.pattern.permute.xlu0 %v8105_v33  ;;  %vm11396_vm5 = vcmask 23552  }
 0x682   : > { %v2526_v54 = vmul.f32 %v9178_v23, %v2523_v17  ;;  %v2505_v23 = vld [vmem:[%s11284_s3 + $0x90] ss:$0 sm:$0xff]  ;;  %7952 = vset.pattern.permute.xlu1 %v8105_v33  ;;  %3088 = vperm.xlu0 %7955, %v3010_v39  }
 0x683   : > { %v2799_v56 = vld [vmem:[#allocation2 + $0x50] sm:$0xff]  ;;  %3083 = vperm.xlu1 %7952, %v3009_v41  }
 0x684   : > { %2528 = vst.msk [vmem:[#allocation2 + $0x30] sm:$0xff] %vm2423_vm10, %v2526_v54  ;;  %v2639_v57 = vpop.permute.xlu1 %2638  ;;  %7471 = vmatpush3.msra.mxu1 %v2799_v56  ;;  %v2633_v22 = vpop.permute.xlu0 %2632 }
 0x685   : > { %v2644_v16 = vsel %vm2642_vm7, %v2633_v22, %v2639_v57  ;;  %7472 = vmatprep.subr.mxu1 %v2814_v58 }
 0x686   : > { %v2647_v61 = vmul.f32 %v9186_v9, %v2644_v16  ;;  %7473 = vmatpush3.msra.mxu1 %v2798_v59 }
 0x687   : > { %v2813_v27 = vld [vmem:[#allocation2 + $0x130] sm:$0xff]  ;;  %3078 = vperm.xlu1 %7952, %v3008_v40  }
 0x688   : > { %2649 = vst.msk [vmem:[#allocation2 + $0x110] sm:$0xff] %vm2423_vm10, %v2647_v61  ;;  %v2499_v62 = vpop.permute.xlu1 %2498  ;;  %7474 = vmatprep.subr.mxu1 %v2813_v27  ;;  %v2493_v63 = vpop.permute.xlu0 %2492 }
 0x689   : > { %v2504_v6 = vsel %vm2502_vm3, %v2493_v63, %v2499_v62 }
 0x68a   : > { %v2507_v0 = vmul.f32 %v2505_v23, %v2504_v6 }
 0x68b   : > { %v2797_v13 = vld [vmem:[#allocation2 + $0x30] sm:$0xff]  ;;  %7954 = vset.pattern.permute.xlu1 %v8106_v34 }
 0x68c   : > { %2509 = vst.msk [vmem:[#allocation2 + $0x10] sm:$0xff] %vm2423_vm10, %v2507_v0  ;;  %v2497_v14 = vpop.permute.xlu1 %2496  ;;  %7475 = vmatpush3.msra.mxu1 %v2797_v13  ;;  %v2491_v9 = vpop.permute.xlu0 %2490  ;;  %3105 = vperm.xlu1 %7954, %v3009_v41  }
 0x68d   : > { %v2503_v15 = vsel %vm2502_vm3, %v2491_v9, %v2497_v14  ;;  %7476 = vmatprep.subr.mxu1 %v2812_v35 }
 0x68e   : > { %v2506_v19 = vmul.f32 %v2505_v23, %v2503_v15  ;;  %7477 = vmatpush3.msra.mxu1 %v2796_v18 }
 0x68f   : > { %v2811_v20 = vld [vmem:[#allocation2 + $0x110] sm:$0xff] }
 0x690   : > { %2508 = vst.msk [vmem:[#allocation2] sm:$0xff] %vm2423_vm10, %v2506_v19  ;;  %7478 = vmatprep.subr.mxu1 %v2811_v20  ;;  %7956 = vset.pattern.permute.xlu1 %v8105_v33 }
 0x693   : > { %v2795_v42 = vld [vmem:[#allocation2 + $0x10] sm:$0xff] }
 0x694   : > { %7479 = vmatpush3.msra.mxu1 %v2795_v42 }
 0x695   : > { %7480 = vmatprep.subr.mxu1 %v2810_v21 }
 0x697   : > { %v2794_v25 = vld [vmem:[#allocation2] sm:$0xff] }
 0x698   : > { %7481 = vmatpush3.msra.mxu1 %v2794_v25 }
 0x699   : > { %2891 = vmatmul.mubr.f32.vlgmr.msra.gmra.mxu1 %v2786_v24 }
 0x69a   : > { %2895 = vmatprep.mubr.f32.mxu1 %v2789_v26 }
 0x69d   : > { %2896 = vmatmul.mubr.f32.gmra.mxu1 %v2788_v28 }
 0x69e   : > { %2900 = vmatprep.mubr.f32.mxu1 %v2791_v29 }
 0x6a1   : > { %2901 = vmatmul.mubr.f32.gmra.mxu1 %v2790_v7 }
 0x6a2   : > { %2905 = vmatprep.mubr.f32.mxu1 %v2793_v30 }
 0x6a5   : > { %2906 = vmatmul.mubr.f32.gmra.mxu1 %v2792_v31 }
 0x6f2   : > { %v9323_v6 = vpop.permute.xlu1 %3093 }
 0x6f4   : > { %v9327_v13 = vpop.permute.xlu0 %3109 }
 0x6f8   : > { %v3102_v9 = vpop.permute.xlu0 %3101 }
 0x6f9   : > { %v9325_v0 = vpop.permute.xlu1 %3113 }
 0x6fd   : > { %v9329_v15 = vpop.permute.xlu0 %3088 }
 0x6fe   : > { %v3084_v14 = vpop.permute.xlu1 %3083 }
 0x702   : > { %v3079_v35 = vpop.permute.xlu1 %3078 }
 0x707   : > { %v3106_v18 = vpop.permute.xlu1 %3105 }
 0x759   : > { %v7482_v43 = vpop.f32.mrf.mxu1 }
 0x75b   : > { %v7483_v44 = vpop.f32.mrf.mxu1 }
 0x75c   : > { %v7484_v55 = vadd.f32 %v7483_v44, %v7482_v43 }
 0x75d   : > { %v7485_v8 = vpop.f32.mrf.mxu1 }
 0x75e   : > { %7762 = vmatprep.mubr.msk.f32.mxu0 %vm2423_vm10, %v7484_v55 }
 0x75f   : > { %v7486_v45 = vpop.f32.mrf.mxu1 }
 0x760   : > { %v7487_v46 = vadd.f32 %v7486_v45, %v7485_v8 }
 0x761   : > { %v7488_v47 = vpop.f32.mrf.mxu1 }
 0x762   : > { %7763 = vmatmul.mubr.msk.f32.vlgmr.msra.gmra.mxu0 %vm2423_vm10, %v7487_v46 }
 0x763   : > { %v7489_v48 = vpop.f32.mrf.mxu1 }
 0x764   : > { %v7490_v12 = vadd.f32 %v7489_v48, %v7488_v47 }
 0x765   : > { %v7491_v60 = vpop.f32.mrf.mxu1 }
 0x766   : > { %7765 = vmatprep.mubr.msk.f32.mxu0 %vm2423_vm10, %v7490_v12 }
 0x767   : > { %v7492_v49 = vpop.f32.mrf.mxu1 }
 0x768   : > { %v7493_v51 = vadd.f32 %v7492_v49, %v7491_v60 }
 0x76a   : > { %7766 = vmatmul.mubr.msk.f32.gmra.mxu0 %vm2423_vm10, %v7493_v51 }
 0x822   : > { %v9295_v52 = vpop.f32.mrf.mxu0 }
 0x823   : > { %v3029_v53 = vmul.f32 %v9295_v52, %v9295_v52  ;;  %v3015_v11 = vsel %vm692_vm13, %v9295_v52, 0.0 }
 0x824   : > { %3016 = vadd.xlane.f32.xlu0 %v3015_v11  ;;  %v9301_v17 = vpop.f32.mrf.mxu0 }
 0x825   : > { %v3035_v54 = vsel %vm692_vm13, %v3029_v53, 0.0  ;;  %v3028_v56 = vmul.f32 %v9301_v17, %v9301_v17  ;;  %v3012_v57 = vsel %vm692_vm13, %v9301_v17, 0.0 }
 0x826   : > { %3036 = vadd.xlane.f32.xlu1 %v3035_v54 }
 0x827   : > { %v3032_v58 = vsel %vm692_vm13, %v3028_v56, 0.0 }
 0x828   : > { %3013 = vadd.xlane.f32.xlu0 %v3012_v57 }
 0x82a   : > { %v9308_v22 = vpop.f32.mrf.mxu0 }
 0x82b   : > { %v3031_v59 = vmul.f32 %v9308_v22, %v9308_v22  ;;  %v3021_v23 = vsel %vm692_vm13, %v9308_v22, 0.0 }
 0x82c   : > { %3033 = vadd.xlane.f32.xlu0 %v3032_v58  ;;  %v9311_v16 = vpop.f32.mrf.mxu0 }
 0x82d   : > { %v3030_v61 = vmul.f32 %v9311_v16, %v9311_v16  ;;  %v3018_v27 = vsel %vm692_vm13, %v9311_v16, 0.0  ;;  %v3041_v63 = vsel %vm692_vm13, %v3031_v59, 0.0 }
 0x82e   : > { %3019 = vadd.xlane.f32.xlu1 %v3018_v27 }
 0x82f   : > { %v3038_v62 = vsel %vm692_vm13, %v3030_v61, 0.0 }
 0x830   : > { %3022 = vadd.xlane.f32.xlu0 %v3021_v23 }
 0x832   : > { %3039 = vadd.xlane.f32.xlu1 %v3038_v62 }
 0x834   : > { %3042 = vadd.xlane.f32.xlu0 %v3041_v63 }
 0x8ad   : > { %v3017_v19 = vpop.xlane.xlu0 %3016 }
 0x8ae   : > { %v3025_v20 = vmul.f32 0.0625, %v3017_v19 }
 0x8af   : > { %v3037_v42 = vpop.xlane.xlu1 %3036 }
 0x8b0   : > { %v3049_v21 = vmul.f32 %v3025_v20, %v3025_v20  ;;  %v3045_v24 = vmul.f32 0.0625, %v3037_v42  ;;  %v3061_v51 = vsub.f32 %v9295_v52, %v3025_v20 }
 0x8b1   : > { %v3014_v25 = vpop.xlane.xlu0 %3013 }
 0x8b2   : > { %v3053_v26 = vsub.f32 %v3045_v24, %v3049_v21  ;;  %v3024_v28 = vmul.f32 0.0625, %v3014_v25 }
 0x8b4   : > { %v3057_v29 = vmax.f32 %v3053_v26, 0.0  ;;  %v3048_v31 = vmul.f32 %v3024_v28, %v3024_v28  ;;  %v3060_v58 = vsub.f32 %v9301_v17, %v3024_v28  ;;  %v9469_v26 = vld [vmem:[%s11284_s3 + $0xb3] ss:$0 sm:$0xff] }
 0x8b5   : > { %v3034_v7 = vpop.xlane.xlu0 %3033 }
 0x8b6   : > { %v3065_v30 = vadd.f32 1e-05, %v3057_v29  ;;  %v3044_v32 = vmul.f32 0.0625, %v3034_v7 }
 0x8b7   : > { %v3020_v36 = vpop.xlane.xlu1 %3019 }
 0x8b8   : > { %7985 = vrsqrt.f32 %v3065_v30  ;;  %v3052_v37 = vsub.f32 %v3044_v32, %v3048_v31  ;;  %v3026_v38 = vmul.f32 0.0625, %v3020_v36  ;;  %v9481_v31 = vld [vmem:[%s11284_s3 + $0xb6] ss:$0 sm:$0xff] }
 0x8b9   : > { %v3023_v50 = vpop.xlane.xlu0 %3022 }
 0x8ba   : > { %v3056_v39 = vmax.f32 %v3052_v37, 0.0  ;;  %v3050_v40 = vmul.f32 %v3026_v38, %v3026_v38  ;;  %v3027_v41 = vmul.f32 0.0625, %v3023_v50  ;;  %v3062_v62 = vsub.f32 %v9311_v16, %v3026_v38  ;;  %v3434_v37 = vld [vmem:[%s11282_s1 + $0xf0] sm:$0xff] }
 0x8bb   : > { %v3040_v43 = vpop.xlane.xlu1 %3039  ;;  %7776 = vmatprep.mubr.msk.f32.mxu0 %vm11395_vm8, %v3434_v37  ;;  %vm3152_vm8 = vcmask 39936  }
 0x8bc   : > { %v3064_v44 = vadd.f32 1e-05, %v3056_v39  ;;  %v3051_v55 = vmul.f32 %v3027_v41, %v3027_v41  ;;  %v3046_v8 = vmul.f32 0.0625, %v3040_v43  ;;  %v9497_v39 = vld [vmem:[%s11284_s3 + $0xb2] ss:$0 sm:$0xff] }
 0x8bd   : > { %v3043_v45 = vpop.xlane.xlu0 %3042 }
 0x8be   : > { %7987 = vrsqrt.f32 %v3064_v44  ;;  %v3054_v46 = vsub.f32 %v3046_v8, %v3050_v40  ;;  %v3047_v47 = vmul.f32 0.0625, %v3043_v45  ;;  %v3665_v40 = vld [vmem:[%s11283_s2 + $0x50] sm:$0xff]  ;;  %v3664_v8 = vld [vmem:[%s11283_s2 + $0x48] sm:$0xff] }
 0x8bf   : > { %v9511_v45 = vld [vmem:[%s11284_s3 + $0xb5] ss:$0 sm:$0xff] }
 0x8c0   : > { %v3058_v48 = vmax.f32 %v3054_v46, 0.0  ;;  %v3055_v12 = vsub.f32 %v3047_v47, %v3051_v55 }
 0x8c2   : > { %v3066_v60 = vadd.f32 1e-05, %v3058_v48  ;;  %v3059_v49 = vmax.f32 %v3055_v12, 0.0 }
 0x8c4   : > { %7989 = vrsqrt.f32 %v3066_v60  ;;  %v3067_v53 = vadd.f32 1e-05, %v3059_v49  ;;  %v9520_v60 = vld [vmem:[%s11284_s3 + $0xb1] ss:$0 sm:$0xff] }
 0x8c5   : > { %v7986_v11 = vpop.eup %7985 }
 0x8c6   : > { %v3073_v54 = vmul.f32 %v7986_v11, %v3061_v51  ;;  %7991 = vrsqrt.f32 %v3067_v53 }
 0x8c8   : > { %v3097_v56 = vmul.f32 %v3084_v14, %v3073_v54  ;;  %v3063_v14 = vsub.f32 %v9308_v22, %v3027_v41  ;;  %v3663_v54 = vld [vmem:[%s11283_s2 + $0x40] sm:$0xff] }
 0x8ca   : > { %v3117_v57 = vadd.f32 %v3106_v18, %v3097_v56  ;;  %v9532_v56 = vld [vmem:[%s11284_s3 + $0xb0] ss:$0 sm:$0xff] }
 0x8cb   : > { %v7988_v59 = vpop.eup %7987 }
 0x8cc   : > { %v9333_v61 = vmax.f32 %v3117_v57, 0.0  ;;  %v3072_v27 = vmul.f32 %v7988_v59, %v3060_v58 }
 0x8ce   : > { %3279 = vst.msk [vmem:[#allocation2 + $0x110] sm:$0xff] %vm692_vm13, %v9333_v61  ;;  %v3096_v23 = vmul.f32 %v3079_v35, %v3072_v27  ;;  %3370 = vrot.lane.b32.xlu0 %v9333_v61, %s11368_s17  ;;  %3358 = vrot.lane.b32.xlu1 %v9333_v61, %s11366_s26 }
 0x8d0   : > { %v3116_v52 = vadd.f32 %v3102_v9, %v3096_v23 }
 0x8d1   : > { %v7990_v17 = vpop.eup %7989 }
 0x8d2   : > { %v9342_v63 = vmax.f32 %v3116_v52, 0.0  ;;  %v3074_v18 = vmul.f32 %v7990_v17, %v3062_v62  ;;  %3255 = vrot.lane.b32.xlu0 %v9333_v61, %s11364_s29  ;;  %3243 = vrot.lane.b32.xlu1 %v9333_v61, %s11362_s20 }
 0x8d3   : > { %v7992_v35 = vpop.eup %7991 }
 0x8d4   : > { %3278 = vst.msk [vmem:[#allocation2 + $0x100] sm:$0xff] %vm692_vm13, %v9342_v63  ;;  %v3098_v9 = vmul.f32 %v9329_v15, %v3074_v18  ;;  %v3075_v19 = vmul.f32 %v7992_v35, %v3063_v14  ;;  %v3433_v15 = vld [vmem:[%s11282_s1 + $0xe8] sm:$0xff]  ;;  %v3662_v14 = vld [vmem:[%s11283_s2 + $0x38] sm:$0xff] }
 0x8d5   : > { %3556 = vmatprep.mubr.f32.mxu1 %v3433_v15 }
 0x8d6   : > { %v3118_v16 = vadd.f32 %v9327_v13, %v3098_v9  ;;  %v3099_v20 = vmul.f32 %v9323_v6, %v3075_v19  ;;  %3333 = vrot.lane.b32.xlu0 %v9333_v61, %s11389_s16  ;;  %3321 = vrot.lane.b32.xlu1 %v9333_v61, %s11390_s6  ;;  %v9455_v6 = vld [vmem:[%s11284_s3 + $0xb7] ss:$0 sm:$0xff] }
 0x8d8   : > { %v9358_v22 = vmax.f32 %v3118_v16, 0.0  ;;  %v3119_v42 = vadd.f32 %v9325_v0, %v3099_v20 }
 0x8da   : > { %3280 = vst.msk [vmem:[#allocation2 + $0x120] sm:$0xff] %vm692_vm13, %v9358_v22  ;;  %v3123_v21 = vmax.f32 %v3119_v42, 0.0  ;;  %3218 = vrot.lane.b32.xlu0 %v9333_v61, %s11391_s21  ;;  %3206 = vrot.lane.b32.xlu1 %v9333_v61, %s11392_s9 }
 0x8dc   : > { %3281 = vst.msk [vmem:[#allocation2 + $0x130] sm:$0xff] %vm692_vm13, %v3123_v21 }
 0x8de   : > { %3296 = vrot.lane.b32.xlu0 %v9333_v61, %s11393_s22  ;;  %3284 = vrot.lane.b32.xlu1 %v9333_v61, %s11360_s13 }
 0x8e2   : > { %3180 = vrot.lane.b32.xlu0 %v9333_v61, %s11358_s15  ;;  %3168 = vrot.lane.b32.xlu1 %v9333_v61, %s11345_s7 }
 0x8e6   : > { %3142 = vrot.lane.b32.xlu0 %v9333_v61, %s11354_s8  ;;  %3130 = vrot.lane.b32.xlu1 %v9333_v61, %s11347_s25 }
 0x8ea   : > { %3368 = vrot.lane.b32.xlu0 %v9342_v63, %s11368_s17  ;;  %3356 = vrot.lane.b32.xlu1 %v9342_v63, %s11366_s26 }
 0x8ee   : > { %3253 = vrot.lane.b32.xlu0 %v9342_v63, %s11364_s29  ;;  %3241 = vrot.lane.b32.xlu1 %v9342_v63, %s11362_s20 }
 0x8f2   : > { %3331 = vrot.lane.b32.xlu0 %v9342_v63, %s11389_s16  ;;  %3319 = vrot.lane.b32.xlu1 %v9342_v63, %s11390_s6 }
 0x8f6   : > { %3216 = vrot.lane.b32.xlu0 %v9342_v63, %s11391_s21  ;;  %3204 = vrot.lane.b32.xlu1 %v9342_v63, %s11392_s9 }
 0x8fa   : > { %3294 = vrot.lane.b32.xlu0 %v9342_v63, %s11393_s22  ;;  %3282 = vrot.lane.b32.xlu1 %v9342_v63, %s11360_s13 }
 0x8fe   : > { %3178 = vrot.lane.b32.xlu0 %v9342_v63, %s11358_s15  ;;  %3166 = vrot.lane.b32.xlu1 %v9342_v63, %s11345_s7 }
 0x902   : > { %3374 = vrot.lane.b32.xlu0 %v3123_v21, %s11368_s17  ;;  %3362 = vrot.lane.b32.xlu1 %v3123_v21, %s11366_s26 }
 0x906   : > { %3259 = vrot.lane.b32.xlu0 %v3123_v21, %s11364_s29  ;;  %3247 = vrot.lane.b32.xlu1 %v3123_v21, %s11362_s20 }
 0x90a   : > { %3337 = vrot.lane.b32.xlu0 %v3123_v21, %s11389_s16  ;;  %3325 = vrot.lane.b32.xlu1 %v3123_v21, %s11390_s6 }
 0x90e   : > { %3222 = vrot.lane.b32.xlu0 %v3123_v21, %s11391_s21  ;;  %3210 = vrot.lane.b32.xlu1 %v3123_v21, %s11392_s9 }
 0x912   : > { %3300 = vrot.lane.b32.xlu0 %v3123_v21, %s11393_s22  ;;  %3288 = vrot.lane.b32.xlu1 %v3123_v21, %s11360_s13 }
 0x916   : > { %3184 = vrot.lane.b32.xlu0 %v3123_v21, %s11358_s15  ;;  %3172 = vrot.lane.b32.xlu1 %v3123_v21, %s11345_s7 }
 0x91a   : > { %3146 = vrot.lane.b32.xlu0 %v3123_v21, %s11354_s8  ;;  %3134 = vrot.lane.b32.xlu1 %v3123_v21, %s11347_s25 }
 0x91e   : > { %3372 = vrot.lane.b32.xlu0 %v9358_v22, %s11368_s17  ;;  %3360 = vrot.lane.b32.xlu1 %v9358_v22, %s11366_s26 }
 0x922   : > { %3257 = vrot.lane.b32.xlu0 %v9358_v22, %s11364_s29  ;;  %3245 = vrot.lane.b32.xlu1 %v9358_v22, %s11362_s20 }
 0x926   : > { %3335 = vrot.lane.b32.xlu0 %v9358_v22, %s11389_s16  ;;  %3323 = vrot.lane.b32.xlu1 %v9358_v22, %s11390_s6 }
 0x92a   : > { %3220 = vrot.lane.b32.xlu0 %v9358_v22, %s11391_s21  ;;  %3208 = vrot.lane.b32.xlu1 %v9358_v22, %s11392_s9 }
 0x92e   : > { %3298 = vrot.lane.b32.xlu0 %v9358_v22, %s11393_s22  ;;  %3286 = vrot.lane.b32.xlu1 %v9358_v22, %s11360_s13 }
 0x932   : > { %3182 = vrot.lane.b32.xlu0 %v9358_v22, %s11358_s15  ;;  %3170 = vrot.lane.b32.xlu1 %v9358_v22, %s11345_s7  ;;  %s11407_s7 = smov 11  }
 0x936   : > { %3140 = vrot.lane.b32.xlu0 %v9342_v63, %s11354_s8  ;;  %3128 = vrot.lane.b32.xlu1 %v9342_v63, %s11347_s25 }
 0x93a   : > { %3144 = vrot.lane.b32.xlu0 %v9358_v22, %s11354_s8  ;;  %3132 = vrot.lane.b32.xlu1 %v9358_v22, %s11347_s25  ;;  %s11408_s25 = smov 123   ;;  %s11423_s8 = smov 4  }
 0x93e   : > { %3412 = vrot.lane.b32.xlu0 %v3123_v21, %s11352_s23  ;;  %3400 = vrot.lane.b32.xlu1 %v3123_v21, %s11349_s27 }
 0x940   : > { %v3359_v0 = vpop.permute.xlu1 %3358  ;;  %v3371_v13 = vpop.permute.xlu0 %3370 }
 0x941   : > { %v3382_v24 = vsel %vm3380_vm11, %v3359_v0, %v3371_v13 }
 0x942   : > { %v3387_v25 = vmul.f32 %v9455_v6, %v3382_v24  ;;  %3408 = vrot.lane.b32.xlu0 %v9333_v61, %s11352_s23  ;;  %3396 = vrot.lane.b32.xlu1 %v9333_v61, %s11349_s27 }
 0x944   : > { %3391 = vst.msk [vmem:[#allocation2 + $0x1d0] sm:$0xff] %vm692_vm13, %v3387_v25  ;;  %v3244_v28 = vpop.permute.xlu1 %3243  ;;  %v3256_v29 = vpop.permute.xlu0 %3255 }
 0x945   : > { %v3266_v7 = vsel %vm854_vm14, %v3244_v28, %v3256_v29 }
 0x946   : > { %v3271_v30 = vmul.f32 %v9469_v26, %v3266_v7  ;;  %3410 = vrot.lane.b32.xlu0 %v9358_v22, %s11352_s23  ;;  %3398 = vrot.lane.b32.xlu1 %v9358_v22, %s11349_s27 }
 0x948   : > { %3275 = vst.msk [vmem:[#allocation2 + $0xd0] sm:$0xff] %vm692_vm13, %v3271_v30  ;;  %v3322_v32 = vpop.permute.xlu1 %3321  ;;  %v3334_v36 = vpop.permute.xlu0 %3333 }
 0x949   : > { %v3344_v38 = vsel %vm11394_vm4, %v3322_v32, %v3334_v36  ;;  %vm3190_vm4 = vcmask 31744  }
 0x94a   : > { %v3349_v50 = vmul.f32 %v9481_v31, %v3344_v38  ;;  %3406 = vrot.lane.b32.xlu0 %v9342_v63, %s11352_s23  ;;  %3394 = vrot.lane.b32.xlu1 %v9342_v63, %s11349_s27  ;;  %s11421_s23 = smov 113   ;;  %s11436_s27 = smov 124  }
 0x94c   : > { %3353 = vst.msk [vmem:[#allocation2 + $0x190] sm:$0xff] %vm692_vm13, %v3349_v50  ;;  %v3207_v41 = vpop.permute.xlu1 %3206  ;;  %v3219_v43 = vpop.permute.xlu0 %3218 }
 0x94d   : > { %v3229_v44 = vsel %vm11396_vm5, %v3207_v41, %v3219_v43  ;;  %vm11397_vm5 = vcmask 105472  }
 0x94e   : > { %v3234_v55 = vmul.f32 %v9497_v39, %v3229_v44  ;;  %3747 = vperm.xlu0 %7955, %v3665_v40   ;;  %3742 = vperm.xlu1 %7956, %v3664_v8  }
 0x950   : > { %3238 = vst.msk [vmem:[#allocation2 + $0x90] sm:$0xff] %vm692_vm13, %v3234_v55  ;;  %v3285_v46 = vpop.permute.xlu1 %3284  ;;  %v3297_v47 = vpop.permute.xlu0 %3296 }
 0x951   : > { %v3307_v48 = vsel %vm719_vm1, %v3285_v46, %v3297_v47 }
 0x952   : > { %v3312_v12 = vmul.f32 %v9511_v45, %v3307_v48  ;;  %7965 = vset.pattern.permute.xlu0 %v8106_v34  ;;  %7957 = vset.pattern.permute.xlu1 %v8106_v34 }
 0x953   : > { %3767 = vperm.xlu1 %7957, %v3665_v40  }
 0x954   : > { %3316 = vst.msk [vmem:[#allocation2 + $0x150] sm:$0xff] %vm692_vm13, %v3312_v12  ;;  %v3169_v49 = vpop.permute.xlu1 %3168  ;;  %v3181_v51 = vpop.permute.xlu0 %3180 }
 0x955   : > { %v3192_v53 = vsel %vm3190_vm4, %v3169_v49, %v3181_v51 }
 0x956   : > { %v3197_v11 = vmul.f32 %v9520_v60, %v3192_v53 }
 0x957   : > { %7958 = vset.pattern.permute.xlu1 %v8105_v33 }
 0x958   : > { %3201 = vst.msk [vmem:[#allocation2 + $0x50] sm:$0xff] %vm692_vm13, %v3197_v11  ;;  %v3131_v57 = vpop.permute.xlu1 %3130  ;;  %v3143_v58 = vpop.permute.xlu0 %3142  ;;  %3737 = vperm.xlu1 %7958, %v3663_v54  }
 0x959   : > { %v3154_v59 = vsel %vm3152_vm8, %v3131_v57, %v3143_v58 }
 0x95a   : > { %v3159_v61 = vmul.f32 %v9532_v56, %v3154_v59 }
 0x95c   : > { %3163 = vst.msk [vmem:[#allocation2 + $0x10] sm:$0xff] %vm692_vm13, %v3159_v61  ;;  %v3357_v27 = vpop.permute.xlu1 %3356  ;;  %v3369_v23 = vpop.permute.xlu0 %3368  ;;  %7959 = vset.pattern.permute.xlu1 %v8106_v34 }
 0x95d   : > { %v3381_v52 = vsel %vm3380_vm11, %v3357_v27, %v3369_v23  ;;  %3763 = vperm.xlu1 %7959, %v3664_v8  }
 0x95e   : > { %v3386_v62 = vmul.f32 %v9455_v6, %v3381_v52 }
 0x960   : > { %3390 = vst.msk [vmem:[#allocation2 + $0x1c0] sm:$0xff] %vm692_vm13, %v3386_v62  ;;  %v3242_v17 = vpop.permute.xlu1 %3241  ;;  %v3254_v63 = vpop.permute.xlu0 %3253 }
 0x961   : > { %v3265_v18 = vsel %vm854_vm14, %v3242_v17, %v3254_v63  ;;  %7960 = vset.pattern.permute.xlu1 %v8105_v33 }
 0x962   : > { %v3270_v35 = vmul.f32 %v9469_v26, %v3265_v18  ;;  %3732 = vperm.xlu1 %7960, %v3662_v14  }
 0x964   : > { %3274 = vst.msk [vmem:[#allocation2 + $0xc0] sm:$0xff] %vm692_vm13, %v3270_v35  ;;  %v3320_v9 = vpop.permute.xlu1 %3319  ;;  %v3332_v19 = vpop.permute.xlu0 %3331 }
 0x965   : > { %v3343_v16 = vsel %vm11397_vm5, %v3320_v9, %v3332_v19 }
 0x966   : > { %v3348_v20 = vmul.f32 %v9481_v31, %v3343_v16  ;;  %7961 = vset.pattern.permute.xlu1 %v8106_v34 }
 0x967   : > { %3759 = vperm.xlu1 %7961, %v3663_v54  }
 0x968   : > { %3352 = vst.msk [vmem:[#allocation2 + $0x180] sm:$0xff] %vm692_vm13, %v3348_v20  ;;  %v3205_v22 = vpop.permute.xlu1 %3204  ;;  %v3217_v42 = vpop.permute.xlu0 %3216 }
 0x969   : > { %v3228_v21 = vsel %vm11398_vm2, %v3205_v22, %v3217_v42  ;;  %vm11399_vm2 = vmmov %vm11397_vm5  ;;  %vm11400_vm5 = vcmask 23552  }
 0x96a   : > { %v3233_v0 = vmul.f32 %v9497_v39, %v3228_v21 }
 0x96b   : > { %3755 = vperm.xlu1 %7961, %v3662_v14  }
 0x96c   : > { %3237 = vst.msk [vmem:[#allocation2 + $0x80] sm:$0xff] %vm692_vm13, %v3233_v0  ;;  %v3283_v13 = vpop.permute.xlu1 %3282  ;;  %v3295_v15 = vpop.permute.xlu0 %3294 }
 0x96d   : > { %v3306_v24 = vsel %vm719_vm1, %v3283_v13, %v3295_v15 }
 0x96e   : > { %v3311_v25 = vmul.f32 %v9511_v45, %v3306_v24 }
 0x96f   : > { %7962 = vset.pattern.permute.xlu1 %v8105_v33 }
 0x970   : > { %3315 = vst.msk [vmem:[#allocation2 + $0x140] sm:$0xff] %vm692_vm13, %v3311_v25  ;;  %v3167_v28 = vpop.permute.xlu1 %3166  ;;  %v3179_v29 = vpop.permute.xlu0 %3178 }
 0x971   : > { %v3191_v7 = vsel %vm3190_vm4, %v3167_v28, %v3179_v29 }
 0x972   : > { %v3196_v30 = vmul.f32 %v9520_v60, %v3191_v7 }
 0x974   : > { %3200 = vst.msk [vmem:[#allocation2 + $0x40] sm:$0xff] %vm692_vm13, %v3196_v30  ;;  %v3363_v32 = vpop.permute.xlu1 %3362  ;;  %v3375_v36 = vpop.permute.xlu0 %3374 }
 0x975   : > { %v3384_v37 = vsel %vm3380_vm11, %v3363_v32, %v3375_v36  ;;  %v3473_v36 = vld [vmem:[#allocation2 + $0x1d0] sm:$0xff] }
 0x976   : > { %v3389_v38 = vmul.f32 %v9455_v6, %v3384_v37 }
 0x978   : > { %3393 = vst.msk [vmem:[#allocation2 + $0x1f0] sm:$0xff] %vm692_vm13, %v3389_v38  ;;  %v3248_v50 = vpop.permute.xlu1 %3247  ;;  %v3260_v40 = vpop.permute.xlu0 %3259  ;;  %v3457_v38 = vld [vmem:[#allocation2 + $0xd0] sm:$0xff] }
 0x979   : > { %v3268_v41 = vsel %vm854_vm14, %v3248_v50, %v3260_v40  ;;  %v3472_v40 = vld [vmem:[#allocation2 + $0x1c0] sm:$0xff] }
 0x97a   : > { %v3273_v43 = vmul.f32 %v9469_v26, %v3268_v41  ;;  %v3456_v41 = vld [vmem:[#allocation2 + $0xc0] sm:$0xff] }
 0x97c   : > { %3277 = vst.msk [vmem:[#allocation2 + $0xf0] sm:$0xff] %vm692_vm13, %v3273_v43  ;;  %v3326_v44 = vpop.permute.xlu1 %3325  ;;  %v3338_v55 = vpop.permute.xlu0 %3337 }
 0x97d   : > { %v3346_v8 = vsel %vm11399_vm2, %v3326_v44, %v3338_v55 }
 0x97e   : > { %v3351_v46 = vmul.f32 %v9481_v31, %v3346_v8 }
 0x97f   : > { %v3475_v47 = vld [vmem:[#allocation2 + $0x1f0] sm:$0xff] }
 0x980   : > { %3355 = vst.msk [vmem:[#allocation2 + $0x1b0] sm:$0xff] %vm692_vm13, %v3351_v46  ;;  %v3211_v48 = vpop.permute.xlu1 %3210  ;;  %7506 = vmatprep.subr.mxu1 %v3475_v47  ;;  %v3223_v12 = vpop.permute.xlu0 %3222 }
 0x981   : > { %v3231_v49 = vsel %vm11400_vm5, %v3211_v48, %v3223_v12 }
 0x982   : > { %v3236_v51 = vmul.f32 %v9497_v39, %v3231_v49 }
 0x983   : > { %v3459_v53 = vld [vmem:[#allocation2 + $0xf0] sm:$0xff] }
 0x984   : > { %3240 = vst.msk [vmem:[#allocation2 + $0xb0] sm:$0xff] %vm692_vm13, %v3236_v51  ;;  %v3289_v11 = vpop.permute.xlu1 %3288  ;;  %7507 = vmatpush3.msra.mxu1 %v3459_v53  ;;  %v3301_v54 = vpop.permute.xlu0 %3300  ;;  %v3469_v53 = vld [vmem:[#allocation2 + $0x190] sm:$0xff] }
 0x985   : > { %v3309_v57 = vsel %vm719_vm1, %v3289_v11, %v3301_v54  ;;  %v3453_v54 = vld [vmem:[#allocation2 + $0x90] sm:$0xff] }
 0x986   : > { %v3314_v58 = vmul.f32 %v9511_v45, %v3309_v57 }
 0x987   : > { %v3471_v55 = vld [vmem:[#allocation2 + $0x1b0] sm:$0xff] }
 0x988   : > { %3318 = vst.msk [vmem:[#allocation2 + $0x170] sm:$0xff] %vm692_vm13, %v3314_v58  ;;  %v3173_v59 = vpop.permute.xlu1 %3172  ;;  %v3185_v61 = vpop.permute.xlu0 %3184  ;;  %v3468_v58 = vld [vmem:[#allocation2 + $0x180] sm:$0xff] }
 0x989   : > { %v3194_v27 = vsel %vm3190_vm4, %v3173_v59, %v3185_v61  ;;  %v3452_v59 = vld [vmem:[#allocation2 + $0x80] sm:$0xff] }
 0x98a   : > { %v3199_v23 = vmul.f32 %v9520_v60, %v3194_v27 }
 0x98b   : > { %v3455_v46 = vld [vmem:[#allocation2 + $0xb0] sm:$0xff] }
 0x98c   : > { %3203 = vst.msk [vmem:[#allocation2 + $0x70] sm:$0xff] %vm692_vm13, %v3199_v23  ;;  %v3135_v52 = vpop.permute.xlu1 %3134  ;;  %v3147_v62 = vpop.permute.xlu0 %3146 }
 0x98d   : > { %v3156_v17 = vsel %vm3152_vm8, %v3135_v52, %v3147_v62 }
 0x98e   : > { %v3161_v63 = vmul.f32 %v9532_v56, %v3156_v17 }
 0x98f   : > { %v3467_v23 = vld [vmem:[#allocation2 + $0x170] sm:$0xff] }
 0x990   : > { %3165 = vst.msk [vmem:[#allocation2 + $0x30] sm:$0xff] %vm692_vm13, %v3161_v63  ;;  %v3361_v14 = vpop.permute.xlu1 %3360  ;;  %v3373_v18 = vpop.permute.xlu0 %3372 }
 0x991   : > { %v3383_v35 = vsel %vm3380_vm11, %v3361_v14, %v3373_v18  ;;  %v9611_v18 = vld [vmem:[%s11284_s3 + $0xc0] ss:$0 sm:$0xff] }
 0x992   : > { %v3388_v9 = vmul.f32 %v9455_v6, %v3383_v35 }
 0x993   : > { %v3451_v62 = vld [vmem:[#allocation2 + $0x70] sm:$0xff] }
 0x994   : > { %3392 = vst.msk [vmem:[#allocation2 + $0x1e0] sm:$0xff] %vm692_vm13, %v3388_v9  ;;  %v3246_v19 = vpop.permute.xlu1 %3245  ;;  %v3258_v16 = vpop.permute.xlu0 %3257 }
 0x995   : > { %v3267_v20 = vsel %vm854_vm14, %v3246_v19, %v3258_v16  ;;  %v3465_v19 = vld [vmem:[#allocation2 + $0x150] sm:$0xff] }
 0x996   : > { %v3272_v22 = vmul.f32 %v9469_v26, %v3267_v20 }
 0x998   : > { %3276 = vst.msk [vmem:[#allocation2 + $0xe0] sm:$0xff] %vm692_vm13, %v3272_v22  ;;  %v3324_v42 = vpop.permute.xlu1 %3323  ;;  %v3336_v21 = vpop.permute.xlu0 %3335  ;;  %v3464_v22 = vld [vmem:[#allocation2 + $0x140] sm:$0xff] }
 0x999   : > { %v3345_v0 = vsel %vm11399_vm2, %v3324_v42, %v3336_v21  ;;  %vm3418_vm2 = vcmask 89088   ;;  %v3448_v42 = vld [vmem:[#allocation2 + $0x40] sm:$0xff] }
 0x99a   : > { %v3350_v13 = vmul.f32 %v9481_v31, %v3345_v0 }
 0x99b   : > { %v3474_v15 = vld [vmem:[#allocation2 + $0x1e0] sm:$0xff] }
 0x99c   : > { %3354 = vst.msk [vmem:[#allocation2 + $0x1a0] sm:$0xff] %vm692_vm13, %v3350_v13  ;;  %v3209_v24 = vpop.permute.xlu1 %3208  ;;  %7508 = vmatprep.subr.mxu1 %v3474_v15  ;;  %v3221_v25 = vpop.permute.xlu0 %3220  ;;  %v3463_v13 = vld [vmem:[#allocation2 + $0x130] sm:$0xff] }
 0x99d   : > { %v3230_v28 = vsel %vm11400_vm5, %v3209_v24, %v3221_v25  ;;  %v3447_v24 = vld [vmem:[#allocation2 + $0x30] sm:$0xff]  ;;  %vm11401_vm5 = vcmask 261120  }
 0x99e   : > { %v3235_v29 = vmul.f32 %v9497_v39, %v3230_v28  ;;  %v3462_v28 = vld [vmem:[#allocation2 + $0x120] sm:$0xff]  ;;  %vm11402_vm12 = vmmov %vm11401_vm5 }
 0x99f   : > { %v3458_v7 = vld [vmem:[#allocation2 + $0xe0] sm:$0xff]  ;;  %vm11403_vm9 = vmmov %vm11401_vm5 }
 0x9a0   : > { %3239 = vst.msk [vmem:[#allocation2 + $0xa0] sm:$0xff] %vm692_vm13, %v3235_v29  ;;  %v3287_v30 = vpop.permute.xlu1 %3286  ;;  %7509 = vmatpush3.msra.mxu1 %v3458_v7  ;;  %v3299_v32 = vpop.permute.xlu0 %3298 }
 0x9a1   : > { %v3308_v37 = vsel %vm719_vm1, %v3287_v30, %v3299_v32  ;;  %7510 = vmatprep.subr.mxu1 %v3473_v36  ;;  %v3461_v32 = vld [vmem:[#allocation2 + $0x110] sm:$0xff] }
 0x9a2   : > { %v3313_v50 = vmul.f32 %v9511_v45, %v3308_v37  ;;  %7511 = vmatpush3.msra.mxu1 %v3457_v38  ;;  %v3445_v37 = vld [vmem:[#allocation2 + $0x10] sm:$0xff] }
 0x9a3   : > { %7512 = vmatprep.subr.mxu1 %v3472_v40  ;;  %v3470_v48 = vld [vmem:[#allocation2 + $0x1a0] sm:$0xff] }
 0x9a4   : > { %3317 = vst.msk [vmem:[#allocation2 + $0x160] sm:$0xff] %vm692_vm13, %v3313_v50  ;;  %v3171_v43 = vpop.permute.xlu1 %3170  ;;  %7513 = vmatpush3.msra.mxu1 %v3456_v41  ;;  %v3183_v44 = vpop.permute.xlu0 %3182  ;;  %v3460_v50 = vld [vmem:[#allocation2 + $0x100] sm:$0xff] }
 0x9a5   : > { %v3193_v8 = vsel %vm3190_vm4, %v3171_v43, %v3183_v44  ;;  %7514 = vmatprep.subr.mxu1 %v3471_v55  ;;  %v3432_v40 = vld [vmem:[%s11282_s1 + $0xe0] sm:$0xff]  ;;  %v3436_v44 = vld [vmem:[%s11282_s1 + $0x108] sm:$0xff] }
 0x9a6   : > { %v3198_v47 = vmul.f32 %v9520_v60, %v3193_v8  ;;  %7515 = vmatpush3.msra.mxu1 %v3455_v46 }
 0x9a7   : > { %7516 = vmatprep.subr.mxu1 %v3470_v48  ;;  %v3454_v12 = vld [vmem:[#allocation2 + $0xa0] sm:$0xff] }
 0x9a8   : > { %3202 = vst.msk [vmem:[#allocation2 + $0x60] sm:$0xff] %vm692_vm13, %v3198_v47  ;;  %v3129_v49 = vpop.permute.xlu1 %3128  ;;  %7517 = vmatpush3.msra.mxu1 %v3454_v12  ;;  %v3141_v51 = vpop.permute.xlu0 %3140  ;;  %v3435_v48 = vld [vmem:[%s11282_s1 + $0x100] sm:$0xff]  ;;  %v3439_v12 = vld [vmem:[%s11282_s1 + $0x128] sm:$0xff] }
 0x9a9   : > { %v3153_v11 = vsel %vm3152_vm8, %v3129_v49, %v3141_v51  ;;  %7518 = vmatprep.subr.mxu1 %v3469_v53  ;;  %v3438_v49 = vld [vmem:[%s11282_s1 + $0x120] sm:$0xff]  ;;  %v3442_v53 = vld [vmem:[%s11282_s1 + $0x148] sm:$0xff] }
 0x9aa   : > { %v3158_v57 = vmul.f32 %v9532_v56, %v3153_v11  ;;  %7519 = vmatpush3.msra.mxu1 %v3453_v54  ;;  %v3441_v54 = vld [vmem:[%s11282_s1 + $0x140] sm:$0xff] }
 0x9ab   : > { %7520 = vmatprep.subr.mxu1 %v3468_v58  ;;  %v3466_v63 = vld [vmem:[#allocation2 + $0x160] sm:$0xff]  ;;  %v3437_v58 = vld [vmem:[%s11282_s1 + $0x110] sm:$0xff] }
 0x9ac   : > { %3162 = vst.msk [vmem:[#allocation2] sm:$0xff] %vm692_vm13, %v3158_v57  ;;  %v3133_v61 = vpop.permute.xlu1 %3132  ;;  %7521 = vmatpush3.msra.mxu1 %v3452_v59  ;;  %v3145_v27 = vpop.permute.xlu0 %3144  ;;  %v3440_v59 = vld [vmem:[%s11282_s1 + $0x130] sm:$0xff] }
 0x9ad   : > { %v3155_v52 = vsel %vm3152_vm8, %v3133_v61, %v3145_v27  ;;  %7522 = vmatprep.subr.mxu1 %v3467_v23  ;;  %v3443_v61 = vld [vmem:[%s11282_s1 + $0x150] sm:$0xff] }
 0x9ae   : > { %v3160_v17 = vmul.f32 %v9532_v56, %v3155_v52  ;;  %7523 = vmatpush3.msra.mxu1 %v3451_v62  ;;  %v3449_v56 = vld [vmem:[#allocation2 + $0x50] sm:$0xff] }
 0x9af   : > { %7524 = vmatprep.subr.mxu1 %v3466_v63  ;;  %v3450_v14 = vld [vmem:[#allocation2 + $0x60] sm:$0xff] }
 0x9b0   : > { %3164 = vst.msk [vmem:[#allocation2 + $0x20] sm:$0xff] %vm692_vm13, %v3160_v17  ;;  %v3401_v35 = vpop.permute.xlu1 %3400  ;;  %7525 = vmatpush3.msra.mxu1 %v3450_v14  ;;  %v3413_v9 = vpop.permute.xlu0 %3412 }
 0x9b1   : > { %v3422_v16 = vsel %vm3418_vm2, %v3401_v35, %v3413_v9  ;;  %7526 = vmatprep.subr.mxu1 %v3465_v19 }
 0x9b2   : > { %v3427_v20 = vmul.f32 %v9611_v18, %v3422_v16  ;;  %7527 = vmatpush3.msra.mxu1 %v3449_v56 }
 0x9b3   : > { %7528 = vmatprep.subr.mxu1 %v3464_v22  ;;  %v3444_v41 = vld [vmem:[#allocation2] sm:$0xff] }
 0x9b4   : > { %3431 = vst.msk [vmem:[#allocation2 + $0x230] sm:$0xff] %vm692_vm13, %v3427_v20  ;;  %v3397_v21 = vpop.permute.xlu1 %3396  ;;  %7529 = vmatpush3.msra.mxu1 %v3448_v42  ;;  %v3409_v0 = vpop.permute.xlu0 %3408 }
 0x9b5   : > { %v3420_v15 = vsel %vm3418_vm2, %v3397_v21, %v3409_v0  ;;  %7530 = vmatprep.subr.mxu1 %v3463_v13 }
 0x9b6   : > { %v3425_v25 = vmul.f32 %v9611_v18, %v3420_v15  ;;  %7531 = vmatpush3.msra.mxu1 %v3447_v24 }
 0x9b7   : > { %7532 = vmatprep.subr.mxu1 %v3462_v28  ;;  %v3446_v29 = vld [vmem:[#allocation2 + $0x20] sm:$0xff] }
 0x9b8   : > { %3429 = vst.msk [vmem:[#allocation2 + $0x210] sm:$0xff] %vm692_vm13, %v3425_v25  ;;  %v3399_v7 = vpop.permute.xlu1 %3398  ;;  %7533 = vmatpush3.msra.mxu1 %v3446_v29  ;;  %v3411_v30 = vpop.permute.xlu0 %3410 }
 0x9b9   : > { %v3421_v36 = vsel %vm3418_vm2, %v3399_v7, %v3411_v30  ;;  %7534 = vmatprep.subr.mxu1 %v3461_v32 }
 0x9ba   : > { %v3426_v38 = vmul.f32 %v9611_v18, %v3421_v36  ;;  %7535 = vmatpush3.msra.mxu1 %v3445_v37 }
 0x9bb   : > { %7536 = vmatprep.subr.mxu1 %v3460_v50  ;;  %v3479_v43 = vld [vmem:[#allocation2 + $0x230] sm:$0xff] }
 0x9bc   : > { %3430 = vst.msk [vmem:[#allocation2 + $0x220] sm:$0xff] %vm692_vm13, %v3426_v38  ;;  %v3395_v55 = vpop.permute.xlu1 %3394  ;;  %7537 = vmatpush3.msra.mxu1 %v3444_v41  ;;  %7768 = vmatprep.subr.mxu0 %v3479_v43  ;;  %v3407_v8 = vpop.permute.xlu0 %3406 }
 0x9bd   : > { %v3419_v46 = vsel %vm3418_vm2, %v3395_v55, %v3407_v8  ;;  %7769 = vmatpush3.msra.mxu0 %v3479_v43  ;;  %3557 = vmatmul.mubr.f32.vlgmr.msra.gmra.mxu1 %v3432_v40 }
 0x9be   : > { %v3424_v47 = vmul.f32 %v9611_v18, %v3419_v46  ;;  %3561 = vmatprep.mubr.f32.mxu1 %v3436_v44 }
 0x9bf   : > { %v3477_v11 = vld [vmem:[#allocation2 + $0x210] sm:$0xff] }
 0x9c0   : > { %3428 = vst.msk [vmem:[#allocation2 + $0x200] sm:$0xff] %vm692_vm13, %v3424_v47 }
 0x9c1   : > { %3562 = vmatmul.mubr.f32.gmra.mxu1 %v3435_v48 }
 0x9c2   : > { %3566 = vmatprep.mubr.f32.mxu1 %v3439_v12 }
 0x9c3   : > { %v3478_v51 = vld [vmem:[#allocation2 + $0x220] sm:$0xff] }
 0x9c4   : > { %7770 = vmatprep.subr.mxu0 %v3478_v51 }
 0x9c5   : > { %7771 = vmatpush3.msra.mxu0 %v3478_v51  ;;  %3567 = vmatmul.mubr.f32.gmra.mxu1 %v3438_v49 }
 0x9c6   : > { %7772 = vmatprep.subr.mxu0 %v3477_v11  ;;  %3571 = vmatprep.mubr.f32.mxu1 %v3442_v53 }
 0x9c7   : > { %7773 = vmatpush3.msra.mxu0 %v3477_v11  ;;  %v3476_v57 = vld [vmem:[#allocation2 + $0x200] sm:$0xff] }
 0x9c8   : > { %7774 = vmatprep.subr.mxu0 %v3476_v57 }
 0x9c9   : > { %7775 = vmatpush3.msra.mxu0 %v3476_v57  ;;  %3572 = vmatmul.mubr.f32.gmra.mxu1 %v3441_v54  ;;  %v3743_v43 = vpop.permute.xlu1 %3742  ;;  %v9689_v48 = vpop.permute.xlu0 %3747 }
 0x9ca   : > { %7777 = vmatmul.mubr.msk.f32.vlgmr.msra.gmra.mxu0 %vm11401_vm5, %v3437_v58 }
 0x9cb   : > { %7779 = vmatprep.mubr.msk.f32.mxu0 %vm11402_vm12, %v3440_v59  ;;  %vm11409_vm12 = vcmask 105472  }
 0x9ce   : > { %7780 = vmatmul.mubr.msk.f32.gmra.mxu0 %vm11403_vm9, %v3443_v61  ;;  %v9687_v44 = vpop.permute.xlu1 %3767  ;;  %vm11410_vm9 = vmmov %vm11401_vm5  ;;  %vm11411_vm5 = vcmask 23552  }
 0x9d3   : > { %v3738_v55 = vpop.permute.xlu1 %3737 }
 0x9d8   : > { %v3764_v8 = vpop.permute.xlu1 %3763 }
 0x9dd   : > { %v3733_v46 = vpop.permute.xlu1 %3732 }
 0x9e2   : > { %v3760_v47 = vpop.permute.xlu1 %3759 }
 0x9e6   : > { %v3756_v12 = vpop.permute.xlu1 %3755 }
 0xa7d   : > { %v7538_v27 = vpop.f32.mrf.mxu1 }
 0xa7f   : > { %v7539_v23 = vpop.f32.mrf.mxu1 }
 0xa80   : > { %v7540_v19 = vadd.f32 %v7539_v23, %v7538_v27 }
 0xa81   : > { %v7541_v52 = vpop.f32.mrf.mxu1 }
 0xa83   : > { %v7542_v62 = vpop.f32.mrf.mxu1 }
 0xa84   : > { %v7543_v63 = vadd.f32 %v7542_v62, %v7541_v52 }
 0xa85   : > { %v7544_v17 = vpop.f32.mrf.mxu1 }
 0xa87   : > { %v7545_v14 = vpop.f32.mrf.mxu1 }
 0xa88   : > { %v7546_v42 = vadd.f32 %v7545_v14, %v7544_v17 }
 0xa89   : > { %v7547_v35 = vpop.f32.mrf.mxu1 }
 0xa8a   : > { %v7778_v9 = vpop.f32.mrf.mxu0 }
 0xa8b   : > { %v9659_v16 = vadd.f32 %v7778_v9, %v7543_v63  ;;  %v7548_v56 = vpop.f32.mrf.mxu1 }
 0xa8c   : > { %v3643_v20 = vpop.f32.mrf.mxu0  ;;  %v7549_v0 = vadd.f32 %v7548_v56, %v7547_v35 }
 0xa8d   : > { %v9661_v22 = vadd.f32 %v7540_v19, %v3643_v20  ;;  %v3683_v21 = vmul.f32 %v9659_v16, %v9659_v16  ;;  %v3669_v50 = vsel %vm692_vm13, %v9659_v16, 0.0 }
 0xa8e   : > { %v7781_v13 = vpop.f32.mrf.mxu0 }
 0xa8f   : > { %v3689_v15 = vsel %vm692_vm13, %v3683_v21, 0.0  ;;  %v3666_v24 = vsel %vm692_vm13, %v9661_v22, 0.0  ;;  %v3682_v25 = vmul.f32 %v9661_v22, %v9661_v22  ;;  %v9672_v7 = vadd.f32 %v7781_v13, %v7549_v0 }
 0xa90   : > { %3690 = vadd.xlane.f32.xlu0 %v3689_v15  ;;  %v3653_v28 = vpop.f32.mrf.mxu0  ;;  %3667 = vadd.xlane.f32.xlu1 %v3666_v24 }
 0xa91   : > { %v9670_v29 = vadd.f32 %v7546_v42, %v3653_v28  ;;  %v3686_v32 = vsel %vm692_vm13, %v3682_v25, 0.0  ;;  %v3685_v38 = vmul.f32 %v9672_v7, %v9672_v7  ;;  %v3675_v40 = vsel %vm692_vm13, %v9672_v7, 0.0 }
 0xa93   : > { %v3672_v30 = vsel %vm692_vm13, %v9670_v29, 0.0  ;;  %v3684_v36 = vmul.f32 %v9670_v29, %v9670_v29  ;;  %v3695_v41 = vsel %vm692_vm13, %v3685_v38, 0.0 }
 0xa94   : > { %3673 = vadd.xlane.f32.xlu0 %v3672_v30  ;;  %3687 = vadd.xlane.f32.xlu1 %v3686_v32 }
 0xa95   : > { %v3692_v37 = vsel %vm692_vm13, %v3684_v36, 0.0 }
 0xa98   : > { %3693 = vadd.xlane.f32.xlu0 %v3692_v37  ;;  %3670 = vadd.xlane.f32.xlu1 %v3669_v50 }
 0xa9c   : > { %3676 = vadd.xlane.f32.xlu1 %v3675_v40  ;;  %3696 = vadd.xlane.f32.xlu0 %v3695_v41 }
 0xb19   : > { %v3668_v49 = vpop.xlane.xlu1 %3667  ;;  %v3691_v51 = vpop.xlane.xlu0 %3690 }
 0xb1a   : > { %v3678_v53 = vmul.f32 0.0625, %v3668_v49  ;;  %v3699_v14 = vmul.f32 0.0625, %v3691_v51 }
 0xb1c   : > { %v3702_v57 = vmul.f32 %v3678_v53, %v3678_v53  ;;  %v3714_v37 = vsub.f32 %v9661_v22, %v3678_v53 }
 0xb1d   : > { %v3688_v11 = vpop.xlane.xlu1 %3687  ;;  %v3674_v54 = vpop.xlane.xlu0 %3673 }
 0xb1e   : > { %v3698_v58 = vmul.f32 0.0625, %v3688_v11  ;;  %v3680_v59 = vmul.f32 0.0625, %v3674_v54 }
 0xb20   : > { %v3706_v61 = vsub.f32 %v3698_v58, %v3702_v57  ;;  %v3704_v27 = vmul.f32 %v3680_v59, %v3680_v59  ;;  %v3716_v41 = vsub.f32 %v9670_v29, %v3680_v59 }
 0xb21   : > { %v3671_v23 = vpop.xlane.xlu1 %3670  ;;  %v3694_v52 = vpop.xlane.xlu0 %3693 }
 0xb22   : > { %v3710_v62 = vmax.f32 %v3706_v61, 0.0  ;;  %v3679_v17 = vmul.f32 0.0625, %v3671_v23  ;;  %v3700_v63 = vmul.f32 0.0625, %v3694_v52 }
 0xb24   : > { %v3718_v35 = vadd.f32 1e-05, %v3710_v62  ;;  %v3703_v9 = vmul.f32 %v3679_v17, %v3679_v17  ;;  %v3708_v19 = vsub.f32 %v3700_v63, %v3704_v27  ;;  %v3715_v11 = vsub.f32 %v9659_v16, %v3679_v17 }
 0xb25   : > { %v3677_v56 = vpop.xlane.xlu1 %3676  ;;  %v3697_v20 = vpop.xlane.xlu0 %3696 }
 0xb26   : > { %7993 = vrsqrt.f32 %v3718_v35  ;;  %v3707_v42 = vsub.f32 %v3699_v14, %v3703_v9  ;;  %v3712_v21 = vmax.f32 %v3708_v19, 0.0  ;;  %v3681_v0 = vmul.f32 0.0625, %v3677_v56  ;;  %v4084_v9 = vld [vmem:[%s11282_s1 + $0x170] sm:$0xff] }
 0xb27   : > { %v3701_v13 = vmul.f32 0.0625, %v3697_v20  ;;  %7790 = vmatprep.mubr.msk.f32.mxu1 %vm11410_vm9, %v4084_v9  ;;  %vm11412_vm9 = vmmov %vm11411_vm5 }
 0xb28   : > { %v3711_v15 = vmax.f32 %v3707_v42, 0.0  ;;  %v3720_v24 = vadd.f32 1e-05, %v3712_v21  ;;  %v3705_v25 = vmul.f32 %v3681_v0, %v3681_v0  ;;  %v3717_v53 = vsub.f32 %v9672_v7, %v3681_v0  ;;  %v4315_v0 = vld [vmem:[%s11283_s2 + $0x70] sm:$0xff] }
 0xb2a   : > { %v3719_v28 = vadd.f32 1e-05, %v3711_v15  ;;  %7995 = vrsqrt.f32 %v3720_v24  ;;  %v3709_v30 = vsub.f32 %v3701_v13, %v3705_v25 }
 0xb2c   : > { %7997 = vrsqrt.f32 %v3719_v28  ;;  %v3713_v32 = vmax.f32 %v3709_v30, 0.0 }
 0xb2e   : > { %v3721_v36 = vadd.f32 1e-05, %v3713_v32 }
 0xb30   : > { %7999 = vrsqrt.f32 %v3721_v36 }
 0xb33   : > { %v7994_v38 = vpop.eup %7993 }
 0xb34   : > { %v3726_v50 = vmul.f32 %v7994_v38, %v3714_v37  ;;  %v4313_v37 = vld [vmem:[%s11283_s2 + $0x60] sm:$0xff] }
 0xb36   : > { %v3750_v40 = vmul.f32 %v3733_v46, %v3726_v50 }
 0xb37   : > { %v7996_v49 = vpop.eup %7995 }
 0xb38   : > { %v3770_v51 = vadd.f32 %v3756_v12, %v3750_v40  ;;  %v3728_v54 = vmul.f32 %v7996_v49, %v3716_v41  ;;  %v9885_v41 = vld [vmem:[%s11284_s3 + $0xb7] ss:$0 sm:$0xff] }
 0xb39   : > { %v7998_v57 = vpop.eup %7997 }
 0xb3a   : > { %v9694_v58 = vmax.f32 %v3770_v51, 0.0  ;;  %v3727_v61 = vmul.f32 %v7998_v57, %v3715_v11  ;;  %v3752_v27 = vmul.f32 %v3743_v43, %v3728_v54  ;;  %v9893_v57 = vld [vmem:[%s11284_s3 + $0xb3] ss:$0 sm:$0xff] }
 0xb3c   : > { %3930 = vst.msk [vmem:[#allocation2 + $0x100] sm:$0xff] %vm692_vm13, %v9694_v58  ;;  %v3751_v23 = vmul.f32 %v3738_v55, %v3727_v61  ;;  %v3772_v22 = vadd.f32 %v3764_v8, %v3752_v27  ;;  %4020 = vrot.lane.b32.xlu1 %v9694_v58, %s11368_s17  ;;  %4008 = vrot.lane.b32.xlu0 %v9694_v58, %s11366_s26 }
 0xb3d   : > { %v8000_v16 = vpop.eup %7999 }
 0xb3e   : > { %v3771_v29 = vadd.f32 %v3760_v47, %v3751_v23  ;;  %v9703_v46 = vmax.f32 %v3772_v22, 0.0  ;;  %v3729_v12 = vmul.f32 %v8000_v16, %v3717_v53  ;;  %v4083_v47 = vld [vmem:[%s11282_s1 + $0x168] sm:$0xff]  ;;  %v9902_v53 = vld [vmem:[%s11284_s3 + $0xb6] ss:$0 sm:$0xff] }
 0xb3f   : > { %4206 = vmatprep.mubr.f32.mxu0 %v4083_v47 }
 0xb40   : > { %v9705_v59 = vmax.f32 %v3771_v29, 0.0  ;;  %3932 = vst.msk [vmem:[#allocation2 + $0x120] sm:$0xff] %vm692_vm13, %v9703_v46  ;;  %v3753_v43 = vmul.f32 %v9689_v48, %v3729_v12  ;;  %3905 = vrot.lane.b32.xlu1 %v9694_v58, %s11364_s29  ;;  %3893 = vrot.lane.b32.xlu0 %v9694_v58, %s11362_s20 }
 0xb42   : > { %3931 = vst.msk [vmem:[#allocation2 + $0x110] sm:$0xff] %vm692_vm13, %v9705_v59  ;;  %v3773_v7 = vadd.f32 %v9687_v44, %v3753_v43 }
 0xb44   : > { %v9717_v55 = vmax.f32 %v3773_v7, 0.0  ;;  %3983 = vrot.lane.b32.xlu1 %v9694_v58, %s11389_s16  ;;  %3971 = vrot.lane.b32.xlu0 %v9694_v58, %s11390_s6  ;;  %v9910_v7 = vld [vmem:[%s11284_s3 + $0xb2] ss:$0 sm:$0xff] }
 0xb46   : > { %3933 = vst.msk [vmem:[#allocation2 + $0x130] sm:$0xff] %vm692_vm13, %v9717_v55 }
 0xb48   : > { %3868 = vrot.lane.b32.xlu1 %v9694_v58, %s11391_s21  ;;  %3856 = vrot.lane.b32.xlu0 %v9694_v58, %s11392_s9 }
 0xb4c   : > { %3946 = vrot.lane.b32.xlu1 %v9694_v58, %s11393_s22  ;;  %3934 = vrot.lane.b32.xlu0 %v9694_v58, %s11360_s13 }
 0xb50   : > { %3831 = vrot.lane.b32.xlu1 %v9694_v58, %s11358_s15  ;;  %3819 = vrot.lane.b32.xlu0 %v9694_v58, %s11404_s30 }
 0xb54   : > { %4022 = vrot.lane.b32.xlu1 %v9705_v59, %s11368_s17  ;;  %4010 = vrot.lane.b32.xlu0 %v9705_v59, %s11366_s26 }
 0xb58   : > { %3907 = vrot.lane.b32.xlu1 %v9705_v59, %s11364_s29  ;;  %3895 = vrot.lane.b32.xlu0 %v9705_v59, %s11362_s20 }
 0xb5c   : > { %3985 = vrot.lane.b32.xlu1 %v9705_v59, %s11389_s16  ;;  %3973 = vrot.lane.b32.xlu0 %v9705_v59, %s11390_s6 }
 0xb60   : > { %3870 = vrot.lane.b32.xlu1 %v9705_v59, %s11391_s21  ;;  %3858 = vrot.lane.b32.xlu0 %v9705_v59, %s11392_s9 }
 0xb64   : > { %3948 = vrot.lane.b32.xlu1 %v9705_v59, %s11393_s22  ;;  %3936 = vrot.lane.b32.xlu0 %v9705_v59, %s11360_s13 }
 0xb68   : > { %3833 = vrot.lane.b32.xlu1 %v9705_v59, %s11358_s15  ;;  %3821 = vrot.lane.b32.xlu0 %v9705_v59, %s11404_s30 }
 0xb6c   : > { %4024 = vrot.lane.b32.xlu1 %v9703_v46, %s11368_s17  ;;  %4012 = vrot.lane.b32.xlu0 %v9703_v46, %s11366_s26 }
 0xb70   : > { %3909 = vrot.lane.b32.xlu1 %v9703_v46, %s11364_s29  ;;  %3897 = vrot.lane.b32.xlu0 %v9703_v46, %s11362_s20 }
 0xb74   : > { %3987 = vrot.lane.b32.xlu1 %v9703_v46, %s11389_s16  ;;  %3975 = vrot.lane.b32.xlu0 %v9703_v46, %s11390_s6 }
 0xb78   : > { %3872 = vrot.lane.b32.xlu1 %v9703_v46, %s11391_s21  ;;  %3860 = vrot.lane.b32.xlu0 %v9703_v46, %s11392_s9 }
 0xb7c   : > { %3950 = vrot.lane.b32.xlu1 %v9703_v46, %s11393_s22  ;;  %3938 = vrot.lane.b32.xlu0 %v9703_v46, %s11360_s13 }
 0xb80   : > { %3835 = vrot.lane.b32.xlu1 %v9703_v46, %s11358_s15  ;;  %3823 = vrot.lane.b32.xlu0 %v9703_v46, %s11404_s30 }
 0xb84   : > { %3798 = vrot.lane.b32.xlu1 %v9703_v46, %s11405_s14  ;;  %3786 = vrot.lane.b32.xlu0 %v9703_v46, %s11406_s24 }
 0xb88   : > { %4026 = vrot.lane.b32.xlu1 %v9717_v55, %s11368_s17  ;;  %4014 = vrot.lane.b32.xlu0 %v9717_v55, %s11366_s26 }
 0xb8c   : > { %3911 = vrot.lane.b32.xlu1 %v9717_v55, %s11364_s29  ;;  %3899 = vrot.lane.b32.xlu0 %v9717_v55, %s11362_s20  ;;  %s11420_s29 = smov 1  }
 0xb90   : > { %3989 = vrot.lane.b32.xlu1 %v9717_v55, %s11389_s16  ;;  %3977 = vrot.lane.b32.xlu0 %v9717_v55, %s11390_s6 }
 0xb94   : > { %3874 = vrot.lane.b32.xlu1 %v9717_v55, %s11391_s21  ;;  %3862 = vrot.lane.b32.xlu0 %v9717_v55, %s11392_s9 }
 0xb98   : > { %3952 = vrot.lane.b32.xlu1 %v9717_v55, %s11393_s22  ;;  %3940 = vrot.lane.b32.xlu0 %v9717_v55, %s11360_s13  ;;  %s11452_s13 = smov 121  }
 0xb9c   : > { %3837 = vrot.lane.b32.xlu1 %v9717_v55, %s11358_s15  ;;  %3825 = vrot.lane.b32.xlu0 %v9717_v55, %s11404_s30  ;;  %s11422_s15 = smov 127  }
 0xba0   : > { %3796 = vrot.lane.b32.xlu1 %v9705_v59, %s11405_s14  ;;  %3784 = vrot.lane.b32.xlu0 %v9705_v59, %s11406_s24 }
 0xba4   : > { %3800 = vrot.lane.b32.xlu1 %v9717_v55, %s11405_s14  ;;  %3788 = vrot.lane.b32.xlu0 %v9717_v55, %s11406_s24 }
 0xba8   : > { %3794 = vrot.lane.b32.xlu1 %v9694_v58, %s11405_s14  ;;  %3782 = vrot.lane.b32.xlu0 %v9694_v58, %s11406_s24 }
 0xbac   : > { %4061 = vrot.lane.b32.xlu1 %v9703_v46, %s11407_s7  ;;  %4049 = vrot.lane.b32.xlu0 %v9703_v46, %s11408_s25 }
 0xbae   : > { %v4021_v44 = vpop.permute.xlu1 %4020  ;;  %v4009_v8 = vpop.permute.xlu0 %4008 }
 0xbaf   : > { %v4032_v48 = vsel %vm3380_vm11, %v4009_v8, %v4021_v44 }
 0xbb0   : > { %v4037_v52 = vmul.f32 %v4032_v48, %v9455_v6  ;;  %4063 = vrot.lane.b32.xlu1 %v9717_v55, %s11407_s7  ;;  %4051 = vrot.lane.b32.xlu0 %v9717_v55, %s11408_s25 }
 0xbb2   : > { %4041 = vst.msk [vmem:[#allocation2 + $0x1c0] sm:$0xff] %vm692_vm13, %v4037_v52  ;;  %v3906_v62 = vpop.permute.xlu1 %3905  ;;  %v3894_v17 = vpop.permute.xlu0 %3893 }
 0xbb3   : > { %v3917_v63 = vsel %vm854_vm14, %v3894_v17, %v3906_v62 }
 0xbb4   : > { %v3922_v14 = vmul.f32 %v3917_v63, %v9469_v26  ;;  %4059 = vrot.lane.b32.xlu1 %v9705_v59, %s11407_s7  ;;  %4047 = vrot.lane.b32.xlu0 %v9705_v59, %s11408_s25 }
 0xbb6   : > { %3926 = vst.msk [vmem:[#allocation2 + $0xc0] sm:$0xff] %vm692_vm13, %v3922_v14  ;;  %v3984_v6 = vpop.permute.xlu1 %3983  ;;  %v3972_v35 = vpop.permute.xlu0 %3971 }
 0xbb7   : > { %v3995_v19 = vsel %vm11409_vm12, %v3972_v35, %v3984_v6 }
 0xbb8   : > { %v4000_v26 = vmul.f32 %v3995_v19, %v9481_v31  ;;  %4057 = vrot.lane.b32.xlu1 %v9694_v58, %s11407_s7  ;;  %4045 = vrot.lane.b32.xlu0 %v9694_v58, %s11408_s25  ;;  %v4314_v31 = vld [vmem:[%s11283_s2 + $0x68] sm:$0xff] }
 0xbba   : > { %4004 = vst.msk [vmem:[#allocation2 + $0x180] sm:$0xff] %vm692_vm13, %v4000_v26  ;;  %v3869_v56 = vpop.permute.xlu1 %3868  ;;  %v3857_v20 = vpop.permute.xlu0 %3856 }
 0xbbb   : > { %v3880_v42 = vsel %vm11411_vm5, %v3857_v20, %v3869_v56  ;;  %vm11413_vm5 = vmmov %vm11409_vm12 }
 0xbbc   : > { %v3885_v21 = vmul.f32 %v3880_v42, %v9497_v39  ;;  %4397 = vperm.xlu1 %7962, %v4315_v0   ;;  %4413 = vperm.xlu0 %7965, %v4314_v31   ;;  %v4312_v39 = vld [vmem:[%s11283_s2 + $0x58] sm:$0xff] }
 0xbbe   : > { %3889 = vst.msk [vmem:[#allocation2 + $0x80] sm:$0xff] %vm692_vm13, %v3885_v21  ;;  %v3947_v13 = vpop.permute.xlu1 %3946  ;;  %v3935_v15 = vpop.permute.xlu0 %3934 }
 0xbbf   : > { %v3958_v24 = vsel %vm719_vm1, %v3935_v15, %v3947_v13 }
 0xbc0   : > { %v3963_v25 = vmul.f32 %v3958_v24, %v9511_v45  ;;  %7963 = vset.pattern.permute.xlu1 %v8106_v34  ;;  %4405 = vperm.xlu0 %7965, %v4312_v39  }
 0xbc1   : > { %4417 = vperm.xlu1 %7963, %v4315_v0  }
 0xbc2   : > { %3967 = vst.msk [vmem:[#allocation2 + $0x140] sm:$0xff] %vm692_vm13, %v3963_v25  ;;  %v3832_v28 = vpop.permute.xlu1 %3831  ;;  %v3820_v30 = vpop.permute.xlu0 %3819 }
 0xbc3   : > { %v3843_v32 = vsel %vm3190_vm4, %v3820_v30, %v3832_v28  ;;  %v8039_v30 = vld [vmem:[%s11284_s3 + $0xb5] ss:$0 sm:$0xff] }
 0xbc4   : > { %v3848_v36 = vmul.f32 %v3843_v32, %v9520_v60  ;;  %7967 = vset.pattern.permute.xlu0 %v8105_v33 }
 0xbc5   : > { %7964 = vset.pattern.permute.xlu1 %v8105_v33  ;;  %4392 = vperm.xlu0 %7967, %v4314_v31  }
 0xbc6   : > { %3852 = vst.msk [vmem:[#allocation2 + $0x40] sm:$0xff] %vm692_vm13, %v3848_v36  ;;  %v4023_v38 = vpop.permute.xlu1 %4022  ;;  %v4011_v50 = vpop.permute.xlu0 %4010  ;;  %4387 = vperm.xlu1 %7964, %v4313_v37  }
 0xbc7   : > { %v4033_v40 = vsel %vm3380_vm11, %v4011_v50, %v4023_v38  ;;  %v8040_v50 = vld [vmem:[%s11284_s3 + $0xb1] ss:$0 sm:$0xff] }
 0xbc8   : > { %v4038_v49 = vmul.f32 %v9885_v41, %v4033_v40 }
 0xbca   : > { %4042 = vst.msk [vmem:[#allocation2 + $0x1d0] sm:$0xff] %vm692_vm13, %v4038_v49  ;;  %v3908_v51 = vpop.permute.xlu1 %3907  ;;  %v3896_v11 = vpop.permute.xlu0 %3895  ;;  %4382 = vperm.xlu1 %7964, %v4312_v39   ;;  %v9945_v49 = vld [vmem:[%s11284_s3 + $0xb0] ss:$0 sm:$0xff] }
 0xbcb   : > { %v3918_v54 = vsel %vm854_vm14, %v3896_v11, %v3908_v51 }
 0xbcc   : > { %v3923_v61 = vmul.f32 %v9893_v57, %v3918_v54 }
 0xbce   : > { %3927 = vst.msk [vmem:[#allocation2 + $0xd0] sm:$0xff] %vm692_vm13, %v3923_v61  ;;  %v3986_v27 = vpop.permute.xlu1 %3985  ;;  %v3974_v23 = vpop.permute.xlu0 %3973  ;;  %7966 = vset.pattern.permute.xlu1 %v8106_v34 }
 0xbcf   : > { %v3996_v22 = vsel %vm11409_vm12, %v3974_v23, %v3986_v27  ;;  %4409 = vperm.xlu1 %7966, %v4313_v37   ;;  %vm11414_vm12 = vmmov %vm11412_vm9 }
 0xbd0   : > { %v4001_v16 = vmul.f32 %v9902_v53, %v3996_v22 }
 0xbd2   : > { %4005 = vst.msk [vmem:[#allocation2 + $0x190] sm:$0xff] %vm692_vm13, %v4001_v16  ;;  %v3871_v29 = vpop.permute.xlu1 %3870  ;;  %v3859_v12 = vpop.permute.xlu0 %3858 }
 0xbd3   : > { %v3881_v43 = vsel %vm11412_vm9, %v3859_v12, %v3871_v29  ;;  %7968 = vset.pattern.permute.xlu1 %v8105_v33  ;;  %vm11415_vm9 = vmmov %vm11413_vm5 }
 0xbd4   : > { %v3886_v44 = vmul.f32 %v9910_v7, %v3881_v43 }
 0xbd6   : > { %3890 = vst.msk [vmem:[#allocation2 + $0x90] sm:$0xff] %vm692_vm13, %v3886_v44  ;;  %v3949_v8 = vpop.permute.xlu1 %3948  ;;  %v3937_v47 = vpop.permute.xlu0 %3936 }
 0xbd7   : > { %v3959_v48 = vsel %vm719_vm1, %v3937_v47, %v3949_v8 }
 0xbd8   : > { %v3964_v52 = vmul.f32 %v3959_v48, %v9511_v45 }
 0xbda   : > { %3968 = vst.msk [vmem:[#allocation2 + $0x150] sm:$0xff] %vm692_vm13, %v3964_v52  ;;  %v3834_v62 = vpop.permute.xlu1 %3833  ;;  %v3822_v17 = vpop.permute.xlu0 %3821 }
 0xbdb   : > { %v3844_v63 = vsel %vm3190_vm4, %v3822_v17, %v3834_v62 }
 0xbdc   : > { %v3849_v14 = vmul.f32 %v3844_v63, %v9520_v60 }
 0xbde   : > { %3853 = vst.msk [vmem:[#allocation2 + $0x50] sm:$0xff] %vm692_vm13, %v3849_v14  ;;  %v4025_v6 = vpop.permute.xlu1 %4024  ;;  %v4013_v35 = vpop.permute.xlu0 %4012 }
 0xbdf   : > { %v4034_v9 = vsel %vm3380_vm11, %v4013_v35, %v4025_v6 }
 0xbe0   : > { %v4039_v19 = vmul.f32 %v9885_v41, %v4034_v9 }
 0xbe2   : > { %4043 = vst.msk [vmem:[#allocation2 + $0x1e0] sm:$0xff] %vm692_vm13, %v4039_v19  ;;  %v3910_v26 = vpop.permute.xlu1 %3909  ;;  %v3898_v45 = vpop.permute.xlu0 %3897 }
 0xbe3   : > { %v3919_v56 = vsel %vm854_vm14, %v3898_v45, %v3910_v26  ;;  %v4123_v45 = vld [vmem:[#allocation2 + $0x1d0] sm:$0xff] }
 0xbe4   : > { %v3924_v20 = vmul.f32 %v9893_v57, %v3919_v56  ;;  %v4107_v56 = vld [vmem:[#allocation2 + $0xd0] sm:$0xff] }
 0xbe6   : > { %3928 = vst.msk [vmem:[#allocation2 + $0xe0] sm:$0xff] %vm692_vm13, %v3924_v20  ;;  %v3988_v42 = vpop.permute.xlu1 %3987  ;;  %v3976_v60 = vpop.permute.xlu0 %3975 }
 0xbe7   : > { %v3997_v21 = vsel %vm11413_vm5, %v3976_v60, %v3988_v42  ;;  %vm11416_vm5 = vmmov %vm11414_vm12  ;;  %v4122_v42 = vld [vmem:[#allocation2 + $0x1c0] sm:$0xff] }
 0xbe8   : > { %v4002_v0 = vmul.f32 %v9902_v53, %v3997_v21  ;;  %v4106_v21 = vld [vmem:[#allocation2 + $0xc0] sm:$0xff] }
 0xbe9   : > { %v4124_v9 = vld [vmem:[#allocation2 + $0x1e0] sm:$0xff] }
 0xbea   : > { %4006 = vst.msk [vmem:[#allocation2 + $0x1a0] sm:$0xff] %vm692_vm13, %v4002_v0  ;;  %v3873_v31 = vpop.permute.xlu1 %3872  ;;  %v3861_v13 = vpop.permute.xlu0 %3860 }
 0xbeb   : > { %v3882_v15 = vsel %vm11414_vm12, %v3861_v13, %v3873_v31  ;;  %vm11417_vm12 = vcmask 261120  }
 0xbec   : > { %v3887_v24 = vmul.f32 %v9910_v7, %v3882_v15 }
 0xbee   : > { %3891 = vst.msk [vmem:[#allocation2 + $0xa0] sm:$0xff] %vm692_vm13, %v3887_v24  ;;  %v3951_v39 = vpop.permute.xlu1 %3950  ;;  %v3939_v25 = vpop.permute.xlu0 %3938 }
 0xbef   : > { %v3960_v28 = vsel %vm719_vm1, %v3939_v25, %v3951_v39 }
 0xbf0   : > { %v3965_v32 = vmul.f32 %v8039_v30, %v3960_v28 }
 0xbf1   : > { %v4120_v39 = vld [vmem:[#allocation2 + $0x1a0] sm:$0xff] }
 0xbf2   : > { %3969 = vst.msk [vmem:[#allocation2 + $0x160] sm:$0xff] %vm692_vm13, %v3965_v32  ;;  %v3836_v36 = vpop.permute.xlu1 %3835  ;;  %v3824_v37 = vpop.permute.xlu0 %3823  ;;  %v4119_v32 = vld [vmem:[#allocation2 + $0x190] sm:$0xff] }
 0xbf3   : > { %v3845_v38 = vsel %vm3190_vm4, %v3824_v37, %v3836_v36  ;;  %v4103_v36 = vld [vmem:[#allocation2 + $0x90] sm:$0xff] }
 0xbf4   : > { %v3850_v40 = vmul.f32 %v8040_v50, %v3845_v38 }
 0xbf5   : > { %v4104_v28 = vld [vmem:[#allocation2 + $0xa0] sm:$0xff] }
 0xbf6   : > { %3854 = vst.msk [vmem:[#allocation2 + $0x60] sm:$0xff] %vm692_vm13, %v3850_v40  ;;  %v3799_v51 = vpop.permute.xlu1 %3798  ;;  %v3787_v11 = vpop.permute.xlu0 %3786 }
 0xbf7   : > { %v3808_v54 = vsel %vm3152_vm8, %v3787_v11, %v3799_v51  ;;  %v4102_v51 = vld [vmem:[#allocation2 + $0x80] sm:$0xff] }
 0xbf8   : > { %v3813_v61 = vmul.f32 %v9945_v49, %v3808_v54 }
 0xbfa   : > { %3817 = vst.msk [vmem:[#allocation2 + $0x20] sm:$0xff] %vm692_vm13, %v3813_v61  ;;  %v4027_v27 = vpop.permute.xlu1 %4026  ;;  %v4015_v23 = vpop.permute.xlu0 %4014 }
 0xbfb   : > { %v4035_v22 = vsel %vm3380_vm11, %v4015_v23, %v4027_v27 }
 0xbfc   : > { %v4040_v16 = vmul.f32 %v9885_v41, %v4035_v22  ;;  %v4116_v22 = vld [vmem:[#allocation2 + $0x160] sm:$0xff] }
 0xbfe   : > { %4044 = vst.msk [vmem:[#allocation2 + $0x1f0] sm:$0xff] %vm692_vm13, %v4040_v16  ;;  %v3912_v29 = vpop.permute.xlu1 %3911  ;;  %v3900_v12 = vpop.permute.xlu0 %3899 }
 0xbff   : > { %v3920_v43 = vsel %vm854_vm14, %v3900_v12, %v3912_v29  ;;  %v4100_v29 = vld [vmem:[#allocation2 + $0x60] sm:$0xff] }
 0xc00   : > { %v3925_v44 = vmul.f32 %v9893_v57, %v3920_v43  ;;  %v4115_v43 = vld [vmem:[#allocation2 + $0x150] sm:$0xff] }
 0xc02   : > { %3929 = vst.msk [vmem:[#allocation2 + $0xf0] sm:$0xff] %vm692_vm13, %v3925_v44  ;;  %v3990_v8 = vpop.permute.xlu1 %3989  ;;  %v3978_v47 = vpop.permute.xlu0 %3977  ;;  %v4099_v44 = vld [vmem:[#allocation2 + $0x50] sm:$0xff] }
 0xc03   : > { %v3998_v48 = vsel %vm11415_vm9, %v3978_v47, %v3990_v8  ;;  %vm11418_vm9 = vmmov %vm11417_vm12 }
 0xc04   : > { %v4003_v52 = vmul.f32 %v9902_v53, %v3998_v48  ;;  %v4108_v53 = vld [vmem:[#allocation2 + $0xe0] sm:$0xff] }
 0xc05   : > { %v4125_v62 = vld [vmem:[#allocation2 + $0x1f0] sm:$0xff]  ;;  %v4114_v48 = vld [vmem:[#allocation2 + $0x140] sm:$0xff] }
 0xc06   : > { %4007 = vst.msk [vmem:[#allocation2 + $0x1b0] sm:$0xff] %vm692_vm13, %v4003_v52  ;;  %v3875_v41 = vpop.permute.xlu1 %3874  ;;  %7558 = vmatprep.subr.mxu0 %v4125_v62  ;;  %v3863_v17 = vpop.permute.xlu0 %3862  ;;  %v4098_v62 = vld [vmem:[#allocation2 + $0x40] sm:$0xff] }
 0xc07   : > { %v3883_v63 = vsel %vm11416_vm5, %v3863_v17, %v3875_v41  ;;  %v4113_v17 = vld [vmem:[#allocation2 + $0x130] sm:$0xff]  ;;  %vm11419_vm5 = vmmov %vm11418_vm9 }
 0xc08   : > { %v3888_v14 = vmul.f32 %v9910_v7, %v3883_v63 }
 0xc09   : > { %v4109_v6 = vld [vmem:[#allocation2 + $0xf0] sm:$0xff] }
 0xc0a   : > { %3892 = vst.msk [vmem:[#allocation2 + $0xb0] sm:$0xff] %vm692_vm13, %v3888_v14  ;;  %v3953_v57 = vpop.permute.xlu1 %3952  ;;  %7559 = vmatpush3.msra.mxu0 %v4109_v6  ;;  %v3941_v35 = vpop.permute.xlu0 %3940 }
 0xc0b   : > { %v3961_v19 = vsel %vm719_vm1, %v3941_v35, %v3953_v57  ;;  %7560 = vmatprep.subr.mxu0 %v4124_v9  ;;  %v4112_v57 = vld [vmem:[#allocation2 + $0x120] sm:$0xff] }
 0xc0c   : > { %v3966_v26 = vmul.f32 %v8039_v30, %v3961_v19  ;;  %7561 = vmatpush3.msra.mxu0 %v4108_v53  ;;  %v4096_v9 = vld [vmem:[#allocation2 + $0x20] sm:$0xff]  ;;  %v4111_v53 = vld [vmem:[#allocation2 + $0x110] sm:$0xff] }
 0xc0d   : > { %7562 = vmatprep.subr.mxu0 %v4123_v45  ;;  %v4121_v31 = vld [vmem:[#allocation2 + $0x1b0] sm:$0xff] }
 0xc0e   : > { %3970 = vst.msk [vmem:[#allocation2 + $0x170] sm:$0xff] %vm692_vm13, %v3966_v26  ;;  %v3838_v20 = vpop.permute.xlu1 %3837  ;;  %7563 = vmatpush3.msra.mxu0 %v4107_v56  ;;  %v3826_v7 = vpop.permute.xlu0 %3825 }
 0xc0f   : > { %v3846_v60 = vsel %vm3190_vm4, %v3826_v7, %v3838_v20  ;;  %7564 = vmatprep.subr.mxu0 %v4122_v42  ;;  %v4110_v20 = vld [vmem:[#allocation2 + $0x100] sm:$0xff] }
 0xc10   : > { %v3851_v0 = vmul.f32 %v8040_v50, %v3846_v60  ;;  %7565 = vmatpush3.msra.mxu0 %v4106_v21  ;;  %v4118_v50 = vld [vmem:[#allocation2 + $0x180] sm:$0xff]  ;;  %v4086_v21 = vld [vmem:[%s11282_s1 + $0x188] sm:$0xff] }
 0xc11   : > { %7566 = vmatprep.subr.mxu0 %v4121_v31  ;;  %v4105_v13 = vld [vmem:[#allocation2 + $0xb0] sm:$0xff]  ;;  %v4082_v7 = vld [vmem:[%s11282_s1 + $0x160] sm:$0xff] }
 0xc12   : > { %3855 = vst.msk [vmem:[#allocation2 + $0x70] sm:$0xff] %vm692_vm13, %v3851_v0  ;;  %v3797_v15 = vpop.permute.xlu1 %3796  ;;  %7567 = vmatpush3.msra.mxu0 %v4105_v13  ;;  %v3785_v24 = vpop.permute.xlu0 %3784 }
 0xc13   : > { %v3807_v25 = vsel %vm3152_vm8, %v3785_v24, %v3797_v15  ;;  %7568 = vmatprep.subr.mxu0 %v4120_v39  ;;  %v4085_v15 = vld [vmem:[%s11282_s1 + $0x180] sm:$0xff]  ;;  %v4089_v39 = vld [vmem:[%s11282_s1 + $0x1a8] sm:$0xff] }
 0xc14   : > { %v3812_v30 = vmul.f32 %v9945_v49, %v3807_v25  ;;  %7569 = vmatpush3.msra.mxu0 %v4104_v28 }
 0xc15   : > { %7570 = vmatprep.subr.mxu0 %v4119_v32  ;;  %v4117_v54 = vld [vmem:[#allocation2 + $0x170] sm:$0xff] }
 0xc16   : > { %3816 = vst.msk [vmem:[#allocation2 + $0x10] sm:$0xff] %vm692_vm13, %v3812_v30  ;;  %v3801_v37 = vpop.permute.xlu1 %3800  ;;  %7571 = vmatpush3.msra.mxu0 %v4103_v36  ;;  %v3789_v38 = vpop.permute.xlu0 %3788  ;;  %v4088_v30 = vld [vmem:[%s11282_s1 + $0x1a0] sm:$0xff]  ;;  %v4092_v36 = vld [vmem:[%s11282_s1 + $0x1c8] sm:$0xff] }
 0xc17   : > { %v3809_v40 = vsel %vm3152_vm8, %v3789_v38, %v3801_v37  ;;  %7572 = vmatprep.subr.mxu0 %v4118_v50  ;;  %v4087_v50 = vld [vmem:[%s11282_s1 + $0x190] sm:$0xff] }
 0xc18   : > { %v3814_v11 = vmul.f32 %v9945_v49, %v3809_v40  ;;  %7573 = vmatpush3.msra.mxu0 %v4102_v51  ;;  %v4090_v40 = vld [vmem:[%s11282_s1 + $0x1b0] sm:$0xff] }
 0xc19   : > { %7574 = vmatprep.subr.mxu0 %v4117_v54  ;;  %v4101_v61 = vld [vmem:[#allocation2 + $0x70] sm:$0xff] }
 0xc1a   : > { %3818 = vst.msk [vmem:[#allocation2 + $0x30] sm:$0xff] %vm692_vm13, %v3814_v11  ;;  %v3795_v27 = vpop.permute.xlu1 %3794  ;;  %7575 = vmatpush3.msra.mxu0 %v4101_v61  ;;  %v3783_v23 = vpop.permute.xlu0 %3782  ;;  %v4093_v51 = vld [vmem:[%s11282_s1 + $0x1d0] sm:$0xff] }
 0xc1b   : > { %v3806_v16 = vsel %vm3152_vm8, %v3783_v23, %v3795_v27  ;;  %7576 = vmatprep.subr.mxu0 %v4116_v22 }
 0xc1c   : > { %v3811_v12 = vmul.f32 %v9945_v49, %v3806_v16  ;;  %7577 = vmatpush3.msra.mxu0 %v4100_v29 }
 0xc1d   : > { %7578 = vmatprep.subr.mxu0 %v4115_v43  ;;  %v4095_v26 = vld [vmem:[#allocation2 + $0x10] sm:$0xff] }
 0xc1e   : > { %3815 = vst.msk [vmem:[#allocation2] sm:$0xff] %vm692_vm13, %v3811_v12  ;;  %v4062_v8 = vpop.permute.xlu1 %4061  ;;  %7579 = vmatpush3.msra.mxu0 %v4099_v44  ;;  %v4050_v47 = vpop.permute.xlu0 %4049 }
 0xc1f   : > { %v4071_v52 = vsel %vm3418_vm2, %v4050_v47, %v4062_v8  ;;  %7580 = vmatprep.subr.mxu0 %v4114_v48 }
 0xc20   : > { %v4076_v41 = vmul.f32 %v4071_v52, %v9611_v18  ;;  %7581 = vmatpush3.msra.mxu0 %v4098_v62 }
 0xc21   : > { %7582 = vmatprep.subr.mxu0 %v4113_v17  ;;  %v4097_v63 = vld [vmem:[#allocation2 + $0x30] sm:$0xff] }
 0xc22   : > { %4080 = vst.msk [vmem:[#allocation2 + $0x220] sm:$0xff] %vm692_vm13, %v4076_v41  ;;  %v4064_v14 = vpop.permute.xlu1 %4063  ;;  %7583 = vmatpush3.msra.mxu0 %v4097_v63  ;;  %v4052_v6 = vpop.permute.xlu0 %4051 }
 0xc23   : > { %v4072_v35 = vsel %vm3418_vm2, %v4052_v6, %v4064_v14  ;;  %7584 = vmatprep.subr.mxu0 %v4112_v57 }
 0xc24   : > { %v4077_v19 = vmul.f32 %v4072_v35, %v9611_v18  ;;  %7585 = vmatpush3.msra.mxu0 %v4096_v9 }
 0xc25   : > { %7586 = vmatprep.subr.mxu0 %v4111_v53  ;;  %v4094_v60 = vld [vmem:[#allocation2] sm:$0xff] }
 0xc26   : > { %4081 = vst.msk [vmem:[#allocation2 + $0x230] sm:$0xff] %vm692_vm13, %v4077_v19  ;;  %v4060_v45 = vpop.permute.xlu1 %4059  ;;  %7587 = vmatpush3.msra.mxu0 %v4095_v26  ;;  %v4048_v56 = vpop.permute.xlu0 %4047 }
 0xc27   : > { %v4070_v42 = vsel %vm3418_vm2, %v4048_v56, %v4060_v45  ;;  %7588 = vmatprep.subr.mxu0 %v4110_v20 }
 0xc28   : > { %v4075_v0 = vmul.f32 %v4070_v42, %v9611_v18  ;;  %7589 = vmatpush3.msra.mxu0 %v4094_v60 }
 0xc29   : > { %4207 = vmatmul.mubr.f32.vlgmr.msra.gmra.mxu0 %v4082_v7  ;;  %v4128_v32 = vld [vmem:[#allocation2 + $0x220] sm:$0xff] }
 0xc2a   : > { %4079 = vst.msk [vmem:[#allocation2 + $0x210] sm:$0xff] %vm692_vm13, %v4075_v0  ;;  %v4058_v31 = vpop.permute.xlu1 %4057  ;;  %v4046_v13 = vpop.permute.xlu0 %4045  ;;  %4211 = vmatprep.mubr.f32.mxu0 %v4086_v21 }
 0xc2b   : > { %v4069_v24 = vsel %vm3418_vm2, %v4046_v13, %v4058_v31 }
 0xc2c   : > { %v4074_v25 = vmul.f32 %v4069_v24, %v9611_v18  ;;  %v4091_v18 = vld [vmem:[%s11282_s1 + $0x1c0] sm:$0xff] }
 0xc2d   : > { %v4129_v28 = vld [vmem:[#allocation2 + $0x230] sm:$0xff]  ;;  %4212 = vmatmul.mubr.f32.gmra.mxu0 %v4085_v15 }
 0xc2e   : > { %4078 = vst.msk [vmem:[#allocation2 + $0x200] sm:$0xff] %vm692_vm13, %v4074_v25  ;;  %7782 = vmatprep.subr.mxu1 %v4129_v28  ;;  %4216 = vmatprep.mubr.f32.mxu0 %v4089_v39 }
 0xc2f   : > { %7783 = vmatpush3.msra.mxu1 %v4129_v28 }
 0xc30   : > { %7784 = vmatprep.subr.mxu1 %v4128_v32 }
 0xc31   : > { %7785 = vmatpush3.msra.mxu1 %v4128_v32  ;;  %v4127_v37 = vld [vmem:[#allocation2 + $0x210] sm:$0xff]  ;;  %4217 = vmatmul.mubr.f32.gmra.mxu0 %v4088_v30 }
 0xc32   : > { %7786 = vmatprep.subr.mxu1 %v4127_v37  ;;  %4221 = vmatprep.mubr.f32.mxu0 %v4092_v36 }
 0xc33   : > { %7787 = vmatpush3.msra.mxu1 %v4127_v37 }
 0xc35   : > { %v4126_v38 = vld [vmem:[#allocation2 + $0x200] sm:$0xff]  ;;  %4222 = vmatmul.mubr.f32.gmra.mxu0 %v4091_v18 }
 0xc36   : > { %7788 = vmatprep.subr.mxu1 %v4126_v38 }
 0xc37   : > { %7789 = vmatpush3.msra.mxu1 %v4126_v38  ;;  %v10049_v60 = vpop.permute.xlu1 %4397  ;;  %v4414_v0 = vpop.permute.xlu0 %4413 }
 0xc38   : > { %7791 = vmatmul.mubr.msk.f32.vlgmr.msra.gmra.mxu1 %vm11417_vm12, %v4087_v50  ;;  %vm11424_vm12 = vcmask 105472  }
 0xc39   : > { %7793 = vmatprep.mubr.msk.f32.mxu1 %vm11418_vm9, %v4090_v40  ;;  %vm11425_vm9 = vmmov %vm11419_vm5 }
 0xc3b   : > { %v4406_v13 = vpop.permute.xlu0 %4405 }
 0xc3c   : > { %7794 = vmatmul.mubr.msk.f32.gmra.mxu1 %vm11419_vm5, %v4093_v51  ;;  %v10051_v21 = vpop.permute.xlu1 %4417  ;;  %vm11426_vm5 = vcmask 23552  }
 0xc40   : > { %v4393_v24 = vpop.permute.xlu0 %4392 }
 0xc41   : > { %v4388_v31 = vpop.permute.xlu1 %4387 }
 0xc45   : > { %v4383_v15 = vpop.permute.xlu1 %4382 }
 0xc4a   : > { %v4410_v39 = vpop.permute.xlu1 %4409 }
 0xce9   : > { %v7590_v11 = vpop.f32.mrf.mxu0 }
 0xceb   : > { %v7591_v54 = vpop.f32.mrf.mxu0 }
 0xcec   : > { %v7592_v43 = vadd.f32 %v7591_v54, %v7590_v11 }
 0xced   : > { %v7593_v61 = vpop.f32.mrf.mxu0 }
 0xcef   : > { %v7594_v27 = vpop.f32.mrf.mxu0 }
 0xcf0   : > { %v7595_v22 = vadd.f32 %v7594_v27, %v7593_v61 }
 0xcf1   : > { %v7596_v23 = vpop.f32.mrf.mxu0 }
 0xcf3   : > { %v7597_v16 = vpop.f32.mrf.mxu0 }
 0xcf4   : > { %v7598_v48 = vadd.f32 %v7597_v16, %v7596_v23 }
 0xcf5   : > { %v7599_v12 = vpop.f32.mrf.mxu0 }
 0xcf7   : > { %v7600_v41 = vpop.f32.mrf.mxu0 }
 0xcf8   : > { %v7792_v29 = vpop.f32.mrf.mxu1  ;;  %v7601_v35 = vadd.f32 %v7600_v41, %v7599_v12 }
 0xcf9   : > { %v10021_v44 = vadd.f32 %v7792_v29, %v7595_v22 }
 0xcfa   : > { %v4293_v8 = vpop.f32.mrf.mxu1 }
 0xcfb   : > { %v10023_v47 = vadd.f32 %v7592_v43, %v4293_v8  ;;  %v4333_v52 = vmul.f32 %v10021_v44, %v10021_v44  ;;  %v4319_v56 = vsel %vm692_vm13, %v10021_v44, 0.0 }
 0xcfc   : > { %v7795_v62 = vpop.f32.mrf.mxu1 }
 0xcfd   : > { %v4339_v17 = vsel %vm692_vm13, %v4333_v52, 0.0  ;;  %v4316_v63 = vsel %vm692_vm13, %v10023_v47, 0.0  ;;  %v4332_v14 = vmul.f32 %v10023_v47, %v10023_v47  ;;  %v10039_v26 = vadd.f32 %v7795_v62, %v7601_v35 }
 0xcfe   : > { %4340 = vadd.xlane.f32.xlu1 %v4339_v17  ;;  %v4303_v6 = vpop.f32.mrf.mxu1  ;;  %4317 = vadd.xlane.f32.xlu0 %v4316_v63 }
 0xcff   : > { %v10032_v57 = vadd.f32 %v7598_v48, %v4303_v6  ;;  %v4336_v19 = vsel %vm692_vm13, %v4332_v14, 0.0  ;;  %v4325_v20 = vsel %vm692_vm13, %v10039_v26, 0.0  ;;  %v4335_v7 = vmul.f32 %v10039_v26, %v10039_v26 }
 0xd01   : > { %v4322_v9 = vsel %vm692_vm13, %v10032_v57, 0.0  ;;  %v4334_v53 = vmul.f32 %v10032_v57, %v10032_v57  ;;  %v4345_v42 = vsel %vm692_vm13, %v4335_v7, 0.0 }
 0xd02   : > { %4323 = vadd.xlane.f32.xlu1 %v4322_v9  ;;  %4337 = vadd.xlane.f32.xlu0 %v4336_v19 }
 0xd03   : > { %v4342_v45 = vsel %vm692_vm13, %v4334_v53, 0.0 }
 0xd06   : > { %4343 = vadd.xlane.f32.xlu1 %v4342_v45  ;;  %4320 = vadd.xlane.f32.xlu0 %v4319_v56 }
 0xd0a   : > { %4326 = vadd.xlane.f32.xlu0 %v4325_v20 }
 0xd0e   : > { %4346 = vadd.xlane.f32.xlu0 %v4345_v42 }
 0xd87   : > { %v4341_v25 = vpop.xlane.xlu1 %4340  ;;  %v4318_v28 = vpop.xlane.xlu0 %4317 }
 0xd88   : > { %v4328_v30 = vmul.f32 0.0625, %v4318_v28  ;;  %v4349_v23 = vmul.f32 0.0625, %v4341_v25 }
 0xd8a   : > { %v4352_v37 = vmul.f32 %v4328_v30, %v4328_v30  ;;  %v4364_v19 = vsub.f32 %v10023_v47, %v4328_v30 }
 0xd8b   : > { %v4324_v32 = vpop.xlane.xlu1 %4323  ;;  %v4338_v36 = vpop.xlane.xlu0 %4337 }
 0xd8c   : > { %v4330_v18 = vmul.f32 0.0625, %v4324_v32  ;;  %v4348_v38 = vmul.f32 0.0625, %v4338_v36 }
 0xd8e   : > { %v4354_v50 = vmul.f32 %v4330_v18, %v4330_v18  ;;  %v4356_v40 = vsub.f32 %v4348_v38, %v4352_v37  ;;  %v4366_v56 = vsub.f32 %v10032_v57, %v4330_v18 }
 0xd8f   : > { %v4344_v51 = vpop.xlane.xlu1 %4343  ;;  %v4321_v11 = vpop.xlane.xlu0 %4320 }
 0xd90   : > { %v4360_v54 = vmax.f32 %v4356_v40, 0.0  ;;  %v4350_v61 = vmul.f32 0.0625, %v4344_v51  ;;  %v4329_v27 = vmul.f32 0.0625, %v4321_v11  ;;  %v10189_v11 = vld [vmem:[%s11284_s3 + $0xb3] ss:$0 sm:$0xff] }
 0xd92   : > { %v4368_v22 = vadd.f32 1e-05, %v4360_v54  ;;  %v4358_v16 = vsub.f32 %v4350_v61, %v4354_v50  ;;  %v4353_v29 = vmul.f32 %v4329_v27, %v4329_v27  ;;  %v4365_v28 = vsub.f32 %v10021_v44, %v4329_v27  ;;  %v4733_v50 = vld [vmem:[%s11282_s1 + $0x1e8] sm:$0xff] }
 0xd93   : > { %v4327_v12 = vpop.xlane.xlu0 %4326  ;;  %4856 = vmatprep.mubr.f32.mxu1 %v4733_v50 }
 0xd94   : > { %8001 = vrsqrt.f32 %v4368_v22  ;;  %v4362_v43 = vmax.f32 %v4358_v16, 0.0  ;;  %v4357_v8 = vsub.f32 %v4349_v23, %v4353_v29  ;;  %v4331_v48 = vmul.f32 0.0625, %v4327_v12  ;;  %v10201_v22 = vld [vmem:[%s11284_s3 + $0xb6] ss:$0 sm:$0xff] }
 0xd95   : > { %v4734_v12 = vld [vmem:[%s11282_s1 + $0x1f0] sm:$0xff] }
 0xd96   : > { %v4370_v52 = vadd.f32 1e-05, %v4362_v43  ;;  %v4361_v62 = vmax.f32 %v4357_v8, 0.0  ;;  %v4355_v41 = vmul.f32 %v4331_v48, %v4331_v48  ;;  %v4367_v44 = vsub.f32 %v10039_v26, %v4331_v48  ;;  %7804 = vmatprep.mubr.msk.f32.mxu0 %vm11425_vm9, %v4734_v12  ;;  %v10217_v48 = vld [vmem:[%s11284_s3 + $0xb2] ss:$0 sm:$0xff]  ;;  %vm11427_vm9 = vmmov %vm11426_vm5 }
 0xd97   : > { %v4347_v17 = vpop.xlane.xlu0 %4346 }
 0xd98   : > { %8003 = vrsqrt.f32 %v4370_v52  ;;  %v4369_v63 = vadd.f32 1e-05, %v4361_v62  ;;  %v4351_v14 = vmul.f32 0.0625, %v4347_v17  ;;  %v4965_v52 = vld [vmem:[%s11283_s2 + $0x90] sm:$0xff] }
 0xd9a   : > { %8005 = vrsqrt.f32 %v4369_v63  ;;  %v4359_v6 = vsub.f32 %v4351_v14, %v4355_v41  ;;  %v4964_v14 = vld [vmem:[%s11283_s2 + $0x88] sm:$0xff] }
 0xd9c   : > { %v4363_v35 = vmax.f32 %v4359_v6, 0.0  ;;  %v10231_v6 = vld [vmem:[%s11284_s3 + $0xb5] ss:$0 sm:$0xff] }
 0xd9e   : > { %v4371_v9 = vadd.f32 1e-05, %v4363_v35 }
 0xda0   : > { %8007 = vrsqrt.f32 %v4371_v9 }
 0xda1   : > { %v8002_v53 = vpop.eup %8001 }
 0xda2   : > { %v4376_v45 = vmul.f32 %v8002_v53, %v4364_v19 }
 0xda4   : > { %v4400_v20 = vmul.f32 %v4383_v15, %v4376_v45  ;;  %v10239_v45 = vld [vmem:[%s11284_s3 + $0xb1] ss:$0 sm:$0xff] }
 0xda5   : > { %v8004_v7 = vpop.eup %8003 }
 0xda6   : > { %v4420_v42 = vadd.f32 %v4406_v13, %v4400_v20  ;;  %v4378_v25 = vmul.f32 %v8004_v7, %v4366_v56 }
 0xda7   : > { %v8006_v32 = vpop.eup %8005 }
 0xda8   : > { %v10056_v36 = vmax.f32 %v4420_v42, 0.0  ;;  %v4402_v37 = vmul.f32 %v4393_v24, %v4378_v25  ;;  %v4377_v38 = vmul.f32 %v8006_v32, %v4365_v28  ;;  %v4963_v25 = vld [vmem:[%s11283_s2 + $0x80] sm:$0xff] }
 0xdaa   : > { %4580 = vst.msk [vmem:[#allocation2 + $0x100] sm:$0xff] %vm692_vm13, %v10056_v36  ;;  %v4422_v47 = vadd.f32 %v4414_v0, %v4402_v37  ;;  %v4401_v30 = vmul.f32 %v4388_v31, %v4377_v38  ;;  %4670 = vrot.lane.b32.xlu0 %v10056_v36, %s11368_s17  ;;  %4658 = vrot.lane.b32.xlu1 %v10056_v36, %s11366_s26 }
 0xdac   : > { %v10064_v57 = vmax.f32 %v4422_v47, 0.0  ;;  %v4421_v13 = vadd.f32 %v4410_v39, %v4401_v30 }
 0xdad   : > { %v8008_v15 = vpop.eup %8007 }
 0xdae   : > { %4582 = vst.msk [vmem:[#allocation2 + $0x120] sm:$0xff] %vm692_vm13, %v10064_v57  ;;  %v10069_v24 = vmax.f32 %v4421_v13, 0.0  ;;  %v4379_v18 = vmul.f32 %v8008_v15, %v4367_v44  ;;  %4555 = vrot.lane.b32.xlu0 %v10056_v36, %s11420_s29  ;;  %4543 = vrot.lane.b32.xlu1 %v10056_v36, %s11421_s23  ;;  %v4962_v15 = vld [vmem:[%s11283_s2 + $0x78] sm:$0xff] }
 0xdb0   : > { %4581 = vst.msk [vmem:[#allocation2 + $0x110] sm:$0xff] %vm692_vm13, %v10069_v24  ;;  %v4403_v0 = vmul.f32 %v10049_v60, %v4379_v18  ;;  %v10177_v60 = vld [vmem:[%s11284_s3 + $0xb7] ss:$0 sm:$0xff] }
 0xdb2   : > { %v4423_v26 = vadd.f32 %v10051_v21, %v4403_v0  ;;  %4633 = vrot.lane.b32.xlu0 %v10056_v36, %s11389_s16  ;;  %4621 = vrot.lane.b32.xlu1 %v10056_v36, %s11390_s6 }
 0xdb4   : > { %v4427_v31 = vmax.f32 %v4423_v26, 0.0 }
 0xdb6   : > { %4583 = vst.msk [vmem:[#allocation2 + $0x130] sm:$0xff] %vm692_vm13, %v4427_v31  ;;  %4518 = vrot.lane.b32.xlu0 %v10056_v36, %s11391_s21  ;;  %4506 = vrot.lane.b32.xlu1 %v10056_v36, %s11392_s9 }
 0xdba   : > { %4596 = vrot.lane.b32.xlu0 %v10056_v36, %s11393_s22  ;;  %4584 = vrot.lane.b32.xlu1 %v10056_v36, %s11422_s15 }
 0xdbe   : > { %4481 = vrot.lane.b32.xlu0 %v10056_v36, %s11423_s8  ;;  %4469 = vrot.lane.b32.xlu1 %v10056_v36, %s11404_s30 }
 0xdc2   : > { %4672 = vrot.lane.b32.xlu0 %v10069_v24, %s11368_s17  ;;  %4660 = vrot.lane.b32.xlu1 %v10069_v24, %s11366_s26 }
 0xdc6   : > { %4557 = vrot.lane.b32.xlu0 %v10069_v24, %s11420_s29  ;;  %4545 = vrot.lane.b32.xlu1 %v10069_v24, %s11421_s23 }
 0xdca   : > { %4635 = vrot.lane.b32.xlu0 %v10069_v24, %s11389_s16  ;;  %4623 = vrot.lane.b32.xlu1 %v10069_v24, %s11390_s6 }
 0xdce   : > { %4520 = vrot.lane.b32.xlu0 %v10069_v24, %s11391_s21  ;;  %4508 = vrot.lane.b32.xlu1 %v10069_v24, %s11392_s9 }
 0xdd2   : > { %4598 = vrot.lane.b32.xlu0 %v10069_v24, %s11393_s22  ;;  %4586 = vrot.lane.b32.xlu1 %v10069_v24, %s11422_s15 }
 0xdd6   : > { %4483 = vrot.lane.b32.xlu0 %v10069_v24, %s11423_s8  ;;  %4471 = vrot.lane.b32.xlu1 %v10069_v24, %s11404_s30 }
 0xdda   : > { %4674 = vrot.lane.b32.xlu0 %v10064_v57, %s11368_s17  ;;  %4662 = vrot.lane.b32.xlu1 %v10064_v57, %s11366_s26 }
 0xdde   : > { %4559 = vrot.lane.b32.xlu0 %v10064_v57, %s11420_s29  ;;  %4547 = vrot.lane.b32.xlu1 %v10064_v57, %s11421_s23 }
 0xde2   : > { %4637 = vrot.lane.b32.xlu0 %v10064_v57, %s11389_s16  ;;  %4625 = vrot.lane.b32.xlu1 %v10064_v57, %s11390_s6 }
 0xde6   : > { %4522 = vrot.lane.b32.xlu0 %v10064_v57, %s11391_s21  ;;  %4510 = vrot.lane.b32.xlu1 %v10064_v57, %s11392_s9 }
 0xdea   : > { %4600 = vrot.lane.b32.xlu0 %v10064_v57, %s11393_s22  ;;  %4588 = vrot.lane.b32.xlu1 %v10064_v57, %s11422_s15 }
 0xdee   : > { %4485 = vrot.lane.b32.xlu0 %v10064_v57, %s11423_s8  ;;  %4473 = vrot.lane.b32.xlu1 %v10064_v57, %s11404_s30 }
 0xdf2   : > { %4448 = vrot.lane.b32.xlu0 %v10064_v57, %s11405_s14  ;;  %4436 = vrot.lane.b32.xlu1 %v10064_v57, %s11406_s24 }
 0xdf6   : > { %4676 = vrot.lane.b32.xlu0 %v4427_v31, %s11368_s17  ;;  %4664 = vrot.lane.b32.xlu1 %v4427_v31, %s11366_s26 }
 0xdfa   : > { %4561 = vrot.lane.b32.xlu0 %v4427_v31, %s11420_s29  ;;  %4549 = vrot.lane.b32.xlu1 %v4427_v31, %s11421_s23 }
 0xdfe   : > { %4639 = vrot.lane.b32.xlu0 %v4427_v31, %s11389_s16  ;;  %4627 = vrot.lane.b32.xlu1 %v4427_v31, %s11390_s6 }
 0xe02   : > { %4524 = vrot.lane.b32.xlu0 %v4427_v31, %s11391_s21  ;;  %4512 = vrot.lane.b32.xlu1 %v4427_v31, %s11392_s9 }
 0xe06   : > { %4602 = vrot.lane.b32.xlu0 %v4427_v31, %s11393_s22  ;;  %4590 = vrot.lane.b32.xlu1 %v4427_v31, %s11422_s15 }
 0xe0a   : > { %4487 = vrot.lane.b32.xlu0 %v4427_v31, %s11423_s8  ;;  %4475 = vrot.lane.b32.xlu1 %v4427_v31, %s11404_s30 }
 0xe0e   : > { %4446 = vrot.lane.b32.xlu0 %v10069_v24, %s11405_s14  ;;  %4434 = vrot.lane.b32.xlu1 %v10069_v24, %s11406_s24 }
 0xe12   : > { %4450 = vrot.lane.b32.xlu0 %v4427_v31, %s11405_s14  ;;  %4438 = vrot.lane.b32.xlu1 %v4427_v31, %s11406_s24 }
 0xe16   : > { %4444 = vrot.lane.b32.xlu0 %v10056_v36, %s11405_s14  ;;  %4432 = vrot.lane.b32.xlu1 %v10056_v36, %s11406_s24 }
 0xe1a   : > { %4711 = vrot.lane.b32.xlu0 %v10064_v57, %s11407_s7  ;;  %4699 = vrot.lane.b32.xlu1 %v10064_v57, %s11408_s25 }
 0xe1c   : > { %v4659_v21 = vpop.permute.xlu1 %4658  ;;  %v4671_v39 = vpop.permute.xlu0 %4670 }
 0xe1d   : > { %v4682_v40 = vsel %vm3380_vm11, %v4659_v21, %v4671_v39 }
 0xe1e   : > { %v4687_v51 = vmul.f32 %v10177_v60, %v4682_v40  ;;  %4713 = vrot.lane.b32.xlu0 %v4427_v31, %s11407_s7  ;;  %4701 = vrot.lane.b32.xlu1 %v4427_v31, %s11408_s25 }
 0xe20   : > { %4691 = vst.msk [vmem:[#allocation2 + $0x1c0] sm:$0xff] %vm692_vm13, %v4687_v51  ;;  %v4544_v54 = vpop.permute.xlu1 %4543  ;;  %v4556_v61 = vpop.permute.xlu0 %4555 }
 0xe21   : > { %v4567_v27 = vsel %vm854_vm14, %v4544_v54, %v4556_v61 }
 0xe22   : > { %v4572_v23 = vmul.f32 %v10189_v11, %v4567_v27  ;;  %4709 = vrot.lane.b32.xlu0 %v10069_v24, %s11407_s7  ;;  %4697 = vrot.lane.b32.xlu1 %v10069_v24, %s11408_s25 }
 0xe24   : > { %4576 = vst.msk [vmem:[#allocation2 + $0xc0] sm:$0xff] %vm692_vm13, %v4572_v23  ;;  %v4622_v16 = vpop.permute.xlu1 %4621  ;;  %v4634_v29 = vpop.permute.xlu0 %4633 }
 0xe25   : > { %v4645_v43 = vsel %vm11424_vm12, %v4622_v16, %v4634_v29 }
 0xe26   : > { %v4650_v8 = vmul.f32 %v10201_v22, %v4645_v43  ;;  %4707 = vrot.lane.b32.xlu0 %v10056_v36, %s11407_s7  ;;  %4695 = vrot.lane.b32.xlu1 %v10056_v36, %s11408_s25 }
 0xe28   : > { %4654 = vst.msk [vmem:[#allocation2 + $0x180] sm:$0xff] %vm692_vm13, %v4650_v8  ;;  %v4507_v62 = vpop.permute.xlu1 %4506  ;;  %v4519_v41 = vpop.permute.xlu0 %4518 }
 0xe29   : > { %v4530_v17 = vsel %vm11426_vm5, %v4507_v62, %v4519_v41  ;;  %vm11428_vm5 = vmmov %vm11424_vm12 }
 0xe2a   : > { %v4535_v63 = vmul.f32 %v10217_v48, %v4530_v17  ;;  %5047 = vperm.xlu0 %7967, %v4965_v52   ;;  %5042 = vperm.xlu1 %7968, %v4964_v14  }
 0xe2c   : > { %4539 = vst.msk [vmem:[#allocation2 + $0x80] sm:$0xff] %vm692_vm13, %v4535_v63  ;;  %v4585_v35 = vpop.permute.xlu1 %4584  ;;  %v4597_v9 = vpop.permute.xlu0 %4596 }
 0xe2d   : > { %v4608_v19 = vsel %vm719_vm1, %v4585_v35, %v4597_v9 }
 0xe2e   : > { %v4613_v53 = vmul.f32 %v10231_v6, %v4608_v19  ;;  %7969 = vset.pattern.permute.xlu1 %v8106_v34 }
 0xe2f   : > { %5067 = vperm.xlu1 %7969, %v4965_v52  }
 0xe30   : > { %4617 = vst.msk [vmem:[#allocation2 + $0x140] sm:$0xff] %vm692_vm13, %v4613_v53  ;;  %v4470_v56 = vpop.permute.xlu1 %4469  ;;  %v4482_v20 = vpop.permute.xlu0 %4481 }
 0xe31   : > { %v4493_v7 = vsel %vm3190_vm4, %v4470_v56, %v4482_v20 }
 0xe32   : > { %v4498_v42 = vmul.f32 %v10239_v45, %v4493_v7 }
 0xe33   : > { %7970 = vset.pattern.permute.xlu1 %v8105_v33 }
 0xe34   : > { %4502 = vst.msk [vmem:[#allocation2 + $0x40] sm:$0xff] %vm692_vm13, %v4498_v42  ;;  %v4661_v28 = vpop.permute.xlu1 %4660  ;;  %v4673_v32 = vpop.permute.xlu0 %4672  ;;  %5037 = vperm.xlu1 %7970, %v4963_v25  }
 0xe35   : > { %v4683_v36 = vsel %vm3380_vm11, %v4661_v28, %v4673_v32 }
 0xe36   : > { %v4688_v37 = vmul.f32 %v10177_v60, %v4683_v36 }
 0xe38   : > { %4692 = vst.msk [vmem:[#allocation2 + $0x1d0] sm:$0xff] %vm692_vm13, %v4688_v37  ;;  %v4546_v38 = vpop.permute.xlu1 %4545  ;;  %v4558_v47 = vpop.permute.xlu0 %4557  ;;  %7971 = vset.pattern.permute.xlu1 %v8106_v34 }
 0xe39   : > { %v4568_v30 = vsel %vm854_vm14, %v4546_v38, %v4558_v47  ;;  %5063 = vperm.xlu1 %7971, %v4964_v14  }
 0xe3a   : > { %v4573_v57 = vmul.f32 %v10189_v11, %v4568_v30 }
 0xe3c   : > { %4577 = vst.msk [vmem:[#allocation2 + $0xd0] sm:$0xff] %vm692_vm13, %v4573_v57  ;;  %v4624_v13 = vpop.permute.xlu1 %4623  ;;  %v4636_v44 = vpop.permute.xlu0 %4635 }
 0xe3d   : > { %v4646_v24 = vsel %vm11424_vm12, %v4624_v13, %v4636_v44  ;;  %7972 = vset.pattern.permute.xlu1 %v8105_v33  ;;  %vm11429_vm12 = vmmov %vm11427_vm9 }
 0xe3e   : > { %v4651_v18 = vmul.f32 %v10201_v22, %v4646_v24  ;;  %5032 = vperm.xlu1 %7972, %v4962_v15  }
 0xe40   : > { %4655 = vst.msk [vmem:[#allocation2 + $0x190] sm:$0xff] %vm692_vm13, %v4651_v18  ;;  %v4509_v0 = vpop.permute.xlu1 %4508  ;;  %v4521_v26 = vpop.permute.xlu0 %4520 }
 0xe41   : > { %v4531_v31 = vsel %vm11427_vm9, %v4509_v0, %v4521_v26  ;;  %vm11430_vm9 = vmmov %vm11428_vm5 }
 0xe42   : > { %v4536_v21 = vmul.f32 %v10217_v48, %v4531_v31  ;;  %7973 = vset.pattern.permute.xlu1 %v8106_v34 }
 0xe43   : > { %5059 = vperm.xlu1 %7973, %v4963_v25  }
 0xe44   : > { %4540 = vst.msk [vmem:[#allocation2 + $0x90] sm:$0xff] %vm692_vm13, %v4536_v21  ;;  %v4587_v39 = vpop.permute.xlu1 %4586  ;;  %v4599_v50 = vpop.permute.xlu0 %4598 }
 0xe45   : > { %v4609_v40 = vsel %vm719_vm1, %v4587_v39, %v4599_v50 }
 0xe46   : > { %v4614_v51 = vmul.f32 %v10231_v6, %v4609_v40 }
 0xe47   : > { %5055 = vperm.xlu1 %7973, %v4962_v15  }
 0xe48   : > { %4618 = vst.msk [vmem:[#allocation2 + $0x150] sm:$0xff] %vm692_vm13, %v4614_v51  ;;  %v4472_v54 = vpop.permute.xlu1 %4471  ;;  %v4484_v61 = vpop.permute.xlu0 %4483 }
 0xe49   : > { %v4494_v27 = vsel %vm3190_vm4, %v4472_v54, %v4484_v61 }
 0xe4a   : > { %v4499_v23 = vmul.f32 %v10239_v45, %v4494_v27 }
 0xe4b   : > { %7974 = vset.pattern.permute.xlu1 %v8105_v33 }
 0xe4c   : > { %4503 = vst.msk [vmem:[#allocation2 + $0x50] sm:$0xff] %vm692_vm13, %v4499_v23  ;;  %v4663_v16 = vpop.permute.xlu1 %4662  ;;  %v4675_v29 = vpop.permute.xlu0 %4674 }
 0xe4d   : > { %v4684_v12 = vsel %vm3380_vm11, %v4663_v16, %v4675_v29 }
 0xe4e   : > { %v4689_v43 = vmul.f32 %v10177_v60, %v4684_v12 }
 0xe50   : > { %4693 = vst.msk [vmem:[#allocation2 + $0x1e0] sm:$0xff] %vm692_vm13, %v4689_v43  ;;  %v4548_v8 = vpop.permute.xlu1 %4547  ;;  %v4560_v52 = vpop.permute.xlu0 %4559 }
 0xe51   : > { %v4569_v62 = vsel %vm854_vm14, %v4548_v8, %v4560_v52 }
 0xe52   : > { %v4574_v41 = vmul.f32 %v10189_v11, %v4569_v62  ;;  %v4773_v62 = vld [vmem:[#allocation2 + $0x1d0] sm:$0xff] }
 0xe54   : > { %4578 = vst.msk [vmem:[#allocation2 + $0xe0] sm:$0xff] %vm692_vm13, %v4574_v41  ;;  %v4626_v17 = vpop.permute.xlu1 %4625  ;;  %v4638_v63 = vpop.permute.xlu0 %4637  ;;  %v4757_v41 = vld [vmem:[#allocation2 + $0xd0] sm:$0xff] }
 0xe55   : > { %v4647_v14 = vsel %vm11428_vm5, %v4626_v17, %v4638_v63  ;;  %vm11431_vm5 = vmmov %vm11429_vm12 }
 0xe56   : > { %v4652_v35 = vmul.f32 %v10201_v22, %v4647_v14  ;;  %v4772_v14 = vld [vmem:[#allocation2 + $0x1c0] sm:$0xff] }
 0xe57   : > { %v4774_v12 = vld [vmem:[#allocation2 + $0x1e0] sm:$0xff] }
 0xe58   : > { %4656 = vst.msk [vmem:[#allocation2 + $0x1a0] sm:$0xff] %vm692_vm13, %v4652_v35  ;;  %v4511_v9 = vpop.permute.xlu1 %4510  ;;  %v4523_v19 = vpop.permute.xlu0 %4522 }
 0xe59   : > { %v4532_v53 = vsel %vm11429_vm12, %v4511_v9, %v4523_v19  ;;  %v4756_v9 = vld [vmem:[#allocation2 + $0xc0] sm:$0xff]  ;;  %vm11432_vm12 = vcmask 261120  }
 0xe5a   : > { %v4537_v56 = vmul.f32 %v10217_v48, %v4532_v53 }
 0xe5b   : > { %v4758_v8 = vld [vmem:[#allocation2 + $0xe0] sm:$0xff] }
 0xe5c   : > { %4541 = vst.msk [vmem:[#allocation2 + $0xa0] sm:$0xff] %vm692_vm13, %v4537_v56  ;;  %v4589_v20 = vpop.permute.xlu1 %4588  ;;  %v4601_v7 = vpop.permute.xlu0 %4600 }
 0xe5d   : > { %v4610_v42 = vsel %vm719_vm1, %v4589_v20, %v4601_v7 }
 0xe5e   : > { %v4615_v25 = vmul.f32 %v10231_v6, %v4610_v42 }
 0xe5f   : > { %v4770_v42 = vld [vmem:[#allocation2 + $0x1a0] sm:$0xff] }
 0xe60   : > { %4619 = vst.msk [vmem:[#allocation2 + $0x160] sm:$0xff] %vm692_vm13, %v4615_v25  ;;  %v4474_v28 = vpop.permute.xlu1 %4473  ;;  %v4486_v32 = vpop.permute.xlu0 %4485 }
 0xe61   : > { %v4495_v36 = vsel %vm3190_vm4, %v4474_v28, %v4486_v32  ;;  %v8041_v32 = vld [vmem:[%s11284_s3 + $0xb0] ss:$0 sm:$0xff] }
 0xe62   : > { %v4500_v37 = vmul.f32 %v10239_v45, %v4495_v36 }
 0xe63   : > { %v4754_v28 = vld [vmem:[#allocation2 + $0xa0] sm:$0xff] }
 0xe64   : > { %4504 = vst.msk [vmem:[#allocation2 + $0x60] sm:$0xff] %vm692_vm13, %v4500_v37  ;;  %v4437_v38 = vpop.permute.xlu1 %4436  ;;  %v4449_v47 = vpop.permute.xlu0 %4448  ;;  %v4769_v37 = vld [vmem:[#allocation2 + $0x190] sm:$0xff] }
 0xe65   : > { %v4458_v30 = vsel %vm3152_vm8, %v4437_v38, %v4449_v47  ;;  %v4753_v38 = vld [vmem:[#allocation2 + $0x90] sm:$0xff] }
 0xe66   : > { %v4463_v57 = vmul.f32 %v4458_v30, %v9945_v49 }
 0xe68   : > { %4467 = vst.msk [vmem:[#allocation2 + $0x20] sm:$0xff] %vm692_vm13, %v4463_v57  ;;  %v4665_v13 = vpop.permute.xlu1 %4664  ;;  %v4677_v44 = vpop.permute.xlu0 %4676  ;;  %v4768_v57 = vld [vmem:[#allocation2 + $0x180] sm:$0xff] }
 0xe69   : > { %v4685_v15 = vsel %vm3380_vm11, %v4665_v13, %v4677_v44  ;;  %v4752_v44 = vld [vmem:[#allocation2 + $0x80] sm:$0xff] }
 0xe6a   : > { %v4690_v24 = vmul.f32 %v10177_v60, %v4685_v15 }
 0xe6c   : > { %4694 = vst.msk [vmem:[#allocation2 + $0x1f0] sm:$0xff] %vm692_vm13, %v4690_v24  ;;  %v4550_v18 = vpop.permute.xlu1 %4549  ;;  %v4562_v0 = vpop.permute.xlu0 %4561 }
 0xe6d   : > { %v4570_v26 = vsel %vm854_vm14, %v4550_v18, %v4562_v0 }
 0xe6e   : > { %v4575_v31 = vmul.f32 %v10189_v11, %v4570_v26 }
 0xe70   : > { %4579 = vst.msk [vmem:[#allocation2 + $0xf0] sm:$0xff] %vm692_vm13, %v4575_v31  ;;  %v4628_v21 = vpop.permute.xlu1 %4627  ;;  %v4640_v49 = vpop.permute.xlu0 %4639  ;;  %v4766_v31 = vld [vmem:[#allocation2 + $0x160] sm:$0xff] }
 0xe71   : > { %v4648_v39 = vsel %vm11430_vm9, %v4628_v21, %v4640_v49  ;;  %v4750_v49 = vld [vmem:[#allocation2 + $0x60] sm:$0xff]  ;;  %vm11433_vm9 = vmmov %vm11432_vm12 }
 0xe72   : > { %v4653_v50 = vmul.f32 %v10201_v22, %v4648_v39 }
 0xe73   : > { %v4775_v40 = vld [vmem:[#allocation2 + $0x1f0] sm:$0xff] }
 0xe74   : > { %4657 = vst.msk [vmem:[#allocation2 + $0x1b0] sm:$0xff] %vm692_vm13, %v4653_v50  ;;  %v4513_v51 = vpop.permute.xlu1 %4512  ;;  %7610 = vmatprep.subr.mxu1 %v4775_v40  ;;  %v4525_v54 = vpop.permute.xlu0 %4524  ;;  %v4765_v50 = vld [vmem:[#allocation2 + $0x150] sm:$0xff] }
 0xe75   : > { %v4533_v61 = vsel %vm11431_vm5, %v4513_v51, %v4525_v54  ;;  %v4749_v40 = vld [vmem:[#allocation2 + $0x50] sm:$0xff]  ;;  %v10325_v51 = vld [vmem:[%s11284_s3 + $0xc0] ss:$0 sm:$0xff]  ;;  %vm11434_vm5 = vmmov %vm11433_vm9 }
 0xe76   : > { %v4538_v27 = vmul.f32 %v10217_v48, %v4533_v61 }
 0xe77   : > { %v4759_v23 = vld [vmem:[#allocation2 + $0xf0] sm:$0xff] }
 0xe78   : > { %4542 = vst.msk [vmem:[#allocation2 + $0xb0] sm:$0xff] %vm692_vm13, %v4538_v27  ;;  %v4591_v16 = vpop.permute.xlu1 %4590  ;;  %7611 = vmatpush3.msra.mxu1 %v4759_v23  ;;  %v4603_v29 = vpop.permute.xlu0 %4602  ;;  %v4764_v27 = vld [vmem:[#allocation2 + $0x140] sm:$0xff] }
 0xe79   : > { %v4611_v43 = vsel %vm719_vm1, %v4591_v16, %v4603_v29  ;;  %7612 = vmatprep.subr.mxu1 %v4774_v12  ;;  %v4748_v16 = vld [vmem:[#allocation2 + $0x40] sm:$0xff]  ;;  %v4763_v12 = vld [vmem:[#allocation2 + $0x130] sm:$0xff] }
 0xe7a   : > { %v4616_v52 = vmul.f32 %v10231_v6, %v4611_v43  ;;  %7613 = vmatpush3.msra.mxu1 %v4758_v8 }
 0xe7b   : > { %7614 = vmatprep.subr.mxu1 %v4773_v62  ;;  %v4771_v53 = vld [vmem:[#allocation2 + $0x1b0] sm:$0xff]  ;;  %v4762_v62 = vld [vmem:[#allocation2 + $0x120] sm:$0xff] }
 0xe7c   : > { %4620 = vst.msk [vmem:[#allocation2 + $0x170] sm:$0xff] %vm692_vm13, %v4616_v52  ;;  %v4476_v17 = vpop.permute.xlu1 %4475  ;;  %7615 = vmatpush3.msra.mxu1 %v4757_v41  ;;  %v4488_v63 = vpop.permute.xlu0 %4487 }
 0xe7d   : > { %v4496_v35 = vsel %vm3190_vm4, %v4476_v17, %v4488_v63  ;;  %7616 = vmatprep.subr.mxu1 %v4772_v14  ;;  %v4746_v17 = vld [vmem:[#allocation2 + $0x20] sm:$0xff]  ;;  %v4761_v14 = vld [vmem:[#allocation2 + $0x110] sm:$0xff] }
 0xe7e   : > { %v4501_v19 = vmul.f32 %v10239_v45, %v4496_v35  ;;  %7617 = vmatpush3.msra.mxu1 %v4756_v9 }
 0xe7f   : > { %7618 = vmatprep.subr.mxu1 %v4771_v53  ;;  %v4755_v56 = vld [vmem:[#allocation2 + $0xb0] sm:$0xff]  ;;  %v4760_v53 = vld [vmem:[#allocation2 + $0x100] sm:$0xff] }
 0xe80   : > { %4505 = vst.msk [vmem:[#allocation2 + $0x70] sm:$0xff] %vm692_vm13, %v4501_v19  ;;  %v4435_v20 = vpop.permute.xlu1 %4434  ;;  %7619 = vmatpush3.msra.mxu1 %v4755_v56  ;;  %v4447_v7 = vpop.permute.xlu0 %4446  ;;  %v4732_v56 = vld [vmem:[%s11282_s1 + $0x1e0] sm:$0xff] }
 0xe81   : > { %v4457_v25 = vsel %vm3152_vm8, %v4435_v20, %v4447_v7  ;;  %7620 = vmatprep.subr.mxu1 %v4770_v42  ;;  %v4736_v42 = vld [vmem:[%s11282_s1 + $0x208] sm:$0xff] }
 0xe82   : > { %v4462_v36 = vmul.f32 %v8041_v32, %v4457_v25  ;;  %7621 = vmatpush3.msra.mxu1 %v4754_v28 }
 0xe83   : > { %7622 = vmatprep.subr.mxu1 %v4769_v37  ;;  %v4767_v24 = vld [vmem:[#allocation2 + $0x170] sm:$0xff] }
 0xe84   : > { %4466 = vst.msk [vmem:[#allocation2 + $0x10] sm:$0xff] %vm692_vm13, %v4462_v36  ;;  %v4439_v47 = vpop.permute.xlu1 %4438  ;;  %7623 = vmatpush3.msra.mxu1 %v4753_v38  ;;  %v4451_v30 = vpop.permute.xlu0 %4450  ;;  %v4735_v36 = vld [vmem:[%s11282_s1 + $0x200] sm:$0xff]  ;;  %v4739_v38 = vld [vmem:[%s11282_s1 + $0x228] sm:$0xff] }
 0xe85   : > { %v4459_v13 = vsel %vm3152_vm8, %v4439_v47, %v4451_v30  ;;  %7624 = vmatprep.subr.mxu1 %v4768_v57  ;;  %v4738_v57 = vld [vmem:[%s11282_s1 + $0x220] sm:$0xff] }
 0xe86   : > { %v4464_v15 = vmul.f32 %v8041_v32, %v4459_v13  ;;  %7625 = vmatpush3.msra.mxu1 %v4752_v44  ;;  %v4742_v44 = vld [vmem:[%s11282_s1 + $0x248] sm:$0xff] }
 0xe87   : > { %7626 = vmatprep.subr.mxu1 %v4767_v24  ;;  %v4751_v18 = vld [vmem:[#allocation2 + $0x70] sm:$0xff]  ;;  %v4741_v24 = vld [vmem:[%s11282_s1 + $0x240] sm:$0xff] }
 0xe88   : > { %4468 = vst.msk [vmem:[#allocation2 + $0x30] sm:$0xff] %vm692_vm13, %v4464_v15  ;;  %v4433_v0 = vpop.permute.xlu1 %4432  ;;  %7627 = vmatpush3.msra.mxu1 %v4751_v18  ;;  %v4445_v26 = vpop.permute.xlu0 %4444 }
 0xe89   : > { %v4456_v21 = vsel %vm3152_vm8, %v4433_v0, %v4445_v26  ;;  %7628 = vmatprep.subr.mxu1 %v4766_v31  ;;  %v4737_v0 = vld [vmem:[%s11282_s1 + $0x210] sm:$0xff] }
 0xe8a   : > { %v4461_v39 = vmul.f32 %v8041_v32, %v4456_v21  ;;  %7629 = vmatpush3.msra.mxu1 %v4750_v49  ;;  %v4740_v26 = vld [vmem:[%s11282_s1 + $0x230] sm:$0xff] }
 0xe8b   : > { %7630 = vmatprep.subr.mxu1 %v4765_v50  ;;  %v4745_v35 = vld [vmem:[#allocation2 + $0x10] sm:$0xff] }
 0xe8c   : > { %4465 = vst.msk [vmem:[#allocation2] sm:$0xff] %vm692_vm13, %v4461_v39  ;;  %v4700_v54 = vpop.permute.xlu1 %4699  ;;  %7631 = vmatpush3.msra.mxu1 %v4749_v40  ;;  %v4712_v61 = vpop.permute.xlu0 %4711  ;;  %v4743_v31 = vld [vmem:[%s11282_s1 + $0x250] sm:$0xff] }
 0xe8d   : > { %v4721_v23 = vsel %vm3418_vm2, %v4700_v54, %v4712_v61  ;;  %7632 = vmatprep.subr.mxu1 %v4764_v27 }
 0xe8e   : > { %v4726_v29 = vmul.f32 %v10325_v51, %v4721_v23  ;;  %7633 = vmatpush3.msra.mxu1 %v4748_v16 }
 0xe8f   : > { %7634 = vmatprep.subr.mxu1 %v4763_v12  ;;  %v4747_v43 = vld [vmem:[#allocation2 + $0x30] sm:$0xff] }
 0xe90   : > { %4730 = vst.msk [vmem:[#allocation2 + $0x220] sm:$0xff] %vm692_vm13, %v4726_v29  ;;  %v4702_v8 = vpop.permute.xlu1 %4701  ;;  %7635 = vmatpush3.msra.mxu1 %v4747_v43  ;;  %v4714_v52 = vpop.permute.xlu0 %4713 }
 0xe91   : > { %v4722_v41 = vsel %vm3418_vm2, %v4702_v8, %v4714_v52  ;;  %7636 = vmatprep.subr.mxu1 %v4762_v62 }
 0xe92   : > { %v4727_v63 = vmul.f32 %v10325_v51, %v4722_v41  ;;  %7637 = vmatpush3.msra.mxu1 %v4746_v17 }
 0xe93   : > { %7638 = vmatprep.subr.mxu1 %v4761_v14  ;;  %v4744_v7 = vld [vmem:[#allocation2] sm:$0xff] }
 0xe94   : > { %4731 = vst.msk [vmem:[#allocation2 + $0x230] sm:$0xff] %vm692_vm13, %v4727_v63  ;;  %v4698_v9 = vpop.permute.xlu1 %4697  ;;  %7639 = vmatpush3.msra.mxu1 %v4745_v35  ;;  %v4710_v19 = vpop.permute.xlu0 %4709 }
 0xe95   : > { %v4720_v20 = vsel %vm3418_vm2, %v4698_v9, %v4710_v19  ;;  %7640 = vmatprep.subr.mxu1 %v4760_v53 }
 0xe96   : > { %v4725_v25 = vmul.f32 %v10325_v51, %v4720_v20  ;;  %7641 = vmatpush3.msra.mxu1 %v4744_v7 }
 0xe97   : > { %4857 = vmatmul.mubr.f32.vlgmr.msra.gmra.mxu1 %v4732_v56  ;;  %v4778_v13 = vld [vmem:[#allocation2 + $0x220] sm:$0xff] }
 0xe98   : > { %4729 = vst.msk [vmem:[#allocation2 + $0x210] sm:$0xff] %vm692_vm13, %v4725_v25  ;;  %v4696_v28 = vpop.permute.xlu1 %4695  ;;  %v4708_v32 = vpop.permute.xlu0 %4707  ;;  %4861 = vmatprep.mubr.f32.mxu1 %v4736_v42 }
 0xe99   : > { %v4719_v37 = vsel %vm3418_vm2, %v4696_v28, %v4708_v32 }
 0xe9a   : > { %v4724_v47 = vmul.f32 %v10325_v51, %v4719_v37 }
 0xe9b   : > { %v4779_v30 = vld [vmem:[#allocation2 + $0x230] sm:$0xff]  ;;  %4862 = vmatmul.mubr.f32.gmra.mxu1 %v4735_v36 }
 0xe9c   : > { %4728 = vst.msk [vmem:[#allocation2 + $0x200] sm:$0xff] %vm692_vm13, %v4724_v47  ;;  %7796 = vmatprep.subr.mxu0 %v4779_v30  ;;  %4866 = vmatprep.mubr.f32.mxu1 %v4739_v38 }
 0xe9d   : > { %7797 = vmatpush3.msra.mxu0 %v4779_v30 }
 0xe9e   : > { %7798 = vmatprep.subr.mxu0 %v4778_v13 }
 0xe9f   : > { %7799 = vmatpush3.msra.mxu0 %v4778_v13  ;;  %v4777_v15 = vld [vmem:[#allocation2 + $0x210] sm:$0xff]  ;;  %4867 = vmatmul.mubr.f32.gmra.mxu1 %v4738_v57 }
 0xea0   : > { %7800 = vmatprep.subr.mxu0 %v4777_v15  ;;  %4871 = vmatprep.mubr.f32.mxu1 %v4742_v44 }
 0xea1   : > { %7801 = vmatpush3.msra.mxu0 %v4777_v15 }
 0xea3   : > { %v4776_v18 = vld [vmem:[#allocation2 + $0x200] sm:$0xff]  ;;  %4872 = vmatmul.mubr.f32.gmra.mxu1 %v4741_v24 }
 0xea4   : > { %7802 = vmatprep.subr.mxu0 %v4776_v18 }
 0xea5   : > { %7803 = vmatpush3.msra.mxu0 %v4776_v18  ;;  %v5043_v37 = vpop.permute.xlu1 %5042  ;;  %v10403_v44 = vpop.permute.xlu0 %5047 }
 0xea6   : > { %7805 = vmatmul.mubr.msk.f32.vlgmr.msra.gmra.mxu0 %vm11432_vm12, %v4737_v0  ;;  %vm11437_vm12 = vcmask 105472  }
 0xea7   : > { %7807 = vmatprep.mubr.msk.f32.mxu0 %vm11433_vm9, %v4740_v26  ;;  %vm11438_vm9 = vmmov %vm11434_vm5 }
 0xeaa   : > { %7808 = vmatmul.mubr.msk.f32.gmra.mxu0 %vm11434_vm5, %v4743_v31  ;;  %v10401_v38 = vpop.permute.xlu1 %5067  ;;  %vm11439_vm5 = vcmask 23552  }
 0xeaf   : > { %v5038_v47 = vpop.permute.xlu1 %5037 }
 0xeb4   : > { %v5064_v30 = vpop.permute.xlu1 %5063 }
 0xeb9   : > { %v5033_v57 = vpop.permute.xlu1 %5032 }
 0xebe   : > { %v5060_v13 = vpop.permute.xlu1 %5059 }
 0xec2   : > { %v5056_v15 = vpop.permute.xlu1 %5055 }
 0xf57   : > { %v7642_v21 = vpop.f32.mrf.mxu1 }
 0xf59   : > { %v7643_v49 = vpop.f32.mrf.mxu1 }
 0xf5a   : > { %v7644_v29 = vadd.f32 %v7643_v49, %v7642_v21 }
 0xf5b   : > { %v7645_v39 = vpop.f32.mrf.mxu1 }
 0xf5d   : > { %v7646_v50 = vpop.f32.mrf.mxu1 }
 0xf5e   : > { %v7647_v61 = vadd.f32 %v7646_v50, %v7645_v39 }
 0xf5f   : > { %v7648_v40 = vpop.f32.mrf.mxu1 }
 0xf61   : > { %v7649_v54 = vpop.f32.mrf.mxu1 }
 0xf62   : > { %v7650_v52 = vadd.f32 %v7649_v54, %v7648_v40 }
 0xf63   : > { %v7651_v27 = vpop.f32.mrf.mxu1 }
 0xf65   : > { %v7652_v16 = vpop.f32.mrf.mxu1 }
 0xf66   : > { %v7806_v23 = vpop.f32.mrf.mxu0  ;;  %v7653_v41 = vadd.f32 %v7652_v16, %v7651_v27 }
 0xf67   : > { %v10373_v12 = vadd.f32 %v7806_v23, %v7647_v61 }
 0xf68   : > { %v4943_v43 = vpop.f32.mrf.mxu0 }
 0xf69   : > { %v10375_v8 = vadd.f32 %v7644_v29, %v4943_v43  ;;  %v4983_v62 = vmul.f32 %v10373_v12, %v10373_v12  ;;  %v4969_v28 = vsel %vm692_vm13, %v10373_v12, 0.0 }
 0xf6a   : > { %v7809_v17 = vpop.f32.mrf.mxu0 }
 0xf6b   : > { %v4989_v63 = vsel %vm692_vm13, %v4983_v62, 0.0  ;;  %v4966_v14 = vsel %vm692_vm13, %v10375_v8, 0.0  ;;  %v4982_v35 = vmul.f32 %v10375_v8, %v10375_v8  ;;  %v10386_v53 = vadd.f32 %v7809_v17, %v7653_v41 }
 0xf6c   : > { %4990 = vadd.xlane.f32.xlu0 %v4989_v63  ;;  %v4953_v9 = vpop.f32.mrf.mxu0  ;;  %4967 = vadd.xlane.f32.xlu1 %v4966_v14 }
 0xf6d   : > { %v10384_v19 = vadd.f32 %v7650_v52, %v4953_v9  ;;  %v4986_v20 = vsel %vm692_vm13, %v4982_v35, 0.0  ;;  %v4985_v25 = vmul.f32 %v10386_v53, %v10386_v53  ;;  %v4975_v32 = vsel %vm692_vm13, %v10386_v53, 0.0 }
 0xf6f   : > { %v4972_v56 = vsel %vm692_vm13, %v10384_v19, 0.0  ;;  %v4984_v7 = vmul.f32 %v10384_v19, %v10384_v19  ;;  %v4995_v36 = vsel %vm692_vm13, %v4985_v25, 0.0 }
 0xf70   : > { %4973 = vadd.xlane.f32.xlu0 %v4972_v56  ;;  %4987 = vadd.xlane.f32.xlu1 %v4986_v20 }
 0xf71   : > { %v4992_v42 = vsel %vm692_vm13, %v4984_v7, 0.0 }
 0xf74   : > { %4993 = vadd.xlane.f32.xlu0 %v4992_v42  ;;  %4970 = vadd.xlane.f32.xlu1 %v4969_v28 }
 0xf78   : > { %4976 = vadd.xlane.f32.xlu1 %v4975_v32  ;;  %4996 = vadd.xlane.f32.xlu0 %v4995_v36 }
 0xff5   : > { %v4968_v24 = vpop.xlane.xlu1 %4967  ;;  %v4991_v18 = vpop.xlane.xlu0 %4990 }
 0xff6   : > { %v4978_v0 = vmul.f32 0.0625, %v4968_v24  ;;  %v4999_v29 = vmul.f32 0.0625, %v4991_v18 }
 0xff8   : > { %v5002_v21 = vmul.f32 %v4978_v0, %v4978_v0  ;;  %v5014_v36 = vsub.f32 %v10375_v8, %v4978_v0 }
 0xff9   : > { %v4988_v26 = vpop.xlane.xlu1 %4987  ;;  %v4974_v31 = vpop.xlane.xlu0 %4973 }
 0xffa   : > { %v4998_v49 = vmul.f32 0.0625, %v4988_v26  ;;  %v4980_v39 = vmul.f32 0.0625, %v4974_v31 }
 0xffc   : > { %v5006_v50 = vsub.f32 %v4998_v49, %v5002_v21  ;;  %v5004_v40 = vmul.f32 %v4980_v39, %v4980_v39  ;;  %v5016_v31 = vsub.f32 %v10384_v19, %v4980_v39 }
 0xffd   : > { %v4971_v54 = vpop.xlane.xlu1 %4970  ;;  %v4994_v61 = vpop.xlane.xlu0 %4993 }
 0xffe   : > { %v5010_v27 = vmax.f32 %v5006_v50, 0.0  ;;  %v4979_v23 = vmul.f32 0.0625, %v4971_v54  ;;  %v5000_v16 = vmul.f32 0.0625, %v4994_v61 }
0x1000   : > { %v5018_v43 = vadd.f32 1e-05, %v5010_v27  ;;  %v5003_v52 = vmul.f32 %v4979_v23, %v4979_v23  ;;  %v5008_v62 = vsub.f32 %v5000_v16, %v5004_v40  ;;  %v5015_v50 = vsub.f32 %v10373_v12, %v4979_v23 }
0x1001   : > { %v4977_v41 = vpop.xlane.xlu1 %4976  ;;  %v4997_v17 = vpop.xlane.xlu0 %4996 }
0x1002   : > { %8009 = vrsqrt.f32 %v5018_v43  ;;  %v5007_v63 = vsub.f32 %v4999_v29, %v5003_v52  ;;  %v5012_v14 = vmax.f32 %v5008_v62, 0.0  ;;  %v4981_v35 = vmul.f32 0.0625, %v4977_v41  ;;  %v5384_v62 = vld [vmem:[%s11282_s1 + $0x270] sm:$0xff] }
0x1003   : > { %v5001_v9 = vmul.f32 0.0625, %v4997_v17  ;;  %7818 = vmatprep.mubr.msk.f32.mxu1 %vm11438_vm9, %v5384_v62  ;;  %vm11440_vm9 = vmmov %vm11439_vm5 }
0x1004   : > { %v5011_v56 = vmax.f32 %v5007_v63, 0.0  ;;  %v5020_v20 = vadd.f32 1e-05, %v5012_v14  ;;  %v5005_v7 = vmul.f32 %v4981_v35, %v4981_v35 }
0x1006   : > { %v5019_v42 = vadd.f32 1e-05, %v5011_v56  ;;  %8011 = vrsqrt.f32 %v5020_v20  ;;  %v5009_v25 = vsub.f32 %v5001_v9, %v5005_v7 }
0x1008   : > { %8013 = vrsqrt.f32 %v5019_v42  ;;  %v5013_v28 = vmax.f32 %v5009_v25, 0.0 }
0x100a   : > { %v5021_v32 = vadd.f32 1e-05, %v5013_v28 }
0x100c   : > { %8015 = vrsqrt.f32 %v5021_v32 }
0x100f   : > { %v8010_v24 = vpop.eup %8009 }
0x1010   : > { %v5026_v18 = vmul.f32 %v8010_v24, %v5014_v36 }
0x1012   : > { %v5050_v26 = vmul.f32 %v5033_v57, %v5026_v18  ;;  %v5017_v57 = vsub.f32 %v10386_v53, %v4981_v35 }
0x1013   : > { %v8012_v21 = vpop.eup %8011 }
0x1014   : > { %v5070_v49 = vadd.f32 %v5056_v15, %v5050_v26  ;;  %v5028_v40 = vmul.f32 %v8012_v21, %v5016_v31 }
0x1015   : > { %v8014_v54 = vpop.eup %8013 }
0x1016   : > { %v10409_v61 = vadd.f32 %v5070_v49, %v9694_v58  ;;  %v5027_v27 = vmul.f32 %v8014_v54, %v5015_v50  ;;  %v5052_v16 = vmul.f32 %v5043_v37, %v5028_v40 }
0x1018   : > { %5230 = vst.msk [vmem:[#allocation2 + $0x100] sm:$0xff] %vm692_vm13, %v10409_v61  ;;  %v5051_v8 = vmul.f32 %v5038_v47, %v5027_v27  ;;  %v5072_v0 = vadd.f32 %v5064_v30, %v5052_v16  ;;  %5320 = vrot.lane.b32.xlu0 %v10409_v61, %s11435_s18  ;;  %5308 = vrot.lane.b32.xlu1 %v10409_v61, %s11436_s27 }
0x1019   : > { %v8016_v12 = vpop.eup %8015 }
0x101a   : > { %v5071_v19 = vadd.f32 %v5060_v13, %v5051_v8  ;;  %v10419_v58 = vadd.f32 %v5072_v0, %v9703_v46  ;;  %v5029_v15 = vmul.f32 %v8016_v12, %v5017_v57 }
0x101c   : > { %v10422_v37 = vadd.f32 %v5071_v19, %v9705_v59  ;;  %5232 = vst.msk [vmem:[#allocation2 + $0x120] sm:$0xff] %vm692_vm13, %v10419_v58  ;;  %v5053_v53 = vmul.f32 %v10403_v44, %v5029_v15  ;;  %5205 = vrot.lane.b32.xlu0 %v10409_v61, %s11420_s29  ;;  %5193 = vrot.lane.b32.xlu1 %v10409_v61, %s11421_s23  ;;  %v5383_v59 = vld [vmem:[%s11282_s1 + $0x268] sm:$0xff] }
0x101d   : > { %5530 = vmatprep.mubr.f32.mxu0 %v5383_v59  ;;  %v8042_v59 = vld [vmem:[%s11284_s3 + $0xb7] ss:$0 sm:$0xff] }
0x101e   : > { %5231 = vst.msk [vmem:[#allocation2 + $0x110] sm:$0xff] %vm692_vm13, %v10422_v37  ;;  %v5073_v46 = vadd.f32 %v10401_v38, %v5053_v53 }
0x1020   : > { %v5077_v47 = vadd.f32 %v5073_v46, %v9717_v55  ;;  %5283 = vrot.lane.b32.xlu0 %v10409_v61, %s11389_s16  ;;  %5271 = vrot.lane.b32.xlu1 %v10409_v61, %s11390_s6 }
0x1022   : > { %5233 = vst.msk [vmem:[#allocation2 + $0x130] sm:$0xff] %vm692_vm13, %v5077_v47 }
0x1024   : > { %5168 = vrot.lane.b32.xlu0 %v10409_v61, %s11391_s21  ;;  %5156 = vrot.lane.b32.xlu1 %v10409_v61, %s11392_s9 }
0x1028   : > { %5246 = vrot.lane.b32.xlu0 %v10409_v61, %s11393_s22  ;;  %5234 = vrot.lane.b32.xlu1 %v10409_v61, %s11422_s15 }
0x102c   : > { %5131 = vrot.lane.b32.xlu0 %v10409_v61, %s11423_s8  ;;  %5119 = vrot.lane.b32.xlu1 %v10409_v61, %s11404_s30 }
0x1030   : > { %5322 = vrot.lane.b32.xlu0 %v10422_v37, %s11435_s18  ;;  %5310 = vrot.lane.b32.xlu1 %v10422_v37, %s11436_s27 }
0x1034   : > { %5207 = vrot.lane.b32.xlu0 %v10422_v37, %s11420_s29  ;;  %5195 = vrot.lane.b32.xlu1 %v10422_v37, %s11421_s23 }
0x1038   : > { %5285 = vrot.lane.b32.xlu0 %v10422_v37, %s11389_s16  ;;  %5273 = vrot.lane.b32.xlu1 %v10422_v37, %s11390_s6 }
0x103c   : > { %5170 = vrot.lane.b32.xlu0 %v10422_v37, %s11391_s21  ;;  %5158 = vrot.lane.b32.xlu1 %v10422_v37, %s11392_s9 }
0x1040   : > { %5248 = vrot.lane.b32.xlu0 %v10422_v37, %s11393_s22  ;;  %5236 = vrot.lane.b32.xlu1 %v10422_v37, %s11422_s15 }
0x1044   : > { %5133 = vrot.lane.b32.xlu0 %v10422_v37, %s11423_s8  ;;  %5121 = vrot.lane.b32.xlu1 %v10422_v37, %s11404_s30 }
0x1048   : > { %5324 = vrot.lane.b32.xlu0 %v10419_v58, %s11435_s18  ;;  %5312 = vrot.lane.b32.xlu1 %v10419_v58, %s11436_s27 }
0x104c   : > { %5209 = vrot.lane.b32.xlu0 %v10419_v58, %s11420_s29  ;;  %5197 = vrot.lane.b32.xlu1 %v10419_v58, %s11421_s23 }
0x1050   : > { %5287 = vrot.lane.b32.xlu0 %v10419_v58, %s11389_s16  ;;  %5275 = vrot.lane.b32.xlu1 %v10419_v58, %s11390_s6 }
0x1054   : > { %5172 = vrot.lane.b32.xlu0 %v10419_v58, %s11391_s21  ;;  %5160 = vrot.lane.b32.xlu1 %v10419_v58, %s11392_s9 }
0x1058   : > { %5250 = vrot.lane.b32.xlu0 %v10419_v58, %s11393_s22  ;;  %5238 = vrot.lane.b32.xlu1 %v10419_v58, %s11422_s15 }
0x105c   : > { %5135 = vrot.lane.b32.xlu0 %v10419_v58, %s11423_s8  ;;  %5123 = vrot.lane.b32.xlu1 %v10419_v58, %s11404_s30 }
0x1060   : > { %5098 = vrot.lane.b32.xlu0 %v10419_v58, %s11405_s14  ;;  %5086 = vrot.lane.b32.xlu1 %v10419_v58, %s11406_s24 }
0x1064   : > { %5326 = vrot.lane.b32.xlu0 %v5077_v47, %s11435_s18  ;;  %5314 = vrot.lane.b32.xlu1 %v5077_v47, %s11436_s27  ;;  %s11453_s18 = smov 120   ;;  %s11454_s27 = smov 56  }
0x1068   : > { %5211 = vrot.lane.b32.xlu0 %v5077_v47, %s11420_s29  ;;  %5199 = vrot.lane.b32.xlu1 %v5077_v47, %s11421_s23 }
0x106c   : > { %5289 = vrot.lane.b32.xlu0 %v5077_v47, %s11389_s16  ;;  %5277 = vrot.lane.b32.xlu1 %v5077_v47, %s11390_s6  ;;  %s11455_s16 = smov 65   ;;  %s11456_s6 = smov 57  }
0x1070   : > { %5174 = vrot.lane.b32.xlu0 %v5077_v47, %s11391_s21  ;;  %5162 = vrot.lane.b32.xlu1 %v5077_v47, %s11392_s9  ;;  %s11457_s21 = smov 63   ;;  %s11458_s9 = smov 72  }
0x1074   : > { %5252 = vrot.lane.b32.xlu0 %v5077_v47, %s11393_s22  ;;  %5240 = vrot.lane.b32.xlu1 %v5077_v47, %s11422_s15 }
0x1078   : > { %5137 = vrot.lane.b32.xlu0 %v5077_v47, %s11423_s8  ;;  %5125 = vrot.lane.b32.xlu1 %v5077_v47, %s11404_s30  ;;  %s11459_s30 = smov 73  }
0x107c   : > { %5096 = vrot.lane.b32.xlu0 %v10422_v37, %s11405_s14  ;;  %5084 = vrot.lane.b32.xlu1 %v10422_v37, %s11406_s24 }
0x1080   : > { %5100 = vrot.lane.b32.xlu0 %v5077_v47, %s11405_s14  ;;  %5088 = vrot.lane.b32.xlu1 %v5077_v47, %s11406_s24 }
0x1084   : > { %5094 = vrot.lane.b32.xlu0 %v10409_v61, %s11405_s14  ;;  %5082 = vrot.lane.b32.xlu1 %v10409_v61, %s11406_s24  ;;  %s11460_s14 = smov 8   ;;  %s11461_s24 = smov 9  }
0x1088   : > { %5361 = vrot.lane.b32.xlu0 %v10419_v58, %s11407_s7  ;;  %5349 = vrot.lane.b32.xlu1 %v10419_v58, %s11408_s25 }
0x108a   : > { %v5309_v55 = vpop.permute.xlu1 %5308  ;;  %v5321_v38 = vpop.permute.xlu0 %5320 }
0x108b   : > { %v5332_v30 = vsel %vm3380_vm11, %v5309_v55, %v5321_v38 }
0x108c   : > { %v5337_v13 = vmul.f32 %v5332_v30, %v10177_v60  ;;  %5363 = vrot.lane.b32.xlu0 %v5077_v47, %s11407_s7  ;;  %5351 = vrot.lane.b32.xlu1 %v5077_v47, %s11408_s25 }
0x108e   : > { %5341 = vst.msk [vmem:[#allocation2 + $0x1c0] sm:$0xff] %vm692_vm13, %v5337_v13  ;;  %v5194_v44 = vpop.permute.xlu1 %5193  ;;  %v5206_v39 = vpop.permute.xlu0 %5205 }
0x108f   : > { %v5217_v23 = vsel %vm854_vm14, %v5194_v44, %v5206_v39 }
0x1090   : > { %v5222_v29 = vmul.f32 %v5217_v23, %v10189_v11  ;;  %5359 = vrot.lane.b32.xlu0 %v10422_v37, %s11407_s7  ;;  %5347 = vrot.lane.b32.xlu1 %v10422_v37, %s11408_s25 }
0x1092   : > { %5226 = vst.msk [vmem:[#allocation2 + $0xc0] sm:$0xff] %vm692_vm13, %v5222_v29  ;;  %v5272_v43 = vpop.permute.xlu1 %5271  ;;  %v5284_v52 = vpop.permute.xlu0 %5283  ;;  %v8044_v29 = vld [vmem:[%s11284_s3 + $0xb6] ss:$0 sm:$0xff] }
0x1093   : > { %v5295_v41 = vsel %vm11437_vm12, %v5272_v43, %v5284_v52 }
0x1094   : > { %v5300_v17 = vmul.f32 %v5295_v41, %v10201_v22  ;;  %5357 = vrot.lane.b32.xlu0 %v10409_v61, %s11407_s7  ;;  %5345 = vrot.lane.b32.xlu1 %v10409_v61, %s11408_s25 }
0x1096   : > { %5304 = vst.msk [vmem:[#allocation2 + $0x180] sm:$0xff] %vm692_vm13, %v5300_v17  ;;  %v5157_v63 = vpop.permute.xlu1 %5156  ;;  %v5169_v14 = vpop.permute.xlu0 %5168  ;;  %v8045_v17 = vld [vmem:[%s11284_s3 + $0xb2] ss:$0 sm:$0xff] }
0x1097   : > { %v5180_v35 = vsel %vm11439_vm5, %v5157_v63, %v5169_v14  ;;  %vm11441_vm5 = vmmov %vm11437_vm12 }
0x1098   : > { %v5185_v9 = vmul.f32 %v5180_v35, %v10217_v48 }
0x109a   : > { %5189 = vst.msk [vmem:[#allocation2 + $0x80] sm:$0xff] %vm692_vm13, %v5185_v9  ;;  %v5235_v56 = vpop.permute.xlu1 %5234  ;;  %v5247_v20 = vpop.permute.xlu0 %5246 }
0x109b   : > { %v5258_v7 = vsel %vm719_vm1, %v5235_v56, %v5247_v20  ;;  %v8046_v56 = vld [vmem:[%s11284_s3 + $0xb5] ss:$0 sm:$0xff] }
0x109c   : > { %v5263_v42 = vmul.f32 %v5258_v7, %v10231_v6 }
0x109e   : > { %5267 = vst.msk [vmem:[#allocation2 + $0x140] sm:$0xff] %vm692_vm13, %v5263_v42  ;;  %v5120_v25 = vpop.permute.xlu1 %5119  ;;  %v5132_v28 = vpop.permute.xlu0 %5131 }
0x109f   : > { %v5143_v32 = vsel %vm3190_vm4, %v5120_v25, %v5132_v28  ;;  %v8047_v28 = vld [vmem:[%s11284_s3 + $0xb1] ss:$0 sm:$0xff] }
0x10a0   : > { %v5148_v36 = vmul.f32 %v5143_v32, %v10239_v45 }
0x10a2   : > { %5152 = vst.msk [vmem:[#allocation2 + $0x40] sm:$0xff] %vm692_vm13, %v5148_v36  ;;  %v5311_v24 = vpop.permute.xlu1 %5310  ;;  %v5323_v18 = vpop.permute.xlu0 %5322  ;;  %v10615_v36 = vld [vmem:[%s11284_s3 + $0xb0] ss:$0 sm:$0xff] }
0x10a3   : > { %v5333_v26 = vsel %vm3380_vm11, %v5311_v24, %v5323_v18 }
0x10a4   : > { %v5338_v31 = vmul.f32 %v5333_v26, %v10177_v60 }
0x10a6   : > { %5342 = vst.msk [vmem:[#allocation2 + $0x1d0] sm:$0xff] %vm692_vm13, %v5338_v31  ;;  %v5196_v21 = vpop.permute.xlu1 %5195  ;;  %v5208_v49 = vpop.permute.xlu0 %5207 }
0x10a7   : > { %v5218_v50 = vsel %vm854_vm14, %v5196_v21, %v5208_v49 }
0x10a8   : > { %v5223_v40 = vmul.f32 %v5218_v50, %v10189_v11 }
0x10aa   : > { %5227 = vst.msk [vmem:[#allocation2 + $0xd0] sm:$0xff] %vm692_vm13, %v5223_v40  ;;  %v5274_v54 = vpop.permute.xlu1 %5273  ;;  %v5286_v61 = vpop.permute.xlu0 %5285 }
0x10ab   : > { %v5296_v27 = vsel %vm11437_vm12, %v5274_v54, %v5286_v61  ;;  %vm11442_vm12 = vmmov %vm11440_vm9 }
0x10ac   : > { %v5301_v16 = vmul.f32 %v5296_v27, %v10201_v22 }
0x10ae   : > { %5305 = vst.msk [vmem:[#allocation2 + $0x190] sm:$0xff] %vm692_vm13, %v5301_v16  ;;  %v5159_v8 = vpop.permute.xlu1 %5158  ;;  %v5171_v60 = vpop.permute.xlu0 %5170 }
0x10af   : > { %v5181_v0 = vsel %vm11440_vm9, %v5159_v8, %v5171_v60  ;;  %vm11443_vm9 = vmmov %vm11441_vm5 }
0x10b0   : > { %v5186_v57 = vmul.f32 %v5181_v0, %v10217_v48 }
0x10b2   : > { %5190 = vst.msk [vmem:[#allocation2 + $0x90] sm:$0xff] %vm692_vm13, %v5186_v57  ;;  %v5237_v12 = vpop.permute.xlu1 %5236  ;;  %v5249_v11 = vpop.permute.xlu0 %5248 }
0x10b3   : > { %v5259_v19 = vsel %vm719_vm1, %v5237_v12, %v5249_v11 }
0x10b4   : > { %v5264_v58 = vmul.f32 %v5259_v19, %v10231_v6 }
0x10b6   : > { %5268 = vst.msk [vmem:[#allocation2 + $0x150] sm:$0xff] %vm692_vm13, %v5264_v58  ;;  %v5122_v15 = vpop.permute.xlu1 %5121  ;;  %v5134_v22 = vpop.permute.xlu0 %5133 }
0x10b7   : > { %v5144_v37 = vsel %vm3190_vm4, %v5122_v15, %v5134_v22 }
0x10b8   : > { %v5149_v53 = vmul.f32 %v5144_v37, %v10239_v45  ;;  %v8043_v45 = vld [vmem:[%s11284_s3 + $0xb3] ss:$0 sm:$0xff] }
0x10ba   : > { %5153 = vst.msk [vmem:[#allocation2 + $0x50] sm:$0xff] %vm692_vm13, %v5149_v53  ;;  %v5313_v46 = vpop.permute.xlu1 %5312  ;;  %v5325_v48 = vpop.permute.xlu0 %5324 }
0x10bb   : > { %v5334_v47 = vsel %vm3380_vm11, %v5313_v46, %v5325_v48 }
0x10bc   : > { %v5339_v55 = vmul.f32 %v8042_v59, %v5334_v47 }
0x10be   : > { %5343 = vst.msk [vmem:[#allocation2 + $0x1e0] sm:$0xff] %vm692_vm13, %v5339_v55  ;;  %v5198_v6 = vpop.permute.xlu1 %5197  ;;  %v5210_v38 = vpop.permute.xlu0 %5209  ;;  %v5435_v55 = vld [vmem:[#allocation2 + $0x1d0] sm:$0xff] }
0x10bf   : > { %v5219_v30 = vsel %vm854_vm14, %v5198_v6, %v5210_v38  ;;  %v5419_v6 = vld [vmem:[#allocation2 + $0xd0] sm:$0xff] }
0x10c0   : > { %v5224_v13 = vmul.f32 %v8043_v45, %v5219_v30 }
0x10c2   : > { %5228 = vst.msk [vmem:[#allocation2 + $0xe0] sm:$0xff] %vm692_vm13, %v5224_v13  ;;  %v5276_v44 = vpop.permute.xlu1 %5275  ;;  %v5288_v39 = vpop.permute.xlu0 %5287 }
0x10c3   : > { %v5297_v23 = vsel %vm11441_vm5, %v5276_v44, %v5288_v39  ;;  %v5418_v44 = vld [vmem:[#allocation2 + $0xc0] sm:$0xff] }
0x10c4   : > { %v5302_v43 = vmul.f32 %v8044_v29, %v5297_v23 }
0x10c5   : > { %v5436_v46 = vld [vmem:[#allocation2 + $0x1e0] sm:$0xff] }
0x10c6   : > { %5306 = vst.msk [vmem:[#allocation2 + $0x1a0] sm:$0xff] %vm692_vm13, %v5302_v43  ;;  %v5161_v52 = vpop.permute.xlu1 %5160  ;;  %v5173_v62 = vpop.permute.xlu0 %5172 }
0x10c7   : > { %v5182_v41 = vsel %vm11442_vm12, %v5161_v52, %v5173_v62 }
0x10c8   : > { %v5187_v63 = vmul.f32 %v8045_v17, %v5182_v41 }
0x10c9   : > { %v5420_v47 = vld [vmem:[#allocation2 + $0xe0] sm:$0xff] }
0x10ca   : > { %5191 = vst.msk [vmem:[#allocation2 + $0xa0] sm:$0xff] %vm692_vm13, %v5187_v63  ;;  %v5239_v14 = vpop.permute.xlu1 %5238  ;;  %v5251_v35 = vpop.permute.xlu0 %5250 }
0x10cb   : > { %v5260_v9 = vsel %vm719_vm1, %v5239_v14, %v5251_v35  ;;  %v5431_v14 = vld [vmem:[#allocation2 + $0x190] sm:$0xff] }
0x10cc   : > { %v5265_v20 = vmul.f32 %v8046_v56, %v5260_v9  ;;  %v5415_v35 = vld [vmem:[#allocation2 + $0x90] sm:$0xff] }
0x10cd   : > { %v5432_v62 = vld [vmem:[#allocation2 + $0x1a0] sm:$0xff] }
0x10ce   : > { %5269 = vst.msk [vmem:[#allocation2 + $0x160] sm:$0xff] %vm692_vm13, %v5265_v20  ;;  %v5124_v7 = vpop.permute.xlu1 %5123  ;;  %v5136_v42 = vpop.permute.xlu0 %5135  ;;  %v5430_v20 = vld [vmem:[#allocation2 + $0x180] sm:$0xff] }
0x10cf   : > { %v5145_v25 = vsel %vm3190_vm4, %v5124_v7, %v5136_v42  ;;  %v5414_v42 = vld [vmem:[#allocation2 + $0x80] sm:$0xff] }
0x10d0   : > { %v5150_v32 = vmul.f32 %v8047_v28, %v5145_v25 }
0x10d2   : > { %5154 = vst.msk [vmem:[#allocation2 + $0x60] sm:$0xff] %vm692_vm13, %v5150_v32  ;;  %v5087_v24 = vpop.permute.xlu1 %5086  ;;  %v5099_v18 = vpop.permute.xlu0 %5098 }
0x10d3   : > { %v5108_v26 = vsel %vm3152_vm8, %v5087_v24, %v5099_v18 }
0x10d4   : > { %v5113_v31 = vmul.f32 %v10615_v36, %v5108_v26 }
0x10d5   : > { %v5428_v26 = vld [vmem:[#allocation2 + $0x160] sm:$0xff] }
0x10d6   : > { %5117 = vst.msk [vmem:[#allocation2 + $0x20] sm:$0xff] %vm692_vm13, %v5113_v31  ;;  %v5315_v21 = vpop.permute.xlu1 %5314  ;;  %v5327_v49 = vpop.permute.xlu0 %5326 }
0x10d7   : > { %v5335_v50 = vsel %vm3380_vm11, %v5315_v21, %v5327_v49  ;;  %vm11444_vm11 = vmmov %vm11442_vm12 }
0x10d8   : > { %v5340_v40 = vmul.f32 %v8042_v59, %v5335_v50  ;;  %v5427_v50 = vld [vmem:[#allocation2 + $0x150] sm:$0xff] }
0x10d9   : > { %v5412_v21 = vld [vmem:[#allocation2 + $0x60] sm:$0xff] }
0x10da   : > { %5344 = vst.msk [vmem:[#allocation2 + $0x1f0] sm:$0xff] %vm692_vm13, %v5340_v40  ;;  %v5200_v54 = vpop.permute.xlu1 %5199  ;;  %v5212_v61 = vpop.permute.xlu0 %5211  ;;  %v5411_v40 = vld [vmem:[#allocation2 + $0x50] sm:$0xff] }
0x10db   : > { %v5220_v27 = vsel %vm854_vm14, %v5200_v54, %v5212_v61 }
0x10dc   : > { %v5225_v16 = vmul.f32 %v8043_v45, %v5220_v27  ;;  %v5434_v45 = vld [vmem:[#allocation2 + $0x1c0] sm:$0xff] }
0x10dd   : > { %v5426_v27 = vld [vmem:[#allocation2 + $0x140] sm:$0xff] }
0x10de   : > { %5229 = vst.msk [vmem:[#allocation2 + $0xf0] sm:$0xff] %vm692_vm13, %v5225_v16  ;;  %v5278_v8 = vpop.permute.xlu1 %5277  ;;  %v5290_v60 = vpop.permute.xlu0 %5289 }
0x10df   : > { %v5298_v0 = vsel %vm11443_vm9, %v5278_v8, %v5290_v60  ;;  %v5410_v8 = vld [vmem:[#allocation2 + $0x40] sm:$0xff] }
0x10e0   : > { %v5303_v57 = vmul.f32 %v8044_v29, %v5298_v0  ;;  %v5425_v0 = vld [vmem:[#allocation2 + $0x130] sm:$0xff] }
0x10e1   : > { %v5437_v12 = vld [vmem:[#allocation2 + $0x1f0] sm:$0xff] }
0x10e2   : > { %5307 = vst.msk [vmem:[#allocation2 + $0x1b0] sm:$0xff] %vm692_vm13, %v5303_v57  ;;  %v5163_v11 = vpop.permute.xlu1 %5162  ;;  %7662 = vmatprep.subr.mxu0 %v5437_v12  ;;  %v5175_v19 = vpop.permute.xlu0 %5174 }
0x10e3   : > { %v5183_v58 = vsel %vm11444_vm11, %v5163_v11, %v5175_v19  ;;  %v5424_v11 = vld [vmem:[#allocation2 + $0x120] sm:$0xff] }
0x10e4   : > { %v5188_v15 = vmul.f32 %v8045_v17, %v5183_v58  ;;  %v5416_v17 = vld [vmem:[#allocation2 + $0xa0] sm:$0xff] }
0x10e5   : > { %v5421_v22 = vld [vmem:[#allocation2 + $0xf0] sm:$0xff]  ;;  %v5408_v58 = vld [vmem:[#allocation2 + $0x20] sm:$0xff] }
0x10e6   : > { %5192 = vst.msk [vmem:[#allocation2 + $0xb0] sm:$0xff] %vm692_vm13, %v5188_v15  ;;  %v5241_v37 = vpop.permute.xlu1 %5240  ;;  %7663 = vmatpush3.msra.mxu0 %v5421_v22  ;;  %v5253_v53 = vpop.permute.xlu0 %5252  ;;  %v5423_v22 = vld [vmem:[#allocation2 + $0x110] sm:$0xff] }
0x10e7   : > { %v5261_v48 = vsel %vm719_vm1, %v5241_v37, %v5253_v53  ;;  %7664 = vmatprep.subr.mxu0 %v5436_v46 }
0x10e8   : > { %v5266_v59 = vmul.f32 %v8046_v56, %v5261_v48  ;;  %7665 = vmatpush3.msra.mxu0 %v5420_v47  ;;  %v5422_v48 = vld [vmem:[#allocation2 + $0x100] sm:$0xff] }
0x10e9   : > { %7666 = vmatprep.subr.mxu0 %v5435_v55  ;;  %v5433_v23 = vld [vmem:[#allocation2 + $0x1b0] sm:$0xff]  ;;  %v5382_v47 = vld [vmem:[%s11282_s1 + $0x260] sm:$0xff] }
0x10ea   : > { %5270 = vst.msk [vmem:[#allocation2 + $0x170] sm:$0xff] %vm692_vm13, %v5266_v59  ;;  %v5126_v38 = vpop.permute.xlu1 %5125  ;;  %7667 = vmatpush3.msra.mxu0 %v5419_v6  ;;  %v5138_v30 = vpop.permute.xlu0 %5137  ;;  %v5386_v6 = vld [vmem:[%s11282_s1 + $0x288] sm:$0xff] }
0x10eb   : > { %v5146_v13 = vsel %vm3190_vm4, %v5126_v38, %v5138_v30  ;;  %7668 = vmatprep.subr.mxu0 %v5434_v45  ;;  %vm11445_vm4 = vcmask 261120  }
0x10ec   : > { %v5151_v39 = vmul.f32 %v8047_v28, %v5146_v13  ;;  %7669 = vmatpush3.msra.mxu0 %v5418_v44  ;;  %v5385_v13 = vld [vmem:[%s11282_s1 + $0x280] sm:$0xff] }
0x10ed   : > { %7670 = vmatprep.subr.mxu0 %v5433_v23  ;;  %v5417_v29 = vld [vmem:[#allocation2 + $0xb0] sm:$0xff] }
0x10ee   : > { %5155 = vst.msk [vmem:[#allocation2 + $0x70] sm:$0xff] %vm692_vm13, %v5151_v39  ;;  %v5085_v43 = vpop.permute.xlu1 %5084  ;;  %7671 = vmatpush3.msra.mxu0 %v5417_v29  ;;  %v5097_v52 = vpop.permute.xlu0 %5096  ;;  %v5389_v39 = vld [vmem:[%s11282_s1 + $0x2a8] sm:$0xff] }
0x10ef   : > { %v5107_v41 = vsel %vm3152_vm8, %v5085_v43, %v5097_v52  ;;  %7672 = vmatprep.subr.mxu0 %v5432_v62  ;;  %v5388_v43 = vld [vmem:[%s11282_s1 + $0x2a0] sm:$0xff]  ;;  %v5392_v62 = vld [vmem:[%s11282_s1 + $0x2c8] sm:$0xff] }
0x10f0   : > { %v5112_v63 = vmul.f32 %v10615_v36, %v5107_v41  ;;  %7673 = vmatpush3.msra.mxu0 %v5416_v17  ;;  %v5395_v17 = vld [vmem:[%s11282_s1 + $0x2e8] sm:$0xff] }
0x10f1   : > { %7674 = vmatprep.subr.mxu0 %v5431_v14  ;;  %v5429_v28 = vld [vmem:[#allocation2 + $0x170] sm:$0xff] }
0x10f2   : > { %5116 = vst.msk [vmem:[#allocation2 + $0x10] sm:$0xff] %vm692_vm13, %v5112_v63  ;;  %v5089_v9 = vpop.permute.xlu1 %5088  ;;  %7675 = vmatpush3.msra.mxu0 %v5415_v35  ;;  %v5101_v56 = vpop.permute.xlu0 %5100  ;;  %v5387_v14 = vld [vmem:[%s11282_s1 + $0x290] sm:$0xff]  ;;  %v5394_v35 = vld [vmem:[%s11282_s1 + $0x2e0] sm:$0xff] }
0x10f3   : > { %v5109_v7 = vsel %vm3152_vm8, %v5089_v9, %v5101_v56  ;;  %7676 = vmatprep.subr.mxu0 %v5430_v20  ;;  %v5390_v9 = vld [vmem:[%s11282_s1 + $0x2b0] sm:$0xff]  ;;  %v5398_v56 = vld [vmem:[%s11282_s1 + $0x308] sm:$0xff] }
0x10f4   : > { %v5114_v25 = vmul.f32 %v10615_v36, %v5109_v7  ;;  %7677 = vmatpush3.msra.mxu0 %v5414_v42  ;;  %v5393_v20 = vld [vmem:[%s11282_s1 + $0x2d0] sm:$0xff]  ;;  %v5397_v7 = vld [vmem:[%s11282_s1 + $0x300] sm:$0xff] }
0x10f5   : > { %7678 = vmatprep.subr.mxu0 %v5429_v28  ;;  %v5413_v32 = vld [vmem:[#allocation2 + $0x70] sm:$0xff] }
0x10f6   : > { %5118 = vst.msk [vmem:[#allocation2 + $0x30] sm:$0xff] %vm692_vm13, %v5114_v25  ;;  %v5083_v24 = vpop.permute.xlu1 %5082  ;;  %7679 = vmatpush3.msra.mxu0 %v5413_v32  ;;  %v5095_v18 = vpop.permute.xlu0 %5094  ;;  %v5396_v42 = vld [vmem:[%s11282_s1 + $0x2f0] sm:$0xff]  ;;  %v5401_v25 = vld [vmem:[%s11282_s1 + $0x328] sm:$0xff]  ;;  %v5400_v32 = vld [vmem:[%s11282_s1 + $0x320] sm:$0xff] }
0x10f7   : > { %v5106_v31 = vsel %vm3152_vm8, %v5083_v24, %v5095_v18  ;;  %7680 = vmatprep.subr.mxu0 %v5428_v26  ;;  %vm11446_vm8 = vmmov %vm11445_vm4  ;;  %v5399_v28 = vld [vmem:[%s11282_s1 + $0x310] sm:$0xff]  ;;  %v5404_v18 = vld [vmem:[%s11282_s1 + $0x348] sm:$0xff] }
0x10f8   : > { %v5111_v49 = vmul.f32 %v10615_v36, %v5106_v31  ;;  %7681 = vmatpush3.msra.mxu0 %v5412_v21  ;;  %v5402_v24 = vld [vmem:[%s11282_s1 + $0x330] sm:$0xff]  ;;  %v5403_v31 = vld [vmem:[%s11282_s1 + $0x340] sm:$0xff] }
0x10f9   : > { %7682 = vmatprep.subr.mxu0 %v5427_v50  ;;  %v5407_v37 = vld [vmem:[#allocation2 + $0x10] sm:$0xff] }
0x10fa   : > { %5115 = vst.msk [vmem:[#allocation2] sm:$0xff] %vm692_vm13, %v5111_v49  ;;  %v5350_v54 = vpop.permute.xlu1 %5349  ;;  %7683 = vmatpush3.msra.mxu0 %v5411_v40  ;;  %v5362_v61 = vpop.permute.xlu0 %5361  ;;  %v5405_v26 = vld [vmem:[%s11282_s1 + $0x350] sm:$0xff]  ;;  %v5678_v49 = vld [vmem:[%s11285_s4 + $0x2a0] sm:$0xff] }
0x10fb   : > { %v5371_v16 = vsel %vm3418_vm2, %v5350_v54, %v5362_v61  ;;  %7684 = vmatprep.subr.mxu0 %v5426_v27  ;;  %v5679_v21 = vld [vmem:[%s11285_s4 + $0x2b0] sm:$0xff] }
0x10fc   : > { %v5376_v60 = vmul.f32 %v5371_v16, %v10325_v51  ;;  %7685 = vmatpush3.msra.mxu0 %v5410_v8  ;;  %v5677_v50 = vld [vmem:[%s11285_s4 + $0x290] sm:$0xff] }
0x10fd   : > { %7686 = vmatprep.subr.mxu0 %v5425_v0  ;;  %v5409_v36 = vld [vmem:[#allocation2 + $0x30] sm:$0xff] }
0x10fe   : > { %5380 = vst.msk [vmem:[#allocation2 + $0x220] sm:$0xff] %vm692_vm13, %v5376_v60  ;;  %v5352_v57 = vpop.permute.xlu1 %5351  ;;  %7687 = vmatpush3.msra.mxu0 %v5409_v36  ;;  %v5364_v12 = vpop.permute.xlu0 %5363 }
0x10ff   : > { %v5372_v19 = vsel %vm3418_vm2, %v5352_v57, %v5364_v12  ;;  %7688 = vmatprep.subr.mxu0 %v5424_v11 }
0x1100   : > { %v5377_v15 = vmul.f32 %v5372_v19, %v10325_v51  ;;  %7689 = vmatpush3.msra.mxu0 %v5408_v58 }
0x1101   : > { %7690 = vmatprep.subr.mxu0 %v5423_v22  ;;  %v5406_v55 = vld [vmem:[#allocation2] sm:$0xff] }
0x1102   : > { %5381 = vst.msk [vmem:[#allocation2 + $0x230] sm:$0xff] %vm692_vm13, %v5377_v15  ;;  %v5348_v53 = vpop.permute.xlu1 %5347  ;;  %7691 = vmatpush3.msra.mxu0 %v5407_v37  ;;  %v5360_v46 = vpop.permute.xlu0 %5359 }
0x1103   : > { %v5370_v59 = vsel %vm3418_vm2, %v5348_v53, %v5360_v46  ;;  %7692 = vmatprep.subr.mxu0 %v5422_v48 }
0x1104   : > { %v5375_v38 = vmul.f32 %v5370_v59, %v10325_v51  ;;  %7693 = vmatpush3.msra.mxu0 %v5406_v55 }
0x1105   : > { %5531 = vmatmul.mubr.f32.vlgmr.msra.gmra.mxu0 %v5382_v47  ;;  %6264 = vmatprep.subr.mxu0 %v8107_v10  ;;  %v5440_v52 = vld [vmem:[#allocation2 + $0x220] sm:$0xff] }
0x1106   : > { %5379 = vst.msk [vmem:[#allocation2 + $0x210] sm:$0xff] %vm692_vm13, %v5375_v38  ;;  %v5346_v30 = vpop.permute.xlu1 %5345  ;;  %v5358_v45 = vpop.permute.xlu0 %5357  ;;  %5535 = vmatprep.mubr.f32.mxu0 %v5386_v6  ;;  %v5676_v38 = vld [vmem:[%s11285_s4 + $0x280] sm:$0xff] }
0x1107   : > { %v5369_v44 = vsel %vm3418_vm2, %v5346_v30, %v5358_v45  ;;  %vm11447_vm2 = vmmov %vm11445_vm4 }
0x1108   : > { %v5374_v23 = vmul.f32 %v5369_v44, %v10325_v51  ;;  %v5391_v51 = vld [vmem:[%s11282_s1 + $0x2c0] sm:$0xff]  ;;  %vm11448_vm5 = vmmov %vm11447_vm2 }
0x1109   : > { %v5441_v29 = vld [vmem:[#allocation2 + $0x230] sm:$0xff]  ;;  %5536 = vmatmul.mubr.f32.gmra.mxu0 %v5385_v13  ;;  %vm11449_vm12 = vmmov %vm11447_vm2 }
0x110a   : > { %5378 = vst.msk [vmem:[#allocation2 + $0x200] sm:$0xff] %vm692_vm13, %v5374_v23  ;;  %7810 = vmatprep.subr.mxu1 %v5441_v29  ;;  %5540 = vmatprep.mubr.f32.mxu0 %v5389_v39  ;;  %vm11450_vm9 = vmmov %vm11447_vm2  ;;  %v5843_v39 = vld [vmem:[%s11285_s4 + $0x2d0] sm:$0xff] }
0x110b   : > { %7811 = vmatpush3.msra.mxu1 %v5441_v29  ;;  %vm11451_vm11 = vmmov %vm11447_vm2 }
0x110c   : > { %7812 = vmatprep.subr.mxu1 %v5440_v52 }
0x110d   : > { %7813 = vmatpush3.msra.mxu1 %v5440_v52  ;;  %v5439_v41 = vld [vmem:[#allocation2 + $0x210] sm:$0xff]  ;;  %5541 = vmatmul.mubr.f32.gmra.mxu0 %v5388_v43 }
0x110e   : > { %7814 = vmatprep.subr.mxu1 %v5439_v41  ;;  %5545 = vmatprep.mubr.f32.mxu0 %v5392_v62 }
0x110f   : > { %7815 = vmatpush3.msra.mxu1 %v5439_v41 }
0x1111   : > { %v5438_v63 = vld [vmem:[#allocation2 + $0x200] sm:$0xff]  ;;  %5546 = vmatmul.mubr.f32.gmra.mxu0 %v5391_v51 }
0x1112   : > { %7816 = vmatprep.subr.mxu1 %v5438_v63  ;;  %5550 = vmatprep.mubr.f32.mxu0 %v5395_v17  ;;  %v5842_v51 = vld [vmem:[%s11285_s4 + $0x2c0] sm:$0xff] }
0x1113   : > { %7817 = vmatpush3.msra.mxu1 %v5438_v63 }
0x1114   : > { %7819 = vmatmul.mubr.msk.f32.vlgmr.msra.gmra.mxu1 %vm11445_vm4, %v5387_v14  ;;  %7830 = vmatprep.subr.mxu1 %v5679_v21  ;;  %v5928_v14 = vld [vmem:[%s11285_s4 + $0x2f0] sm:$0xff]  ;;  %vm11462_vm4 = vcmask 64512  }
0x1115   : > { %5551 = vmatmul.mubr.f32.gmra.mxu0 %v5394_v35  ;;  %7821 = vmatprep.mubr.msk.f32.mxu1 %vm11446_vm8, %v5390_v9 }
0x1116   : > { %5555 = vmatprep.mubr.f32.mxu0 %v5398_v56  ;;  %7831 = vmatpush3.msra.mxu1 %v5679_v21 }
0x1117   : > { %7832 = vmatprep.subr.mxu1 %v5678_v49 }
0x1118   : > { %7822 = vmatmul.mubr.msk.f32.gmra.mxu1 %vm11447_vm2, %v5393_v20  ;;  %v5927_v20 = vld [vmem:[%s11285_s4 + $0x2e0] sm:$0xff]  ;;  %vm11474_vm2 = vcmask 924672  }
0x1119   : > { %5556 = vmatmul.mubr.f32.gmra.mxu0 %v5397_v7  ;;  %7824 = vmatprep.mubr.msk.f32.mxu1 %vm11448_vm5, %v5396_v42  ;;  %vm11475_vm5 = vmmov %vm11474_vm2 }
0x111a   : > { %5560 = vmatprep.mubr.f32.mxu0 %v5401_v25  ;;  %7833 = vmatpush3.msra.mxu1 %v5678_v49 }
0x111b   : > { %7837 = vmatprep.subr.mxu1 %v5677_v50 }
0x111c   : > { %7825 = vmatmul.mubr.msk.f32.gmra.mxu1 %vm11449_vm12, %v5399_v28  ;;  %vm11476_vm12 = vcmask 1039360  }
0x111d   : > { %5561 = vmatmul.mubr.f32.gmra.mxu0 %v5400_v32  ;;  %7827 = vmatprep.mubr.msk.f32.mxu1 %vm11450_vm9, %v5402_v24  ;;  %vm11477_vm9 = vmmov %vm11476_vm12 }
0x111e   : > { %5565 = vmatprep.mubr.f32.mxu0 %v5404_v18 }
0x1120   : > { %7828 = vmatmul.mubr.msk.f32.gmra.mxu1 %vm11451_vm11, %v5405_v26  ;;  %vm7159_vm11 = vcmask 1046528  }
0x1121   : > { %5566 = vmatmul.mubr.f32.gmra.mxu0 %v5403_v31 }
0x11c5   : > { %v7694_v40 = vpop.f32.mrf.mxu0 }
0x11c7   : > { %v7695_v54 = vpop.f32.mrf.mxu0 }
0x11c8   : > { %v7696_v53 = vadd.f32 %v7695_v54, %v7694_v40 }
0x11c9   : > { %v7697_v61 = vpop.f32.mrf.mxu0 }
0x11cb   : > { %v7698_v27 = vpop.f32.mrf.mxu0 }
0x11cc   : > { %v7699_v30 = vadd.f32 %v7698_v27, %v7697_v61 }
0x11cd   : > { %v7700_v16 = vpop.f32.mrf.mxu0 }
0x11cf   : > { %v7701_v8 = vpop.f32.mrf.mxu0 }
0x11d0   : > { %v7702_v58 = vadd.f32 %v7701_v8, %v7700_v16 }
0x11d1   : > { %v7703_v60 = vpop.f32.mrf.mxu0 }
0x11d3   : > { %v7704_v0 = vpop.f32.mrf.mxu0 }
0x11d4   : > { %v7820_v36 = vpop.f32.mrf.mxu1  ;;  %v7705_v22 = vadd.f32 %v7704_v0, %v7703_v60  ;;  %v6012_v0 = vld [vmem:[%s11283_s2 + $0x98] sm:$0xff] }
0x11d5   : > { %v7706_v57 = vpop.f32.mrf.mxu0  ;;  %v5643_v23 = vadd.f32 %v7820_v36, %v7699_v30  ;;  %v6013_v36 = vld [vmem:[%s11283_s2 + $0xa0] sm:$0xff] }
0x11d6   : > { %v5637_v12 = vpop.f32.mrf.mxu1 }
0x11d7   : > { %v7707_v11 = vpop.f32.mrf.mxu0  ;;  %v5638_v55 = vadd.f32 %v7696_v53, %v5637_v12 }
0x11d8   : > { %v7823_v19 = vpop.f32.mrf.mxu1  ;;  %v7708_v13 = vadd.f32 %v7707_v11, %v7706_v57 }
0x11d9   : > { %v7709_v15 = vpop.f32.mrf.mxu0  ;;  %v5653_v47 = vadd.f32 %v7823_v19, %v7705_v22 }
0x11da   : > { %v5647_v37 = vpop.f32.mrf.mxu1 }
0x11db   : > { %v5648_v46 = vadd.f32 %v7702_v58, %v5647_v37  ;;  %v7710_v48 = vpop.f32.mrf.mxu0 }
0x11dc   : > { %v7826_v59 = vpop.f32.mrf.mxu1  ;;  %v7711_v29 = vadd.f32 %v7710_v48, %v7709_v15 }
0x11dd   : > { %7834 = vmatprep.mubr.msk.f32.mxu1 %vm692_vm13, %v5648_v46  ;;  %v7712_v6 = vpop.f32.mrf.mxu0 }
0x11de   : > { %7835 = vmatmul.mubr.msk.f32.vlgmr.msra.gmra.mxu1 %vm692_vm13, %v5653_v47  ;;  %v5657_v45 = vpop.f32.mrf.mxu1  ;;  %v5663_v35 = vadd.f32 %v7826_v59, %v7711_v29 }
0x11df   : > { %7838 = vmatpush3.msra.mxu1 %v5677_v50  ;;  %7841 = vmatprep.mubr.msk.f32.mxu1 %vm692_vm13, %v5638_v55  ;;  %v7713_v44 = vpop.f32.mrf.mxu0  ;;  %v5658_v52 = vadd.f32 %v7708_v13, %v5657_v45 }
0x11e0   : > { %7839 = vmatprep.subr.mxu1 %v5676_v38  ;;  %v7829_v43 = vpop.f32.mrf.mxu1  ;;  %v7714_v62 = vadd.f32 %v7713_v44, %v7712_v6 }
0x11e1   : > { %7840 = vmatpush3.msra.mxu1 %v5676_v38  ;;  %v7715_v41 = vpop.f32.mrf.mxu0 }
0x11e2   : > { %7842 = vmatmul.mubr.msk.f32.vlgmr.msra.gmra.mxu1 %vm692_vm13, %v5643_v23  ;;  %7844 = vmatprep.subr.mxu1 %v5843_v39  ;;  %v5667_v17 = vpop.f32.mrf.mxu1 }
0x11e3   : > { %7845 = vmatpush3.msra.mxu1 %v5843_v39  ;;  %7848 = vmatprep.mubr.msk.f32.mxu1 %vm692_vm13, %v5658_v52  ;;  %v7716_v63 = vpop.f32.mrf.mxu0  ;;  %v5668_v56 = vadd.f32 %v7714_v62, %v5667_v17 }
0x11e4   : > { %7846 = vmatprep.subr.mxu1 %v5842_v51  ;;  %v7717_v9 = vadd.f32 %v7716_v63, %v7715_v41 }
0x11e5   : > { %7847 = vmatpush3.msra.mxu1 %v5842_v51 }
0x11e6   : > { %7849 = vmatmul.mubr.msk.f32.vlgmr.msra.gmra.mxu1 %vm692_vm13, %v5663_v35  ;;  %7851 = vmatprep.subr.mxu1 %v5928_v14  ;;  %v5673_v7 = vadd.f32 %v7829_v43, %v7717_v9 }
0x11e7   : > { %7852 = vmatpush3.msra.mxu1 %v5928_v14  ;;  %7855 = vmatprep.mubr.msk.f32.mxu1 %vm692_vm13, %v5668_v56  ;;  %v6227_v56 = vld [vmem:[%s11282_s1 + $0x368] sm:$0xff] }
0x11e8   : > { %7853 = vmatprep.subr.mxu1 %v5927_v20  ;;  %7389 = vmatprep.mubr.msk.f32.mxu0 %vm692_vm13, %v6227_v56 }
0x11e9   : > { %7854 = vmatpush3.msra.mxu1 %v5927_v20  ;;  %v6380_v20 = vld [vmem:[%s11285_s4 + $0x3f8] sm:$0xff] }
0x11ea   : > { %7856 = vmatmul.mubr.msk.f32.vlgmr.msra.gmra.mxu1 %vm692_vm13, %v5673_v7  ;;  %v6379_v7 = vld [vmem:[%s11285_s4 + $0x3f0] sm:$0xff]  ;;  %6400 = vmatprep.subr.mxu1 %v6380_v20 }
0x11eb   : > { %6448 = vmatprep.mubr.f32.mxu1 %v8107_v10  ;;  %6401 = vmatpush1.msra.mxu1 %v6379_v7 }
0x129e   : > { %v7836_v42 = vpop.f32.mrf.mxu1 }
0x12a0   : > { %v5752_v25 = vpop.f32.mrf.mxu1 }
0x12a2   : > { %v7843_v28 = vpop.f32.mrf.mxu1 }
0x12a3   : > { %v5839_v18 = vadd.f32 %v7843_v28, %v7836_v42  ;;  %v6378_v42 = vld [vmem:[%s11285_s4 + $0x3e8] sm:$0xff]  ;;  %v6376_v28 = vld [vmem:[%s11285_s4 + $0x3d8] sm:$0xff] }
0x12a4   : > { %v5833_v32 = vpop.f32.mrf.mxu1  ;;  %6402 = vmatprep.subr.mxu1 %v6378_v42 }
0x12a5   : > { %v5834_v31 = vadd.f32 %v5833_v32, %v5752_v25  ;;  %v6377_v25 = vld [vmem:[%s11285_s4 + $0x3e0] sm:$0xff]  ;;  %v6375_v32 = vld [vmem:[%s11285_s4 + $0x3d0] sm:$0xff] }
0x12a6   : > { %v7850_v24 = vpop.f32.mrf.mxu1  ;;  %6403 = vmatpush1.msra.mxu1 %v6377_v25 }
0x12a7   : > { %v5926_v21 = vadd.f32 %v7850_v24, %v5839_v18  ;;  %v6374_v24 = vld [vmem:[%s11285_s4 + $0x3c8] sm:$0xff]  ;;  %6404 = vmatprep.subr.mxu1 %v6376_v28  ;;  %v6373_v18 = vld [vmem:[%s11285_s4 + $0x3c0] sm:$0xff] }
0x12a8   : > { %v5916_v26 = vpop.f32.mrf.mxu1  ;;  %6405 = vmatpush1.msra.mxu1 %v6375_v32  ;;  %v6221_v32 = vld [vmem:[%s11284_s3 + $0xe0] ss:$0 sm:$0xff] }
0x12a9   : > { %v5925_v50 = vadd.f32 %v5916_v26, %v5834_v31  ;;  %v6372_v26 = vld [vmem:[%s11285_s4 + $0x3b8] sm:$0xff]  ;;  %6406 = vmatprep.subr.mxu1 %v6374_v24  ;;  %v6371_v31 = vld [vmem:[%s11285_s4 + $0x3b0] sm:$0xff] }
0x12aa   : > { %v7857_v49 = vpop.f32.mrf.mxu1  ;;  %6407 = vmatpush1.msra.mxu1 %v6373_v18 }
0x12ab   : > { %v6011_v40 = vadd.f32 %v7857_v49, %v5926_v21  ;;  %v6370_v21 = vld [vmem:[%s11285_s4 + $0x3a8] sm:$0xff]  ;;  %6408 = vmatprep.subr.mxu1 %v6372_v26  ;;  %v6369_v49 = vld [vmem:[%s11285_s4 + $0x3a0] sm:$0xff] }
0x12ac   : > { %v6001_v54 = vpop.f32.mrf.mxu1  ;;  %6409 = vmatpush1.msra.mxu1 %v6371_v31 }
0x12ad   : > { %v6010_v61 = vadd.f32 %v6001_v54, %v5925_v50  ;;  %v6017_v27 = vsel %vm2423_vm10, %v6011_v40, 0.0  ;;  %v6023_v8 = vmul.f32 %v6011_v40, %v6011_v40  ;;  %6410 = vmatprep.subr.mxu1 %v6370_v21  ;;  %v6202_v54 = vld [vmem:[%s11284_s3 + $0xd7] ss:$0 sm:$0xff] }
0x12ae   : > { %6018 = vadd.xlane.f32.xlu1 %v6017_v27  ;;  %6411 = vmatpush1.msra.mxu1 %v6369_v49 }
0x12af   : > { %v6014_v16 = vsel %vm2423_vm10, %v6010_v61, 0.0  ;;  %v6027_v60 = vsel %vm2423_vm10, %v6023_v8, 0.0  ;;  %v6022_v57 = vmul.f32 %v6010_v61, %v6010_v61 }
0x12b0   : > { %6015 = vadd.xlane.f32.xlu0 %v6014_v16 }
0x12b1   : > { %v6024_v12 = vsel %vm2423_vm10, %v6022_v57, 0.0 }
0x12b4   : > { %6028 = vadd.xlane.f32.xlu0 %v6027_v60  ;;  %v6183_v60 = vld [vmem:[%s11284_s3 + $0xd6] ss:$0 sm:$0xff] }
0x12bf   : > { %6048 = vperm.xlu1 %7974, %v6012_v0  }
0x12c3   : > { %7975 = vset.pattern.permute.xlu1 %v8106_v34 }
0x12ca   : > { %6053 = vperm.xlu0 %7967, %v6013_v36  }
0x12ce   : > { %7976 = vset.pattern.permute.xlu0 %v8106_v34 }
0x12cf   : > { %6059 = vperm.xlu0 %7976, %v6012_v0  }
0x12d3   : > { %7977 = vset.pattern.permute.xlu0 %v8105_v33 }
0x12e3   : > { %6025 = vadd.xlane.f32.xlu1 %v6024_v12 }
0x12f4   : > { %6063 = vperm.xlu1 %7975, %v6013_v36  }
0x1337   : > { %v6019_v19 = vpop.xlane.xlu1 %6018 }
0x1338   : > { %v6021_v15 = vmul.f32 0.015625, %v6019_v19 }
0x1339   : > { %v6016_v11 = vpop.xlane.xlu0 %6015 }
0x133a   : > { %v6033_v37 = vmul.f32 %v6021_v15, %v6021_v15  ;;  %v6039_v59 = vsub.f32 %v6011_v40, %v6021_v15  ;;  %v6020_v55 = vmul.f32 0.015625, %v6016_v11  ;;  %v6164_v11 = vld [vmem:[%s11284_s3 + $0xd5] ss:$0 sm:$0xff] }
0x133b   : > { %v6049_v34 = vpop.permute.xlu1 %6048 }
0x133c   : > { %v6032_v30 = vmul.f32 %v6020_v55, %v6020_v55  ;;  %v6038_v41 = vsub.f32 %v6010_v61, %v6020_v55 }
0x133d   : > { %v6029_v58 = vpop.xlane.xlu0 %6028 }
0x133e   : > { %v6031_v22 = vmul.f32 0.015625, %v6029_v58 }
0x1340   : > { %v6035_v53 = vsub.f32 %v6031_v22, %v6033_v37 }
0x1342   : > { %v6037_v46 = vmax.f32 %v6035_v53, 0.0  ;;  %v6143_v53 = vld [vmem:[%s11284_s3 + $0xd3] ss:$0 sm:$0xff] }
0x1344   : > { %v6041_v48 = vadd.f32 1e-05, %v6037_v46 }
0x1345   : > { %v6054_v13 = vpop.permute.xlu0 %6053 }
0x1346   : > { %8017 = vrsqrt.f32 %v6041_v48 }
0x134a   : > { %v6060_v63 = vpop.permute.xlu0 %6059 }
0x1353   : > { %v8018_v47 = vpop.eup %8017 }
0x1354   : > { %v6045_v6 = vmul.f32 %v8018_v47, %v6039_v59  ;;  %v10871_v59 = vld [vmem:[%s11284_s3 + $0xd2] ss:$0 sm:$0xff] }
0x1356   : > { %v6057_v44 = vmul.f32 %v6054_v13, %v6045_v6 }
0x136c   : > { %v6026_v38 = vpop.xlane.xlu1 %6025 }
0x136d   : > { %v6030_v45 = vmul.f32 0.015625, %v6026_v38 }
0x136f   : > { %v6034_v39 = vsub.f32 %v6030_v45, %v6032_v30  ;;  %v10879_v45 = vld [vmem:[%s11284_s3 + $0xd1] ss:$0 sm:$0xff] }
0x1370   : > { %v6064_v23 = vpop.permute.xlu1 %6063 }
0x1371   : > { %v6036_v29 = vmax.f32 %v6034_v39, 0.0  ;;  %v6067_v43 = vadd.f32 %v6064_v23, %v6057_v44 }
0x1373   : > { %v6040_v52 = vadd.f32 1e-05, %v6036_v29  ;;  %v6069_v62 = vmax.f32 %v6067_v43, 0.0  ;;  %v10887_v29 = vld [vmem:[%s11284_s3 + $0xd0] ss:$0 sm:$0xff] }
0x1375   : > { %8019 = vrsqrt.f32 %v6040_v52  ;;  %6149 = vst.msk [vmem:[#allocation2 + $0x90] sm:$0xff] %vm2423_vm10, %v6069_v62  ;;  %6171 = vrot.lane.b32.xlu0 %v6069_v62, %s11452_s13  ;;  %6190 = vrot.lane.b32.xlu1 %v6069_v62, %s11453_s18 }
0x1379   : > { %6152 = vrot.lane.b32.xlu0 %v6069_v62, %s11422_s15  ;;  %6196 = vrot.lane.b32.xlu1 %v6069_v62, %s11454_s27 }
0x137d   : > { %6131 = vrot.lane.b32.xlu0 %v6069_v62, %s11455_s16  ;;  %6177 = vrot.lane.b32.xlu1 %v6069_v62, %s11456_s6 }
0x1381   : > { %6112 = vrot.lane.b32.xlu0 %v6069_v62, %s11378_s28  ;;  %6158 = vrot.lane.b32.xlu1 %v6069_v62, %s11457_s21 }
0x1382   : > { %v8020_v51 = vpop.eup %8019 }
0x1383   : > { %v6044_v17 = vmul.f32 %v8020_v51, %v6038_v41 }
0x1385   : > { %6093 = vrot.lane.b32.xlu0 %v6069_v62, %s11458_s9  ;;  %6137 = vrot.lane.b32.xlu1 %v6069_v62, %s11420_s29  ;;  %v6056_v14 = vmul.f32 %v6049_v34, %v6044_v17 }
0x1387   : > { %v6066_v35 = vadd.f32 %v6060_v63, %v6056_v14 }
0x1389   : > { %v6068_v9 = vmax.f32 %v6066_v35, 0.0  ;;  %6074 = vrot.lane.b32.xlu0 %v6069_v62, %s11459_s30  ;;  %6118 = vrot.lane.b32.xlu1 %v6069_v62, %s11377_s12 }
0x138b   : > { %6148 = vst.msk [vmem:[#allocation2 + $0x80] sm:$0xff] %vm2423_vm10, %v6068_v9 }
0x138d   : > { %6099 = vrot.lane.b32.xlu1 %v6069_v62, %s11460_s14  ;;  %6188 = vrot.lane.b32.xlu0 %v6068_v9, %s11453_s18 }
0x1391   : > { %6080 = vrot.lane.b32.xlu1 %v6069_v62, %s11461_s24  ;;  %6169 = vrot.lane.b32.xlu0 %v6068_v9, %s11452_s13 }
0x1395   : > { %6194 = vrot.lane.b32.xlu1 %v6068_v9, %s11454_s27  ;;  %6150 = vrot.lane.b32.xlu0 %v6068_v9, %s11422_s15 }
0x1399   : > { %6175 = vrot.lane.b32.xlu1 %v6068_v9, %s11456_s6  ;;  %6209 = vrot.lane.b32.xlu0 %v6069_v62, %s11376_s11  ;;  %s11466_s6 = smov 111  }
0x139d   : > { %6156 = vrot.lane.b32.xlu1 %v6068_v9, %s11457_s21  ;;  %6129 = vrot.lane.b32.xlu0 %v6068_v9, %s11455_s16  ;;  %s11467_s21 = smov 112  }
0x13a1   : > { %6215 = vrot.lane.b32.xlu1 %v6069_v62, %s11375_s10  ;;  %6110 = vrot.lane.b32.xlu0 %v6068_v9, %s11378_s28 }
0x13a5   : > { %6135 = vrot.lane.b32.xlu1 %v6068_v9, %s11420_s29  ;;  %6091 = vrot.lane.b32.xlu0 %v6068_v9, %s11458_s9  ;;  %s11468_s9 = smov 16  }
0x13a9   : > { %6116 = vrot.lane.b32.xlu1 %v6068_v9, %s11377_s12  ;;  %6072 = vrot.lane.b32.xlu0 %v6068_v9, %s11459_s30  ;;  %s11469_s30 = smov 17  }
0x13ad   : > { %6097 = vrot.lane.b32.xlu1 %v6068_v9, %s11460_s14  ;;  %6207 = vrot.lane.b32.xlu0 %v6068_v9, %s11376_s11 }
0x13b1   : > { %6078 = vrot.lane.b32.xlu1 %v6068_v9, %s11461_s24 }
0x13b5   : > { %6213 = vrot.lane.b32.xlu1 %v6068_v9, %s11375_s10 }
0x13e7   : > { %v6191_v50 = vpop.permute.xlu1 %6190  ;;  %v6172_v40 = vpop.permute.xlu0 %6171 }
0x13eb   : > { %v6197_v61 = vpop.permute.xlu1 %6196  ;;  %v6153_v27 = vpop.permute.xlu0 %6152 }
0x13ec   : > { %v6201_v16 = vsel %vm2662_vm0, %v6191_v50, %v6197_v61 }
0x13ed   : > { %v6204_v8 = vmul.f32 %v6202_v54, %v6201_v16 }
0x13ef   : > { %6206 = vst.msk [vmem:[#allocation2 + $0xf0] sm:$0xff] %vm2423_vm10, %v6204_v8  ;;  %v6178_v0 = vpop.permute.xlu1 %6177  ;;  %v6132_v36 = vpop.permute.xlu0 %6131 }
0x13f0   : > { %v6182_v57 = vsel %vm2642_vm7, %v6172_v40, %v6178_v0 }
0x13f1   : > { %v6185_v12 = vmul.f32 %v6183_v60, %v6182_v57 }
0x13f3   : > { %6187 = vst.msk [vmem:[#allocation2 + $0xd0] sm:$0xff] %vm2423_vm10, %v6185_v12  ;;  %v6159_v19 = vpop.permute.xlu1 %6158  ;;  %v6113_v58 = vpop.permute.xlu0 %6112  ;;  %v6242_v12 = vld [vmem:[#allocation2 + $0x80] sm:$0xff] }
0x13f4   : > { %v6163_v15 = vsel %vm2602_vm15, %v6153_v27, %v6159_v19 }
0x13f5   : > { %v6166_v22 = vmul.f32 %v6164_v11, %v6163_v15 }
0x13f6   : > { %v6249_v37 = vld [vmem:[#allocation2 + $0xf0] sm:$0xff] }
0x13f7   : > { %6168 = vst.msk [vmem:[#allocation2 + $0xb0] sm:$0xff] %vm2423_vm10, %v6166_v22  ;;  %6265 = vmatpush1.msra.mxu0 %v6249_v37  ;;  %v6138_v46 = vpop.permute.xlu1 %6137  ;;  %v6094_v48 = vpop.permute.xlu0 %6093 }
0x13f8   : > { %v6142_v47 = vsel %vm854_vm14, %v6132_v36, %v6138_v46  ;;  %6266 = vmatprep.subr.mxu0 %v8107_v10  ;;  %v6243_v36 = vld [vmem:[#allocation2 + $0x90] sm:$0xff] }
0x13f9   : > { %v6145_v34 = vmul.f32 %v6143_v53, %v6142_v47 }
0x13fa   : > { %v6247_v31 = vld [vmem:[#allocation2 + $0xd0] sm:$0xff] }
0x13fb   : > { %6147 = vst.msk [vmem:[#allocation2 + $0x70] sm:$0xff] %vm2423_vm10, %v6145_v34  ;;  %v6119_v55 = vpop.permute.xlu1 %6118  ;;  %v6075_v6 = vpop.permute.xlu0 %6074 }
0x13fc   : > { %v6123_v38 = vsel %vm2541_vm6, %v6113_v58, %v6119_v55 }
0x13fd   : > { %v6126_v30 = vmul.f32 %v10871_v59, %v6123_v38 }
0x13fe   : > { %v6245_v61 = vld [vmem:[#allocation2 + $0xb0] sm:$0xff] }
0x13ff   : > { %6128 = vst.msk [vmem:[#allocation2 + $0x50] sm:$0xff] %vm2423_vm10, %v6126_v30  ;;  %v6100_v13 = vpop.permute.xlu1 %6099  ;;  %v6189_v44 = vpop.permute.xlu0 %6188 }
0x1400   : > { %v6104_v39 = vsel %vm11462_vm4, %v6094_v48, %v6100_v13 }
0x1401   : > { %v6107_v23 = vmul.f32 %v10879_v45, %v6104_v39 }
0x1402   : > { %v6241_v58 = vld [vmem:[#allocation2 + $0x70] sm:$0xff] }
0x1403   : > { %6109 = vst.msk [vmem:[#allocation2 + $0x30] sm:$0xff] %vm2423_vm10, %v6107_v23  ;;  %v6081_v43 = vpop.permute.xlu1 %6080  ;;  %v6170_v52 = vpop.permute.xlu0 %6169  ;;  %v6226_v23 = vld [vmem:[%s11282_s1 + $0x360] sm:$0xff] }
0x1404   : > { %v6085_v62 = vsel %vm2502_vm3, %v6075_v6, %v6081_v43 }
0x1405   : > { %v6088_v41 = vmul.f32 %v10887_v29, %v6085_v62  ;;  %v6363_v62 = vld [vmem:[%s11285_s4 + $0x370] sm:$0xff] }
0x1406   : > { %v6239_v48 = vld [vmem:[#allocation2 + $0x50] sm:$0xff] }
0x1407   : > { %6090 = vst.msk [vmem:[#allocation2 + $0x10] sm:$0xff] %vm2423_vm10, %v6088_v41  ;;  %v6195_v51 = vpop.permute.xlu1 %6194  ;;  %v6151_v17 = vpop.permute.xlu0 %6150  ;;  %v6362_v41 = vld [vmem:[%s11285_s4 + $0x368] sm:$0xff] }
0x1408   : > { %v6200_v63 = vsel %vm2662_vm0, %v6189_v44, %v6195_v51  ;;  %vm11463_vm0 = vcmask 449536   ;;  %v6361_v51 = vld [vmem:[%s11285_s4 + $0x360] sm:$0xff] }
0x1409   : > { %v6203_v14 = vmul.f32 %v6202_v54, %v6200_v63  ;;  %v6360_v63 = vld [vmem:[%s11285_s4 + $0x358] sm:$0xff] }
0x140a   : > { %v6237_v38 = vld [vmem:[#allocation2 + $0x30] sm:$0xff] }
0x140b   : > { %6205 = vst.msk [vmem:[#allocation2 + $0xe0] sm:$0xff] %vm2423_vm10, %v6203_v14  ;;  %v6176_v35 = vpop.permute.xlu1 %6175  ;;  %v6210_v9 = vpop.permute.xlu0 %6209  ;;  %v6231_v14 = vld [vmem:[%s11282_s1 + $0x3a8] sm:$0xff] }
0x140c   : > { %v6181_v56 = vsel %vm2642_vm7, %v6170_v52, %v6176_v35  ;;  %vm11464_vm7 = vmmov %vm11462_vm4  ;;  %v6229_v52 = vld [vmem:[%s11282_s1 + $0x388] sm:$0xff]  ;;  %v6359_v35 = vld [vmem:[%s11285_s4 + $0x350] sm:$0xff]  ;;  %vm11250_vm4 = vcmp.lt.s32.totalorder %v241_v2, 256 }
0x140d   : > { %v6184_v20 = vmul.f32 %v6183_v60, %v6181_v56  ;;  %v6357_v56 = vld [vmem:[%s11285_s4 + $0x340] sm:$0xff] }
0x140e   : > { %v6235_v13 = vld [vmem:[#allocation2 + $0x10] sm:$0xff] }
0x140f   : > { %6186 = vst.msk [vmem:[#allocation2 + $0xc0] sm:$0xff] %vm2423_vm10, %v6184_v20  ;;  %v6157_v7 = vpop.permute.xlu1 %6156  ;;  %v6130_v42 = vpop.permute.xlu0 %6129  ;;  %v6230_v20 = vld [vmem:[%s11282_s1 + $0x3a0] sm:$0xff] }
0x1410   : > { %v6162_v25 = vsel %vm2602_vm15, %v6151_v17, %v6157_v7  ;;  %vm11465_vm15 = vmmov %vm11463_vm0  ;;  %v6228_v17 = vld [vmem:[%s11282_s1 + $0x380] sm:$0xff]  ;;  %v6356_v7 = vld [vmem:[%s11285_s4 + $0x338] sm:$0xff] }
0x1411   : > { %v6165_v28 = vmul.f32 %v6164_v11, %v6162_v25  ;;  %v6355_v25 = vld [vmem:[%s11285_s4 + $0x330] sm:$0xff] }
0x1412   : > { %v6248_v24 = vld [vmem:[#allocation2 + $0xe0] sm:$0xff] }
0x1413   : > { %6167 = vst.msk [vmem:[#allocation2 + $0xa0] sm:$0xff] %vm2423_vm10, %v6165_v28  ;;  %v6216_v18 = vpop.permute.xlu1 %6215  ;;  %6267 = vmatpush1.msra.mxu0 %v6248_v24  ;;  %v6111_v49 = vpop.permute.xlu0 %6110  ;;  %v6232_v28 = vld [vmem:[%s11282_s1 + $0x3c0] sm:$0xff] }
0x1414   : > { %v6220_v26 = vsel %vm11463_vm0, %v6210_v9, %v6216_v18  ;;  %6268 = vmatprep.subr.mxu0 %v8107_v10  ;;  %v6358_v9 = vld [vmem:[%s11285_s4 + $0x348] sm:$0xff]  ;;  %v6353_v24 = vld [vmem:[%s11285_s4 + $0x320] sm:$0xff]  ;;  %v6352_v18 = vld [vmem:[%s11285_s4 + $0x318] sm:$0xff]  ;;  %vm7116_vm0 = vcmask 1041408  }
0x1415   : > { %v6223_v21 = vmul.f32 %v6221_v32, %v6220_v26  ;;  %6269 = vmatpush1.msra.mxu0 %v6247_v31  ;;  %v6351_v26 = vld [vmem:[%s11285_s4 + $0x310] sm:$0xff]  ;;  %v6350_v31 = vld [vmem:[%s11285_s4 + $0x308] sm:$0xff] }
0x1416   : > { %6270 = vmatprep.subr.mxu0 %v8107_v10  ;;  %v6246_v50 = vld [vmem:[#allocation2 + $0xc0] sm:$0xff] }
0x1417   : > { %6225 = vst.msk [vmem:[#allocation2 + $0x110] sm:$0xff] %vm2423_vm10, %v6223_v21  ;;  %v6136_v40 = vpop.permute.xlu1 %6135  ;;  %6271 = vmatpush1.msra.mxu0 %v6246_v50  ;;  %v6092_v8 = vpop.permute.xlu0 %6091  ;;  %v6368_v21 = vld [vmem:[%s11285_s4 + $0x398] sm:$0xff]  ;;  %v6367_v50 = vld [vmem:[%s11285_s4 + $0x390] sm:$0xff] }
0x1418   : > { %v6141_v54 = vsel %vm854_vm14, %v6130_v42, %v6136_v40  ;;  %6272 = vmatprep.subr.mxu0 %v8107_v10  ;;  %v6233_v42 = vld [vmem:[%s11282_s1 + $0x3c8] sm:$0xff]  ;;  %6412 = vmatprep.subr.mxu1 %v6368_v21 }
0x1419   : > { %v6144_v27 = vmul.f32 %v6143_v53, %v6141_v54  ;;  %6273 = vmatpush1.msra.mxu0 %v6245_v61  ;;  %6413 = vmatpush1.msra.mxu1 %v6367_v50  ;;  %v6366_v40 = vld [vmem:[%s11285_s4 + $0x388] sm:$0xff]  ;;  %v6365_v54 = vld [vmem:[%s11285_s4 + $0x380] sm:$0xff]  ;;  %v6544_v61 = vld [vmem:[%s11285_s4 + $0x478] sm:$0xff] }
0x141a   : > { %6274 = vmatprep.subr.mxu0 %v8107_v10  ;;  %v6244_v16 = vld [vmem:[#allocation2 + $0xa0] sm:$0xff]  ;;  %6414 = vmatprep.subr.mxu1 %v6366_v40 }
0x141b   : > { %6146 = vst.msk [vmem:[#allocation2 + $0x60] sm:$0xff] %vm2423_vm10, %v6144_v27  ;;  %v6117_v60 = vpop.permute.xlu1 %6116  ;;  %6275 = vmatpush1.msra.mxu0 %v6244_v16  ;;  %v6073_v15 = vpop.permute.xlu0 %6072  ;;  %6415 = vmatpush1.msra.mxu1 %v6365_v54  ;;  %v6636_v27 = vld [vmem:[%s11285_s4 + $0x4f8] sm:$0xff]  ;;  %v6635_v16 = vld [vmem:[%s11285_s4 + $0x4f0] sm:$0xff] }
0x141c   : > { %v6122_v0 = vsel %vm2541_vm6, %v6111_v49, %v6117_v60  ;;  %6276 = vmatprep.subr.mxu0 %v8107_v10  ;;  %v6349_v49 = vld [vmem:[%s11285_s4 + $0x300] sm:$0xff]  ;;  %6564 = vmatprep.subr.mxu1 %v6544_v61  ;;  %v6634_v60 = vld [vmem:[%s11285_s4 + $0x4e8] sm:$0xff] }
0x141d   : > { %v6125_v57 = vmul.f32 %v10871_v59, %v6122_v0  ;;  %6277 = vmatpush1.msra.mxu0 %v6243_v36  ;;  %v6633_v0 = vld [vmem:[%s11285_s4 + $0x4e0] sm:$0xff] }
0x141e   : > { %6278 = vmatprep.subr.mxu0 %v8107_v10  ;;  %v6251_v39 = vld [vmem:[#allocation2 + $0x110] sm:$0xff] }
0x141f   : > { %6127 = vst.msk [vmem:[#allocation2 + $0x40] sm:$0xff] %vm2423_vm10, %v6125_v57  ;;  %v6098_v11 = vpop.permute.xlu1 %6097  ;;  %6279 = vmatpush1.msra.mxu0 %v6242_v12  ;;  %v6208_v59 = vpop.permute.xlu0 %6207  ;;  %v6632_v57 = vld [vmem:[%s11285_s4 + $0x4d8] sm:$0xff]  ;;  %v6543_v12 = vld [vmem:[%s11285_s4 + $0x470] sm:$0xff] }
0x1420   : > { %v6103_v19 = vsel %vm11464_vm7, %v6092_v8, %v6098_v11  ;;  %6280 = vmatprep.subr.mxu0 %v8107_v10  ;;  %v6631_v11 = vld [vmem:[%s11285_s4 + $0x4d0] sm:$0xff] }
0x1421   : > { %v6106_v22 = vmul.f32 %v10879_v45, %v6103_v19  ;;  %6281 = vmatpush1.msra.mxu0 %v6241_v58  ;;  %v6542_v58 = vld [vmem:[%s11285_s4 + $0x468] sm:$0xff] }
0x1422   : > { %6282 = vmatprep.subr.mxu0 %v8107_v10  ;;  %v6240_v37 = vld [vmem:[#allocation2 + $0x60] sm:$0xff] }
0x1423   : > { %6108 = vst.msk [vmem:[#allocation2 + $0x20] sm:$0xff] %vm2423_vm10, %v6106_v22  ;;  %v6079_v53 = vpop.permute.xlu1 %6078  ;;  %6283 = vmatpush1.msra.mxu0 %v6240_v37  ;;  %v6541_v22 = vld [vmem:[%s11285_s4 + $0x460] sm:$0xff] }
0x1424   : > { %v6084_v46 = vsel %vm2502_vm3, %v6073_v15, %v6079_v53  ;;  %6284 = vmatprep.subr.mxu0 %v8107_v10  ;;  %v6630_v15 = vld [vmem:[%s11285_s4 + $0x4c8] sm:$0xff]  ;;  %v6629_v37 = vld [vmem:[%s11285_s4 + $0x4c0] sm:$0xff]  ;;  %v6540_v53 = vld [vmem:[%s11285_s4 + $0x458] sm:$0xff]  ;;  %vm11472_vm3 = vcmask 916480  }
0x1425   : > { %v6087_v47 = vmul.f32 %v10887_v29, %v6084_v46  ;;  %6285 = vmatpush1.msra.mxu0 %v6239_v48  ;;  %v6364_v29 = vld [vmem:[%s11285_s4 + $0x378] sm:$0xff]  ;;  %vm11473_vm8 = vmmov %vm11472_vm3 }
0x1426   : > { %6286 = vmatprep.subr.mxu0 %v8107_v10  ;;  %v6238_v34 = vld [vmem:[#allocation2 + $0x40] sm:$0xff]  ;;  %v6628_v48 = vld [vmem:[%s11285_s4 + $0x4b8] sm:$0xff] }
0x1427   : > { %6089 = vst.msk [vmem:[#allocation2] sm:$0xff] %vm2423_vm10, %v6087_v47  ;;  %v6214_v55 = vpop.permute.xlu1 %6213  ;;  %6287 = vmatpush1.msra.mxu0 %v6238_v34  ;;  %v6539_v47 = vld [vmem:[%s11285_s4 + $0x450] sm:$0xff] }
0x1428   : > { %v6219_v6 = vsel %vm11465_vm15, %v6208_v59, %v6214_v55  ;;  %6288 = vmatprep.subr.mxu0 %v8107_v10  ;;  %v6627_v34 = vld [vmem:[%s11285_s4 + $0x4b0] sm:$0xff]  ;;  %v6538_v59 = vld [vmem:[%s11285_s4 + $0x448] sm:$0xff] }
0x1429   : > { %v6222_v30 = vmul.f32 %v6221_v32, %v6219_v6  ;;  %6289 = vmatpush1.msra.mxu0 %v6237_v38  ;;  %v6354_v32 = vld [vmem:[%s11285_s4 + $0x328] sm:$0xff]  ;;  %v6537_v38 = vld [vmem:[%s11285_s4 + $0x440] sm:$0xff] }
0x142a   : > { %6290 = vmatprep.subr.mxu0 %v8107_v10  ;;  %v6236_v45 = vld [vmem:[#allocation2 + $0x20] sm:$0xff]  ;;  %v6626_v55 = vld [vmem:[%s11285_s4 + $0x4a8] sm:$0xff] }
0x142b   : > { %6224 = vst.msk [vmem:[#allocation2 + $0x100] sm:$0xff] %vm2423_vm10, %v6222_v30  ;;  %6291 = vmatpush1.msra.mxu0 %v6236_v45  ;;  %v6625_v30 = vld [vmem:[%s11285_s4 + $0x4a0] sm:$0xff]  ;;  %v6536_v45 = vld [vmem:[%s11285_s4 + $0x438] sm:$0xff] }
0x142c   : > { %6292 = vmatprep.subr.mxu0 %v8107_v10 }
0x142d   : > { %6293 = vmatpush1.msra.mxu0 %v6235_v13  ;;  %v6624_v13 = vld [vmem:[%s11285_s4 + $0x498] sm:$0xff] }
0x142e   : > { %6294 = vmatprep.subr.mxu0 %v8107_v10  ;;  %v6234_v44 = vld [vmem:[#allocation2] sm:$0xff] }
0x142f   : > { %6295 = vmatpush1.msra.mxu0 %v6234_v44 }
0x1430   : > { %6324 = vmatprep.subr.mxu0 %v8107_v10 }
0x1431   : > { %6325 = vmatpush2.msra.mxu0 %v6251_v39  ;;  %v6535_v39 = vld [vmem:[%s11285_s4 + $0x430] sm:$0xff] }
0x1432   : > { %6326 = vmatprep.subr.mxu0 %v8107_v10  ;;  %v6250_v43 = vld [vmem:[#allocation2 + $0x100] sm:$0xff] }
0x1433   : > { %6327 = vmatpush2.msra.mxu0 %v6250_v43 }
0x1434   : > { %6329 = vmatmul.mubr.f32.vlgmr.msra.gmra.mxu0 %v6226_v23  ;;  %6474 = vmatprep.subr.mxu0 %v6364_v29  ;;  %v6534_v23 = vld [vmem:[%s11285_s4 + $0x428] sm:$0xff]  ;;  %v6623_v29 = vld [vmem:[%s11285_s4 + $0x490] sm:$0xff] }
0x1435   : > { %7390 = vmatprep.mubr.msk.f32.mxu0 %vm692_vm13, %v6229_v52  ;;  %6475 = vmatpush1.msra.mxu0 %v6363_v62  ;;  %v6533_v52 = vld [vmem:[%s11285_s4 + $0x420] sm:$0xff]  ;;  %v6622_v62 = vld [vmem:[%s11285_s4 + $0x488] sm:$0xff] }
0x1436   : > { %6476 = vmatprep.subr.mxu0 %v6362_v41  ;;  %v6532_v41 = vld [vmem:[%s11285_s4 + $0x418] sm:$0xff] }
0x1437   : > { %6477 = vmatpush1.msra.mxu0 %v6361_v51  ;;  %v6621_v51 = vld [vmem:[%s11285_s4 + $0x480] sm:$0xff] }
0x1438   : > { %6334 = vmatmul.mubr.f32.gmra.mxu0 %v6228_v17  ;;  %6478 = vmatprep.subr.mxu0 %v6360_v63  ;;  %v6531_v63 = vld [vmem:[%s11285_s4 + $0x410] sm:$0xff] }
0x1439   : > { %7391 = vmatprep.mubr.msk.f32.mxu0 %vm692_vm13, %v6231_v14  ;;  %6479 = vmatpush1.msra.mxu0 %v6359_v35  ;;  %v6530_v14 = vld [vmem:[%s11285_s4 + $0x408] sm:$0xff]  ;;  %v6529_v35 = vld [vmem:[%s11285_s4 + $0x400] sm:$0xff] }
0x143a   : > { %6480 = vmatprep.subr.mxu0 %v6358_v9 }
0x143b   : > { %6481 = vmatpush1.msra.mxu0 %v6357_v56 }
0x143c   : > { %6339 = vmatmul.mubr.f32.gmra.mxu0 %v6230_v20  ;;  %6482 = vmatprep.subr.mxu0 %v6356_v7 }
0x143d   : > { %7392 = vmatprep.mubr.msk.f32.mxu0 %vm692_vm13, %v6233_v42  ;;  %6483 = vmatpush1.msra.mxu0 %v6355_v25 }
0x143e   : > { %6484 = vmatprep.subr.mxu0 %v6354_v32 }
0x143f   : > { %6485 = vmatpush1.msra.mxu0 %v6353_v24 }
0x1440   : > { %6344 = vmatmul.mubr.f32.gmra.mxu0 %v6232_v28  ;;  %6486 = vmatprep.subr.mxu0 %v6352_v18 }
0x1441   : > { %6522 = vmatprep.mubr.f32.mxu0 %v8107_v10  ;;  %6487 = vmatpush1.msra.mxu0 %v6351_v26 }
0x1442   : > { %6488 = vmatprep.subr.mxu0 %v6350_v31 }
0x1443   : > { %6489 = vmatpush1.msra.mxu0 %v6349_v49 }
0x1444   : > { %6656 = vmatprep.subr.mxu0 %v6636_v27  ;;  %v6713_v27 = vld [vmem:[%s11283_s2 + $0xa8] sm:$0xff] }
0x14f4   : > { %v6330_v8 = vpop.f32.mrf.mxu0 }
0x14f5   : > { %7394 = vmatmul.mubr.msk.f32.vlgmr.msra.gmra.mxu0 %vm2423_vm10, %v6330_v8 }
0x14f6   : > { %v6332_v36 = vpop.f32.mrf.mxu0  ;;  %6657 = vmatpush1.msra.mxu0 %v6635_v16  ;;  %6704 = vmatprep.mubr.f32.mxu0 %v8107_v10 }
0x14f7   : > { %6658 = vmatprep.subr.mxu0 %v6634_v60 }
0x14f8   : > { %v6335_v19 = vpop.f32.mrf.mxu0  ;;  %6659 = vmatpush1.msra.mxu0 %v6633_v0 }
0x14f9   : > { %7393 = vmatmul.mubr.msk.f32.vlgmr.msra.gmra.mxu1 %vm2423_vm10, %v6335_v19  ;;  %6660 = vmatprep.subr.mxu0 %v6632_v57 }
0x14fa   : > { %6565 = vmatpush1.msra.mxu1 %v6543_v12  ;;  %v6337_v46 = vpop.f32.mrf.mxu0  ;;  %6661 = vmatpush1.msra.mxu0 %v6631_v11 }
0x14fb   : > { %6566 = vmatprep.subr.mxu1 %v6542_v58  ;;  %6662 = vmatprep.subr.mxu0 %v6630_v15 }
0x14fc   : > { %6567 = vmatpush1.msra.mxu1 %v6541_v22  ;;  %6663 = vmatpush1.msra.mxu0 %v6629_v37  ;;  %v6340_v6 = vpop.f32.mrf.mxu0 }
0x14fd   : > { %6568 = vmatprep.subr.mxu1 %v6540_v53  ;;  %6664 = vmatprep.subr.mxu0 %v6628_v48 }
0x14fe   : > { %6569 = vmatpush1.msra.mxu1 %v6539_v47  ;;  %6665 = vmatpush1.msra.mxu0 %v6627_v34  ;;  %v6342_v44 = vpop.f32.mrf.mxu0 }
0x14ff   : > { %6570 = vmatprep.subr.mxu1 %v6538_v59  ;;  %6666 = vmatprep.subr.mxu0 %v6626_v55 }
0x1500   : > { %6571 = vmatpush1.msra.mxu1 %v6537_v38  ;;  %6667 = vmatpush1.msra.mxu0 %v6625_v30  ;;  %v6345_v43 = vpop.f32.mrf.mxu0  ;;  %v6748_v38 = vld [vmem:[%s11283_s2 + $0xb0] sm:$0xff]  ;;  %v7404_v30 = vld [vmem:[%s11284_s3 + $0x100] ss:$8 sm:$0x3] }
0x1501   : > { %6572 = vmatprep.subr.mxu1 %v6536_v45  ;;  %6668 = vmatprep.subr.mxu0 %v6624_v13  ;;  %v6951_v13 = vrot.slane %v7404_v30, %v8266_v4  ;;  %v6955_v44 = vrot.slane %v7404_v30, %v8269_v5 }
0x1502   : > { %6573 = vmatpush1.msra.mxu1 %v6535_v39  ;;  %6612 = vmatprep.mubr.f32.mxu1 %v8107_v10  ;;  %v6347_v17 = vpop.f32.mrf.mxu0 }
0x1503   : > { %6574 = vmatprep.subr.mxu1 %v6534_v23  ;;  %6669 = vmatpush1.msra.mxu0 %v6623_v29 }
0x1504   : > { %6575 = vmatpush1.msra.mxu1 %v6533_v52  ;;  %6670 = vmatprep.subr.mxu0 %v6622_v62 }
0x1505   : > { %6576 = vmatprep.subr.mxu1 %v6532_v41  ;;  %6671 = vmatpush1.msra.mxu0 %v6621_v51  ;;  %v7403_v41 = vld [vmem:[%s11284_s3 + $0xf7] ss:$8 sm:$0x3] }
0x1506   : > { %6577 = vmatpush1.msra.mxu1 %v6531_v63  ;;  %7396 = vmatmul.mubr.msk.f32.vlgmr.msra.gmra.mxu0 %vm2423_vm10, %v6345_v43  ;;  %v6925_v17 = vrot.slane %v7403_v41, %v8266_v4  ;;  %v6929_v63 = vrot.slane %v7403_v41, %v8269_v5 }
0x1507   : > { %6578 = vmatprep.subr.mxu1 %v6530_v14  ;;  %v7402_v14 = vld [vmem:[%s11284_s3 + $0xf6] ss:$8 sm:$0x3] }
0x1508   : > { %6579 = vmatpush1.msra.mxu1 %v6529_v35 }
0x1509   : > { %7395 = vmatmul.mubr.msk.f32.vlgmr.msra.gmra.mxu1 %vm2423_vm10, %v6340_v6  ;;  %v6749_v6 = vld [vmem:[%s11283_s2 + $0xb8] sm:$0x3]  ;;  %vm11470_vm10 = vcmask 908288  }
0x150a   : > { %7063 = vmatprep.mubr.f32.mxu1 %v8107_v10  ;;  %vm11471_vm6 = vmmov %vm11470_vm10 }
0x15b5   : > { %v6524_v56 = vpop.f32.mrf.mxu0 }
0x15b7   : > { %v6526_v7 = vpop.f32.mrf.mxu0 }
0x15b9   : > { %v6450_v9 = vpop.f32.mrf.mxu1 }
0x15ba   : > { %v6525_v42 = vadd.f32 %v6524_v56, %v6450_v9 }
0x15bb   : > { %v6452_v20 = vpop.f32.mrf.mxu1 }
0x15bc   : > { %v6527_v32 = vadd.f32 %v6526_v7, %v6452_v20 }
0x15c6   : > { %v6706_v28 = vpop.f32.mrf.mxu0 }
0x15c8   : > { %v6708_v21 = vpop.f32.mrf.mxu0 }
0x15c9   : > { %v6614_v25 = vpop.f32.mrf.mxu1 }
0x15ca   : > { %v6619_v24 = vadd.f32 %v6614_v25, %v6525_v42  ;;  %v6899_v25 = vrot.slane %v7402_v14, %v8266_v4 }
0x15cb   : > { %v6616_v18 = vpop.f32.mrf.mxu1 }
0x15cc   : > { %v6620_v26 = vadd.f32 %v6616_v18, %v6527_v32  ;;  %v6711_v31 = vadd.f32 %v6706_v28, %v6619_v24  ;;  %v6903_v28 = vrot.slane %v7402_v14, %v8269_v5  ;;  %v7401_v32 = vld [vmem:[%s11284_s3 + $0xf5] ss:$8 sm:$0x3]  ;;  %v6962_v14 = vld [vmem:[%s11282_s1 + $0x3e0] sm:$0xff] }
0x15ce   : > { %v6712_v49 = vadd.f32 %v6708_v21, %v6620_v26  ;;  %v6718_v50 = vmul.f32 %v6711_v31, %v6711_v31 }
0x15d0   : > { %v6719_v40 = vmul.f32 %v6712_v49, %v6712_v49  ;;  %v6714_v54 = vadd.f32 %v6712_v49, %v6711_v31 }
0x15d2   : > { %6715 = vadd.xlane.f32.xlu0 %v6714_v54  ;;  %v6720_v61 = vadd.f32 %v6719_v40, %v6718_v50  ;;  %v6873_v50 = vrot.slane %v7401_v32, %v8266_v4  ;;  %v6877_v40 = vrot.slane %v7401_v32, %v8269_v5  ;;  %v7400_v54 = vld [vmem:[%s11284_s3 + $0xf3] ss:$8 sm:$0x3] }
0x15d4   : > { %6721 = vadd.xlane.f32.xlu1 %v6720_v61 }
0x15e5   : > { %6741 = vperm.xlu1 %7975, %v6713_v27  }
0x15e8   : > { %6735 = vperm.xlu0 %7977, %v6713_v27  }
0x15e9   : > { %7978 = vset.pattern.permute.xlu1 %v8105_v33 }
0x165b   : > { %v6716_v16 = vpop.xlane.xlu0 %6715 }
0x165c   : > { %v6717_v8 = vmul.f32 0.00390625, %v6716_v16 }
0x165d   : > { %v6722_v60 = vpop.xlane.xlu1 %6721 }
0x165e   : > { %v6723_v0 = vmul.f32 0.00390625, %v6722_v60  ;;  %v6724_v36 = vmul.f32 %v6717_v8, %v6717_v8  ;;  %v6727_v19 = vsub.f32 %v6711_v31, %v6717_v8  ;;  %v6728_v58 = vsub.f32 %v6712_v49, %v6717_v8 }
0x1660   : > { %v6725_v57 = vsub.f32 %v6723_v0, %v6724_v36  ;;  %v6845_v0 = vrot.slane %v7400_v54, %v8266_v4  ;;  %v6849_v36 = vrot.slane %v7400_v54, %v8269_v5 }
0x1661   : > { %v6742_v47 = vpop.permute.xlu1 %6741 }
0x1662   : > { %v6726_v12 = vmax.f32 %v6725_v57, 0.0  ;;  %v7399_v57 = vld [vmem:[%s11284_s3 + $0xf2] ss:$8 sm:$0x3] }
0x1663   : > { %v6736_v22 = vpop.permute.xlu0 %6735 }
0x1664   : > { %v6729_v11 = vadd.f32 1e-05, %v6726_v12 }
0x1666   : > { %8021 = vrsqrt.f32 %v6729_v11 }
0x1673   : > { %v8022_v15 = vpop.eup %8021 }
0x1674   : > { %v6731_v37 = vmul.f32 %v8022_v15, %v6727_v19  ;;  %v6732_v53 = vmul.f32 %v8022_v15, %v6728_v58 }
0x1676   : > { %v6738_v46 = vmul.f32 %v6736_v22, %v6731_v37  ;;  %v6739_v48 = vmul.f32 %v6736_v22, %v6732_v53  ;;  %v6819_v37 = vrot.slane %v7399_v57, %v8266_v4  ;;  %v6823_v53 = vrot.slane %v7399_v57, %v8269_v5 }
0x1678   : > { %v6744_v34 = vadd.f32 %v6742_v47, %v6738_v46  ;;  %v6745_v33 = vadd.f32 %v6742_v47, %v6739_v48  ;;  %v7398_v46 = vld [vmem:[%s11284_s3 + $0xf1] ss:$8 sm:$0x3] }
0x1679   : > { %v6793_v30 = vrot.slane %v7398_v46, %v8266_v4 }
0x167a   : > { %v11125_v59 = vmax.f32 %v6744_v34, 0.0  ;;  %v11127_v55 = vmax.f32 %v6745_v33, 0.0 }
0x167c   : > { %6856 = vst [vmem:[#allocation2 + $0x40] sm:$0xff] %v11125_v59  ;;  %6886 = vrot.lane.b32.xlu0 %v11127_v55, %s11421_s23  ;;  %6936 = vrot.lane.b32.xlu1 %v11125_v59, %s11466_s6 }
0x1680   : > { %6860 = vrot.lane.b32.xlu0 %v11127_v55, %s11422_s15  ;;  %6938 = vrot.lane.b32.xlu1 %v11127_v55, %s11466_s6 }
0x1684   : > { %6833 = vrot.lane.b32.xlu0 %v11125_v59, %s11420_s29  ;;  %6910 = vrot.lane.b32.xlu1 %v11125_v59, %s11467_s21 }
0x1688   : > { %6807 = vrot.lane.b32.xlu0 %v11125_v59, %s11393_s22  ;;  %6912 = vrot.lane.b32.xlu1 %v11127_v55, %s11467_s21 }
0x168c   : > { %6781 = vrot.lane.b32.xlu0 %v11125_v59, %s11468_s9  ;;  %6884 = vrot.lane.b32.xlu1 %v11125_v59, %s11421_s23 }
0x1690   : > { %6755 = vrot.lane.b32.xlu0 %v11125_v59, %s11469_s30  ;;  %6858 = vrot.lane.b32.xlu1 %v11125_v59, %s11422_s15 }
0x1694   : > { %6989 = vperm.xlu0 %7977, %v6749_v6   ;;  %6830 = vrot.lane.b32.xlu1 %v11127_v55, %s11420_s29 }
0x1698   : > { %6804 = vrot.lane.b32.xlu1 %v11127_v55, %s11393_s22 }
0x169c   : > { %6778 = vrot.lane.b32.xlu1 %v11127_v55, %s11468_s9 }
0x16a0   : > { %6751 = vrot.lane.b32.xlu1 %v11127_v55, %s11469_s30  ;;  %s7858_s30 = smul.u32 48, %s11484_s19 }
0x16a2   : > { %s11237_s23 = scalar_lea.vmem %s11286_s5, %s7858_s30 }
0x16a4   : > { %6984 = vperm.xlu1 %7978, %v6748_v38  }
0x16ee   : > { %v6937_v45 = vpop.permute.xlu1 %6936  ;;  %v6887_v43 = vpop.permute.xlu0 %6886 }
0x16f2   : > { %v6939_v39 = vpop.permute.xlu1 %6938  ;;  %v6861_v35 = vpop.permute.xlu0 %6860 }
0x16f3   : > { %v6940_v23 = vsel %vm11470_vm10, %v6937_v45, %v6939_v39  ;;  %v6944_v29 = vsel %vm11471_vm6, %v6939_v39, %v6937_v45  ;;  %v7397_v45 = vld [vmem:[%s11284_s3 + $0xf0] ss:$8 sm:$0x3] }
0x16f4   : > { %v6958_v52 = vmul.f32 %v6951_v13, %v6940_v23  ;;  %v6959_v62 = vmul.f32 %v6955_v44, %v6944_v29  ;;  %v6767_v29 = vrot.slane %v7397_v45, %v8266_v4 }
0x16f6   : > { %6960 = vst [vmem:[#allocation2 + $0x80] sm:$0xff] %v6958_v52  ;;  %v6911_v51 = vpop.permute.xlu1 %6910  ;;  %7013 = vmatprep.subr.mxu1 %v6959_v62  ;;  %v6834_v31 = vpop.permute.xlu0 %6833 }
0x16f7   : > { %7014 = vmatpush1.msra.mxu1 %v6958_v52 }
0x16fa   : > { %v6913_v9 = vpop.permute.xlu1 %6912  ;;  %v6808_v12 = vpop.permute.xlu0 %6807 }
0x16fb   : > { %v6914_v56 = vsel %vm11472_vm3, %v6911_v51, %v6913_v9  ;;  %v6918_v20 = vsel %vm11473_vm8, %v6913_v9, %v6911_v51 }
0x16fc   : > { %v6932_v7 = vmul.f32 %v6925_v17, %v6914_v56  ;;  %v6933_v42 = vmul.f32 %v6929_v63, %v6918_v20 }
0x16fe   : > { %6934 = vst [vmem:[#allocation2 + $0x70] sm:$0xff] %v6932_v7  ;;  %v6885_v24 = vpop.permute.xlu1 %6884  ;;  %7015 = vmatprep.subr.mxu1 %v6933_v42  ;;  %v6782_v33 = vpop.permute.xlu0 %6781 }
0x16ff   : > { %v6888_v18 = vsel %vm11474_vm2, %v6885_v24, %v6887_v43  ;;  %v6892_v26 = vsel %vm11475_vm5, %v6887_v43, %v6885_v24  ;;  %7016 = vmatpush1.msra.mxu1 %v6932_v7  ;;  %v6771_v43 = vrot.slane %v7397_v45, %v8269_v5 }
0x1700   : > { %v6906_v21 = vmul.f32 %v6899_v25, %v6888_v18  ;;  %v6907_v49 = vmul.f32 %v6903_v28, %v6892_v26  ;;  %v8135_v26 = vmov 1966171168  }
0x1702   : > { %6908 = vst [vmem:[#allocation2 + $0x60] sm:$0xff] %v6906_v21  ;;  %v6859_v61 = vpop.permute.xlu1 %6858  ;;  %7017 = vmatprep.subr.mxu1 %v6907_v49  ;;  %v6756_v52 = vpop.permute.xlu0 %6755 }
0x1703   : > { %v6862_v27 = vsel %vm11476_vm12, %v6859_v61, %v6861_v35  ;;  %v6866_v16 = vsel %vm11477_vm9, %v6861_v35, %v6859_v61  ;;  %7018 = vmatpush1.msra.mxu1 %v6906_v21 }
0x1704   : > { %v6880_v8 = vmul.f32 %v6873_v50, %v6862_v27  ;;  %v6881_v60 = vmul.f32 %v6877_v40, %v6866_v16  ;;  %v7090_v27 = vsub.s32 5, %v8261_v3 }
0x1706   : > { %6882 = vst [vmem:[#allocation2 + $0x50] sm:$0xff] %v6880_v8  ;;  %v6831_v11 = vpop.permute.xlu1 %6830  ;;  %7019 = vmatprep.subr.mxu1 %v6881_v60 }
0x1707   : > { %v6835_v19 = vsel %vm854_vm14, %v6834_v31, %v6831_v11  ;;  %v6838_v58 = vsel %vm854_vm14, %v6831_v11, %v6834_v31  ;;  %7020 = vmatpush1.msra.mxu1 %v6880_v8  ;;  %v7133_v31 = vunpack.c.l.s4 %v8135_v26 }
0x1708   : > { %v6852_v15 = vmul.f32 %v6845_v0, %v6838_v58  ;;  %v6853_v22 = vmul.f32 %v6849_v36, %v6835_v19  ;;  %7021 = vmatprep.subr.mxu1 %v11127_v55  ;;  %v6797_v55 = vrot.slane %v7398_v46, %v8269_v5  ;;  %v6963_v5 = vld [vmem:[%s11282_s1 + $0x400] sm:$0x3] }
0x1709   : > { %7022 = vmatpush1.msra.mxu1 %v11125_v59  ;;  %v7134_v40 = vunpack.c.0.s8 %v7133_v31 }
0x170a   : > { %6854 = vst [vmem:[#allocation2 + $0x30] sm:$0xff] %v6852_v15  ;;  %v6805_v48 = vpop.permute.xlu1 %6804  ;;  %7023 = vmatprep.subr.mxu1 %v6853_v22 }
0x170b   : > { %v6809_v47 = vsel %vm719_vm1, %v6808_v12, %v6805_v48  ;;  %v6812_v34 = vsel %vm719_vm1, %v6805_v48, %v6808_v12  ;;  %7024 = vmatpush1.msra.mxu1 %v6852_v15  ;;  %vm11478_vm1 = vcmask 138240   ;;  %v7137_v12 = vsub.s32 %v7134_v40, %v8261_v3 }
0x170c   : > { %v6826_v6 = vmul.f32 %v6819_v37, %v6812_v34  ;;  %v6827_v38 = vmul.f32 %v6823_v53, %v6809_v47  ;;  %vm11479_vm14 = vmmov %vm11478_vm1 }
0x170e   : > { %6828 = vst [vmem:[#allocation2 + $0x20] sm:$0xff] %v6826_v6  ;;  %v6779_v59 = vpop.permute.xlu1 %6778  ;;  %7025 = vmatprep.subr.mxu1 %v6827_v38 }
0x170f   : > { %v6783_v13 = vsel %vm692_vm13, %v6782_v33, %v6779_v59  ;;  %v6786_v44 = vsel %vm692_vm13, %v6779_v59, %v6782_v33  ;;  %7026 = vmatpush1.msra.mxu1 %v6826_v6  ;;  %vm6992_vm13 = vcmask 588800   ;;  %v6990_v25 = vpop.permute.xlu0 %6989 }
0x1710   : > { %v6800_v39 = vmul.f32 %v6793_v30, %v6786_v44  ;;  %v6801_v23 = vmul.f32 %v6797_v55, %v6783_v13 }
0x1712   : > { %6802 = vst [vmem:[#allocation2 + $0x10] sm:$0xff] %v6800_v39  ;;  %v6752_v62 = vpop.permute.xlu1 %6751  ;;  %7027 = vmatprep.subr.mxu1 %v6801_v23 }
0x1713   : > { %v6757_v41 = vsel %vm11478_vm1, %v6756_v52, %v6752_v62  ;;  %v6760_v51 = vsel %vm11479_vm14, %v6752_v62, %v6756_v52  ;;  %7028 = vmatpush1.msra.mxu1 %v6800_v39 }
0x1714   : > { %v6774_v17 = vmul.f32 %v6767_v29, %v6760_v51  ;;  %v6775_v63 = vmul.f32 %v6771_v43, %v6757_v41 }
0x1716   : > { %6776 = vst [vmem:[#allocation2] sm:$0xff] %v6774_v17  ;;  %7029 = vmatprep.subr.mxu1 %v6775_v63 }
0x1717   : > { %7030 = vmatpush1.msra.mxu1 %v6774_v17 }
0x1718   : > { %7405 = vmatmul.mubr.msk.f32.vlgmr.msra.gmra.mxu1 %vm6992_vm13, %v6962_v14 }
0x1719   : > { %7069 = vmatprep.mubr.f32.mxu1 %v8107_v10 }
0x171c   : > { %7406 = vmatmul.mubr.msk.f32.gmra.mxu1 %vm6992_vm13, %v6963_v5 }
0x171f   : > { %v6985_v35 = vpop.permute.xlu1 %6984 }
0x17d8   : > { %v7065_v9 = vpop.f32.mrf.mxu1 }
0x17d9   : > { %v7066_v56 = vadd.f32 %v7065_v9, %v6985_v35  ;;  %v8048_v9 = vld [vmem:[#allocation2 + $0x188] sm:$0xff] }
0x17da   : > { %v7067_v20 = vpop.f32.mrf.mxu1 }
0x17db   : > { %v7076_v7 = vmul.f32 0.5, %v7066_v56  ;;  %8023 = vtanh.f32 %v7066_v56  ;;  %v7068_v42 = vadd.f32 %v7067_v20, %v6985_v35 }
0x17dc   : > { %v7071_v28 = vpop.f32.mrf.mxu1 }
0x17dd   : > { %8025 = vtanh.f32 %v7076_v7  ;;  %v7077_v32 = vmul.f32 0.5, %v7068_v42  ;;  %v7072_v24 = vadd.f32 %v7071_v28, %v6990_v25 }
0x17de   : > { %8027 = vtanh.f32 %v7068_v42  ;;  %v7073_v10 = vpop.f32.mrf.mxu1 }
0x17df   : > { %8029 = vtanh.f32 %v7077_v32  ;;  %v7074_v18 = vadd.f32 %v7073_v10, %v6990_v25 }
0x17e0   : > { %8031 = vtanh.f32 %v7072_v24 }
0x17e1   : > { %8033 = vtanh.f32 %v7074_v18 }
0x17e8   : > { %v8024_v21 = vpop.eup %8023 }
0x17e9   : > { %v7223_v49 = vrot.slane %v8024_v21, 3  ;;  %v7160_v11 = vrot.slane %v8024_v21, 1 }
0x17ea   : > { %v8026_v50 = vpop.eup %8025 }
0x17eb   : > { %v11239_v54 = vpop.eup %8027  ;;  %v7080_v61 = vadd.f32 1.0, %v8026_v50  ;;  %7227 = vst [vmem:[%s11237_s23 + $0x20] ss:$-12 sps:$4 sm:$0xc3] %v7223_v49  }
0x17ec   : > { %v8030_v16 = vpop.eup %8029  ;;  %v7224_v8 = vrot.slane %v11239_v54, 3  ;;  %v7163_v3 = vrot.slane %v11239_v54, 1 }
0x17ed   : > { %v8032_v60 = vpop.eup %8031  ;;  %v7082_v0 = vmul.f32 0.5, %v7080_v61  ;;  %v7081_v36 = vadd.f32 1.0, %v8030_v16 }
0x17ee   : > { %v8034_v57 = vpop.eup %8033  ;;  %7228 = vst [vmem:[%s11237_s23 + $0x28] ss:$-12 sps:$4 sm:$0xc3] %v7224_v8   ;;  %v7161_v19 = vrot.slane %v8032_v60, 1 }
0x17ef   : > { %v7091_v58 = vrot.slane %v7082_v0, %v7090_v27  ;;  %v7177_v15 = vrot.slane %v7082_v0, %v8266_v4  ;;  %v7083_v22 = vmul.f32 0.5, %v7081_v36  ;;  %v7098_v37 = vsub.f32 1.0, %v7082_v0 }
0x17f0   : > { %v7162_v53 = vsel %vm7159_vm11, %v7160_v11, %v7161_v19  ;;  %7172 = vst [vmem:[%s11237_s23 + $0x10] sm:$0x1] %v7161_v19  ;;  %v7164_v46 = vrot.slane %v8034_v57, 1 }
0x17f1   : > { %v7131_v48 = vcombine.high %v7082_v0, %v7083_v22  ;;  %7170 = vst [vmem:[%s11237_s23] sm:$0xe0] %v7162_v53  ;;  %v7096_v34 = vmul.f32 %v7091_v58, %v8182_v1  ;;  %v7204_v33 = vcombine.low %v7082_v0, %v7083_v22  ;;  %v7103_v6 = vrot.slane %v7098_v37, %v7090_v27 }
0x17f2   : > { %v7187_v38 = vrot.slane %v7098_v37, %v8266_v4  ;;  %7173 = vst [vmem:[%s11237_s23 + $0x18] sm:$0x1] %v7164_v46  ;;  %v7182_v30 = vmul.f32 %v8024_v21, %v7177_v15  ;;  %v7099_v45 = vsub.f32 1.0, %v7083_v22  ;;  %v7165_v2 = vsel %vm7159_vm11, %v7163_v3, %v7164_v46 }
0x17f3   : > { %v7138_v55 = vrot.slane %v7131_v48, %v7137_v12  ;;  %v7095_v59 = vrot.slane %v7083_v22, %v7090_v27  ;;  %v7211_v13 = vrot.slane %v7204_v33, %v7137_v12  ;;  %v7108_v44 = vmul.f32 %v8024_v21, %v7103_v6  ;;  %7171 = vst [vmem:[%s11237_s23 + $0x8] sm:$0xe0] %v7165_v2 }
0x17f4   : > { %v7110_v39 = vmul.f32 %v8032_v60, %v7103_v6  ;;  %v7192_v29 = vmul.f32 %v7187_v38, %v8182_v1  ;;  %v7107_v43 = vrot.slane %v7099_v45, %v7090_v27  ;;  %v7191_v52 = vrot.slane %v7099_v45, %v8266_v4 }
0x17f5   : > { %v7139_v23 = vcombine.high %v7138_v55, %v7138_v55  ;;  %v7181_v62 = vrot.slane %v7083_v22, %v8266_v4  ;;  %v7218_v41 = vrot.slane %v7211_v13, %v7137_v12  ;;  %v7117_v51 = vrot.slane %v7108_v44, 6 }
0x17f6   : > { %v7118_v17 = vrot.slane %v7110_v39, 6  ;;  %v7196_v14 = vrot.slane %v7192_v29, 7  ;;  %v7109_v5 = vmul.f32 %v11239_v54, %v7107_v43  ;;  %v7111_v35 = vmul.f32 %v8034_v57, %v7107_v43 }
0x17f7   : > { %v7146_v63 = vrot.slane %v7139_v23, %v7137_v12  ;;  %7408 = vst.msk [vmem:[%s11237_s23 + $0x15] ss:$8 sm:$0x3] %vm11250_vm4, %v7218_v41  ;;  %v7193_v56 = vmul.f32 %v8048_v9, %v7191_v52  ;;  %v7097_v25 = vmul.f32 %v8048_v9, %v7095_v59  ;;  %v7183_v28 = vmul.f32 %v11239_v54, %v7181_v62 }
0x17f8   : > { %v7119_v1 = vsel %vm7116_vm0, %v7117_v51, %v7118_v17  ;;  %v7200_v20 = vadd.f32 %v7196_v14, %v7182_v30  ;;  %v7120_v7 = vrot.slane %v7109_v5, 6  ;;  %v7121_v42 = vrot.slane %v7111_v35, 6 }
0x17f9   : > { %7407 = vst.msk [vmem:[%s11237_s23 + $0x4] ss:$8 sm:$0x3] %vm11250_vm4, %v7146_v63  ;;  %v7125_v4 = vadd.f32 %v7119_v1, %v7096_v34  ;;  %v7197_v32 = vrot.slane %v7193_v56, 7 }
0x17fa   : > { %7202 = vst [vmem:[%s11237_s23 + $0x10] sm:$0x1e] %v7200_v20  ;;  %v7122_v24 = vsel %vm7116_vm0, %v7120_v7, %v7121_v42 }
0x17fb   : > { %7127 = vst [vmem:[%s11237_s23] sm:$0xf] %v7125_v4  ;;  %v7126_v10 = vadd.f32 %v7122_v24, %v7097_v25  ;;  %v7201_v18 = vadd.f32 %v7197_v32, %v7183_v28 }
0x17fd   : > { %7128 = vst [vmem:[%s11237_s23 + $0x8] sm:$0xf] %v7126_v10  ;;  %7203 = vst [vmem:[%s11237_s23 + $0x18] sm:$0x1e] %v7201_v18 }
0x17fe PF: > { %s11482_s19 = sld [smem:[#allocation3_spill]] }
0x1804   : > { %s15_s18 = sadd.s32 1, %s11482_s19  }
0x1805   : > { %p12_p4 = scmp.ge.s32.totalorder %s15_s18, 4  }
0x1807   :  { %14 = sbr.rel (!%p12_p4) target bundleno = 2 (0x2), region = 142 }

</bundles_post_ra>
